<compile_context>
chip_gen: v7x
topology: tpu7x:2x2x1
jax: 0.10.0
libtpu: 0.0.40
codegen_flags: <defaults>
</compile_context>

<pallas_src>
import functools

import jax
import jax.numpy as jnp
from jax import lax
from jax.experimental import pallas as pl
from jax.experimental.pallas import tpu as pltpu

CONV_K = 3
DROPOUT = 0.1
BN_EPS = 1e-5
LANE = 128


def _round_up(x, m):
    return (x + m - 1) // m * m


def _zero_halo(ref, pad, H, W):
    """Zero only the `pad`-pixel spatial halo of a (NB, H+2p, W+2p, C) VMEM scratch."""
    NB, Hp, Wp, C = ref.shape
    row = jnp.zeros((NB, pad, Wp, C), ref.dtype)
    col = jnp.zeros((NB, Hp, pad, C), ref.dtype)
    ref[:, 0:pad, :, :] = row
    ref[:, pad + H:Hp, :, :] = row
    ref[:, :, 0:pad, :] = col
    ref[:, :, pad + W:Wp, :] = col


def _double_conv_kernel(x_ref, w1_ref, b1_ref, w2_ref, b2_ref,
                        o_ref, xpad_ref, mid_ref, *, K):
    # x_ref    : (NB, H, W, Cin)            raw input tile (no host padding)
    # w1_ref   : (K*K, Cin, Cp)             conv1 weights (BN1 scale folded in, Cout 0-padded)
    # b1_ref   : (1, Cp)                    folded BN1 bias
    # w2_ref   : (K*K, Cp, Cp)              conv2 weights (BN2 scale folded in, 0-padded)
    # b2_ref   : (1, Cp)                    folded BN2 bias
    # o_ref    : (NB, H, W, Cp)             lane-dense output (caller slices :Cout)
    # xpad_ref : VMEM (NB, H+2p, W+2p, Cin) scratch: zero halo for conv1
    # mid_ref  : VMEM (NB, H+2p, W+2p, Cp)  scratch: conv1 activation + zero halo for conv2
    NB, H, W, Cp = o_ref.shape
    pad = (K - 1) // 2
    M = NB * H * W

    # Only the halo needs zeroing; the interiors are fully overwritten below.
    _zero_halo(xpad_ref, pad, H, W)
    _zero_halo(mid_ref, pad, H, W)
    xpad_ref[:, pad:pad + H, pad:pad + W, :] = x_ref[...]

    def conv(src_ref, w_ref):
        cin = src_ref.shape[-1]
        cout = w_ref.shape[-1]
        acc = jnp.zeros((M, cout), jnp.float32)
        for ky in range(K):
            for kx in range(K):
                patch = src_ref[:, ky:ky + H, kx:kx + W, :].reshape(M, cin)
                acc = acc + jnp.dot(patch, w_ref[ky * K + kx],
                                    preferred_element_type=jnp.float32)
        return acc

    # Conv1 (BN1 scale folded into weights) -> Dropout2d(eval: identity) -> +bias -> ReLU
    y1 = jnp.maximum(conv(xpad_ref, w1_ref) + b1_ref[0], 0.0)
    # Conv1 activation stays resident in VMEM (never written to HBM).
    mid_ref[:, pad:pad + H, pad:pad + W, :] = (
        y1.reshape(NB, H, W, Cp).astype(mid_ref.dtype))

    # Conv2 (BN2 scale folded into weights) -> +bias -> ReLU
    y2 = jnp.maximum(conv(mid_ref, w2_ref) + b2_ref[0], 0.0)
    o_ref[...] = y2.reshape(NB, H, W, Cp).astype(o_ref.dtype)


def _double_conv_pallas(x_nhwc, w1, s1, b1, w2, s2, b2, *, block_n=None):
    """Fused DoubleConv on NHWC input. w1/w2 are HWIO (K, K, Cin, Cout)."""
    N, H, W, Cin = x_nhwc.shape
    K = w1.shape[0]
    Cout = w1.shape[-1]
    pad = (K - 1) // 2
    Cp = _round_up(Cout, LANE)          # lane-dense intermediate / output channels

    NB = N if block_n is None else block_n
    assert N % NB == 0, (N, NB)

    # Fold BN scales into the conv weights (no conv bias, so this is exact):
    #   relu(s * conv(x, w) + b) == relu(conv(x, w * s[co]) + b)
    # Flatten taps; zero-pad output channels to the lane width. Padded channels stay
    # exactly zero through both layers (zero weights, zero bias, relu(0)=0) and are
    # sliced away by the caller.
    w1f = (w1.astype(jnp.float32) * s1.astype(jnp.float32)[None, None, None, :])
    w2f = (w2.astype(jnp.float32) * s2.astype(jnp.float32)[None, None, None, :])
    w1p = jnp.zeros((K * K, Cin, Cp), jnp.float32).at[:, :, :Cout].set(
        w1f.reshape(K * K, Cin, Cout))
    w2p = jnp.zeros((K * K, Cp, Cp), jnp.float32).at[:, :Cout, :Cout].set(
        w2f.reshape(K * K, Cout, Cout))

    def pad_vec(v):
        return jnp.zeros((1, Cp), jnp.float32).at[0, :Cout].set(v.astype(jnp.float32))

    b1p, b2p = pad_vec(b1), pad_vec(b2)

    kernel = functools.partial(_double_conv_kernel, K=K)
    out = pl.pallas_call(
        kernel,
        out_shape=jax.ShapeDtypeStruct((N, H, W, Cp), jnp.float32),
        grid=(N // NB,),
        in_specs=[
            pl.BlockSpec((NB, H, W, Cin), lambda n: (n, 0, 0, 0)),
            pl.BlockSpec((K * K, Cin, Cp), lambda n: (0, 0, 0)),
            pl.BlockSpec((1, Cp), lambda n: (0, 0)),
            pl.BlockSpec((K * K, Cp, Cp), lambda n: (0, 0, 0)),
            pl.BlockSpec((1, Cp), lambda n: (0, 0)),
        ],
        out_specs=pl.BlockSpec((NB, H, W, Cp), lambda n: (n, 0, 0, 0)),
        scratch_shapes=[
            pltpu.VMEM((NB, H + 2 * pad, W + 2 * pad, Cin), jnp.float32),
            pltpu.VMEM((NB, H + 2 * pad, W + 2 * pad, Cp), jnp.float32),
        ],
        compiler_params=pltpu.CompilerParams(
            dimension_semantics=("parallel",)),
    )(x_nhwc, w1p, b1p, w2p, b2p)
    return out[..., :Cout]


def make_double_conv_params(key, in_channels, out_channels):
    """Deterministic parameter init matching the PyTorch module's shapes."""
    ks = jax.random.split(key, 10)

    def conv_w(k, cin, cout):
        # PyTorch layout is (Cout, Cin, K, K); we keep HWIO for the kernel.
        fan_in = cin * CONV_K * CONV_K
        bound = 1.0 / jnp.sqrt(fan_in)
        w_oihw = jax.random.uniform(k, (cout, cin, CONV_K, CONV_K),
                                    jnp.float32, -bound, bound)
        return jnp.transpose(w_oihw, (2, 3, 1, 0))  # -> (K, K, Cin, Cout)

    def bn_params(kg, kb, km, kv, c):
        gamma = jax.random.uniform(kg, (c,), jnp.float32, 0.5, 1.5)
        beta = jax.random.uniform(kb, (c,), jnp.float32, -0.5, 0.5)
        mean = jax.random.uniform(km, (c,), jnp.float32, -0.5, 0.5)
        var = jax.random.uniform(kv, (c,), jnp.float32, 0.5, 1.5)
        scale = gamma / jnp.sqrt(var + BN_EPS)
        bias = beta - mean * scale
        return scale, bias, (gamma, beta, mean, var)

    w1 = conv_w(ks[0], in_channels, out_channels)
    w2 = conv_w(ks[1], out_channels, out_channels)
    s1, b1, bn1_raw = bn_params(ks[2], ks[3], ks[4], ks[5], out_channels)
    s2, b2, bn2_raw = bn_params(ks[6], ks[7], ks[8], ks[9], out_channels)
    return dict(w1=w1, w2=w2, s1=s1, b1=b1, s2=s2, b2=b2,
                bn1_raw=bn1_raw, bn2_raw=bn2_raw)


def double_conv_forward(x_nchw, params, *, block_n=None):
    """DoubleConv forward. Input/output in NCHW to match PyTorch."""
    x = jnp.transpose(x_nchw, (0, 2, 3, 1))                     # NCHW -> NHWC
    y = _double_conv_pallas(x, params["w1"], params["s1"], params["b1"],
                            params["w2"], params["s2"], params["b2"],
                            block_n=block_n)
    return jnp.transpose(y, (0, 3, 1, 2))                       # NHWC -> NCHW


def _reference_forward(x_nchw, params):
    """Pure-JAX (lax.conv) reference for validation."""
    def conv_bn_relu(x, w_hwio, gamma, beta, mean, var):
        w_oihw = jnp.transpose(w_hwio, (3, 2, 0, 1))
        y = lax.conv_general_dilated(
            x, w_oihw, window_strides=(1, 1), padding=((1, 1), (1, 1)),
            dimension_numbers=("NCHW", "OIHW", "NCHW"))
        y = (y - mean[None, :, None, None]) / jnp.sqrt(var + BN_EPS)[None, :, None, None]
        y = y * gamma[None, :, None, None] + beta[None, :, None, None]
        return jnp.maximum(y, 0.0)

    g1, be1, m1, v1 = params["bn1_raw"]
    g2, be2, m2, v2 = params["bn2_raw"]
    y = conv_bn_relu(x_nchw, params["w1"], g1, be1, m1, v1)
    y = conv_bn_relu(y, params["w2"], g2, be2, m2, v2)
    return y


if __name__ == "__main__":
    key = jax.random.PRNGKey(0)
    k_x, k_p = jax.random.split(key)

    N, C_IN, C_OUT, H, W = 2, 4, 8, 16, 16
    x = jax.random.normal(k_x, (N, C_IN, H, W), jnp.float32)
    params = make_double_conv_params(k_p, C_IN, C_OUT)

    out = jax.block_until_ready(double_conv_forward(x, params))
    assert out.shape == (N, C_OUT, H, W), out.shape

    ref = jax.block_until_ready(_reference_forward(x, params))
    assert jnp.allclose(out, ref, rtol=1e-4, atol=1e-4), \
        float(jnp.max(jnp.abs(out - ref)))

    print("KERNEL_OK")
</pallas_src>

<mosaic_0001>
module attributes {stable_mosaic.version = 11 : i64} {
  func.func @_double_conv_kernel(%arg0: i32, %arg1: memref<2x16x16x4xf32, #tpu.memory_space<vmem>>, %arg2: memref<9x4x128xf32, #tpu.memory_space<vmem>>, %arg3: memref<1x128xf32, #tpu.memory_space<vmem>>, %arg4: memref<9x128x128xf32, #tpu.memory_space<vmem>>, %arg5: memref<1x128xf32, #tpu.memory_space<vmem>>, %arg6: memref<2x16x16x128xf32, #tpu.memory_space<vmem>>, %arg7: memref<2x18x18x4xf32, #tpu.memory_space<vmem>>, %arg8: memref<2x18x18x128xf32, #tpu.memory_space<vmem>>) attributes {dimension_semantics = [#tpu.dimension_semantics<parallel>], iteration_bounds = array<i64: 1>, scalar_prefetch = 0 : i64, scratch_operands = 2 : i64, tpu.core_type = #tpu.core_type<tc>, window_params = [{transform_indices = @transform_0, window_bounds = array<i64: 2, 16, 16, 4>}, {pipeline_mode = #tpu.pipeline_mode<synchronous>, transform_indices = @transform_1, window_bounds = array<i64: 9, 4, 128>}, {pipeline_mode = #tpu.pipeline_mode<synchronous>, transform_indices = @transform_2, window_bounds = array<i64: 1, 128>}, {pipeline_mode = #tpu.pipeline_mode<synchronous>, transform_indices = @transform_3, window_bounds = array<i64: 9, 128, 128>}, {pipeline_mode = #tpu.pipeline_mode<synchronous>, transform_indices = @transform_4, window_bounds = array<i64: 1, 128>}, {transform_indices = @transform_5, window_bounds = array<i64: 2, 16, 16, 128>}]} {
    %cst = arith.constant 0.000000e+00 : f32
    %0 = vector.broadcast %cst : f32 to vector<2x1x18x4xf32>
    %cst_0 = arith.constant 0.000000e+00 : f32
    %1 = vector.broadcast %cst_0 : f32 to vector<2x18x1x4xf32>
    %c0 = arith.constant 0 : index
    %c0_1 = arith.constant 0 : index
    %c0_2 = arith.constant 0 : index
    %c0_3 = arith.constant 0 : index
    %2 = vector.load %arg7[%c0, %c0_1, %c0_2, %c0_3] : memref<2x18x18x4xf32, #tpu.memory_space<vmem>>, vector<2x1x18x4xf32>
    tpu.vector_store %arg7[%c0, %c0_1, %c0_2, %c0_3], %0 {strides = array<i32>} : memref<2x18x18x4xf32, #tpu.memory_space<vmem>>, vector<2x1x18x4xf32>,
    %c0_4 = arith.constant 0 : index
    %c17 = arith.constant 17 : index
    %c0_5 = arith.constant 0 : index
    %c0_6 = arith.constant 0 : index
    %3 = vector.load %arg7[%c0_4, %c17, %c0_5, %c0_6] : memref<2x18x18x4xf32, #tpu.memory_space<vmem>>, vector<2x1x18x4xf32>
    tpu.vector_store %arg7[%c0_4, %c17, %c0_5, %c0_6], %0 {strides = array<i32>} : memref<2x18x18x4xf32, #tpu.memory_space<vmem>>, vector<2x1x18x4xf32>,
    %c0_7 = arith.constant 0 : index
    %c0_8 = arith.constant 0 : index
    %c0_9 = arith.constant 0 : index
    %c0_10 = arith.constant 0 : index
    %4 = vector.load %arg7[%c0_7, %c0_8, %c0_9, %c0_10] : memref<2x18x18x4xf32, #tpu.memory_space<vmem>>, vector<2x18x1x4xf32>
    tpu.vector_store %arg7[%c0_7, %c0_8, %c0_9, %c0_10], %1 {strides = array<i32>} : memref<2x18x18x4xf32, #tpu.memory_space<vmem>>, vector<2x18x1x4xf32>,
    %c0_11 = arith.constant 0 : index
    %c0_12 = arith.constant 0 : index
    %c17_13 = arith.constant 17 : index
    %c0_14 = arith.constant 0 : index
    %5 = vector.load %arg7[%c0_11, %c0_12, %c17_13, %c0_14] : memref<2x18x18x4xf32, #tpu.memory_space<vmem>>, vector<2x18x1x4xf32>
    tpu.vector_store %arg7[%c0_11, %c0_12, %c17_13, %c0_14], %1 {strides = array<i32>} : memref<2x18x18x4xf32, #tpu.memory_space<vmem>>, vector<2x18x1x4xf32>,
    %cst_15 = arith.constant 0.000000e+00 : f32
    %6 = vector.broadcast %cst_15 : f32 to vector<2x1x18x128xf32>
    %cst_16 = arith.constant 0.000000e+00 : f32
    %7 = vector.broadcast %cst_16 : f32 to vector<2x18x1x128xf32>
    %c0_17 = arith.constant 0 : index
    %c0_18 = arith.constant 0 : index
    %c0_19 = arith.constant 0 : index
    %c0_20 = arith.constant 0 : index
    %8 = vector.load %arg8[%c0_17, %c0_18, %c0_19, %c0_20] : memref<2x18x18x128xf32, #tpu.memory_space<vmem>>, vector<2x1x18x128xf32>
    tpu.vector_store %arg8[%c0_17, %c0_18, %c0_19, %c0_20], %6 {strides = array<i32>} : memref<2x18x18x128xf32, #tpu.memory_space<vmem>>, vector<2x1x18x128xf32>,
    %c0_21 = arith.constant 0 : index
    %c17_22 = arith.constant 17 : index
    %c0_23 = arith.constant 0 : index
    %c0_24 = arith.constant 0 : index
    %9 = vector.load %arg8[%c0_21, %c17_22, %c0_23, %c0_24] : memref<2x18x18x128xf32, #tpu.memory_space<vmem>>, vector<2x1x18x128xf32>
    tpu.vector_store %arg8[%c0_21, %c17_22, %c0_23, %c0_24], %6 {strides = array<i32>} : memref<2x18x18x128xf32, #tpu.memory_space<vmem>>, vector<2x1x18x128xf32>,
    %c0_25 = arith.constant 0 : index
    %c0_26 = arith.constant 0 : index
    %c0_27 = arith.constant 0 : index
    %c0_28 = arith.constant 0 : index
    %10 = vector.load %arg8[%c0_25, %c0_26, %c0_27, %c0_28] : memref<2x18x18x128xf32, #tpu.memory_space<vmem>>, vector<2x18x1x128xf32>
    tpu.vector_store %arg8[%c0_25, %c0_26, %c0_27, %c0_28], %7 {strides = array<i32>} : memref<2x18x18x128xf32, #tpu.memory_space<vmem>>, vector<2x18x1x128xf32>,
    %c0_29 = arith.constant 0 : index
    %c0_30 = arith.constant 0 : index
    %c17_31 = arith.constant 17 : index
    %c0_32 = arith.constant 0 : index
    %11 = vector.load %arg8[%c0_29, %c0_30, %c17_31, %c0_32] : memref<2x18x18x128xf32, #tpu.memory_space<vmem>>, vector<2x18x1x128xf32>
    tpu.vector_store %arg8[%c0_29, %c0_30, %c17_31, %c0_32], %7 {strides = array<i32>} : memref<2x18x18x128xf32, #tpu.memory_space<vmem>>, vector<2x18x1x128xf32>,
    %c0_33 = arith.constant 0 : index
    %c0_34 = arith.constant 0 : index
    %c0_35 = arith.constant 0 : index
    %c0_36 = arith.constant 0 : index
    %12 = vector.load %arg1[%c0_33, %c0_34, %c0_35, %c0_36] : memref<2x16x16x4xf32, #tpu.memory_space<vmem>>, vector<2x16x16x4xf32>
    %c0_37 = arith.constant 0 : index
    %c1 = arith.constant 1 : index
    %c1_38 = arith.constant 1 : index
    %c0_39 = arith.constant 0 : index
    %13 = vector.load %arg7[%c0_37, %c1, %c1_38, %c0_39] : memref<2x18x18x4xf32, #tpu.memory_space<vmem>>, vector<2x16x16x4xf32>
    tpu.vector_store %arg7[%c0_37, %c1, %c1_38, %c0_39], %12 {strides = array<i32>} : memref<2x18x18x4xf32, #tpu.memory_space<vmem>>, vector<2x16x16x4xf32>,
    %cst_40 = arith.constant 0.000000e+00 : f32
    %14 = vector.broadcast %cst_40 : f32 to vector<512x128xf32>
    %c0_41 = arith.constant 0 : index
    %c0_42 = arith.constant 0 : index
    %c0_43 = arith.constant 0 : index
    %c0_44 = arith.constant 0 : index
    %15 = vector.load %arg7[%c0_41, %c0_42, %c0_43, %c0_44] : memref<2x18x18x4xf32, #tpu.memory_space<vmem>>, vector<2x16x16x4xf32>
    %16 = vector.shape_cast %15 : vector<2x16x16x4xf32> to vector<512x4xf32>
    %c0_45 = arith.constant 0 : index
    %c0_46 = arith.constant 0 : index
    %c0_47 = arith.constant 0 : index
    %17 = vector.load %arg2[%c0_45, %c0_46, %c0_47] : memref<9x4x128xf32, #tpu.memory_space<vmem>>, vector<1x4x128xf32>
    %18 = vector.shape_cast %17 : vector<1x4x128xf32> to vector<4x128xf32>
    %cst_48 = arith.constant dense<0.000000e+00> : vector<512x128xf32>
    %19 = tpu.matmul %16, %18, %cst_48 {dimension_numbers = #tpu.dot_dimension_numbers<[1], [0], [0], [1], [0, 0, 1, 1], [], []>} : vector<512x4xf32>, vector<4x128xf32>, vector<512x128xf32> -> vector<512x128xf32>
    %20 = arith.addf %14, %19 : vector<512x128xf32>
    %c0_49 = arith.constant 0 : index
    %c0_50 = arith.constant 0 : index
    %c1_51 = arith.constant 1 : index
    %c0_52 = arith.constant 0 : index
    %21 = vector.load %arg7[%c0_49, %c0_50, %c1_51, %c0_52] : memref<2x18x18x4xf32, #tpu.memory_space<vmem>>, vector<2x16x16x4xf32>
    %22 = vector.shape_cast %21 : vector<2x16x16x4xf32> to vector<512x4xf32>
    %c1_53 = arith.constant 1 : index
    %c0_54 = arith.constant 0 : index
    %c0_55 = arith.constant 0 : index
    %23 = vector.load %arg2[%c1_53, %c0_54, %c0_55] : memref<9x4x128xf32, #tpu.memory_space<vmem>>, vector<1x4x128xf32>
    %24 = vector.shape_cast %23 : vector<1x4x128xf32> to vector<4x128xf32>
    %cst_56 = arith.constant dense<0.000000e+00> : vector<512x128xf32>
    %25 = tpu.matmul %22, %24, %cst_56 {dimension_numbers = #tpu.dot_dimension_numbers<[1], [0], [0], [1], [0, 0, 1, 1], [], []>} : vector<512x4xf32>, vector<4x128xf32>, vector<512x128xf32> -> vector<512x128xf32>
    %26 = arith.addf %20, %25 : vector<512x128xf32>
    %c0_57 = arith.constant 0 : index
    %c0_58 = arith.constant 0 : index
    %c2 = arith.constant 2 : index
    %c0_59 = arith.constant 0 : index
    %27 = vector.load %arg7[%c0_57, %c0_58, %c2, %c0_59] : memref<2x18x18x4xf32, #tpu.memory_space<vmem>>, vector<2x16x16x4xf32>
    %28 = vector.shape_cast %27 : vector<2x16x16x4xf32> to vector<512x4xf32>
    %c2_60 = arith.constant 2 : index
    %c0_61 = arith.constant 0 : index
    %c0_62 = arith.constant 0 : index
    %29 = vector.load %arg2[%c2_60, %c0_61, %c0_62] : memref<9x4x128xf32, #tpu.memory_space<vmem>>, vector<1x4x128xf32>
    %30 = vector.shape_cast %29 : vector<1x4x128xf32> to vector<4x128xf32>
    %cst_63 = arith.constant dense<0.000000e+00> : vector<512x128xf32>
    %31 = tpu.matmul %28, %30, %cst_63 {dimension_numbers = #tpu.dot_dimension_numbers<[1], [0], [0], [1], [0, 0, 1, 1], [], []>} : vector<512x4xf32>, vector<4x128xf32>, vector<512x128xf32> -> vector<512x128xf32>
    %32 = arith.addf %26, %31 : vector<512x128xf32>
    %c0_64 = arith.constant 0 : index
    %c1_65 = arith.constant 1 : index
    %c0_66 = arith.constant 0 : index
    %c0_67 = arith.constant 0 : index
    %33 = vector.load %arg7[%c0_64, %c1_65, %c0_66, %c0_67] : memref<2x18x18x4xf32, #tpu.memory_space<vmem>>, vector<2x16x16x4xf32>
    %34 = vector.shape_cast %33 : vector<2x16x16x4xf32> to vector<512x4xf32>
    %c3 = arith.constant 3 : index
    %c0_68 = arith.constant 0 : index
    %c0_69 = arith.constant 0 : index
    %35 = vector.load %arg2[%c3, %c0_68, %c0_69] : memref<9x4x128xf32, #tpu.memory_space<vmem>>, vector<1x4x128xf32>
    %36 = vector.shape_cast %35 : vector<1x4x128xf32> to vector<4x128xf32>
    %cst_70 = arith.constant dense<0.000000e+00> : vector<512x128xf32>
    %37 = tpu.matmul %34, %36, %cst_70 {dimension_numbers = #tpu.dot_dimension_numbers<[1], [0], [0], [1], [0, 0, 1, 1], [], []>} : vector<512x4xf32>, vector<4x128xf32>, vector<512x128xf32> -> vector<512x128xf32>
    %38 = arith.addf %32, %37 : vector<512x128xf32>
    %c0_71 = arith.constant 0 : index
    %c1_72 = arith.constant 1 : index
    %c1_73 = arith.constant 1 : index
    %c0_74 = arith.constant 0 : index
    %39 = vector.load %arg7[%c0_71, %c1_72, %c1_73, %c0_74] : memref<2x18x18x4xf32, #tpu.memory_space<vmem>>, vector<2x16x16x4xf32>
    %40 = vector.shape_cast %39 : vector<2x16x16x4xf32> to vector<512x4xf32>
    %c4 = arith.constant 4 : index
    %c0_75 = arith.constant 0 : index
    %c0_76 = arith.constant 0 : index
    %41 = vector.load %arg2[%c4, %c0_75, %c0_76] : memref<9x4x128xf32, #tpu.memory_space<vmem>>, vector<1x4x128xf32>
    %42 = vector.shape_cast %41 : vector<1x4x128xf32> to vector<4x128xf32>
    %cst_77 = arith.constant dense<0.000000e+00> : vector<512x128xf32>
    %43 = tpu.matmul %40, %42, %cst_77 {dimension_numbers = #tpu.dot_dimension_numbers<[1], [0], [0], [1], [0, 0, 1, 1], [], []>} : vector<512x4xf32>, vector<4x128xf32>, vector<512x128xf32> -> vector<512x128xf32>
    %44 = arith.addf %38, %43 : vector<512x128xf32>
    %c0_78 = arith.constant 0 : index
    %c1_79 = arith.constant 1 : index
    %c2_80 = arith.constant 2 : index
    %c0_81 = arith.constant 0 : index
    %45 = vector.load %arg7[%c0_78, %c1_79, %c2_80, %c0_81] : memref<2x18x18x4xf32, #tpu.memory_space<vmem>>, vector<2x16x16x4xf32>
    %46 = vector.shape_cast %45 : vector<2x16x16x4xf32> to vector<512x4xf32>
    %c5 = arith.constant 5 : index
    %c0_82 = arith.constant 0 : index
    %c0_83 = arith.constant 0 : index
    %47 = vector.load %arg2[%c5, %c0_82, %c0_83] : memref<9x4x128xf32, #tpu.memory_space<vmem>>, vector<1x4x128xf32>
    %48 = vector.shape_cast %47 : vector<1x4x128xf32> to vector<4x128xf32>
    %cst_84 = arith.constant dense<0.000000e+00> : vector<512x128xf32>
    %49 = tpu.matmul %46, %48, %cst_84 {dimension_numbers = #tpu.dot_dimension_numbers<[1], [0], [0], [1], [0, 0, 1, 1], [], []>} : vector<512x4xf32>, vector<4x128xf32>, vector<512x128xf32> -> vector<512x128xf32>
    %50 = arith.addf %44, %49 : vector<512x128xf32>
    %c0_85 = arith.constant 0 : index
    %c2_86 = arith.constant 2 : index
    %c0_87 = arith.constant 0 : index
    %c0_88 = arith.constant 0 : index
    %51 = vector.load %arg7[%c0_85, %c2_86, %c0_87, %c0_88] : memref<2x18x18x4xf32, #tpu.memory_space<vmem>>, vector<2x16x16x4xf32>
    %52 = vector.shape_cast %51 : vector<2x16x16x4xf32> to vector<512x4xf32>
    %c6 = arith.constant 6 : index
    %c0_89 = arith.constant 0 : index
    %c0_90 = arith.constant 0 : index
    %53 = vector.load %arg2[%c6, %c0_89, %c0_90] : memref<9x4x128xf32, #tpu.memory_space<vmem>>, vector<1x4x128xf32>
    %54 = vector.shape_cast %53 : vector<1x4x128xf32> to vector<4x128xf32>
    %cst_91 = arith.constant dense<0.000000e+00> : vector<512x128xf32>
    %55 = tpu.matmul %52, %54, %cst_91 {dimension_numbers = #tpu.dot_dimension_numbers<[1], [0], [0], [1], [0, 0, 1, 1], [], []>} : vector<512x4xf32>, vector<4x128xf32>, vector<512x128xf32> -> vector<512x128xf32>
    %56 = arith.addf %50, %55 : vector<512x128xf32>
    %c0_92 = arith.constant 0 : index
    %c2_93 = arith.constant 2 : index
    %c1_94 = arith.constant 1 : index
    %c0_95 = arith.constant 0 : index
    %57 = vector.load %arg7[%c0_92, %c2_93, %c1_94, %c0_95] : memref<2x18x18x4xf32, #tpu.memory_space<vmem>>, vector<2x16x16x4xf32>
    %58 = vector.shape_cast %57 : vector<2x16x16x4xf32> to vector<512x4xf32>
    %c7 = arith.constant 7 : index
    %c0_96 = arith.constant 0 : index
    %c0_97 = arith.constant 0 : index
    %59 = vector.load %arg2[%c7, %c0_96, %c0_97] : memref<9x4x128xf32, #tpu.memory_space<vmem>>, vector<1x4x128xf32>
    %60 = vector.shape_cast %59 : vector<1x4x128xf32> to vector<4x128xf32>
    %cst_98 = arith.constant dense<0.000000e+00> : vector<512x128xf32>
    %61 = tpu.matmul %58, %60, %cst_98 {dimension_numbers = #tpu.dot_dimension_numbers<[1], [0], [0], [1], [0, 0, 1, 1], [], []>} : vector<512x4xf32>, vector<4x128xf32>, vector<512x128xf32> -> vector<512x128xf32>
    %62 = arith.addf %56, %61 : vector<512x128xf32>
    %c0_99 = arith.constant 0 : index
    %c2_100 = arith.constant 2 : index
    %c2_101 = arith.constant 2 : index
    %c0_102 = arith.constant 0 : index
    %63 = vector.load %arg7[%c0_99, %c2_100, %c2_101, %c0_102] : memref<2x18x18x4xf32, #tpu.memory_space<vmem>>, vector<2x16x16x4xf32>
    %64 = vector.shape_cast %63 : vector<2x16x16x4xf32> to vector<512x4xf32>
    %c8 = arith.constant 8 : index
    %c0_103 = arith.constant 0 : index
    %c0_104 = arith.constant 0 : index
    %65 = vector.load %arg2[%c8, %c0_103, %c0_104] : memref<9x4x128xf32, #tpu.memory_space<vmem>>, vector<1x4x128xf32>
    %66 = vector.shape_cast %65 : vector<1x4x128xf32> to vector<4x128xf32>
    %cst_105 = arith.constant dense<0.000000e+00> : vector<512x128xf32>
    %67 = tpu.matmul %64, %66, %cst_105 {dimension_numbers = #tpu.dot_dimension_numbers<[1], [0], [0], [1], [0, 0, 1, 1], [], []>} : vector<512x4xf32>, vector<4x128xf32>, vector<512x128xf32> -> vector<512x128xf32>
    %68 = arith.addf %62, %67 : vector<512x128xf32>
    %c0_106 = arith.constant 0 : index
    %c0_107 = arith.constant 0 : index
    %69 = vector.load %arg3[%c0_106, %c0_107] : memref<1x128xf32, #tpu.memory_space<vmem>>, vector<1x128xf32>
    %70 = vector.shape_cast %69 : vector<1x128xf32> to vector<128xf32>
    %71 = vector.shape_cast %70 : vector<128xf32> to vector<1x128xf32>
    %72 = vector.broadcast %71 : vector<1x128xf32> to vector<512x128xf32>
    %73 = arith.addf %68, %72 : vector<512x128xf32>
    %cst_108 = arith.constant 0.000000e+00 : f32
    %74 = vector.broadcast %cst_108 : f32 to vector<512x128xf32>
    %75 = arith.maximumf %73, %74 : vector<512x128xf32>
    %76 = vector.shape_cast %75 : vector<512x128xf32> to vector<2x16x16x128xf32>
    %c0_109 = arith.constant 0 : index
    %c1_110 = arith.constant 1 : index
    %c1_111 = arith.constant 1 : index
    %c0_112 = arith.constant 0 : index
    %77 = vector.load %arg8[%c0_109, %c1_110, %c1_111, %c0_112] : memref<2x18x18x128xf32, #tpu.memory_space<vmem>>, vector<2x16x16x128xf32>
    tpu.vector_store %arg8[%c0_109, %c1_110, %c1_111, %c0_112], %76 {strides = array<i32>} : memref<2x18x18x128xf32, #tpu.memory_space<vmem>>, vector<2x16x16x128xf32>,
    %cst_113 = arith.constant 0.000000e+00 : f32
    %78 = vector.broadcast %cst_113 : f32 to vector<512x128xf32>
    %c0_114 = arith.constant 0 : index
    %c0_115 = arith.constant 0 : index
    %c0_116 = arith.constant 0 : index
    %c0_117 = arith.constant 0 : index
    %79 = vector.load %arg8[%c0_114, %c0_115, %c0_116, %c0_117] : memref<2x18x18x128xf32, #tpu.memory_space<vmem>>, vector<2x16x16x128xf32>
    %80 = vector.shape_cast %79 : vector<2x16x16x128xf32> to vector<512x128xf32>
    %c0_118 = arith.constant 0 : index
    %c0_119 = arith.constant 0 : index
    %c0_120 = arith.constant 0 : index
    %81 = vector.load %arg4[%c0_118, %c0_119, %c0_120] : memref<9x128x128xf32, #tpu.memory_space<vmem>>, vector<1x128x128xf32>
    %82 = vector.shape_cast %81 : vector<1x128x128xf32> to vector<128x128xf32>
    %cst_121 = arith.constant dense<0.000000e+00> : vector<512x128xf32>
    %83 = tpu.matmul %80, %82, %cst_121 {dimension_numbers = #tpu.dot_dimension_numbers<[1], [0], [0], [1], [0, 0, 1, 1], [], []>} : vector<512x128xf32>, vector<128x128xf32>, vector<512x128xf32> -> vector<512x128xf32>
    %84 = arith.addf %78, %83 : vector<512x128xf32>
    %c0_122 = arith.constant 0 : index
    %c0_123 = arith.constant 0 : index
    %c1_124 = arith.constant 1 : index
    %c0_125 = arith.constant 0 : index
    %85 = vector.load %arg8[%c0_122, %c0_123, %c1_124, %c0_125] : memref<2x18x18x128xf32, #tpu.memory_space<vmem>>, vector<2x16x16x128xf32>
    %86 = vector.shape_cast %85 : vector<2x16x16x128xf32> to vector<512x128xf32>
    %c1_126 = arith.constant 1 : index
    %c0_127 = arith.constant 0 : index
    %c0_128 = arith.constant 0 : index
    %87 = vector.load %arg4[%c1_126, %c0_127, %c0_128] : memref<9x128x128xf32, #tpu.memory_space<vmem>>, vector<1x128x128xf32>
    %88 = vector.shape_cast %87 : vector<1x128x128xf32> to vector<128x128xf32>
    %cst_129 = arith.constant dense<0.000000e+00> : vector<512x128xf32>
    %89 = tpu.matmul %86, %88, %cst_129 {dimension_numbers = #tpu.dot_dimension_numbers<[1], [0], [0], [1], [0, 0, 1, 1], [], []>} : vector<512x128xf32>, vector<128x128xf32>, vector<512x128xf32> -> vector<512x128xf32>
    %90 = arith.addf %84, %89 : vector<512x128xf32>
    %c0_130 = arith.constant 0 : index
    %c0_131 = arith.constant 0 : index
    %c2_132 = arith.constant 2 : index
    %c0_133 = arith.constant 0 : index
    %91 = vector.load %arg8[%c0_130, %c0_131, %c2_132, %c0_133] : memref<2x18x18x128xf32, #tpu.memory_space<vmem>>, vector<2x16x16x128xf32>
    %92 = vector.shape_cast %91 : vector<2x16x16x128xf32> to vector<512x128xf32>
    %c2_134 = arith.constant 2 : index
    %c0_135 = arith.constant 0 : index
    %c0_136 = arith.constant 0 : index
    %93 = vector.load %arg4[%c2_134, %c0_135, %c0_136] : memref<9x128x128xf32, #tpu.memory_space<vmem>>, vector<1x128x128xf32>
    %94 = vector.shape_cast %93 : vector<1x128x128xf32> to vector<128x128xf32>
    %cst_137 = arith.constant dense<0.000000e+00> : vector<512x128xf32>
    %95 = tpu.matmul %92, %94, %cst_137 {dimension_numbers = #tpu.dot_dimension_numbers<[1], [0], [0], [1], [0, 0, 1, 1], [], []>} : vector<512x128xf32>, vector<128x128xf32>, vector<512x128xf32> -> vector<512x128xf32>
    %96 = arith.addf %90, %95 : vector<512x128xf32>
    %c0_138 = arith.constant 0 : index
    %c1_139 = arith.constant 1 : index
    %c0_140 = arith.constant 0 : index
    %c0_141 = arith.constant 0 : index
    %97 = vector.load %arg8[%c0_138, %c1_139, %c0_140, %c0_141] : memref<2x18x18x128xf32, #tpu.memory_space<vmem>>, vector<2x16x16x128xf32>
    %98 = vector.shape_cast %97 : vector<2x16x16x128xf32> to vector<512x128xf32>
    %c3_142 = arith.constant 3 : index
    %c0_143 = arith.constant 0 : index
    %c0_144 = arith.constant 0 : index
    %99 = vector.load %arg4[%c3_142, %c0_143, %c0_144] : memref<9x128x128xf32, #tpu.memory_space<vmem>>, vector<1x128x128xf32>
    %100 = vector.shape_cast %99 : vector<1x128x128xf32> to vector<128x128xf32>
    %cst_145 = arith.constant dense<0.000000e+00> : vector<512x128xf32>
    %101 = tpu.matmul %98, %100, %cst_145 {dimension_numbers = #tpu.dot_dimension_numbers<[1], [0], [0], [1], [0, 0, 1, 1], [], []>} : vector<512x128xf32>, vector<128x128xf32>, vector<512x128xf32> -> vector<512x128xf32>
    %102 = arith.addf %96, %101 : vector<512x128xf32>
    %c0_146 = arith.constant 0 : index
    %c1_147 = arith.constant 1 : index
    %c1_148 = arith.constant 1 : index
    %c0_149 = arith.constant 0 : index
    %103 = vector.load %arg8[%c0_146, %c1_147, %c1_148, %c0_149] : memref<2x18x18x128xf32, #tpu.memory_space<vmem>>, vector<2x16x16x128xf32>
    %104 = vector.shape_cast %103 : vector<2x16x16x128xf32> to vector<512x128xf32>
    %c4_150 = arith.constant 4 : index
    %c0_151 = arith.constant 0 : index
    %c0_152 = arith.constant 0 : index
    %105 = vector.load %arg4[%c4_150, %c0_151, %c0_152] : memref<9x128x128xf32, #tpu.memory_space<vmem>>, vector<1x128x128xf32>
    %106 = vector.shape_cast %105 : vector<1x128x128xf32> to vector<128x128xf32>
    %cst_153 = arith.constant dense<0.000000e+00> : vector<512x128xf32>
    %107 = tpu.matmul %104, %106, %cst_153 {dimension_numbers = #tpu.dot_dimension_numbers<[1], [0], [0], [1], [0, 0, 1, 1], [], []>} : vector<512x128xf32>, vector<128x128xf32>, vector<512x128xf32> -> vector<512x128xf32>
    %108 = arith.addf %102, %107 : vector<512x128xf32>
    %c0_154 = arith.constant 0 : index
    %c1_155 = arith.constant 1 : index
    %c2_156 = arith.constant 2 : index
    %c0_157 = arith.constant 0 : index
    %109 = vector.load %arg8[%c0_154, %c1_155, %c2_156, %c0_157] : memref<2x18x18x128xf32, #tpu.memory_space<vmem>>, vector<2x16x16x128xf32>
    %110 = vector.shape_cast %109 : vector<2x16x16x128xf32> to vector<512x128xf32>
    %c5_158 = arith.constant 5 : index
    %c0_159 = arith.constant 0 : index
    %c0_160 = arith.constant 0 : index
    %111 = vector.load %arg4[%c5_158, %c0_159, %c0_160] : memref<9x128x128xf32, #tpu.memory_space<vmem>>, vector<1x128x128xf32>
    %112 = vector.shape_cast %111 : vector<1x128x128xf32> to vector<128x128xf32>
    %cst_161 = arith.constant dense<0.000000e+00> : vector<512x128xf32>
    %113 = tpu.matmul %110, %112, %cst_161 {dimension_numbers = #tpu.dot_dimension_numbers<[1], [0], [0], [1], [0, 0, 1, 1], [], []>} : vector<512x128xf32>, vector<128x128xf32>, vector<512x128xf32> -> vector<512x128xf32>
    %114 = arith.addf %108, %113 : vector<512x128xf32>
    %c0_162 = arith.constant 0 : index
    %c2_163 = arith.constant 2 : index
    %c0_164 = arith.constant 0 : index
    %c0_165 = arith.constant 0 : index
    %115 = vector.load %arg8[%c0_162, %c2_163, %c0_164, %c0_165] : memref<2x18x18x128xf32, #tpu.memory_space<vmem>>, vector<2x16x16x128xf32>
    %116 = vector.shape_cast %115 : vector<2x16x16x128xf32> to vector<512x128xf32>
    %c6_166 = arith.constant 6 : index
    %c0_167 = arith.constant 0 : index
    %c0_168 = arith.constant 0 : index
    %117 = vector.load %arg4[%c6_166, %c0_167, %c0_168] : memref<9x128x128xf32, #tpu.memory_space<vmem>>, vector<1x128x128xf32>
    %118 = vector.shape_cast %117 : vector<1x128x128xf32> to vector<128x128xf32>
    %cst_169 = arith.constant dense<0.000000e+00> : vector<512x128xf32>
    %119 = tpu.matmul %116, %118, %cst_169 {dimension_numbers = #tpu.dot_dimension_numbers<[1], [0], [0], [1], [0, 0, 1, 1], [], []>} : vector<512x128xf32>, vector<128x128xf32>, vector<512x128xf32> -> vector<512x128xf32>
    %120 = arith.addf %114, %119 : vector<512x128xf32>
    %c0_170 = arith.constant 0 : index
    %c2_171 = arith.constant 2 : index
    %c1_172 = arith.constant 1 : index
    %c0_173 = arith.constant 0 : index
    %121 = vector.load %arg8[%c0_170, %c2_171, %c1_172, %c0_173] : memref<2x18x18x128xf32, #tpu.memory_space<vmem>>, vector<2x16x16x128xf32>
    %122 = vector.shape_cast %121 : vector<2x16x16x128xf32> to vector<512x128xf32>
    %c7_174 = arith.constant 7 : index
    %c0_175 = arith.constant 0 : index
    %c0_176 = arith.constant 0 : index
    %123 = vector.load %arg4[%c7_174, %c0_175, %c0_176] : memref<9x128x128xf32, #tpu.memory_space<vmem>>, vector<1x128x128xf32>
    %124 = vector.shape_cast %123 : vector<1x128x128xf32> to vector<128x128xf32>
    %cst_177 = arith.constant dense<0.000000e+00> : vector<512x128xf32>
    %125 = tpu.matmul %122, %124, %cst_177 {dimension_numbers = #tpu.dot_dimension_numbers<[1], [0], [0], [1], [0, 0, 1, 1], [], []>} : vector<512x128xf32>, vector<128x128xf32>, vector<512x128xf32> -> vector<512x128xf32>
    %126 = arith.addf %120, %125 : vector<512x128xf32>
    %c0_178 = arith.constant 0 : index
    %c2_179 = arith.constant 2 : index
    %c2_180 = arith.constant 2 : index
    %c0_181 = arith.constant 0 : index
    %127 = vector.load %arg8[%c0_178, %c2_179, %c2_180, %c0_181] : memref<2x18x18x128xf32, #tpu.memory_space<vmem>>, vector<2x16x16x128xf32>
    %128 = vector.shape_cast %127 : vector<2x16x16x128xf32> to vector<512x128xf32>
    %c8_182 = arith.constant 8 : index
    %c0_183 = arith.constant 0 : index
    %c0_184 = arith.constant 0 : index
    %129 = vector.load %arg4[%c8_182, %c0_183, %c0_184] : memref<9x128x128xf32, #tpu.memory_space<vmem>>, vector<1x128x128xf32>
    %130 = vector.shape_cast %129 : vector<1x128x128xf32> to vector<128x128xf32>
    %cst_185 = arith.constant dense<0.000000e+00> : vector<512x128xf32>
    %131 = tpu.matmul %128, %130, %cst_185 {dimension_numbers = #tpu.dot_dimension_numbers<[1], [0], [0], [1], [0, 0, 1, 1], [], []>} : vector<512x128xf32>, vector<128x128xf32>, vector<512x128xf32> -> vector<512x128xf32>
    %132 = arith.addf %126, %131 : vector<512x128xf32>
    %c0_186 = arith.constant 0 : index
    %c0_187 = arith.constant 0 : index
    %133 = vector.load %arg5[%c0_186, %c0_187] : memref<1x128xf32, #tpu.memory_space<vmem>>, vector<1x128xf32>
    %134 = vector.shape_cast %133 : vector<1x128xf32> to vector<128xf32>
    %135 = vector.shape_cast %134 : vector<128xf32> to vector<1x128xf32>
    %136 = vector.broadcast %135 : vector<1x128xf32> to vector<512x128xf32>
    %137 = arith.addf %132, %136 : vector<512x128xf32>
    %cst_188 = arith.constant 0.000000e+00 : f32
    %138 = vector.broadcast %cst_188 : f32 to vector<512x128xf32>
    %139 = arith.maximumf %137, %138 : vector<512x128xf32>
    %140 = vector.shape_cast %139 : vector<512x128xf32> to vector<2x16x16x128xf32>
    %c0_189 = arith.constant 0 : index
    %c0_190 = arith.constant 0 : index
    %c0_191 = arith.constant 0 : index
    %c0_192 = arith.constant 0 : index
    %141 = vector.load %arg6[%c0_189, %c0_190, %c0_191, %c0_192] : memref<2x16x16x128xf32, #tpu.memory_space<vmem>>, vector<2x16x16x128xf32>
    tpu.vector_store %arg6[%c0_189, %c0_190, %c0_191, %c0_192], %140 {strides = array<i32>} : memref<2x16x16x128xf32, #tpu.memory_space<vmem>>, vector<2x16x16x128xf32>,
    return
  }
  func.func @transform_0(%arg0: i32) -> (i32, i32, i32, i32) {
    %c0_i32 = arith.constant 0 : i32
    %c0_i32_0 = arith.constant 0 : i32
    %c0_i32_1 = arith.constant 0 : i32
    %c0_i32_2 = arith.constant 0 : i32
    return %arg0, %c0_i32, %c0_i32_0, %c0_i32_1 : i32, i32, i32, i32
  }
  func.func @transform_1(%arg0: i32) -> (i32, i32, i32) {
    %c0_i32 = arith.constant 0 : i32
    %c0_i32_0 = arith.constant 0 : i32
    %c0_i32_1 = arith.constant 0 : i32
    %c0_i32_2 = arith.constant 0 : i32
    return %c0_i32, %c0_i32_0, %c0_i32_1 : i32, i32, i32
  }
  func.func @transform_2(%arg0: i32) -> (i32, i32) {
    %c0_i32 = arith.constant 0 : i32
    %c0_i32_0 = arith.constant 0 : i32
    %c0_i32_1 = arith.constant 0 : i32
    return %c0_i32, %c0_i32_0 : i32, i32
  }
  func.func @transform_3(%arg0: i32) -> (i32, i32, i32) {
    %c0_i32 = arith.constant 0 : i32
    %c0_i32_0 = arith.constant 0 : i32
    %c0_i32_1 = arith.constant 0 : i32
    %c0_i32_2 = arith.constant 0 : i32
    return %c0_i32, %c0_i32_0, %c0_i32_1 : i32, i32, i32
  }
  func.func @transform_4(%arg0: i32) -> (i32, i32) {
    %c0_i32 = arith.constant 0 : i32
    %c0_i32_0 = arith.constant 0 : i32
    %c0_i32_1 = arith.constant 0 : i32
    return %c0_i32, %c0_i32_0 : i32, i32
  }
  func.func @transform_5(%arg0: i32) -> (i32, i32, i32, i32) {
    %c0_i32 = arith.constant 0 : i32
    %c0_i32_0 = arith.constant 0 : i32
    %c0_i32_1 = arith.constant 0 : i32
    %c0_i32_2 = arith.constant 0 : i32
    return %arg0, %c0_i32, %c0_i32_0, %c0_i32_1 : i32, i32, i32, i32
  }
}

</mosaic_0001>

<bundles_post_ra>
// kernel: tpu_custom_call.1
= control target key start
LH: loop header
LB: loop body
LE: loop exit
PB: predicated region body
PF: predicated region fallthrough
CT: control target
= control target key end

     0   :  { %10 = vsyncpa [#allocation5], 0  ;;  %s19893_s0 = inlined_call_operand.vmem [shape: f32[2,16,16,4], index: 0, kind: input, shape index: {}]   ;;  %s19894_s1 = inlined_call_operand.vmem [shape: f32[9,4,128], index: 1, kind: input, shape index: {}]   ;;  %s19895_s2 = inlined_call_operand.vmem [shape: f32[1,128], index: 2, kind: input, shape index: {}]   ;;  %s19896_s3 = inlined_call_operand.hbm [shape: f32[9,128,128], index: 3, kind: input, shape index: {}]   ;;  %s19897_s4 = inlined_call_operand.vmem [shape: f32[1,128], index: 4, kind: input, shape index: {}]   ;;  %s19898_s5 = inlined_call_operand.hbm [shape: f32[2,16,16,128], index: 5, kind: output, shape index: {}]  }
   0x1   :  { %11 = vsyncpa [#allocation6], 0  ;;  %s16975_s18 = smov [#allocation4]   ;;  %s16927_s22 = scalar_lea.hbm %s19896_s3, 18432 }
   0x2   :  { %s23_s19 = sshll.u32 %s16975_s18, 4  ;;  %p16928_p0 = scmp.ne.s32.totalorder %s19896_s3, %s16927_s22  ;;  %s24_s19 = int_to_ptr.vmem [resolvable:$true] %s23_s19 }
   0x3   :  { %p16931_p1 = scmp.lt.u32.totalorder %s16927_s22, %s19896_s3 }
   0x5   :  { %p16933_p2 = pnand %p16931_p1, %p16928_p0 }
   0x7   :  { %16936 = shalt.err (!%p16933_p2)
}
   0x8   :  { %s16937_s27 = scalar_lea.vmem %s24_s19, 18432  ;;  %p16942_p4 = scmp.lt.s32.totalorder %s24_s19, %s24_s19 }
   0x9   :  { %p16938_p3 = scmp.ne.s32.totalorder %s24_s19, %s16937_s27  ;;  %p16943_p5 = scmp.lt.s32.totalorder %s16937_s27, %s16937_s27 }
   0xb   :  { %p16944_p6 = por %p16943_p5, %p16942_p4 }
   0xd   :  { %p16945_p7 = pnand %p16944_p6, %p16938_p3 }
   0xf   :  { %16948 = shalt.err (!%p16945_p7)
}
  0x10   :  { %s16976_s28 = smov 128   ;;  %s16977_s29 = smov 8  }
  0x11   :  { %29 = dma.hbm_to_vmem [thread:$0]  %s19896_s3, 18432, %s24_s19, [#allocation5], %s16976_s28, %s16976_s28, %s16977_s29  }
  0x12   :  { %16971 = dma.done.wait [#allocation5], 18432  }
  0x13   :  { %16972 = vsyncadd [#allocation5], 4294948864  ;;  %vm35_vm0 = vcmask 31744   ;;  %vm38_vm1 = vcmask 25600   ;;  %v16978_v0 = vmov 0.0   ;;  %vm50_vm2 = vcmask 24576  }
  0x14   :  { %36 = vst.msk [vmem:[#allocation2] sm:$0xff] %vm35_vm0, %v16978_v0  ;;  %37 = vst.msk [vmem:[#allocation2 + $0x8] sm:$0xff] %vm35_vm0, %v16978_v0  ;;  %vm660_vm3 = vcmask 1043456   ;;  %v11658_v1 = vld [vmem:[%s19894_s1 + $0x4] sm:$0xf]  ;;  %v209_v6 = vld [vmem:[%s19893_s0 + $0x8] sm:$0xff] }
  0x15   :  { %40 = vst.msk [vmem:[#allocation2 + $0x1b0] sm:$0xff] %vm35_vm0, %v16978_v0  ;;  %41 = vst.msk [vmem:[#allocation2 + $0x1b8] sm:$0xff] %vm35_vm0, %v16978_v0  ;;  %v401_v2 = vld [vmem:[%s19894_s1] sm:$0xf]  ;;  %13558 = vmatprep.subr.msk.mxu0 %vm660_vm3, %v11658_v1  ;;  %v210_v7 = vld [vmem:[%s19893_s0 + $0x10] sm:$0xff] }
  0x16   :  { %44 = vst.msk [vmem:[#allocation2 + $0x198] sm:$0xff] %vm35_vm0, %v16978_v0  ;;  %45 = vst.msk [vmem:[#allocation2 + $0x1a0] sm:$0xff] %vm35_vm0, %v16978_v0  ;;  %v208_v3 = vld [vmem:[%s19893_s0] sm:$0xff]  ;;  %13559 = vmatpush3.msk.msra.mxu0 %vm660_vm3, %v11658_v1  ;;  %v211_v8 = vld [vmem:[%s19893_s0 + $0x18] sm:$0xff] }
  0x17   :  { %47 = vst.msk [vmem:[#allocation2 + $0x348] sm:$0xff] %vm35_vm0, %v16978_v0  ;;  %48 = vst.msk [vmem:[#allocation2 + $0x350] sm:$0xff] %vm35_vm0, %v16978_v0  ;;  %v212_v9 = vld [vmem:[%s19893_s0 + $0x20] sm:$0xff]  ;;  %13656 = vmatprep.subr.msk.mxu0 %vm660_vm3, %v401_v2  ;;  %v213_v10 = vld [vmem:[%s19893_s0 + $0x28] sm:$0xff] }
  0x18   :  { %123 = vst [vmem:[#allocation3] sm:$0xff] %v16978_v0  ;;  %124 = vst [vmem:[#allocation3 + $0x8] sm:$0xff] %v16978_v0  ;;  %v214_v11 = vld [vmem:[%s19893_s0 + $0x30] sm:$0xff]  ;;  %v215_v12 = vld [vmem:[%s19893_s0 + $0x38] sm:$0xff] }
  0x19   :  { %125 = vst [vmem:[#allocation3 + $0x10] sm:$0x3] %v16978_v0  ;;  %126 = vst [vmem:[#allocation3 + $0x1b0] sm:$0xff] %v16978_v0  ;;  %v216_v13 = vld [vmem:[%s19893_s0 + $0x40] sm:$0xff]  ;;  %v217_v14 = vld [vmem:[%s19893_s0 + $0x48] sm:$0xff] }
  0x1a   :  { %127 = vst [vmem:[#allocation3 + $0x1b8] sm:$0xff] %v16978_v0  ;;  %128 = vst [vmem:[#allocation3 + $0x1c0] sm:$0x3] %v16978_v0  ;;  %v218_v15 = vld [vmem:[%s19893_s0 + $0x50] sm:$0xff]  ;;  %v219_v16 = vld [vmem:[%s19893_s0 + $0x58] sm:$0xff] }
  0x1b   :  { %130 = vst [vmem:[#allocation3 + $0x198] sm:$0xff] %v16978_v0  ;;  %131 = vst [vmem:[#allocation3 + $0x1a0] sm:$0xff] %v16978_v0  ;;  %v402_v4 = vld [vmem:[#allocation2 + $0x1] sm:$0xff]  ;;  %v222_v19 = vld [vmem:[%s19893_s0 + $0x70] sm:$0xff] }
  0x1c   :  { %132 = vst [vmem:[#allocation3 + $0x1a8] sm:$0x3] %v16978_v0  ;;  %133 = vst [vmem:[#allocation3 + $0x348] sm:$0xff] %v16978_v0  ;;  %13560 = vmatprep.mubr.msk.f32.mxu0 %vm35_vm0, %v402_v4  ;;  %v220_v17 = vld [vmem:[%s19893_s0 + $0x60] sm:$0xff]  ;;  %v221_v18 = vld [vmem:[%s19893_s0 + $0x68] sm:$0xff] }
  0x1d   :  { %134 = vst [vmem:[#allocation3 + $0x350] sm:$0xff] %v16978_v0  ;;  %135 = vst [vmem:[#allocation3 + $0x358] sm:$0x3] %v16978_v0  ;;  %v223_v20 = vld [vmem:[%s19893_s0 + $0x78] sm:$0xff]  ;;  %v224_v21 = vld [vmem:[%s19893_s0 + $0x80] sm:$0xff] }
  0x1e   :  { %137 = vst [vmem:[#allocation3 + $0x18] sm:$0x1] %v16978_v0  ;;  %138 = vst [vmem:[#allocation3 + $0x30] sm:$0x1] %v16978_v0  ;;  %v225_v22 = vld [vmem:[%s19893_s0 + $0x88] sm:$0xff]  ;;  %v226_v23 = vld [vmem:[%s19893_s0 + $0x90] sm:$0xff] }
  0x1f   :  { %139 = vst [vmem:[#allocation3 + $0x48] sm:$0x1] %v16978_v0  ;;  %140 = vst [vmem:[#allocation3 + $0x60] sm:$0x1] %v16978_v0  ;;  %v227_v24 = vld [vmem:[%s19893_s0 + $0x98] sm:$0xff]  ;;  %v228_v26 = vld [vmem:[%s19893_s0 + $0xa0] sm:$0xff] }
  0x20   :  { %141 = vst [vmem:[#allocation3 + $0x78] sm:$0x1] %v16978_v0  ;;  %142 = vst [vmem:[#allocation3 + $0x90] sm:$0x1] %v16978_v0  ;;  %v229_v27 = vld [vmem:[%s19893_s0 + $0xa8] sm:$0xff]  ;;  %v230_v29 = vld [vmem:[%s19893_s0 + $0xb0] sm:$0xff] }
  0x21   :  { %143 = vst [vmem:[#allocation3 + $0xa8] sm:$0x1] %v16978_v0  ;;  %144 = vst [vmem:[#allocation3 + $0xc0] sm:$0x1] %v16978_v0  ;;  %v231_v30 = vld [vmem:[%s19893_s0 + $0xb8] sm:$0xff]  ;;  %v232_v36 = vld [vmem:[%s19893_s0 + $0xc0] sm:$0xff] }
  0x22   :  { %145 = vst [vmem:[#allocation3 + $0xd8] sm:$0x1] %v16978_v0  ;;  %146 = vst [vmem:[#allocation3 + $0xf0] sm:$0x1] %v16978_v0  ;;  %v233_v37 = vld [vmem:[%s19893_s0 + $0xc8] sm:$0xff]  ;;  %v234_v38 = vld [vmem:[%s19893_s0 + $0xd0] sm:$0xff] }
  0x23   :  { %147 = vst [vmem:[#allocation3 + $0x108] sm:$0x1] %v16978_v0  ;;  %148 = vst [vmem:[#allocation3 + $0x120] sm:$0x1] %v16978_v0  ;;  %v235_v39 = vld [vmem:[%s19893_s0 + $0xd8] sm:$0xff]  ;;  %v236_v40 = vld [vmem:[%s19893_s0 + $0xe0] sm:$0xff] }
  0x24   :  { %149 = vst [vmem:[#allocation3 + $0x138] sm:$0x1] %v16978_v0  ;;  %150 = vst [vmem:[#allocation3 + $0x150] sm:$0x1] %v16978_v0  ;;  %v237_v43 = vld [vmem:[%s19893_s0 + $0xe8] sm:$0xff]  ;;  %v240_v44 = vld [vmem:[%s19893_s0 + $0x100] sm:$0xff] }
  0x25   :  { %151 = vst [vmem:[#allocation3 + $0x168] sm:$0x1] %v16978_v0  ;;  %152 = vst [vmem:[#allocation3 + $0x180] sm:$0x1] %v16978_v0  ;;  %v241_v45 = vld [vmem:[%s19893_s0 + $0x108] sm:$0xff]  ;;  %v242_v46 = vld [vmem:[%s19893_s0 + $0x110] sm:$0xff] }
  0x26   :  { %155 = vst [vmem:[#allocation3 + $0x1c8] sm:$0x1] %v16978_v0  ;;  %156 = vst [vmem:[#allocation3 + $0x1e0] sm:$0x1] %v16978_v0  ;;  %v243_v48 = vld [vmem:[%s19893_s0 + $0x118] sm:$0xff]  ;;  %v244_v49 = vld [vmem:[%s19893_s0 + $0x120] sm:$0xff] }
  0x27   :  { %157 = vst [vmem:[#allocation3 + $0x1f8] sm:$0x1] %v16978_v0  ;;  %158 = vst [vmem:[#allocation3 + $0x210] sm:$0x1] %v16978_v0  ;;  %v245_v50 = vld [vmem:[%s19893_s0 + $0x128] sm:$0xff]  ;;  %v246_v51 = vld [vmem:[%s19893_s0 + $0x130] sm:$0xff] }
  0x28   :  { %159 = vst [vmem:[#allocation3 + $0x228] sm:$0x1] %v16978_v0  ;;  %160 = vst [vmem:[#allocation3 + $0x240] sm:$0x1] %v16978_v0  ;;  %v247_v52 = vld [vmem:[%s19893_s0 + $0x138] sm:$0xff]  ;;  %v248_v53 = vld [vmem:[%s19893_s0 + $0x140] sm:$0xff] }
  0x29   :  { %161 = vst [vmem:[#allocation3 + $0x258] sm:$0x1] %v16978_v0  ;;  %162 = vst [vmem:[#allocation3 + $0x270] sm:$0x1] %v16978_v0  ;;  %v249_v54 = vld [vmem:[%s19893_s0 + $0x148] sm:$0xff]  ;;  %v250_v55 = vld [vmem:[%s19893_s0 + $0x150] sm:$0xff] }
  0x2a   :  { %163 = vst [vmem:[#allocation3 + $0x288] sm:$0x1] %v16978_v0  ;;  %164 = vst [vmem:[#allocation3 + $0x2a0] sm:$0x1] %v16978_v0  ;;  %v251_v56 = vld [vmem:[%s19893_s0 + $0x158] sm:$0xff]  ;;  %v252_v58 = vld [vmem:[%s19893_s0 + $0x160] sm:$0xff] }
  0x2b   :  { %165 = vst [vmem:[#allocation3 + $0x2b8] sm:$0x1] %v16978_v0  ;;  %166 = vst [vmem:[#allocation3 + $0x2d0] sm:$0x1] %v16978_v0  ;;  %v253_v59 = vld [vmem:[%s19893_s0 + $0x168] sm:$0xff]  ;;  %v254_v60 = vld [vmem:[%s19893_s0 + $0x170] sm:$0xff] }
  0x2c   :  { %167 = vst [vmem:[#allocation3 + $0x2e8] sm:$0x1] %v16978_v0  ;;  %168 = vst [vmem:[#allocation3 + $0x300] sm:$0x1] %v16978_v0  ;;  %v255_v61 = vld [vmem:[%s19893_s0 + $0x178] sm:$0xff]  ;;  %v256_v63 = vld [vmem:[%s19893_s0 + $0x180] sm:$0xff] }
  0x2d   :  { %169 = vst [vmem:[#allocation3 + $0x318] sm:$0x1] %v16978_v0  ;;  %170 = vst [vmem:[#allocation3 + $0x330] sm:$0x1] %v16978_v0  ;;  %v258_v4 = vld [vmem:[%s19893_s0 + $0x190] sm:$0xff] }
  0x2e   :  { %173 = vst [vmem:[#allocation3 + $0x29] sm:$0x1] %v16978_v0  ;;  %174 = vst [vmem:[#allocation3 + $0x41] sm:$0x1] %v16978_v0 }
  0x2f   :  { %175 = vst [vmem:[#allocation3 + $0x59] sm:$0x1] %v16978_v0  ;;  %176 = vst [vmem:[#allocation3 + $0x71] sm:$0x1] %v16978_v0 }
  0x30   :  { %177 = vst [vmem:[#allocation3 + $0x89] sm:$0x1] %v16978_v0  ;;  %178 = vst [vmem:[#allocation3 + $0xa1] sm:$0x1] %v16978_v0 }
  0x31   :  { %179 = vst [vmem:[#allocation3 + $0xb9] sm:$0x1] %v16978_v0  ;;  %180 = vst [vmem:[#allocation3 + $0xd1] sm:$0x1] %v16978_v0 }
  0x32   :  { %181 = vst [vmem:[#allocation3 + $0xe9] sm:$0x1] %v16978_v0  ;;  %182 = vst [vmem:[#allocation3 + $0x101] sm:$0x1] %v16978_v0 }
  0x33   :  { %183 = vst [vmem:[#allocation3 + $0x119] sm:$0x1] %v16978_v0  ;;  %184 = vst [vmem:[#allocation3 + $0x131] sm:$0x1] %v16978_v0 }
  0x34   :  { %185 = vst [vmem:[#allocation3 + $0x149] sm:$0x1] %v16978_v0  ;;  %186 = vst [vmem:[#allocation3 + $0x161] sm:$0x1] %v16978_v0 }
  0x35   :  { %187 = vst [vmem:[#allocation3 + $0x179] sm:$0x1] %v16978_v0  ;;  %188 = vst [vmem:[#allocation3 + $0x191] sm:$0x1] %v16978_v0 }
  0x36   :  { %191 = vst [vmem:[#allocation3 + $0x1d9] sm:$0x1] %v16978_v0  ;;  %192 = vst [vmem:[#allocation3 + $0x1f1] sm:$0x1] %v16978_v0 }
  0x37   :  { %193 = vst [vmem:[#allocation3 + $0x209] sm:$0x1] %v16978_v0  ;;  %194 = vst [vmem:[#allocation3 + $0x221] sm:$0x1] %v16978_v0 }
  0x38   :  { %195 = vst [vmem:[#allocation3 + $0x239] sm:$0x1] %v16978_v0  ;;  %196 = vst [vmem:[#allocation3 + $0x251] sm:$0x1] %v16978_v0 }
  0x39   :  { %197 = vst [vmem:[#allocation3 + $0x269] sm:$0x1] %v16978_v0  ;;  %198 = vst [vmem:[#allocation3 + $0x281] sm:$0x1] %v16978_v0 }
  0x3a   :  { %199 = vst [vmem:[#allocation3 + $0x299] sm:$0x1] %v16978_v0  ;;  %200 = vst [vmem:[#allocation3 + $0x2b1] sm:$0x1] %v16978_v0 }
  0x3b   :  { %201 = vst [vmem:[#allocation3 + $0x2c9] sm:$0x1] %v16978_v0  ;;  %202 = vst [vmem:[#allocation3 + $0x2e1] sm:$0x1] %v16978_v0 }
  0x3c   :  { %203 = vst [vmem:[#allocation3 + $0x2f9] sm:$0x1] %v16978_v0  ;;  %204 = vst [vmem:[#allocation3 + $0x311] sm:$0x1] %v16978_v0 }
  0x3d   :  { %205 = vst [vmem:[#allocation3 + $0x329] sm:$0x1] %v16978_v0  ;;  %206 = vst [vmem:[#allocation3 + $0x341] sm:$0x1] %v16978_v0 }
  0x3e   :  { %39 = vst.msk [vmem:[#allocation2 + $0x10] sm:$0x3] %vm38_vm1, %v16978_v0  ;;  %42 = vst.msk [vmem:[#allocation2 + $0x1c0] sm:$0x3] %vm38_vm1, %v16978_v0 }
  0x3f   :  { %46 = vst.msk [vmem:[#allocation2 + $0x1a8] sm:$0x3] %vm38_vm1, %v16978_v0  ;;  %49 = vst.msk [vmem:[#allocation2 + $0x358] sm:$0x3] %vm38_vm1, %v16978_v0 }
  0x40   :  { %136 = vst [vmem:[#allocation3] sm:$0x1] %v16978_v0  ;;  %153 = vst [vmem:[#allocation3 + $0x198] sm:$0x1] %v16978_v0 }
  0x41   :  { %154 = vst [vmem:[#allocation3 + $0x1b0] sm:$0x1] %v16978_v0  ;;  %171 = vst [vmem:[#allocation3 + $0x348] sm:$0x1] %v16978_v0 }
  0x42   :  { %172 = vst [vmem:[#allocation3 + $0x11] sm:$0x1] %v16978_v0  ;;  %189 = vst [vmem:[#allocation3 + $0x1a9] sm:$0x1] %v16978_v0 }
  0x43   :  { %190 = vst [vmem:[#allocation3 + $0x1c1] sm:$0x1] %v16978_v0  ;;  %207 = vst [vmem:[#allocation3 + $0x359] sm:$0x1] %v16978_v0 }
  0x44   :  { %87 = vst.msk [vmem:[#allocation2 + $0x11] sm:$0x1] %vm50_vm2, %v16978_v0  ;;  %51 = vst.msk [vmem:[#allocation2] sm:$0x1] %vm50_vm2, %v16978_v0 }
  0x45   :  { %52 = vst.msk [vmem:[#allocation2 + $0x18] sm:$0x1] %vm50_vm2, %v16978_v0  ;;  %53 = vst.msk [vmem:[#allocation2 + $0x30] sm:$0x1] %vm50_vm2, %v16978_v0  ;;  %v403_v5 = vld [vmem:[#allocation2 + $0x9] sm:$0xff] }
  0x46   :  { %54 = vst.msk [vmem:[#allocation2 + $0x48] sm:$0x1] %vm50_vm2, %v16978_v0  ;;  %55 = vst.msk [vmem:[#allocation2 + $0x60] sm:$0x1] %vm50_vm2, %v16978_v0  ;;  %13561 = vmatmul.mubr.msk.f32.vlgmr.msra.gmra.mrb[0].mxu0 %vm35_vm0, %v403_v5  ;;  %v259_v5 = vld [vmem:[%s19893_s0 + $0x198] sm:$0xff] }
  0x47   :  { %56 = vst.msk [vmem:[#allocation2 + $0x78] sm:$0x1] %vm50_vm2, %v16978_v0  ;;  %57 = vst.msk [vmem:[#allocation2 + $0x90] sm:$0x1] %vm50_vm2, %v16978_v0  ;;  %13657 = vmatpush3.msk.msra.mxu0 %vm660_vm3, %v401_v2 }
  0x48   :  { %58 = vst.msk [vmem:[#allocation2 + $0xa8] sm:$0x1] %vm50_vm2, %v16978_v0  ;;  %59 = vst.msk [vmem:[#allocation2 + $0xc0] sm:$0x1] %vm50_vm2, %v16978_v0 }
  0x49   :  { %60 = vst.msk [vmem:[#allocation2 + $0xd8] sm:$0x1] %vm50_vm2, %v16978_v0  ;;  %61 = vst.msk [vmem:[#allocation2 + $0xf0] sm:$0x1] %vm50_vm2, %v16978_v0 }
  0x4a   :  { %62 = vst.msk [vmem:[#allocation2 + $0x108] sm:$0x1] %vm50_vm2, %v16978_v0  ;;  %63 = vst.msk [vmem:[#allocation2 + $0x120] sm:$0x1] %vm50_vm2, %v16978_v0 }
  0x4b   :  { %64 = vst.msk [vmem:[#allocation2 + $0x138] sm:$0x1] %vm50_vm2, %v16978_v0  ;;  %65 = vst.msk [vmem:[#allocation2 + $0x150] sm:$0x1] %vm50_vm2, %v16978_v0 }
  0x4c   :  { %66 = vst.msk [vmem:[#allocation2 + $0x168] sm:$0x1] %vm50_vm2, %v16978_v0  ;;  %67 = vst.msk [vmem:[#allocation2 + $0x180] sm:$0x1] %vm50_vm2, %v16978_v0 }
  0x4d   :  { %68 = vst.msk [vmem:[#allocation2 + $0x198] sm:$0x1] %vm50_vm2, %v16978_v0  ;;  %69 = vst.msk [vmem:[#allocation2 + $0x1b0] sm:$0x1] %vm50_vm2, %v16978_v0 }
  0x4e   :  { %70 = vst.msk [vmem:[#allocation2 + $0x1c8] sm:$0x1] %vm50_vm2, %v16978_v0  ;;  %71 = vst.msk [vmem:[#allocation2 + $0x1e0] sm:$0x1] %vm50_vm2, %v16978_v0 }
  0x4f   :  { %72 = vst.msk [vmem:[#allocation2 + $0x1f8] sm:$0x1] %vm50_vm2, %v16978_v0  ;;  %73 = vst.msk [vmem:[#allocation2 + $0x210] sm:$0x1] %vm50_vm2, %v16978_v0 }
  0x50   :  { %74 = vst.msk [vmem:[#allocation2 + $0x228] sm:$0x1] %vm50_vm2, %v16978_v0  ;;  %75 = vst.msk [vmem:[#allocation2 + $0x240] sm:$0x1] %vm50_vm2, %v16978_v0 }
  0x51   :  { %76 = vst.msk [vmem:[#allocation2 + $0x258] sm:$0x1] %vm50_vm2, %v16978_v0  ;;  %77 = vst.msk [vmem:[#allocation2 + $0x270] sm:$0x1] %vm50_vm2, %v16978_v0 }
  0x52   :  { %78 = vst.msk [vmem:[#allocation2 + $0x288] sm:$0x1] %vm50_vm2, %v16978_v0  ;;  %79 = vst.msk [vmem:[#allocation2 + $0x2a0] sm:$0x1] %vm50_vm2, %v16978_v0 }
  0x53   :  { %80 = vst.msk [vmem:[#allocation2 + $0x2b8] sm:$0x1] %vm50_vm2, %v16978_v0  ;;  %81 = vst.msk [vmem:[#allocation2 + $0x2d0] sm:$0x1] %vm50_vm2, %v16978_v0 }
  0x54   :  { %82 = vst.msk [vmem:[#allocation2 + $0x2e8] sm:$0x1] %vm50_vm2, %v16978_v0  ;;  %83 = vst.msk [vmem:[#allocation2 + $0x300] sm:$0x1] %vm50_vm2, %v16978_v0 }
  0x55   :  { %84 = vst.msk [vmem:[#allocation2 + $0x318] sm:$0x1] %vm50_vm2, %v16978_v0  ;;  %85 = vst.msk [vmem:[#allocation2 + $0x330] sm:$0x1] %vm50_vm2, %v16978_v0 }
  0x56   :  { %86 = vst.msk [vmem:[#allocation2 + $0x348] sm:$0x1] %vm50_vm2, %v16978_v0  ;;  %88 = vst.msk [vmem:[#allocation2 + $0x29] sm:$0x1] %vm50_vm2, %v16978_v0 }
  0x57   :  { %89 = vst.msk [vmem:[#allocation2 + $0x41] sm:$0x1] %vm50_vm2, %v16978_v0  ;;  %90 = vst.msk [vmem:[#allocation2 + $0x59] sm:$0x1] %vm50_vm2, %v16978_v0 }
  0x58   :  { %91 = vst.msk [vmem:[#allocation2 + $0x71] sm:$0x1] %vm50_vm2, %v16978_v0  ;;  %92 = vst.msk [vmem:[#allocation2 + $0x89] sm:$0x1] %vm50_vm2, %v16978_v0 }
  0x59   :  { %93 = vst.msk [vmem:[#allocation2 + $0xa1] sm:$0x1] %vm50_vm2, %v16978_v0  ;;  %94 = vst.msk [vmem:[#allocation2 + $0xb9] sm:$0x1] %vm50_vm2, %v16978_v0 }
  0x5a   :  { %95 = vst.msk [vmem:[#allocation2 + $0xd1] sm:$0x1] %vm50_vm2, %v16978_v0  ;;  %96 = vst.msk [vmem:[#allocation2 + $0xe9] sm:$0x1] %vm50_vm2, %v16978_v0 }
  0x5b   :  { %97 = vst.msk [vmem:[#allocation2 + $0x101] sm:$0x1] %vm50_vm2, %v16978_v0  ;;  %98 = vst.msk [vmem:[#allocation2 + $0x119] sm:$0x1] %vm50_vm2, %v16978_v0 }
  0x5c   :  { %99 = vst.msk [vmem:[#allocation2 + $0x131] sm:$0x1] %vm50_vm2, %v16978_v0  ;;  %100 = vst.msk [vmem:[#allocation2 + $0x149] sm:$0x1] %vm50_vm2, %v16978_v0 }
  0x5d   :  { %101 = vst.msk [vmem:[#allocation2 + $0x161] sm:$0x1] %vm50_vm2, %v16978_v0  ;;  %102 = vst.msk [vmem:[#allocation2 + $0x179] sm:$0x1] %vm50_vm2, %v16978_v0 }
  0x5e   :  { %103 = vst.msk [vmem:[#allocation2 + $0x191] sm:$0x1] %vm50_vm2, %v16978_v0  ;;  %106 = vst.msk [vmem:[#allocation2 + $0x1d9] sm:$0x1] %vm50_vm2, %v16978_v0 }
  0x5f   :  { %107 = vst.msk [vmem:[#allocation2 + $0x1f1] sm:$0x1] %vm50_vm2, %v16978_v0  ;;  %108 = vst.msk [vmem:[#allocation2 + $0x209] sm:$0x1] %vm50_vm2, %v16978_v0 }
  0x60   :  { %109 = vst.msk [vmem:[#allocation2 + $0x221] sm:$0x1] %vm50_vm2, %v16978_v0  ;;  %110 = vst.msk [vmem:[#allocation2 + $0x239] sm:$0x1] %vm50_vm2, %v16978_v0 }
  0x61   :  { %111 = vst.msk [vmem:[#allocation2 + $0x251] sm:$0x1] %vm50_vm2, %v16978_v0  ;;  %112 = vst.msk [vmem:[#allocation2 + $0x269] sm:$0x1] %vm50_vm2, %v16978_v0 }
  0x62   :  { %113 = vst.msk [vmem:[#allocation2 + $0x281] sm:$0x1] %vm50_vm2, %v16978_v0  ;;  %114 = vst.msk [vmem:[#allocation2 + $0x299] sm:$0x1] %vm50_vm2, %v16978_v0 }
  0x63   :  { %115 = vst.msk [vmem:[#allocation2 + $0x2b1] sm:$0x1] %vm50_vm2, %v16978_v0  ;;  %116 = vst.msk [vmem:[#allocation2 + $0x2c9] sm:$0x1] %vm50_vm2, %v16978_v0 }
  0x64   :  { %117 = vst.msk [vmem:[#allocation2 + $0x2e1] sm:$0x1] %vm50_vm2, %v16978_v0  ;;  %118 = vst.msk [vmem:[#allocation2 + $0x2f9] sm:$0x1] %vm50_vm2, %v16978_v0 }
  0x65   :  { %119 = vst.msk [vmem:[#allocation2 + $0x311] sm:$0x1] %vm50_vm2, %v16978_v0  ;;  %120 = vst.msk [vmem:[#allocation2 + $0x329] sm:$0x1] %vm50_vm2, %v16978_v0 }
  0x66   :  { %121 = vst.msk [vmem:[#allocation2 + $0x341] sm:$0x1] %vm50_vm2, %v16978_v0  ;;  %104 = vst.msk [vmem:[#allocation2 + $0x1a9] sm:$0x1] %vm50_vm2, %v16978_v0 }
  0x67   :  { %105 = vst.msk [vmem:[#allocation2 + $0x1c1] sm:$0x1] %vm50_vm2, %v16978_v0  ;;  %122 = vst.msk [vmem:[#allocation2 + $0x359] sm:$0x1] %vm50_vm2, %v16978_v0  ;;  %v257_v0 = vld [vmem:[%s19893_s0 + $0x188] sm:$0xff] }
  0x68   :  { %273 = vst.msk [vmem:[#allocation2 + $0x19] sm:$0xff] %vm35_vm0, %v208_v3  ;;  %274 = vst.msk [vmem:[#allocation2 + $0x21] sm:$0xff] %vm35_vm0, %v209_v6  ;;  %v260_v6 = vld [vmem:[%s19893_s0 + $0x1a0] sm:$0xff] }
  0x69   :  { %275 = vst.msk [vmem:[#allocation2 + $0x31] sm:$0xff] %vm35_vm0, %v210_v7  ;;  %276 = vst.msk [vmem:[#allocation2 + $0x39] sm:$0xff] %vm35_vm0, %v211_v8  ;;  %v261_v7 = vld [vmem:[%s19893_s0 + $0x1a8] sm:$0xff]  ;;  %v262_v8 = vld [vmem:[%s19893_s0 + $0x1b0] sm:$0xff] }
  0x6a   :  { %277 = vst.msk [vmem:[#allocation2 + $0x49] sm:$0xff] %vm35_vm0, %v212_v9  ;;  %278 = vst.msk [vmem:[#allocation2 + $0x51] sm:$0xff] %vm35_vm0, %v213_v10 }
  0x6b   :  { %279 = vst.msk [vmem:[#allocation2 + $0x61] sm:$0xff] %vm35_vm0, %v214_v11  ;;  %280 = vst.msk [vmem:[#allocation2 + $0x69] sm:$0xff] %vm35_vm0, %v215_v12  ;;  %v263_v11 = vld [vmem:[%s19893_s0 + $0x1b8] sm:$0xff]  ;;  %v264_v12 = vld [vmem:[%s19893_s0 + $0x1c0] sm:$0xff] }
  0x6c   :  { %281 = vst.msk [vmem:[#allocation2 + $0x79] sm:$0xff] %vm35_vm0, %v216_v13  ;;  %282 = vst.msk [vmem:[#allocation2 + $0x81] sm:$0xff] %vm35_vm0, %v217_v14  ;;  %v265_v13 = vld [vmem:[%s19893_s0 + $0x1c8] sm:$0xff]  ;;  %v266_v14 = vld [vmem:[%s19893_s0 + $0x1d0] sm:$0xff] }
  0x6d   :  { %283 = vst.msk [vmem:[#allocation2 + $0x91] sm:$0xff] %vm35_vm0, %v218_v15  ;;  %284 = vst.msk [vmem:[#allocation2 + $0x99] sm:$0xff] %vm35_vm0, %v219_v16  ;;  %v267_v15 = vld [vmem:[%s19893_s0 + $0x1d8] sm:$0xff]  ;;  %v268_v16 = vld [vmem:[%s19893_s0 + $0x1e0] sm:$0xff] }
  0x6e   :  { %285 = vst.msk [vmem:[#allocation2 + $0xa9] sm:$0xff] %vm35_vm0, %v220_v17  ;;  %286 = vst.msk [vmem:[#allocation2 + $0xb1] sm:$0xff] %vm35_vm0, %v221_v18  ;;  %v269_v17 = vld [vmem:[%s19893_s0 + $0x1e8] sm:$0xff] }
  0x6f   :  { %287 = vst.msk [vmem:[#allocation2 + $0xc1] sm:$0xff] %vm35_vm0, %v222_v19  ;;  %288 = vst.msk [vmem:[#allocation2 + $0xc9] sm:$0xff] %vm35_vm0, %v223_v20  ;;  %v404_v25 = vld [vmem:[#allocation2 + $0x19] sm:$0xff]  ;;  %v405_v28 = vld [vmem:[#allocation2 + $0x21] sm:$0xff] }
  0x70   :  { %289 = vst.msk [vmem:[#allocation2 + $0xd9] sm:$0xff] %vm35_vm0, %v224_v21  ;;  %290 = vst.msk [vmem:[#allocation2 + $0xe1] sm:$0xff] %vm35_vm0, %v225_v22  ;;  %13563 = vmatprep.mubr.msk.f32.mxu0 %vm35_vm0, %v404_v25  ;;  %v406_v31 = vld [vmem:[#allocation2 + $0x31] sm:$0xff]  ;;  %v407_v32 = vld [vmem:[#allocation2 + $0x39] sm:$0xff] }
  0x71   :  { %291 = vst.msk [vmem:[#allocation2 + $0xf1] sm:$0xff] %vm35_vm0, %v226_v23  ;;  %292 = vst.msk [vmem:[#allocation2 + $0xf9] sm:$0xff] %vm35_vm0, %v227_v24  ;;  %13564 = vmatmul.mubr.msk.f32.gmra.mrb[2].mxu0 %vm35_vm0, %v405_v28  ;;  %v408_v33 = vld [vmem:[#allocation2 + $0x49] sm:$0xff]  ;;  %v409_v34 = vld [vmem:[#allocation2 + $0x51] sm:$0xff] }
  0x72   :  { %293 = vst.msk [vmem:[#allocation2 + $0x109] sm:$0xff] %vm35_vm0, %v228_v26  ;;  %294 = vst.msk [vmem:[#allocation2 + $0x111] sm:$0xff] %vm35_vm0, %v229_v27  ;;  %13566 = vmatprep.mubr.msk.f32.mxu0 %vm35_vm0, %v406_v31  ;;  %v410_v35 = vld [vmem:[#allocation2 + $0x61] sm:$0xff]  ;;  %v411_v41 = vld [vmem:[#allocation2 + $0x69] sm:$0xff] }
  0x73   :  { %295 = vst.msk [vmem:[#allocation2 + $0x121] sm:$0xff] %vm35_vm0, %v230_v29  ;;  %296 = vst.msk [vmem:[#allocation2 + $0x129] sm:$0xff] %vm35_vm0, %v231_v30  ;;  %v412_v42 = vld [vmem:[#allocation2 + $0x79] sm:$0xff]  ;;  %v413_v47 = vld [vmem:[#allocation2 + $0x81] sm:$0xff] }
  0x74   :  { %297 = vst.msk [vmem:[#allocation2 + $0x139] sm:$0xff] %vm35_vm0, %v232_v36  ;;  %298 = vst.msk [vmem:[#allocation2 + $0x141] sm:$0xff] %vm35_vm0, %v233_v37  ;;  %v414_v57 = vld [vmem:[#allocation2 + $0x91] sm:$0xff]  ;;  %v415_v62 = vld [vmem:[#allocation2 + $0x99] sm:$0xff] }
  0x75   :  { %13567 = vmatmul.mubr.msk.f32.gmra.mrb[4].mxu0 %vm35_vm0, %v407_v32  ;;  %299 = vst.msk [vmem:[#allocation2 + $0x151] sm:$0xff] %vm35_vm0, %v234_v38  ;;  %300 = vst.msk [vmem:[#allocation2 + $0x159] sm:$0xff] %vm35_vm0, %v235_v39  ;;  %v416_v1 = vld [vmem:[#allocation2 + $0xa9] sm:$0xff]  ;;  %v417_v2 = vld [vmem:[#allocation2 + $0xb1] sm:$0xff] }
  0x76   :  { %13569 = vmatprep.mubr.msk.f32.mxu0 %vm35_vm0, %v408_v33  ;;  %301 = vst.msk [vmem:[#allocation2 + $0x169] sm:$0xff] %vm35_vm0, %v236_v40  ;;  %302 = vst.msk [vmem:[#allocation2 + $0x171] sm:$0xff] %vm35_vm0, %v237_v43  ;;  %v418_v3 = vld [vmem:[#allocation2 + $0xc1] sm:$0xff]  ;;  %v419_v9 = vld [vmem:[#allocation2 + $0xc9] sm:$0xff] }
  0x77   :  { %305 = vst.msk [vmem:[#allocation2 + $0x1c9] sm:$0xff] %vm35_vm0, %v240_v44  ;;  %306 = vst.msk [vmem:[#allocation2 + $0x1d1] sm:$0xff] %vm35_vm0, %v241_v45  ;;  %v420_v10 = vld [vmem:[#allocation2 + $0xd9] sm:$0xff]  ;;  %v17548_v18 = vld [vmem:[%s19894_s1 + $0x8] sm:$0xf] }
  0x78   :  { %307 = vst.msk [vmem:[#allocation2 + $0x1e1] sm:$0xff] %vm35_vm0, %v242_v46  ;;  %308 = vst.msk [vmem:[#allocation2 + $0x1e9] sm:$0xff] %vm35_vm0, %v243_v48  ;;  %v421_v19 = vld [vmem:[#allocation2 + $0xe1] sm:$0xff]  ;;  %13754 = vmatprep.subr.msk.mxu0 %vm660_vm3, %v17548_v18  ;;  %v422_v20 = vld [vmem:[#allocation2 + $0xf1] sm:$0xff] }
  0x79   :  { %13570 = vmatmul.mubr.msk.f32.gmra.mrb[6].mxu0 %vm35_vm0, %v409_v34  ;;  %309 = vst.msk [vmem:[#allocation2 + $0x1f9] sm:$0xff] %vm35_vm0, %v244_v49  ;;  %310 = vst.msk [vmem:[#allocation2 + $0x201] sm:$0xff] %vm35_vm0, %v245_v50  ;;  %v423_v21 = vld [vmem:[#allocation2 + $0xf9] sm:$0xff]  ;;  %v424_v22 = vld [vmem:[#allocation2 + $0x109] sm:$0xff] }
  0x7a   :  { %13572 = vmatprep.mubr.msk.f32.mxu0 %vm35_vm0, %v410_v35  ;;  %311 = vst.msk [vmem:[#allocation2 + $0x211] sm:$0xff] %vm35_vm0, %v246_v51  ;;  %312 = vst.msk [vmem:[#allocation2 + $0x219] sm:$0xff] %vm35_vm0, %v247_v52  ;;  %v425_v23 = vld [vmem:[#allocation2 + $0x111] sm:$0xff]  ;;  %v426_v24 = vld [vmem:[#allocation2 + $0x121] sm:$0xff] }
  0x7b   :  { %313 = vst.msk [vmem:[#allocation2 + $0x229] sm:$0xff] %vm35_vm0, %v248_v53  ;;  %314 = vst.msk [vmem:[#allocation2 + $0x231] sm:$0xff] %vm35_vm0, %v249_v54  ;;  %v427_v25 = vld [vmem:[#allocation2 + $0x129] sm:$0xff]  ;;  %v428_v26 = vld [vmem:[#allocation2 + $0x139] sm:$0xff] }
  0x7c   :  { %315 = vst.msk [vmem:[#allocation2 + $0x241] sm:$0xff] %vm35_vm0, %v250_v55  ;;  %316 = vst.msk [vmem:[#allocation2 + $0x249] sm:$0xff] %vm35_vm0, %v251_v56  ;;  %v429_v27 = vld [vmem:[#allocation2 + $0x141] sm:$0xff]  ;;  %v430_v28 = vld [vmem:[#allocation2 + $0x151] sm:$0xff] }
  0x7d   :  { %13573 = vmatmul.mubr.msk.f32.gmra.mrb[8].mxu0 %vm35_vm0, %v411_v41  ;;  %317 = vst.msk [vmem:[#allocation2 + $0x259] sm:$0xff] %vm35_vm0, %v252_v58  ;;  %318 = vst.msk [vmem:[#allocation2 + $0x261] sm:$0xff] %vm35_vm0, %v253_v59  ;;  %v431_v29 = vld [vmem:[#allocation2 + $0x159] sm:$0xff]  ;;  %v432_v30 = vld [vmem:[#allocation2 + $0x169] sm:$0xff] }
  0x7e   :  { %13575 = vmatprep.mubr.msk.f32.mxu0 %vm35_vm0, %v412_v42  ;;  %319 = vst.msk [vmem:[#allocation2 + $0x271] sm:$0xff] %vm35_vm0, %v254_v60  ;;  %320 = vst.msk [vmem:[#allocation2 + $0x279] sm:$0xff] %vm35_vm0, %v255_v61  ;;  %v433_v31 = vld [vmem:[#allocation2 + $0x171] sm:$0xff]  ;;  %v435_v33 = vld [vmem:[#allocation2 + $0x1b9] sm:$0xff] }
  0x7f   :  { %321 = vst.msk [vmem:[#allocation2 + $0x289] sm:$0xff] %vm35_vm0, %v256_v63  ;;  %322 = vst.msk [vmem:[#allocation2 + $0x291] sm:$0xff] %vm35_vm0, %v257_v0  ;;  %v434_v32 = vld [vmem:[#allocation2 + $0x1b1] sm:$0xff]  ;;  %v436_v34 = vld [vmem:[#allocation2 + $0x1c9] sm:$0xff] }
  0x80   :  { %323 = vst.msk [vmem:[#allocation2 + $0x2a1] sm:$0xff] %vm35_vm0, %v258_v4  ;;  %324 = vst.msk [vmem:[#allocation2 + $0x2a9] sm:$0xff] %vm35_vm0, %v259_v5  ;;  %v437_v35 = vld [vmem:[#allocation2 + $0x1d1] sm:$0xff]  ;;  %v438_v36 = vld [vmem:[#allocation2 + $0x1e1] sm:$0xff] }
  0x81   :  { %13576 = vmatmul.mubr.msk.f32.gmra.mrb[10].mxu0 %vm35_vm0, %v413_v47  ;;  %325 = vst.msk [vmem:[#allocation2 + $0x2b9] sm:$0xff] %vm35_vm0, %v260_v6  ;;  %326 = vst.msk [vmem:[#allocation2 + $0x2c1] sm:$0xff] %vm35_vm0, %v261_v7  ;;  %v439_v37 = vld [vmem:[#allocation2 + $0x1e9] sm:$0xff]  ;;  %v440_v38 = vld [vmem:[#allocation2 + $0x1f9] sm:$0xff] }
  0x82   :  { %13578 = vmatprep.mubr.msk.f32.mxu0 %vm35_vm0, %v414_v57  ;;  %327 = vst.msk [vmem:[#allocation2 + $0x2d1] sm:$0xff] %vm35_vm0, %v262_v8  ;;  %328 = vst.msk [vmem:[#allocation2 + $0x2d9] sm:$0xff] %vm35_vm0, %v263_v11  ;;  %v441_v39 = vld [vmem:[#allocation2 + $0x201] sm:$0xff]  ;;  %v442_v40 = vld [vmem:[#allocation2 + $0x211] sm:$0xff] }
  0x83   :  { %329 = vst.msk [vmem:[#allocation2 + $0x2e9] sm:$0xff] %vm35_vm0, %v264_v12  ;;  %330 = vst.msk [vmem:[#allocation2 + $0x2f1] sm:$0xff] %vm35_vm0, %v265_v13  ;;  %v443_v41 = vld [vmem:[#allocation2 + $0x219] sm:$0xff]  ;;  %v444_v42 = vld [vmem:[#allocation2 + $0x229] sm:$0xff] }
  0x84   :  { %331 = vst.msk [vmem:[#allocation2 + $0x301] sm:$0xff] %vm35_vm0, %v266_v14  ;;  %332 = vst.msk [vmem:[#allocation2 + $0x309] sm:$0xff] %vm35_vm0, %v267_v15  ;;  %v445_v43 = vld [vmem:[#allocation2 + $0x231] sm:$0xff]  ;;  %v446_v44 = vld [vmem:[#allocation2 + $0x241] sm:$0xff] }
  0x85   :  { %13579 = vmatmul.mubr.msk.f32.gmra.mrb[12].mxu0 %vm35_vm0, %v415_v62  ;;  %333 = vst.msk [vmem:[#allocation2 + $0x319] sm:$0xff] %vm35_vm0, %v268_v16  ;;  %334 = vst.msk [vmem:[#allocation2 + $0x321] sm:$0xff] %vm35_vm0, %v269_v17  ;;  %v447_v45 = vld [vmem:[#allocation2 + $0x249] sm:$0xff]  ;;  %v448_v46 = vld [vmem:[#allocation2 + $0x259] sm:$0xff] }
  0x86   :  { %13581 = vmatprep.mubr.msk.f32.mxu0 %vm35_vm0, %v416_v1  ;;  %v449_v47 = vld [vmem:[#allocation2 + $0x261] sm:$0xff]  ;;  %v450_v48 = vld [vmem:[#allocation2 + $0x271] sm:$0xff]  ;;  %v451_v49 = vld [vmem:[#allocation2 + $0x279] sm:$0xff] }
  0x87   :  { %v452_v50 = vld [vmem:[#allocation2 + $0x289] sm:$0xff]  ;;  %v453_v51 = vld [vmem:[#allocation2 + $0x291] sm:$0xff]  ;;  %v454_v52 = vld [vmem:[#allocation2 + $0x2a1] sm:$0xff] }
  0x88   :  { %v455_v53 = vld [vmem:[#allocation2 + $0x2a9] sm:$0xff]  ;;  %v456_v54 = vld [vmem:[#allocation2 + $0x2b9] sm:$0xff]  ;;  %v457_v55 = vld [vmem:[#allocation2 + $0x2c1] sm:$0xff] }
  0x89   :  { %13582 = vmatmul.mubr.msk.f32.gmra.mrb[14].mxu0 %vm35_vm0, %v417_v2  ;;  %v458_v56 = vld [vmem:[#allocation2 + $0x2d1] sm:$0xff]  ;;  %v459_v57 = vld [vmem:[#allocation2 + $0x2d9] sm:$0xff]  ;;  %v338_v1 = vld [vmem:[#allocation2 + $0x8] sm:$0xff] }
  0x8a   :  { %13584 = vmatprep.mubr.msk.f32.mxu0 %vm35_vm0, %v418_v3  ;;  %v460_v58 = vld [vmem:[#allocation2 + $0x2e9] sm:$0xff]  ;;  %v461_v59 = vld [vmem:[#allocation2 + $0x2f1] sm:$0xff]  ;;  %v337_v0 = vld [vmem:[#allocation2] sm:$0xff] }
  0x8b   :  { %v462_v60 = vld [vmem:[#allocation2 + $0x301] sm:$0xff]  ;;  %v463_v61 = vld [vmem:[#allocation2 + $0x309] sm:$0xff]  ;;  %v17599_v2 = vld [vmem:[#allocation2 + $0x18] sm:$0xff] }
  0x8c   :  { %v464_v62 = vld [vmem:[#allocation2 + $0x319] sm:$0xff]  ;;  %v465_v63 = vld [vmem:[#allocation2 + $0x321] sm:$0xff]  ;;  %v17604_v3 = vld [vmem:[%s19894_s1 + $0xc] sm:$0xf] }
  0x8d   :  { %13585 = vmatmul.mubr.msk.f32.gmra.mrb[16].mxu0 %vm35_vm0, %v419_v9  ;;  %v17611_v4 = vld [vmem:[#allocation2 + $0x20] sm:$0xff]  ;;  %v17613_v5 = vld [vmem:[#allocation2 + $0x30] sm:$0xff]  ;;  %v17621_v6 = vld [vmem:[#allocation2 + $0x38] sm:$0xff] }
  0x8e   :  { %13587 = vmatprep.mubr.msk.f32.mxu0 %vm35_vm0, %v420_v10  ;;  %v17623_v7 = vld [vmem:[#allocation2 + $0x48] sm:$0xff]  ;;  %v17629_v8 = vld [vmem:[#allocation2 + $0x50] sm:$0xff]  ;;  %v17631_v9 = vld [vmem:[#allocation2 + $0x60] sm:$0xff] }
  0x8f   :  { %v17637_v10 = vld [vmem:[#allocation2 + $0x68] sm:$0xff]  ;;  %v17639_v11 = vld [vmem:[#allocation2 + $0x78] sm:$0xff]  ;;  %v17645_v12 = vld [vmem:[#allocation2 + $0x80] sm:$0xff] }
  0x90   :  { %v17647_v13 = vld [vmem:[#allocation2 + $0x90] sm:$0xff]  ;;  %v17653_v14 = vld [vmem:[#allocation2 + $0x98] sm:$0xff]  ;;  %v17655_v15 = vld [vmem:[#allocation2 + $0xa8] sm:$0xff] }
  0x91   :  { %13588 = vmatmul.mubr.msk.f32.gmra.mrb[18].mxu0 %vm35_vm0, %v421_v19  ;;  %v17661_v16 = vld [vmem:[#allocation2 + $0xb0] sm:$0xff]  ;;  %v17663_v17 = vld [vmem:[#allocation2 + $0xc0] sm:$0xff]  ;;  %v17671_v19 = vld [vmem:[#allocation2 + $0xd8] sm:$0xff] }
  0x92   :  { %13590 = vmatprep.mubr.msk.f32.mxu0 %vm35_vm0, %v422_v20  ;;  %v17677_v20 = vld [vmem:[#allocation2 + $0xe0] sm:$0xff] }
  0x95   :  { %13591 = vmatmul.mubr.msk.f32.gmra.mrb[20].mxu0 %vm35_vm0, %v423_v21  ;;  %v17679_v21 = vld [vmem:[#allocation2 + $0xf0] sm:$0xff] }
  0x96   :  { %13593 = vmatprep.mubr.msk.f32.mxu0 %vm35_vm0, %v424_v22  ;;  %v17685_v22 = vld [vmem:[#allocation2 + $0xf8] sm:$0xff] }
  0x99   :  { %13594 = vmatmul.mubr.msk.f32.gmra.mrb[22].mxu0 %vm35_vm0, %v425_v23  ;;  %v17687_v23 = vld [vmem:[#allocation2 + $0x108] sm:$0xff] }
  0x9a   :  { %13596 = vmatprep.mubr.msk.f32.mxu0 %vm35_vm0, %v426_v24  ;;  %v17693_v24 = vld [vmem:[#allocation2 + $0x110] sm:$0xff] }
  0x9d   :  { %13597 = vmatmul.mubr.msk.f32.gmra.mrb[24].mxu0 %vm35_vm0, %v427_v25  ;;  %v17695_v25 = vld [vmem:[#allocation2 + $0x120] sm:$0xff] }
  0x9e   :  { %13599 = vmatprep.mubr.msk.f32.mxu0 %vm35_vm0, %v428_v26  ;;  %v17701_v26 = vld [vmem:[#allocation2 + $0x128] sm:$0xff] }
  0xa1   :  { %13600 = vmatmul.mubr.msk.f32.gmra.mrb[26].mxu0 %vm35_vm0, %v429_v27  ;;  %v17703_v27 = vld [vmem:[#allocation2 + $0x138] sm:$0xff] }
  0xa2   :  { %13602 = vmatprep.mubr.msk.f32.mxu0 %vm35_vm0, %v430_v28  ;;  %v17709_v28 = vld [vmem:[#allocation2 + $0x140] sm:$0xff] }
  0xa5   :  { %13603 = vmatmul.mubr.msk.f32.gmra.mrb[28].mxu0 %vm35_vm0, %v431_v29  ;;  %v17711_v29 = vld [vmem:[#allocation2 + $0x150] sm:$0xff] }
  0xa6   :  { %13605 = vmatprep.mubr.msk.f32.mxu0 %vm35_vm0, %v432_v30  ;;  %v17717_v30 = vld [vmem:[#allocation2 + $0x158] sm:$0xff] }
  0xa9   :  { %13606 = vmatmul.mubr.msk.f32.gmra.mrb[30].mxu0 %vm35_vm0, %v433_v31  ;;  %v17719_v31 = vld [vmem:[#allocation2 + $0x168] sm:$0xff] }
  0xaa   :  { %13608 = vmatprep.mubr.msk.f32.mxu0 %vm35_vm0, %v434_v32  ;;  %v17725_v32 = vld [vmem:[#allocation2 + $0x170] sm:$0xff] }
  0xad   :  { %13609 = vmatmul.mubr.msk.f32.gmra.mrb[32].mxu0 %vm35_vm0, %v435_v33  ;;  %v369_v33 = vld [vmem:[#allocation2 + $0x1b0] sm:$0xff] }
  0xae   :  { %13611 = vmatprep.mubr.msk.f32.mxu0 %vm35_vm0, %v436_v34  ;;  %v370_v34 = vld [vmem:[#allocation2 + $0x1b8] sm:$0xff] }
  0xb1   :  { %13612 = vmatmul.mubr.msk.f32.gmra.mrb[34].mxu0 %vm35_vm0, %v437_v35  ;;  %v17730_v35 = vld [vmem:[#allocation2 + $0x1c8] sm:$0xff] }
  0xb2   :  { %13614 = vmatprep.mubr.msk.f32.mxu0 %vm35_vm0, %v438_v36  ;;  %v17735_v36 = vld [vmem:[#allocation2 + $0x1d0] sm:$0xff] }
  0xb5   :  { %13615 = vmatmul.mubr.msk.f32.gmra.mrb[36].mxu0 %vm35_vm0, %v439_v37  ;;  %v17737_v37 = vld [vmem:[#allocation2 + $0x1e0] sm:$0xff] }
  0xb6   :  { %13617 = vmatprep.mubr.msk.f32.mxu0 %vm35_vm0, %v440_v38  ;;  %v17743_v38 = vld [vmem:[#allocation2 + $0x1e8] sm:$0xff] }
  0xb9   :  { %13618 = vmatmul.mubr.msk.f32.gmra.mrb[38].mxu0 %vm35_vm0, %v441_v39  ;;  %v17745_v39 = vld [vmem:[#allocation2 + $0x1f8] sm:$0xff] }
  0xba   :  { %13620 = vmatprep.mubr.msk.f32.mxu0 %vm35_vm0, %v442_v40  ;;  %v17751_v40 = vld [vmem:[#allocation2 + $0x200] sm:$0xff] }
  0xbd   :  { %13621 = vmatmul.mubr.msk.f32.gmra.mrb[40].mxu0 %vm35_vm0, %v443_v41  ;;  %v17753_v41 = vld [vmem:[#allocation2 + $0x210] sm:$0xff] }
  0xbe   :  { %13623 = vmatprep.mubr.msk.f32.mxu0 %vm35_vm0, %v444_v42  ;;  %v17759_v42 = vld [vmem:[#allocation2 + $0x218] sm:$0xff] }
  0xc1   :  { %13624 = vmatmul.mubr.msk.f32.gmra.mrb[42].mxu0 %vm35_vm0, %v445_v43  ;;  %v17761_v43 = vld [vmem:[#allocation2 + $0x228] sm:$0xff] }
  0xc2   :  { %13626 = vmatprep.mubr.msk.f32.mxu0 %vm35_vm0, %v446_v44  ;;  %v17767_v44 = vld [vmem:[#allocation2 + $0x230] sm:$0xff] }
  0xc5   :  { %13627 = vmatmul.mubr.msk.f32.gmra.mrb[44].mxu0 %vm35_vm0, %v447_v45  ;;  %v17769_v45 = vld [vmem:[#allocation2 + $0x240] sm:$0xff] }
  0xc6   :  { %13629 = vmatprep.mubr.msk.f32.mxu0 %vm35_vm0, %v448_v46  ;;  %v17775_v46 = vld [vmem:[#allocation2 + $0x248] sm:$0xff] }
  0xc9   :  { %13630 = vmatmul.mubr.msk.f32.gmra.mrb[46].mxu0 %vm35_vm0, %v449_v47  ;;  %v17777_v47 = vld [vmem:[#allocation2 + $0x258] sm:$0xff] }
  0xca   :  { %13632 = vmatprep.mubr.msk.f32.mxu0 %vm35_vm0, %v450_v48  ;;  %v17783_v48 = vld [vmem:[#allocation2 + $0x260] sm:$0xff] }
  0xcd   :  { %13633 = vmatmul.mubr.msk.f32.gmra.mrb[48].mxu0 %vm35_vm0, %v451_v49  ;;  %v17785_v49 = vld [vmem:[#allocation2 + $0x270] sm:$0xff] }
  0xce   :  { %13635 = vmatprep.mubr.msk.f32.mxu0 %vm35_vm0, %v452_v50  ;;  %v17791_v50 = vld [vmem:[#allocation2 + $0x278] sm:$0xff] }
  0xd1   :  { %13636 = vmatmul.mubr.msk.f32.gmra.mrb[50].mxu0 %vm35_vm0, %v453_v51  ;;  %v17793_v51 = vld [vmem:[#allocation2 + $0x288] sm:$0xff] }
  0xd2   :  { %13638 = vmatprep.mubr.msk.f32.mxu0 %vm35_vm0, %v454_v52  ;;  %v17799_v52 = vld [vmem:[#allocation2 + $0x290] sm:$0xff] }
  0xd5   :  { %13639 = vmatmul.mubr.msk.f32.gmra.mrb[52].mxu0 %vm35_vm0, %v455_v53  ;;  %v17801_v53 = vld [vmem:[#allocation2 + $0x2a0] sm:$0xff] }
  0xd6   :  { %13641 = vmatprep.mubr.msk.f32.mxu0 %vm35_vm0, %v456_v54  ;;  %v17807_v54 = vld [vmem:[#allocation2 + $0x2a8] sm:$0xff] }
  0xd9   :  { %13642 = vmatmul.mubr.msk.f32.gmra.mrb[54].mxu0 %vm35_vm0, %v457_v55  ;;  %v17809_v55 = vld [vmem:[#allocation2 + $0x2b8] sm:$0xff] }
  0xda   :  { %13644 = vmatprep.mubr.msk.f32.mxu0 %vm35_vm0, %v458_v56  ;;  %v17815_v56 = vld [vmem:[#allocation2 + $0x2c0] sm:$0xff] }
  0xdd   :  { %13645 = vmatmul.mubr.msk.f32.gmra.mrb[56].mxu0 %vm35_vm0, %v459_v57  ;;  %v17817_v57 = vld [vmem:[#allocation2 + $0x2d0] sm:$0xff] }
  0xde   :  { %13647 = vmatprep.mubr.msk.f32.mxu0 %vm35_vm0, %v460_v58  ;;  %v17823_v58 = vld [vmem:[#allocation2 + $0x2d8] sm:$0xff] }
  0xe1   :  { %13648 = vmatmul.mubr.msk.f32.gmra.mrb[58].mxu0 %vm35_vm0, %v461_v59  ;;  %v17825_v59 = vld [vmem:[#allocation2 + $0x2e8] sm:$0xff] }
  0xe2   :  { %13650 = vmatprep.mubr.msk.f32.mxu0 %vm35_vm0, %v462_v60  ;;  %v17831_v60 = vld [vmem:[#allocation2 + $0x2f0] sm:$0xff] }
  0xe5   :  { %13651 = vmatmul.mubr.msk.f32.gmra.mrb[60].mxu0 %vm35_vm0, %v463_v61  ;;  %v17833_v61 = vld [vmem:[#allocation2 + $0x300] sm:$0xff] }
  0xe6   :  { %13653 = vmatprep.mubr.msk.f32.mxu0 %vm35_vm0, %v464_v62  ;;  %20058 = vst [vmem:[#allocation10_spill] sm:$0xff] %v17833_v61  ;;  %v17839_v62 = vld [vmem:[#allocation2 + $0x308] sm:$0xff] }
  0xe7   :  { %20059 = vst [vmem:[#allocation11_spill] sm:$0xff] %v17839_v62 }
  0xe9   :  { %13654 = vmatmul.mubr.msk.f32.gmra.mrb[62].mxu0 %vm35_vm0, %v465_v63  ;;  %v17841_v63 = vld [vmem:[#allocation2 + $0x318] sm:$0xff] }
  0xea   :  { %13658 = vmatprep.mubr.msk.f32.mxu0 %vm35_vm0, %v337_v0  ;;  %20060 = vst [vmem:[#allocation12_spill] sm:$0xff] %v17841_v63  ;;  %v17847_v0 = vld [vmem:[#allocation2 + $0x320] sm:$0xff] }
  0xeb   :  { %20061 = vst [vmem:[#allocation13_spill] sm:$0xff] %v17847_v0 }
  0xed   :  { %13659 = vmatmul.mubr.msk.f32.vlgmr.msra.gmra.mrb[0].mxu0 %vm35_vm0, %v338_v1  ;;  %v1629_v1 = vld [vmem:[#allocation2 + $0x2] sm:$0xff] }
  0xee   :  { %13755 = vmatpush3.msk.msra.mxu0 %vm660_vm3, %v17548_v18  ;;  %13661 = vmatprep.mubr.msk.f32.mxu0 %vm35_vm0, %v17599_v2  ;;  %v17669_v18 = vld [vmem:[#allocation2 + $0xc8] sm:$0xff] }
  0xef   :  { %13852 = vmatprep.subr.msk.mxu0 %vm660_vm3, %v17604_v3 }
  0xf1   :  { %13662 = vmatmul.mubr.msk.f32.gmra.mrb[2].mxu0 %vm35_vm0, %v17611_v4 }
  0xf2   :  { %13664 = vmatprep.mubr.msk.f32.mxu0 %vm35_vm0, %v17613_v5 }
  0xf5   :  { %13665 = vmatmul.mubr.msk.f32.gmra.mrb[4].mxu0 %vm35_vm0, %v17621_v6 }
  0xf6   :  { %13667 = vmatprep.mubr.msk.f32.mxu0 %vm35_vm0, %v17623_v7 }
  0xf9   :  { %13668 = vmatmul.mubr.msk.f32.gmra.mrb[6].mxu0 %vm35_vm0, %v17629_v8 }
  0xfa   :  { %13670 = vmatprep.mubr.msk.f32.mxu0 %vm35_vm0, %v17631_v9 }
  0xfd   :  { %13671 = vmatmul.mubr.msk.f32.gmra.mrb[8].mxu0 %vm35_vm0, %v17637_v10 }
  0xfe   :  { %13673 = vmatprep.mubr.msk.f32.mxu0 %vm35_vm0, %v17639_v11 }
 0x101   :  { %13674 = vmatmul.mubr.msk.f32.gmra.mrb[10].mxu0 %vm35_vm0, %v17645_v12 }
 0x102   :  { %13676 = vmatprep.mubr.msk.f32.mxu0 %vm35_vm0, %v17647_v13 }
 0x105   :  { %13677 = vmatmul.mubr.msk.f32.gmra.mrb[12].mxu0 %vm35_vm0, %v17653_v14 }
 0x106   :  { %13679 = vmatprep.mubr.msk.f32.mxu0 %vm35_vm0, %v17655_v15 }
 0x109   :  { %13680 = vmatmul.mubr.msk.f32.gmra.mrb[14].mxu0 %vm35_vm0, %v17661_v16 }
 0x10a   :  { %13682 = vmatprep.mubr.msk.f32.mxu0 %vm35_vm0, %v17663_v17 }
 0x10d   :  { %13683 = vmatmul.mubr.msk.f32.gmra.mrb[16].mxu0 %vm35_vm0, %v17669_v18 }
 0x10e   :  { %13685 = vmatprep.mubr.msk.f32.mxu0 %vm35_vm0, %v17671_v19 }
 0x111   :  { %13686 = vmatmul.mubr.msk.f32.gmra.mrb[18].mxu0 %vm35_vm0, %v17677_v20 }
 0x112   :  { %13688 = vmatprep.mubr.msk.f32.mxu0 %vm35_vm0, %v17679_v21 }
 0x115   :  { %13689 = vmatmul.mubr.msk.f32.gmra.mrb[20].mxu0 %vm35_vm0, %v17685_v22 }
 0x116   :  { %13691 = vmatprep.mubr.msk.f32.mxu0 %vm35_vm0, %v17687_v23 }
 0x119   :  { %13692 = vmatmul.mubr.msk.f32.gmra.mrb[22].mxu0 %vm35_vm0, %v17693_v24 }
 0x11a   :  { %13694 = vmatprep.mubr.msk.f32.mxu0 %vm35_vm0, %v17695_v25 }
 0x11d   :  { %13695 = vmatmul.mubr.msk.f32.gmra.mrb[24].mxu0 %vm35_vm0, %v17701_v26 }
 0x11e   :  { %13697 = vmatprep.mubr.msk.f32.mxu0 %vm35_vm0, %v17703_v27 }
 0x121   :  { %13698 = vmatmul.mubr.msk.f32.gmra.mrb[26].mxu0 %vm35_vm0, %v17709_v28 }
 0x122   :  { %13700 = vmatprep.mubr.msk.f32.mxu0 %vm35_vm0, %v17711_v29 }
 0x125   :  { %13701 = vmatmul.mubr.msk.f32.gmra.mrb[28].mxu0 %vm35_vm0, %v17717_v30 }
 0x126   :  { %13703 = vmatprep.mubr.msk.f32.mxu0 %vm35_vm0, %v17719_v31 }
 0x129   :  { %13704 = vmatmul.mubr.msk.f32.gmra.mrb[30].mxu0 %vm35_vm0, %v17725_v32 }
 0x12a   :  { %13706 = vmatprep.mubr.msk.f32.mxu0 %vm35_vm0, %v369_v33  ;;  %v1630_v33 = vld [vmem:[#allocation2 + $0xa] sm:$0xff] }
 0x12d   :  { %13707 = vmatmul.mubr.msk.f32.gmra.mrb[32].mxu0 %vm35_vm0, %v370_v34  ;;  %v17852_v34 = vld [vmem:[#allocation2 + $0x1a] sm:$0xff] }
 0x12e   :  { %13709 = vmatprep.mubr.msk.f32.mxu0 %vm35_vm0, %v17730_v35  ;;  %20062 = vst [vmem:[#allocation14_spill] sm:$0xff] %v17852_v34 }
 0x131   :  { %13710 = vmatmul.mubr.msk.f32.gmra.mrb[34].mxu0 %vm35_vm0, %v17735_v36 }
 0x132   :  { %13712 = vmatprep.mubr.msk.f32.mxu0 %vm35_vm0, %v17737_v37 }
 0x135   :  { %13713 = vmatmul.mubr.msk.f32.gmra.mrb[36].mxu0 %vm35_vm0, %v17743_v38 }
 0x136   :  { %13715 = vmatprep.mubr.msk.f32.mxu0 %vm35_vm0, %v17745_v39 }
 0x139   :  { %13716 = vmatmul.mubr.msk.f32.gmra.mrb[38].mxu0 %vm35_vm0, %v17751_v40 }
 0x13a   :  { %13718 = vmatprep.mubr.msk.f32.mxu0 %vm35_vm0, %v17753_v41 }
 0x13d   :  { %13719 = vmatmul.mubr.msk.f32.gmra.mrb[40].mxu0 %vm35_vm0, %v17759_v42 }
 0x13e   :  { %13721 = vmatprep.mubr.msk.f32.mxu0 %vm35_vm0, %v17761_v43 }
 0x141   :  { %13722 = vmatmul.mubr.msk.f32.gmra.mrb[42].mxu0 %vm35_vm0, %v17767_v44 }
 0x142   :  { %13724 = vmatprep.mubr.msk.f32.mxu0 %vm35_vm0, %v17769_v45 }
 0x145   :  { %13725 = vmatmul.mubr.msk.f32.gmra.mrb[44].mxu0 %vm35_vm0, %v17775_v46 }
 0x146   :  { %13727 = vmatprep.mubr.msk.f32.mxu0 %vm35_vm0, %v17777_v47 }
 0x149   :  { %13728 = vmatmul.mubr.msk.f32.gmra.mrb[46].mxu0 %vm35_vm0, %v17783_v48 }
 0x14a   :  { %13730 = vmatprep.mubr.msk.f32.mxu0 %vm35_vm0, %v17785_v49 }
 0x14d   :  { %13731 = vmatmul.mubr.msk.f32.gmra.mrb[48].mxu0 %vm35_vm0, %v17791_v50 }
 0x14e   :  { %13733 = vmatprep.mubr.msk.f32.mxu0 %vm35_vm0, %v17793_v51 }
 0x151   :  { %13734 = vmatmul.mubr.msk.f32.gmra.mrb[50].mxu0 %vm35_vm0, %v17799_v52 }
 0x152   :  { %13736 = vmatprep.mubr.msk.f32.mxu0 %vm35_vm0, %v17801_v53 }
 0x155   :  { %13737 = vmatmul.mubr.msk.f32.gmra.mrb[52].mxu0 %vm35_vm0, %v17807_v54 }
 0x156   :  { %13739 = vmatprep.mubr.msk.f32.mxu0 %vm35_vm0, %v17809_v55 }
 0x159   :  { %13740 = vmatmul.mubr.msk.f32.gmra.mrb[54].mxu0 %vm35_vm0, %v17815_v56 }
 0x15a   :  { %13742 = vmatprep.mubr.msk.f32.mxu0 %vm35_vm0, %v17817_v57 }
 0x15d   :  { %13743 = vmatmul.mubr.msk.f32.gmra.mrb[56].mxu0 %vm35_vm0, %v17823_v58 }
 0x15e   :  { %13745 = vmatprep.mubr.msk.f32.mxu0 %vm35_vm0, %v17825_v59 }
 0x161   :  { %13746 = vmatmul.mubr.msk.f32.gmra.mrb[58].mxu0 %vm35_vm0, %v17831_v60 }
 0x162   :  { %13748 = vmatprep.mubr.msk.f32.mxu0 %vm35_vm0, %v17833_v61  ;;  %v17857_v61 = vld [vmem:[%s19894_s1 + $0x10] sm:$0xf] }
 0x165   :  { %13749 = vmatmul.mubr.msk.f32.gmra.mrb[60].mxu0 %vm35_vm0, %v17839_v62  ;;  %v1661_v62 = vld [vmem:[#allocation2 + $0x1b2] sm:$0xff] }
 0x166   :  { %13751 = vmatprep.mubr.msk.f32.mxu0 %vm35_vm0, %v17841_v63  ;;  %v17864_v63 = vld [vmem:[#allocation2 + $0x22] sm:$0xff] }
 0x167   :  { %20063 = vst [vmem:[#allocation15_spill] sm:$0xff] %v17864_v63 }
 0x169   :  { %13752 = vmatmul.mubr.msk.f32.gmra.mrb[62].mxu0 %vm35_vm0, %v17847_v0  ;;  %v17866_v0 = vld [vmem:[#allocation2 + $0x32] sm:$0xff] }
 0x16a   :  { %13756 = vmatprep.mubr.msk.f32.mxu0 %vm35_vm0, %v1629_v1  ;;  %20064 = vst [vmem:[#allocation16_spill] sm:$0xff] %v17866_v0  ;;  %v17874_v1 = vld [vmem:[#allocation2 + $0x3a] sm:$0xff] }
 0x16b   :  { %20065 = vst [vmem:[#allocation17_spill] sm:$0xff] %v17874_v1 }
 0x16d   :  { %13757 = vmatmul.mubr.msk.f32.vlgmr.msra.gmra.mrb[0].mxu0 %vm35_vm0, %v1630_v33  ;;  %v17876_v33 = vld [vmem:[#allocation2 + $0x4a] sm:$0xff] }
 0x16e   :  { %13853 = vmatpush3.msk.msra.mxu0 %vm660_vm3, %v17604_v3  ;;  %13759 = vmatprep.mubr.msk.f32.mxu0 %vm35_vm0, %v17852_v34  ;;  %20066 = vst [vmem:[#allocation18_spill] sm:$0xff] %v17876_v33  ;;  %v17882_v3 = vld [vmem:[#allocation2 + $0x52] sm:$0xff]  ;;  %v17884_v34 = vld [vmem:[#allocation2 + $0x62] sm:$0xff] }
 0x16f   :  { %13950 = vmatprep.subr.msk.mxu0 %vm660_vm3, %v17857_v61  ;;  %20067 = vst [vmem:[#allocation19_spill] sm:$0xff] %v17882_v3  ;;  %20068 = vst [vmem:[#allocation20_spill] sm:$0xff] %v17884_v34 }
 0x171   :  { %13760 = vmatmul.mubr.msk.f32.gmra.mrb[2].mxu0 %vm35_vm0, %v17864_v63  ;;  %v17892_v63 = vld [vmem:[#allocation2 + $0x7a] sm:$0xff] }
 0x172   :  { %13762 = vmatprep.mubr.msk.f32.mxu0 %vm35_vm0, %v17866_v0  ;;  %v17890_v0 = vld [vmem:[#allocation2 + $0x6a] sm:$0xff]  ;;  %20070 = vst [vmem:[#allocation22_spill] sm:$0xff] %v17892_v63 }
 0x173   :  { %20069 = vst [vmem:[#allocation21_spill] sm:$0xff] %v17890_v0 }
 0x175   :  { %13763 = vmatmul.mubr.msk.f32.gmra.mrb[4].mxu0 %vm35_vm0, %v17874_v1  ;;  %v17900_v1 = vld [vmem:[#allocation2 + $0x92] sm:$0xff] }
 0x176   :  { %13765 = vmatprep.mubr.msk.f32.mxu0 %vm35_vm0, %v17876_v33  ;;  %v17898_v33 = vld [vmem:[#allocation2 + $0x82] sm:$0xff]  ;;  %20072 = vst [vmem:[#allocation24_spill] sm:$0xff] %v17900_v1 }
 0x177   :  { %20071 = vst [vmem:[#allocation23_spill] sm:$0xff] %v17898_v33 }
 0x179   :  { %13766 = vmatmul.mubr.msk.f32.gmra.mrb[6].mxu0 %vm35_vm0, %v17882_v3  ;;  %v17908_v3 = vld [vmem:[#allocation2 + $0xaa] sm:$0xff] }
 0x17a   :  { %13768 = vmatprep.mubr.msk.f32.mxu0 %vm35_vm0, %v17884_v34  ;;  %v17906_v34 = vld [vmem:[#allocation2 + $0x9a] sm:$0xff]  ;;  %20074 = vst [vmem:[#allocation26_spill] sm:$0xff] %v17908_v3 }
 0x17b   :  { %20073 = vst [vmem:[#allocation25_spill] sm:$0xff] %v17906_v34 }
 0x17d   :  { %13769 = vmatmul.mubr.msk.f32.gmra.mrb[8].mxu0 %vm35_vm0, %v17890_v0  ;;  %v17916_v0 = vld [vmem:[#allocation2 + $0xc2] sm:$0xff] }
 0x17e   :  { %13771 = vmatprep.mubr.msk.f32.mxu0 %vm35_vm0, %v17892_v63  ;;  %v17914_v63 = vld [vmem:[#allocation2 + $0xb2] sm:$0xff]  ;;  %20076 = vst [vmem:[#allocation28_spill] sm:$0xff] %v17916_v0 }
 0x17f   :  { %20075 = vst [vmem:[#allocation27_spill] sm:$0xff] %v17914_v63 }
 0x181   :  { %13772 = vmatmul.mubr.msk.f32.gmra.mrb[10].mxu0 %vm35_vm0, %v17898_v33  ;;  %v17924_v33 = vld [vmem:[#allocation2 + $0xda] sm:$0xff] }
 0x182   :  { %13774 = vmatprep.mubr.msk.f32.mxu0 %vm35_vm0, %v17900_v1  ;;  %v17922_v1 = vld [vmem:[#allocation2 + $0xca] sm:$0xff]  ;;  %20078 = vst [vmem:[#allocation30_spill] sm:$0xff] %v17924_v33 }
 0x183   :  { %20077 = vst [vmem:[#allocation29_spill] sm:$0xff] %v17922_v1 }
 0x185   :  { %13775 = vmatmul.mubr.msk.f32.gmra.mrb[12].mxu0 %vm35_vm0, %v17906_v34  ;;  %v17932_v34 = vld [vmem:[#allocation2 + $0xf2] sm:$0xff] }
 0x186   :  { %13777 = vmatprep.mubr.msk.f32.mxu0 %vm35_vm0, %v17908_v3  ;;  %v17930_v3 = vld [vmem:[#allocation2 + $0xe2] sm:$0xff]  ;;  %20080 = vst [vmem:[#allocation32_spill] sm:$0xff] %v17932_v34 }
 0x187   :  { %20079 = vst [vmem:[#allocation31_spill] sm:$0xff] %v17930_v3 }
 0x189   :  { %13778 = vmatmul.mubr.msk.f32.gmra.mrb[14].mxu0 %vm35_vm0, %v17914_v63  ;;  %v17940_v63 = vld [vmem:[#allocation2 + $0x10a] sm:$0xff] }
 0x18a   :  { %13780 = vmatprep.mubr.msk.f32.mxu0 %vm35_vm0, %v17916_v0  ;;  %v17938_v0 = vld [vmem:[#allocation2 + $0xfa] sm:$0xff]  ;;  %20082 = vst [vmem:[#allocation34_spill] sm:$0xff] %v17940_v63 }
 0x18b   :  { %20081 = vst [vmem:[#allocation33_spill] sm:$0xff] %v17938_v0 }
 0x18d   :  { %13781 = vmatmul.mubr.msk.f32.gmra.mrb[16].mxu0 %vm35_vm0, %v17922_v1  ;;  %v17948_v1 = vld [vmem:[#allocation2 + $0x122] sm:$0xff] }
 0x18e   :  { %13783 = vmatprep.mubr.msk.f32.mxu0 %vm35_vm0, %v17924_v33  ;;  %v17946_v33 = vld [vmem:[#allocation2 + $0x112] sm:$0xff]  ;;  %20084 = vst [vmem:[#allocation36_spill] sm:$0xff] %v17948_v1 }
 0x18f   :  { %20083 = vst [vmem:[#allocation35_spill] sm:$0xff] %v17946_v33 }
 0x191   :  { %13784 = vmatmul.mubr.msk.f32.gmra.mrb[18].mxu0 %vm35_vm0, %v17930_v3  ;;  %v17956_v3 = vld [vmem:[#allocation2 + $0x13a] sm:$0xff] }
 0x192   :  { %13786 = vmatprep.mubr.msk.f32.mxu0 %vm35_vm0, %v17932_v34  ;;  %v17954_v34 = vld [vmem:[#allocation2 + $0x12a] sm:$0xff]  ;;  %20086 = vst [vmem:[#allocation38_spill] sm:$0xff] %v17956_v3 }
 0x193   :  { %20085 = vst [vmem:[#allocation37_spill] sm:$0xff] %v17954_v34 }
 0x195   :  { %13787 = vmatmul.mubr.msk.f32.gmra.mrb[20].mxu0 %vm35_vm0, %v17938_v0  ;;  %v17964_v0 = vld [vmem:[#allocation2 + $0x152] sm:$0xff] }
 0x196   :  { %13789 = vmatprep.mubr.msk.f32.mxu0 %vm35_vm0, %v17940_v63  ;;  %v17962_v63 = vld [vmem:[#allocation2 + $0x142] sm:$0xff]  ;;  %20088 = vst [vmem:[#allocation40_spill] sm:$0xff] %v17964_v0 }
 0x197   :  { %20087 = vst [vmem:[#allocation39_spill] sm:$0xff] %v17962_v63 }
 0x199   :  { %13790 = vmatmul.mubr.msk.f32.gmra.mrb[22].mxu0 %vm35_vm0, %v17946_v33  ;;  %v238_v33 = vld [vmem:[%s19893_s0 + $0xf0] sm:$0xff] }
 0x19a   :  { %13792 = vmatprep.mubr.msk.f32.mxu0 %vm35_vm0, %v17948_v1  ;;  %303 = vst.msk [vmem:[#allocation2 + $0x181] sm:$0xff] %vm35_vm0, %v238_v33  ;;  %v239_v1 = vld [vmem:[%s19893_s0 + $0xf8] sm:$0xff] }
 0x19b   :  { %304 = vst.msk [vmem:[#allocation2 + $0x189] sm:$0xff] %vm35_vm0, %v239_v1  ;;  %v17986_v33 = vld [vmem:[#allocation2 + $0x172] sm:$0xff]  ;;  %v1662_v1 = vld [vmem:[#allocation2 + $0x1ba] sm:$0xff] }
 0x19c   :  { %20090 = vst [vmem:[#allocation42_spill] sm:$0xff] %v17986_v33 }
 0x19d   :  { %13793 = vmatmul.mubr.msk.f32.gmra.mrb[24].mxu0 %vm35_vm0, %v17954_v34  ;;  %v17980_v34 = vld [vmem:[#allocation2 + $0x16a] sm:$0xff] }
 0x19e   :  { %13795 = vmatprep.mubr.msk.f32.mxu0 %vm35_vm0, %v17956_v3  ;;  %v17978_v3 = vld [vmem:[#allocation2 + $0x15a] sm:$0xff] }
 0x19f   :  { %20089 = vst [vmem:[#allocation41_spill] sm:$0xff] %v17978_v3 }
 0x1a1   :  { %13796 = vmatmul.mubr.msk.f32.gmra.mrb[26].mxu0 %vm35_vm0, %v17962_v63  ;;  %v17998_v63 = vld [vmem:[#allocation2 + $0x1e2] sm:$0xff] }
 0x1a2   :  { %13798 = vmatprep.mubr.msk.f32.mxu0 %vm35_vm0, %v17964_v0  ;;  %v17991_v0 = vld [vmem:[#allocation2 + $0x1ca] sm:$0xff]  ;;  %20093 = vst [vmem:[#allocation45_spill] sm:$0xff] %v17998_v63 }
 0x1a3   :  { %20091 = vst [vmem:[#allocation43_spill] sm:$0xff] %v17991_v0 }
 0x1a5   :  { %13799 = vmatmul.mubr.msk.f32.gmra.mrb[28].mxu0 %vm35_vm0, %v17978_v3  ;;  %v17996_v3 = vld [vmem:[#allocation2 + $0x1d2] sm:$0xff] }
 0x1a6   :  { %13801 = vmatprep.mubr.msk.f32.mxu0 %vm35_vm0, %v17980_v34  ;;  %20092 = vst [vmem:[#allocation44_spill] sm:$0xff] %v17996_v3 }
 0x1a9   :  { %13802 = vmatmul.mubr.msk.f32.gmra.mrb[30].mxu0 %vm35_vm0, %v17986_v33  ;;  %v18004_v33 = vld [vmem:[#allocation2 + $0x1ea] sm:$0xff] }
 0x1aa   :  { %13804 = vmatprep.mubr.msk.f32.mxu0 %vm35_vm0, %v1661_v62  ;;  %20094 = vst [vmem:[#allocation46_spill] sm:$0xff] %v18004_v33  ;;  %v18006_v62 = vld [vmem:[#allocation2 + $0x1fa] sm:$0xff] }
 0x1ab   :  { %20095 = vst [vmem:[#allocation47_spill] sm:$0xff] %v18006_v62 }
 0x1ad   :  { %13805 = vmatmul.mubr.msk.f32.gmra.mrb[32].mxu0 %vm35_vm0, %v1662_v1  ;;  %v18012_v1 = vld [vmem:[#allocation2 + $0x202] sm:$0xff] }
 0x1ae   :  { %13807 = vmatprep.mubr.msk.f32.mxu0 %vm35_vm0, %v17991_v0  ;;  %20096 = vst [vmem:[#allocation48_spill] sm:$0xff] %v18012_v1  ;;  %v18014_v0 = vld [vmem:[#allocation2 + $0x212] sm:$0xff] }
 0x1af   :  { %20097 = vst [vmem:[#allocation49_spill] sm:$0xff] %v18014_v0 }
 0x1b1   :  { %13808 = vmatmul.mubr.msk.f32.gmra.mrb[34].mxu0 %vm35_vm0, %v17996_v3  ;;  %v18022_v3 = vld [vmem:[#allocation2 + $0x22a] sm:$0xff] }
 0x1b2   :  { %13810 = vmatprep.mubr.msk.f32.mxu0 %vm35_vm0, %v17998_v63  ;;  %v18020_v63 = vld [vmem:[#allocation2 + $0x21a] sm:$0xff]  ;;  %20099 = vst [vmem:[#allocation51_spill] sm:$0xff] %v18022_v3 }
 0x1b3   :  { %20098 = vst [vmem:[#allocation50_spill] sm:$0xff] %v18020_v63 }
 0x1b5   :  { %13811 = vmatmul.mubr.msk.f32.gmra.mrb[36].mxu0 %vm35_vm0, %v18004_v33  ;;  %v18030_v33 = vld [vmem:[#allocation2 + $0x242] sm:$0xff] }
 0x1b6   :  { %13813 = vmatprep.mubr.msk.f32.mxu0 %vm35_vm0, %v18006_v62  ;;  %v18028_v62 = vld [vmem:[#allocation2 + $0x232] sm:$0xff]  ;;  %20101 = vst [vmem:[#allocation53_spill] sm:$0xff] %v18030_v33 }
 0x1b7   :  { %20100 = vst [vmem:[#allocation52_spill] sm:$0xff] %v18028_v62 }
 0x1b9   :  { %13814 = vmatmul.mubr.msk.f32.gmra.mrb[38].mxu0 %vm35_vm0, %v18012_v1  ;;  %v18038_v1 = vld [vmem:[#allocation2 + $0x25a] sm:$0xff] }
 0x1ba   :  { %13816 = vmatprep.mubr.msk.f32.mxu0 %vm35_vm0, %v18014_v0  ;;  %v18036_v0 = vld [vmem:[#allocation2 + $0x24a] sm:$0xff]  ;;  %20103 = vst [vmem:[#allocation55_spill] sm:$0xff] %v18038_v1 }
 0x1bb   :  { %20102 = vst [vmem:[#allocation54_spill] sm:$0xff] %v18036_v0 }
 0x1bd   :  { %13817 = vmatmul.mubr.msk.f32.gmra.mrb[40].mxu0 %vm35_vm0, %v18020_v63  ;;  %v18046_v63 = vld [vmem:[#allocation2 + $0x272] sm:$0xff] }
 0x1be   :  { %13819 = vmatprep.mubr.msk.f32.mxu0 %vm35_vm0, %v18022_v3  ;;  %v18044_v3 = vld [vmem:[#allocation2 + $0x262] sm:$0xff]  ;;  %20105 = vst [vmem:[#allocation57_spill] sm:$0xff] %v18046_v63 }
 0x1bf   :  { %20104 = vst [vmem:[#allocation56_spill] sm:$0xff] %v18044_v3 }
 0x1c1   :  { %13820 = vmatmul.mubr.msk.f32.gmra.mrb[42].mxu0 %vm35_vm0, %v18028_v62  ;;  %v18054_v62 = vld [vmem:[#allocation2 + $0x28a] sm:$0xff] }
 0x1c2   :  { %13822 = vmatprep.mubr.msk.f32.mxu0 %vm35_vm0, %v18030_v33  ;;  %v18052_v33 = vld [vmem:[#allocation2 + $0x27a] sm:$0xff]  ;;  %20107 = vst [vmem:[#allocation59_spill] sm:$0xff] %v18054_v62 }
 0x1c3   :  { %20106 = vst [vmem:[#allocation58_spill] sm:$0xff] %v18052_v33 }
 0x1c5   :  { %13823 = vmatmul.mubr.msk.f32.gmra.mrb[44].mxu0 %vm35_vm0, %v18036_v0  ;;  %v18062_v0 = vld [vmem:[#allocation2 + $0x2a2] sm:$0xff] }
 0x1c6   :  { %13825 = vmatprep.mubr.msk.f32.mxu0 %vm35_vm0, %v18038_v1  ;;  %v18060_v1 = vld [vmem:[#allocation2 + $0x292] sm:$0xff]  ;;  %20109 = vst [vmem:[#allocation61_spill] sm:$0xff] %v18062_v0 }
 0x1c7   :  { %20108 = vst [vmem:[#allocation60_spill] sm:$0xff] %v18060_v1 }
 0x1c9   :  { %13826 = vmatmul.mubr.msk.f32.gmra.mrb[46].mxu0 %vm35_vm0, %v18044_v3  ;;  %v18070_v3 = vld [vmem:[#allocation2 + $0x2ba] sm:$0xff] }
 0x1ca   :  { %13828 = vmatprep.mubr.msk.f32.mxu0 %vm35_vm0, %v18046_v63  ;;  %v18068_v63 = vld [vmem:[#allocation2 + $0x2aa] sm:$0xff]  ;;  %20111 = vst [vmem:[#allocation63_spill] sm:$0xff] %v18070_v3 }
 0x1cb   :  { %20110 = vst [vmem:[#allocation62_spill] sm:$0xff] %v18068_v63 }
 0x1cd   :  { %13829 = vmatmul.mubr.msk.f32.gmra.mrb[48].mxu0 %vm35_vm0, %v18052_v33  ;;  %v18078_v33 = vld [vmem:[#allocation2 + $0x2d2] sm:$0xff] }
 0x1ce   :  { %13831 = vmatprep.mubr.msk.f32.mxu0 %vm35_vm0, %v18054_v62  ;;  %v18076_v62 = vld [vmem:[#allocation2 + $0x2c2] sm:$0xff]  ;;  %20113 = vst [vmem:[#allocation65_spill] sm:$0xff] %v18078_v33 }
 0x1cf   :  { %20112 = vst [vmem:[#allocation64_spill] sm:$0xff] %v18076_v62 }
 0x1d1   :  { %13832 = vmatmul.mubr.msk.f32.gmra.mrb[50].mxu0 %vm35_vm0, %v18060_v1  ;;  %v18086_v1 = vld [vmem:[#allocation2 + $0x2ea] sm:$0xff] }
 0x1d2   :  { %13834 = vmatprep.mubr.msk.f32.mxu0 %vm35_vm0, %v18062_v0  ;;  %v18084_v0 = vld [vmem:[#allocation2 + $0x2da] sm:$0xff]  ;;  %20115 = vst [vmem:[#allocation67_spill] sm:$0xff] %v18086_v1 }
 0x1d3   :  { %20114 = vst [vmem:[#allocation66_spill] sm:$0xff] %v18084_v0 }
 0x1d5   :  { %13835 = vmatmul.mubr.msk.f32.gmra.mrb[52].mxu0 %vm35_vm0, %v18068_v63  ;;  %v18094_v63 = vld [vmem:[#allocation2 + $0x302] sm:$0xff] }
 0x1d6   :  { %13837 = vmatprep.mubr.msk.f32.mxu0 %vm35_vm0, %v18070_v3  ;;  %v18092_v3 = vld [vmem:[#allocation2 + $0x2f2] sm:$0xff] }
 0x1d9   :  { %13838 = vmatmul.mubr.msk.f32.gmra.mrb[54].mxu0 %vm35_vm0, %v18076_v62  ;;  %v270_v62 = vld [vmem:[%s19893_s0 + $0x1f0] sm:$0xff] }
 0x1da   :  { %13840 = vmatprep.mubr.msk.f32.mxu0 %vm35_vm0, %v18078_v33  ;;  %335 = vst.msk [vmem:[#allocation2 + $0x331] sm:$0xff] %vm35_vm0, %v270_v62  ;;  %v271_v33 = vld [vmem:[%s19893_s0 + $0x1f8] sm:$0xff]  ;;  %v18116_v62 = vld [vmem:[#allocation2 + $0x322] sm:$0xff] }
 0x1db   :  { %336 = vst.msk [vmem:[#allocation2 + $0x339] sm:$0xff] %vm35_vm0, %v271_v33  ;;  %v18125_v33 = vld [vmem:[%s19894_s1 + $0x14] sm:$0xf] }
 0x1dd   :  { %13841 = vmatmul.mubr.msk.f32.gmra.mrb[56].mxu0 %vm35_vm0, %v18084_v0  ;;  %v18110_v0 = vld [vmem:[#allocation2 + $0x31a] sm:$0xff] }
 0x1de   :  { %13843 = vmatprep.mubr.msk.f32.mxu0 %vm35_vm0, %v18086_v1  ;;  %v18108_v1 = vld [vmem:[#allocation2 + $0x30a] sm:$0xff] }
 0x1e1   :  { %13844 = vmatmul.mubr.msk.f32.gmra.mrb[58].mxu0 %vm35_vm0, %v18092_v3 }
 0x1e2   :  { %13846 = vmatprep.mubr.msk.f32.mxu0 %vm35_vm0, %v18094_v63 }
 0x1e5   :  { %13847 = vmatmul.mubr.msk.f32.gmra.mrb[60].mxu0 %vm35_vm0, %v18108_v1 }
 0x1e6   :  { %13849 = vmatprep.mubr.msk.f32.mxu0 %vm35_vm0, %v18110_v0 }
 0x1e9   :  { %13850 = vmatmul.mubr.msk.f32.gmra.mrb[62].mxu0 %vm35_vm0, %v18116_v62 }
 0x1ea   :  { %13854 = vmatprep.mubr.msk.f32.mxu0 %vm35_vm0, %v17599_v2  ;;  %v18187_v2 = vld [vmem:[#allocation2 + $0x180] sm:$0xff] }
 0x1ed   :  { %13855 = vmatmul.mubr.msk.f32.vlgmr.msra.gmra.mrb[0].mxu0 %vm35_vm0, %v17611_v4  ;;  %v18193_v4 = vld [vmem:[#allocation2 + $0x188] sm:$0xff] }
 0x1ee   :  { %13951 = vmatpush3.msk.msra.mxu0 %vm660_vm3, %v17857_v61  ;;  %13857 = vmatprep.mubr.msk.f32.mxu0 %vm35_vm0, %v17613_v5  ;;  %v20116_v5 = vld [vmem:[#allocation10_spill] sm:$0xff] }
 0x1ef   :  { %14048 = vmatprep.subr.msk.mxu0 %vm660_vm3, %v18125_v33  ;;  %v18450_v61 = vld [vmem:[#allocation2 + $0x279] sm:$0xff] }
 0x1f1   :  { %13858 = vmatmul.mubr.msk.f32.gmra.mrb[2].mxu0 %vm35_vm0, %v17621_v6  ;;  %v20117_v6 = vld [vmem:[#allocation11_spill] sm:$0xff] }
 0x1f2   :  { %13860 = vmatprep.mubr.msk.f32.mxu0 %vm35_vm0, %v17623_v7  ;;  %v20118_v7 = vld [vmem:[#allocation12_spill] sm:$0xff] }
 0x1f5   :  { %13861 = vmatmul.mubr.msk.f32.gmra.mrb[4].mxu0 %vm35_vm0, %v17629_v8  ;;  %v18255_v8 = vld [vmem:[#allocation2 + $0x330] sm:$0xff] }
 0x1f6   :  { %13863 = vmatprep.mubr.msk.f32.mxu0 %vm35_vm0, %v17631_v9  ;;  %v20119_v9 = vld [vmem:[#allocation13_spill] sm:$0xff] }
 0x1f9   :  { %13864 = vmatmul.mubr.msk.f32.gmra.mrb[6].mxu0 %vm35_vm0, %v17637_v10  ;;  %v18261_v10 = vld [vmem:[#allocation2 + $0x338] sm:$0xff] }
 0x1fa   :  { %13866 = vmatprep.mubr.msk.f32.mxu0 %vm35_vm0, %v17639_v11  ;;  %v3049_v11 = vld [vmem:[#allocation2 + $0x19] sm:$0xff] }
 0x1fd   :  { %13867 = vmatmul.mubr.msk.f32.gmra.mrb[8].mxu0 %vm35_vm0, %v17645_v12  ;;  %v3050_v12 = vld [vmem:[#allocation2 + $0x21] sm:$0xff] }
 0x1fe   :  { %13869 = vmatprep.mubr.msk.f32.mxu0 %vm35_vm0, %v17647_v13  ;;  %v18266_v13 = vld [vmem:[#allocation2 + $0x31] sm:$0xff] }
 0x201   :  { %13870 = vmatmul.mubr.msk.f32.gmra.mrb[10].mxu0 %vm35_vm0, %v17653_v14  ;;  %v18271_v14 = vld [vmem:[%s19894_s1 + $0x18] sm:$0xf] }
 0x202   :  { %13872 = vmatprep.mubr.msk.f32.mxu0 %vm35_vm0, %v17655_v15  ;;  %v18278_v15 = vld [vmem:[#allocation2 + $0x39] sm:$0xff] }
 0x205   :  { %13873 = vmatmul.mubr.msk.f32.gmra.mrb[12].mxu0 %vm35_vm0, %v17661_v16  ;;  %v18280_v16 = vld [vmem:[#allocation2 + $0x49] sm:$0xff] }
 0x206   :  { %13875 = vmatprep.mubr.msk.f32.mxu0 %vm35_vm0, %v17663_v17  ;;  %v18288_v17 = vld [vmem:[#allocation2 + $0x51] sm:$0xff] }
 0x209   :  { %13876 = vmatmul.mubr.msk.f32.gmra.mrb[14].mxu0 %vm35_vm0, %v17669_v18  ;;  %v18290_v18 = vld [vmem:[#allocation2 + $0x61] sm:$0xff] }
 0x20a   :  { %13878 = vmatprep.mubr.msk.f32.mxu0 %vm35_vm0, %v17671_v19  ;;  %v18296_v19 = vld [vmem:[#allocation2 + $0x69] sm:$0xff] }
 0x20d   :  { %13879 = vmatmul.mubr.msk.f32.gmra.mrb[16].mxu0 %vm35_vm0, %v17677_v20  ;;  %v18298_v20 = vld [vmem:[#allocation2 + $0x79] sm:$0xff] }
 0x20e   :  { %13881 = vmatprep.mubr.msk.f32.mxu0 %vm35_vm0, %v17679_v21  ;;  %v18304_v21 = vld [vmem:[#allocation2 + $0x81] sm:$0xff] }
 0x211   :  { %13882 = vmatmul.mubr.msk.f32.gmra.mrb[18].mxu0 %vm35_vm0, %v17685_v22  ;;  %v18306_v22 = vld [vmem:[#allocation2 + $0x91] sm:$0xff] }
 0x212   :  { %13884 = vmatprep.mubr.msk.f32.mxu0 %vm35_vm0, %v17687_v23  ;;  %v18312_v23 = vld [vmem:[#allocation2 + $0x99] sm:$0xff] }
 0x215   :  { %13885 = vmatmul.mubr.msk.f32.gmra.mrb[20].mxu0 %vm35_vm0, %v17693_v24  ;;  %v18314_v24 = vld [vmem:[#allocation2 + $0xa9] sm:$0xff] }
 0x216   :  { %13887 = vmatprep.mubr.msk.f32.mxu0 %vm35_vm0, %v17695_v25  ;;  %v18320_v25 = vld [vmem:[#allocation2 + $0xb1] sm:$0xff] }
 0x219   :  { %13888 = vmatmul.mubr.msk.f32.gmra.mrb[22].mxu0 %vm35_vm0, %v17701_v26  ;;  %v18322_v26 = vld [vmem:[#allocation2 + $0xc1] sm:$0xff] }
 0x21a   :  { %13890 = vmatprep.mubr.msk.f32.mxu0 %vm35_vm0, %v17703_v27  ;;  %v18328_v27 = vld [vmem:[#allocation2 + $0xc9] sm:$0xff] }
 0x21d   :  { %13891 = vmatmul.mubr.msk.f32.gmra.mrb[24].mxu0 %vm35_vm0, %v17709_v28  ;;  %v18330_v28 = vld [vmem:[#allocation2 + $0xd9] sm:$0xff] }
 0x21e   :  { %13893 = vmatprep.mubr.msk.f32.mxu0 %vm35_vm0, %v17711_v29  ;;  %v18336_v29 = vld [vmem:[#allocation2 + $0xe1] sm:$0xff] }
 0x221   :  { %13894 = vmatmul.mubr.msk.f32.gmra.mrb[26].mxu0 %vm35_vm0, %v17717_v30  ;;  %v18338_v30 = vld [vmem:[#allocation2 + $0xf1] sm:$0xff] }
 0x222   :  { %13896 = vmatprep.mubr.msk.f32.mxu0 %vm35_vm0, %v17719_v31  ;;  %v18344_v31 = vld [vmem:[#allocation2 + $0xf9] sm:$0xff] }
 0x225   :  { %13897 = vmatmul.mubr.msk.f32.gmra.mrb[28].mxu0 %vm35_vm0, %v17725_v32  ;;  %v18346_v32 = vld [vmem:[#allocation2 + $0x109] sm:$0xff] }
 0x226   :  { %13899 = vmatprep.mubr.msk.f32.mxu0 %vm35_vm0, %v18187_v2 }
 0x229   :  { %13900 = vmatmul.mubr.msk.f32.gmra.mrb[30].mxu0 %vm35_vm0, %v18193_v4 }
 0x22a   :  { %13902 = vmatprep.mubr.msk.f32.mxu0 %vm35_vm0, %v17730_v35  ;;  %v18352_v35 = vld [vmem:[#allocation2 + $0x111] sm:$0xff] }
 0x22d   :  { %13903 = vmatmul.mubr.msk.f32.gmra.mrb[32].mxu0 %vm35_vm0, %v17735_v36  ;;  %v18354_v36 = vld [vmem:[#allocation2 + $0x121] sm:$0xff] }
 0x22e   :  { %13905 = vmatprep.mubr.msk.f32.mxu0 %vm35_vm0, %v17737_v37  ;;  %v18360_v37 = vld [vmem:[#allocation2 + $0x129] sm:$0xff] }
 0x231   :  { %13906 = vmatmul.mubr.msk.f32.gmra.mrb[34].mxu0 %vm35_vm0, %v17743_v38  ;;  %v18362_v38 = vld [vmem:[#allocation2 + $0x139] sm:$0xff] }
 0x232   :  { %13908 = vmatprep.mubr.msk.f32.mxu0 %vm35_vm0, %v17745_v39  ;;  %v18368_v39 = vld [vmem:[#allocation2 + $0x141] sm:$0xff] }
 0x235   :  { %13909 = vmatmul.mubr.msk.f32.gmra.mrb[36].mxu0 %vm35_vm0, %v17751_v40  ;;  %v18370_v40 = vld [vmem:[#allocation2 + $0x151] sm:$0xff] }
 0x236   :  { %13911 = vmatprep.mubr.msk.f32.mxu0 %vm35_vm0, %v17753_v41  ;;  %v18376_v41 = vld [vmem:[#allocation2 + $0x159] sm:$0xff] }
 0x239   :  { %13912 = vmatmul.mubr.msk.f32.gmra.mrb[38].mxu0 %vm35_vm0, %v17759_v42  ;;  %v18378_v42 = vld [vmem:[#allocation2 + $0x169] sm:$0xff] }
 0x23a   :  { %13914 = vmatprep.mubr.msk.f32.mxu0 %vm35_vm0, %v17761_v43  ;;  %v18384_v43 = vld [vmem:[#allocation2 + $0x171] sm:$0xff] }
 0x23d   :  { %13915 = vmatmul.mubr.msk.f32.gmra.mrb[40].mxu0 %vm35_vm0, %v17767_v44  ;;  %v18386_v44 = vld [vmem:[#allocation2 + $0x181] sm:$0xff] }
 0x23e   :  { %13917 = vmatprep.mubr.msk.f32.mxu0 %vm35_vm0, %v17769_v45  ;;  %v18392_v45 = vld [vmem:[#allocation2 + $0x189] sm:$0xff] }
 0x241   :  { %13918 = vmatmul.mubr.msk.f32.gmra.mrb[42].mxu0 %vm35_vm0, %v17775_v46  ;;  %v3081_v46 = vld [vmem:[#allocation2 + $0x1c9] sm:$0xff] }
 0x242   :  { %13920 = vmatprep.mubr.msk.f32.mxu0 %vm35_vm0, %v17777_v47  ;;  %v3082_v47 = vld [vmem:[#allocation2 + $0x1d1] sm:$0xff] }
 0x245   :  { %13921 = vmatmul.mubr.msk.f32.gmra.mrb[44].mxu0 %vm35_vm0, %v17783_v48  ;;  %v18397_v48 = vld [vmem:[#allocation2 + $0x1e1] sm:$0xff] }
 0x246   :  { %13923 = vmatprep.mubr.msk.f32.mxu0 %vm35_vm0, %v17785_v49  ;;  %v18402_v49 = vld [vmem:[#allocation2 + $0x1e9] sm:$0xff] }
 0x249   :  { %13924 = vmatmul.mubr.msk.f32.gmra.mrb[46].mxu0 %vm35_vm0, %v17791_v50  ;;  %v18404_v50 = vld [vmem:[#allocation2 + $0x1f9] sm:$0xff] }
 0x24a   :  { %13926 = vmatprep.mubr.msk.f32.mxu0 %vm35_vm0, %v17793_v51  ;;  %v18410_v51 = vld [vmem:[#allocation2 + $0x201] sm:$0xff] }
 0x24d   :  { %13927 = vmatmul.mubr.msk.f32.gmra.mrb[48].mxu0 %vm35_vm0, %v17799_v52  ;;  %v18412_v52 = vld [vmem:[#allocation2 + $0x211] sm:$0xff] }
 0x24e   :  { %13929 = vmatprep.mubr.msk.f32.mxu0 %vm35_vm0, %v17801_v53  ;;  %v18418_v53 = vld [vmem:[#allocation2 + $0x219] sm:$0xff] }
 0x251   :  { %13930 = vmatmul.mubr.msk.f32.gmra.mrb[50].mxu0 %vm35_vm0, %v17807_v54  ;;  %v18420_v54 = vld [vmem:[#allocation2 + $0x229] sm:$0xff] }
 0x252   :  { %13932 = vmatprep.mubr.msk.f32.mxu0 %vm35_vm0, %v17809_v55  ;;  %v18426_v55 = vld [vmem:[#allocation2 + $0x231] sm:$0xff] }
 0x255   :  { %13933 = vmatmul.mubr.msk.f32.gmra.mrb[52].mxu0 %vm35_vm0, %v17815_v56  ;;  %v18428_v56 = vld [vmem:[#allocation2 + $0x241] sm:$0xff] }
 0x256   :  { %13935 = vmatprep.mubr.msk.f32.mxu0 %vm35_vm0, %v17817_v57  ;;  %v18434_v57 = vld [vmem:[#allocation2 + $0x249] sm:$0xff] }
 0x259   :  { %13936 = vmatmul.mubr.msk.f32.gmra.mrb[54].mxu0 %vm35_vm0, %v17823_v58  ;;  %v18436_v58 = vld [vmem:[#allocation2 + $0x259] sm:$0xff] }
 0x25a   :  { %13938 = vmatprep.mubr.msk.f32.mxu0 %vm35_vm0, %v17825_v59  ;;  %v18442_v59 = vld [vmem:[#allocation2 + $0x261] sm:$0xff] }
 0x25d   :  { %13939 = vmatmul.mubr.msk.f32.gmra.mrb[56].mxu0 %vm35_vm0, %v17831_v60  ;;  %v18444_v60 = vld [vmem:[#allocation2 + $0x271] sm:$0xff] }
 0x25e   :  { %13941 = vmatprep.mubr.msk.f32.mxu0 %vm35_vm0, %v20116_v5  ;;  %v18458_v5 = vld [vmem:[#allocation2 + $0x291] sm:$0xff] }
 0x25f   :  { %20120 = vst [vmem:[#allocation10_spill] sm:$0xff] %v18458_v5 }
 0x261   :  { %13942 = vmatmul.mubr.msk.f32.gmra.mrb[58].mxu0 %vm35_vm0, %v20117_v6  ;;  %v18460_v6 = vld [vmem:[#allocation2 + $0x2a1] sm:$0xff] }
 0x262   :  { %13944 = vmatprep.mubr.msk.f32.mxu0 %vm35_vm0, %v20118_v7  ;;  %20121 = vst [vmem:[#allocation11_spill] sm:$0xff] %v18460_v6  ;;  %v18466_v7 = vld [vmem:[#allocation2 + $0x2a9] sm:$0xff] }
 0x263   :  { %20122 = vst [vmem:[#allocation12_spill] sm:$0xff] %v18466_v7 }
 0x265   :  { %13945 = vmatmul.mubr.msk.f32.gmra.mrb[60].mxu0 %vm35_vm0, %v20119_v9  ;;  %v18468_v9 = vld [vmem:[#allocation2 + $0x2b9] sm:$0xff] }
 0x266   :  { %13947 = vmatprep.mubr.msk.f32.mxu0 %vm35_vm0, %v18255_v8  ;;  %20123 = vst [vmem:[#allocation13_spill] sm:$0xff] %v18468_v9 }
 0x269   :  { %13948 = vmatmul.mubr.msk.f32.gmra.mrb[62].mxu0 %vm35_vm0, %v18261_v10 }
 0x26a   :  { %13952 = vmatprep.mubr.msk.f32.mxu0 %vm35_vm0, %v3049_v11  ;;  %v18474_v11 = vld [vmem:[#allocation2 + $0x2c1] sm:$0xff] }
 0x26b   :  { %20124 = vst [vmem:[#allocation68_spill] sm:$0xff] %v18474_v11 }
 0x26d   :  { %13953 = vmatmul.mubr.msk.f32.vlgmr.msra.gmra.mrb[0].mxu0 %vm35_vm0, %v3050_v12  ;;  %v18476_v12 = vld [vmem:[#allocation2 + $0x2d1] sm:$0xff] }
 0x26e   :  { %14049 = vmatpush3.msk.msra.mxu0 %vm660_vm3, %v18125_v33  ;;  %13955 = vmatprep.mubr.msk.f32.mxu0 %vm35_vm0, %v18266_v13  ;;  %v18452_v33 = vld [vmem:[#allocation2 + $0x289] sm:$0xff]  ;;  %20125 = vst [vmem:[#allocation69_spill] sm:$0xff] %v18476_v12 }
 0x26f   :  { %14146 = vmatprep.subr.msk.mxu0 %vm660_vm3, %v18271_v14 }
 0x271   :  { %13956 = vmatmul.mubr.msk.f32.gmra.mrb[2].mxu0 %vm35_vm0, %v18278_v15 }
 0x272   :  { %13958 = vmatprep.mubr.msk.f32.mxu0 %vm35_vm0, %v18280_v16 }
 0x275   :  { %13959 = vmatmul.mubr.msk.f32.gmra.mrb[4].mxu0 %vm35_vm0, %v18288_v17 }
 0x276   :  { %13961 = vmatprep.mubr.msk.f32.mxu0 %vm35_vm0, %v18290_v18 }
 0x279   :  { %13962 = vmatmul.mubr.msk.f32.gmra.mrb[6].mxu0 %vm35_vm0, %v18296_v19 }
 0x27a   :  { %13964 = vmatprep.mubr.msk.f32.mxu0 %vm35_vm0, %v18298_v20 }
 0x27d   :  { %13965 = vmatmul.mubr.msk.f32.gmra.mrb[8].mxu0 %vm35_vm0, %v18304_v21 }
 0x27e   :  { %13967 = vmatprep.mubr.msk.f32.mxu0 %vm35_vm0, %v18306_v22 }
 0x281   :  { %13968 = vmatmul.mubr.msk.f32.gmra.mrb[10].mxu0 %vm35_vm0, %v18312_v23 }
 0x282   :  { %13970 = vmatprep.mubr.msk.f32.mxu0 %vm35_vm0, %v18314_v24 }
 0x285   :  { %13971 = vmatmul.mubr.msk.f32.gmra.mrb[12].mxu0 %vm35_vm0, %v18320_v25 }
 0x286   :  { %13973 = vmatprep.mubr.msk.f32.mxu0 %vm35_vm0, %v18322_v26 }
 0x289   :  { %13974 = vmatmul.mubr.msk.f32.gmra.mrb[14].mxu0 %vm35_vm0, %v18328_v27 }
 0x28a   :  { %13976 = vmatprep.mubr.msk.f32.mxu0 %vm35_vm0, %v18330_v28 }
 0x28d   :  { %13977 = vmatmul.mubr.msk.f32.gmra.mrb[16].mxu0 %vm35_vm0, %v18336_v29 }
 0x28e   :  { %13979 = vmatprep.mubr.msk.f32.mxu0 %vm35_vm0, %v18338_v30 }
 0x291   :  { %13980 = vmatmul.mubr.msk.f32.gmra.mrb[18].mxu0 %vm35_vm0, %v18344_v31 }
 0x292   :  { %13982 = vmatprep.mubr.msk.f32.mxu0 %vm35_vm0, %v18346_v32 }
 0x295   :  { %13983 = vmatmul.mubr.msk.f32.gmra.mrb[20].mxu0 %vm35_vm0, %v18352_v35 }
 0x296   :  { %13985 = vmatprep.mubr.msk.f32.mxu0 %vm35_vm0, %v18354_v36 }
 0x299   :  { %13986 = vmatmul.mubr.msk.f32.gmra.mrb[22].mxu0 %vm35_vm0, %v18360_v37 }
 0x29a   :  { %13988 = vmatprep.mubr.msk.f32.mxu0 %vm35_vm0, %v18362_v38 }
 0x29d   :  { %13989 = vmatmul.mubr.msk.f32.gmra.mrb[24].mxu0 %vm35_vm0, %v18368_v39 }
 0x29e   :  { %13991 = vmatprep.mubr.msk.f32.mxu0 %vm35_vm0, %v18370_v40 }
 0x2a1   :  { %13992 = vmatmul.mubr.msk.f32.gmra.mrb[26].mxu0 %vm35_vm0, %v18376_v41 }
 0x2a2   :  { %13994 = vmatprep.mubr.msk.f32.mxu0 %vm35_vm0, %v18378_v42 }
 0x2a5   :  { %13995 = vmatmul.mubr.msk.f32.gmra.mrb[28].mxu0 %vm35_vm0, %v18384_v43 }
 0x2a6   :  { %13997 = vmatprep.mubr.msk.f32.mxu0 %vm35_vm0, %v18386_v44 }
 0x2a9   :  { %13998 = vmatmul.mubr.msk.f32.gmra.mrb[30].mxu0 %vm35_vm0, %v18392_v45 }
 0x2aa   :  { %14000 = vmatprep.mubr.msk.f32.mxu0 %vm35_vm0, %v3081_v46  ;;  %v18482_v46 = vld [vmem:[#allocation2 + $0x2d9] sm:$0xff] }
 0x2ab   :  { %20126 = vst [vmem:[#allocation70_spill] sm:$0xff] %v18482_v46 }
 0x2ad   :  { %14001 = vmatmul.mubr.msk.f32.gmra.mrb[32].mxu0 %vm35_vm0, %v3082_v47  ;;  %v18484_v47 = vld [vmem:[#allocation2 + $0x2e9] sm:$0xff] }
 0x2ae   :  { %14003 = vmatprep.mubr.msk.f32.mxu0 %vm35_vm0, %v18397_v48  ;;  %20127 = vst [vmem:[#allocation71_spill] sm:$0xff] %v18484_v47 }
 0x2b1   :  { %14004 = vmatmul.mubr.msk.f32.gmra.mrb[34].mxu0 %vm35_vm0, %v18402_v49 }
 0x2b2   :  { %14006 = vmatprep.mubr.msk.f32.mxu0 %vm35_vm0, %v18404_v50 }
 0x2b5   :  { %14007 = vmatmul.mubr.msk.f32.gmra.mrb[36].mxu0 %vm35_vm0, %v18410_v51 }
 0x2b6   :  { %14009 = vmatprep.mubr.msk.f32.mxu0 %vm35_vm0, %v18412_v52 }
 0x2b9   :  { %14010 = vmatmul.mubr.msk.f32.gmra.mrb[38].mxu0 %vm35_vm0, %v18418_v53 }
 0x2ba   :  { %14012 = vmatprep.mubr.msk.f32.mxu0 %vm35_vm0, %v18420_v54 }
 0x2bd   :  { %14013 = vmatmul.mubr.msk.f32.gmra.mrb[40].mxu0 %vm35_vm0, %v18426_v55 }
 0x2be   :  { %14015 = vmatprep.mubr.msk.f32.mxu0 %vm35_vm0, %v18428_v56 }
 0x2c1   :  { %14016 = vmatmul.mubr.msk.f32.gmra.mrb[42].mxu0 %vm35_vm0, %v18434_v57 }
 0x2c2   :  { %14018 = vmatprep.mubr.msk.f32.mxu0 %vm35_vm0, %v18436_v58 }
 0x2c5   :  { %14019 = vmatmul.mubr.msk.f32.gmra.mrb[44].mxu0 %vm35_vm0, %v18442_v59 }
 0x2c6   :  { %14021 = vmatprep.mubr.msk.f32.mxu0 %vm35_vm0, %v18444_v60 }
 0x2c9   :  { %14022 = vmatmul.mubr.msk.f32.gmra.mrb[46].mxu0 %vm35_vm0, %v18450_v61 }
 0x2ca   :  { %14024 = vmatprep.mubr.msk.f32.mxu0 %vm35_vm0, %v18452_v33 }
 0x2cd   :  { %14025 = vmatmul.mubr.msk.f32.gmra.mrb[48].mxu0 %vm35_vm0, %v18458_v5  ;;  %v20145_v5 = vld [vmem:[#allocation24_spill] sm:$0xff] }
 0x2ce   :  { %14027 = vmatprep.mubr.msk.f32.mxu0 %vm35_vm0, %v18460_v6  ;;  %v20141_v6 = vld [vmem:[#allocation20_spill] sm:$0xff] }
 0x2d1   :  { %14028 = vmatmul.mubr.msk.f32.gmra.mrb[50].mxu0 %vm35_vm0, %v18466_v7  ;;  %v18492_v7 = vld [vmem:[#allocation2 + $0x301] sm:$0xff] }
 0x2d2   :  { %14030 = vmatprep.mubr.msk.f32.mxu0 %vm35_vm0, %v18468_v9  ;;  %v18490_v9 = vld [vmem:[#allocation2 + $0x2f1] sm:$0xff]  ;;  %20129 = vst [vmem:[#allocation73_spill] sm:$0xff] %v18492_v7 }
 0x2d3   :  { %20128 = vst [vmem:[#allocation72_spill] sm:$0xff] %v18490_v9 }
 0x2d5   :  { %14031 = vmatmul.mubr.msk.f32.gmra.mrb[52].mxu0 %vm35_vm0, %v18474_v11  ;;  %v18500_v11 = vld [vmem:[#allocation2 + $0x319] sm:$0xff] }
 0x2d6   :  { %14033 = vmatprep.mubr.msk.f32.mxu0 %vm35_vm0, %v18476_v12  ;;  %v18498_v12 = vld [vmem:[#allocation2 + $0x309] sm:$0xff]  ;;  %20131 = vst [vmem:[#allocation75_spill] sm:$0xff] %v18500_v11 }
 0x2d7   :  { %20130 = vst [vmem:[#allocation74_spill] sm:$0xff] %v18498_v12 }
 0x2d9   :  { %14034 = vmatmul.mubr.msk.f32.gmra.mrb[54].mxu0 %vm35_vm0, %v18482_v46  ;;  %v18508_v46 = vld [vmem:[#allocation2 + $0x331] sm:$0xff] }
 0x2da   :  { %14036 = vmatprep.mubr.msk.f32.mxu0 %vm35_vm0, %v18484_v47  ;;  %v18506_v47 = vld [vmem:[#allocation2 + $0x321] sm:$0xff]  ;;  %20133 = vst [vmem:[#allocation77_spill] sm:$0xff] %v18508_v46 }
 0x2db   :  { %20132 = vst [vmem:[#allocation76_spill] sm:$0xff] %v18506_v47 }
 0x2dd   :  { %14037 = vmatmul.mubr.msk.f32.gmra.mrb[56].mxu0 %vm35_vm0, %v18490_v9  ;;  %v20135_v9 = vld [vmem:[#allocation14_spill] sm:$0xff] }
 0x2de   :  { %14039 = vmatprep.mubr.msk.f32.mxu0 %vm35_vm0, %v18492_v7  ;;  %v18514_v7 = vld [vmem:[#allocation2 + $0x339] sm:$0xff] }
 0x2df   :  { %20134 = vst [vmem:[#allocation78_spill] sm:$0xff] %v18514_v7 }
 0x2e1   :  { %14040 = vmatmul.mubr.msk.f32.gmra.mrb[58].mxu0 %vm35_vm0, %v18498_v12  ;;  %v20136_v12 = vld [vmem:[#allocation15_spill] sm:$0xff] }
 0x2e2   :  { %14042 = vmatprep.mubr.msk.f32.mxu0 %vm35_vm0, %v18500_v11  ;;  %v18523_v11 = vld [vmem:[%s19894_s1 + $0x1c] sm:$0xf] }
 0x2e5   :  { %14043 = vmatmul.mubr.msk.f32.gmra.mrb[60].mxu0 %vm35_vm0, %v18506_v47  ;;  %v20140_v47 = vld [vmem:[#allocation19_spill] sm:$0xff] }
 0x2e6   :  { %14045 = vmatprep.mubr.msk.f32.mxu0 %vm35_vm0, %v18508_v46  ;;  %v20137_v46 = vld [vmem:[#allocation16_spill] sm:$0xff] }
 0x2e9   :  { %14046 = vmatmul.mubr.msk.f32.gmra.mrb[62].mxu0 %vm35_vm0, %v18514_v7  ;;  %v20138_v7 = vld [vmem:[#allocation17_spill] sm:$0xff] }
 0x2ea   :  { %14050 = vmatprep.mubr.msk.f32.mxu0 %vm35_vm0, %v20135_v9  ;;  %v20139_v9 = vld [vmem:[#allocation18_spill] sm:$0xff] }
 0x2ed   :  { %14051 = vmatmul.mubr.msk.f32.vlgmr.msra.gmra.mrb[0].mxu0 %vm35_vm0, %v20136_v12  ;;  %v20142_v12 = vld [vmem:[#allocation21_spill] sm:$0xff] }
 0x2ee   :  { %14147 = vmatpush3.msk.msra.mxu0 %vm660_vm3, %v18271_v14  ;;  %14053 = vmatprep.mubr.msk.f32.mxu0 %vm35_vm0, %v20137_v46  ;;  %v20143_v14 = vld [vmem:[#allocation22_spill] sm:$0xff]  ;;  %v20144_v46 = vld [vmem:[#allocation23_spill] sm:$0xff] }
 0x2ef   :  { %14244 = vmatprep.subr.msk.mxu0 %vm660_vm3, %v18523_v11 }
 0x2f1   :  { %14054 = vmatmul.mubr.msk.f32.gmra.mrb[2].mxu0 %vm35_vm0, %v20138_v7  ;;  %v20146_v7 = vld [vmem:[#allocation25_spill] sm:$0xff] }
 0x2f2   :  { %14056 = vmatprep.mubr.msk.f32.mxu0 %vm35_vm0, %v20139_v9  ;;  %v20147_v9 = vld [vmem:[#allocation26_spill] sm:$0xff] }
 0x2f5   :  { %14057 = vmatmul.mubr.msk.f32.gmra.mrb[4].mxu0 %vm35_vm0, %v20140_v47  ;;  %v20148_v47 = vld [vmem:[#allocation27_spill] sm:$0xff] }
 0x2f6   :  { %14059 = vmatprep.mubr.msk.f32.mxu0 %vm35_vm0, %v20141_v6  ;;  %v20149_v6 = vld [vmem:[#allocation28_spill] sm:$0xff] }
 0x2f9   :  { %14060 = vmatmul.mubr.msk.f32.gmra.mrb[6].mxu0 %vm35_vm0, %v20142_v12  ;;  %v20150_v12 = vld [vmem:[#allocation29_spill] sm:$0xff] }
 0x2fa   :  { %14062 = vmatprep.mubr.msk.f32.mxu0 %vm35_vm0, %v20143_v14  ;;  %v20151_v14 = vld [vmem:[#allocation30_spill] sm:$0xff] }
 0x2fd   :  { %14063 = vmatmul.mubr.msk.f32.gmra.mrb[8].mxu0 %vm35_vm0, %v20144_v46  ;;  %v20152_v46 = vld [vmem:[#allocation31_spill] sm:$0xff] }
 0x2fe   :  { %14065 = vmatprep.mubr.msk.f32.mxu0 %vm35_vm0, %v20145_v5  ;;  %v20153_v5 = vld [vmem:[#allocation32_spill] sm:$0xff] }
 0x301   :  { %14066 = vmatmul.mubr.msk.f32.gmra.mrb[10].mxu0 %vm35_vm0, %v20146_v7  ;;  %v20154_v7 = vld [vmem:[#allocation33_spill] sm:$0xff] }
 0x302   :  { %14068 = vmatprep.mubr.msk.f32.mxu0 %vm35_vm0, %v20147_v9  ;;  %v20155_v9 = vld [vmem:[#allocation34_spill] sm:$0xff] }
 0x305   :  { %14069 = vmatmul.mubr.msk.f32.gmra.mrb[12].mxu0 %vm35_vm0, %v20148_v47  ;;  %v20156_v47 = vld [vmem:[#allocation35_spill] sm:$0xff] }
 0x306   :  { %14071 = vmatprep.mubr.msk.f32.mxu0 %vm35_vm0, %v20149_v6  ;;  %v20157_v6 = vld [vmem:[#allocation36_spill] sm:$0xff] }
 0x309   :  { %14072 = vmatmul.mubr.msk.f32.gmra.mrb[14].mxu0 %vm35_vm0, %v20150_v12  ;;  %v20158_v12 = vld [vmem:[#allocation37_spill] sm:$0xff] }
 0x30a   :  { %14074 = vmatprep.mubr.msk.f32.mxu0 %vm35_vm0, %v20151_v14  ;;  %v20159_v14 = vld [vmem:[#allocation38_spill] sm:$0xff] }
 0x30d   :  { %14075 = vmatmul.mubr.msk.f32.gmra.mrb[16].mxu0 %vm35_vm0, %v20152_v46  ;;  %v20160_v46 = vld [vmem:[#allocation39_spill] sm:$0xff] }
 0x30e   :  { %14077 = vmatprep.mubr.msk.f32.mxu0 %vm35_vm0, %v20153_v5  ;;  %v20161_v5 = vld [vmem:[#allocation40_spill] sm:$0xff] }
 0x311   :  { %14078 = vmatmul.mubr.msk.f32.gmra.mrb[18].mxu0 %vm35_vm0, %v20154_v7  ;;  %v20162_v7 = vld [vmem:[#allocation41_spill] sm:$0xff] }
 0x312   :  { %14080 = vmatprep.mubr.msk.f32.mxu0 %vm35_vm0, %v20155_v9  ;;  %v18585_v9 = vld [vmem:[#allocation2 + $0x182] sm:$0xff] }
 0x315   :  { %14081 = vmatmul.mubr.msk.f32.gmra.mrb[20].mxu0 %vm35_vm0, %v20156_v47  ;;  %v20163_v47 = vld [vmem:[#allocation42_spill] sm:$0xff] }
 0x316   :  { %14083 = vmatprep.mubr.msk.f32.mxu0 %vm35_vm0, %v20157_v6  ;;  %v18591_v6 = vld [vmem:[#allocation2 + $0x18a] sm:$0xff] }
 0x317   :  { %20164 = vst [vmem:[#allocation14_spill] sm:$0xff] %v18591_v6 }
 0x319   :  { %14084 = vmatmul.mubr.msk.f32.gmra.mrb[22].mxu0 %vm35_vm0, %v20158_v12  ;;  %v20165_v12 = vld [vmem:[#allocation43_spill] sm:$0xff] }
 0x31a   :  { %14086 = vmatprep.mubr.msk.f32.mxu0 %vm35_vm0, %v20159_v14  ;;  %v20166_v14 = vld [vmem:[#allocation44_spill] sm:$0xff] }
 0x31d   :  { %14087 = vmatmul.mubr.msk.f32.gmra.mrb[24].mxu0 %vm35_vm0, %v20160_v46  ;;  %v20168_v46 = vld [vmem:[#allocation46_spill] sm:$0xff] }
 0x31e   :  { %14089 = vmatprep.mubr.msk.f32.mxu0 %vm35_vm0, %v20161_v5  ;;  %v20169_v5 = vld [vmem:[#allocation47_spill] sm:$0xff] }
 0x321   :  { %14090 = vmatmul.mubr.msk.f32.gmra.mrb[26].mxu0 %vm35_vm0, %v20162_v7  ;;  %v20170_v7 = vld [vmem:[#allocation48_spill] sm:$0xff] }
 0x322   :  { %14092 = vmatprep.mubr.msk.f32.mxu0 %vm35_vm0, %v17980_v34  ;;  %v20167_v34 = vld [vmem:[#allocation45_spill] sm:$0xff] }
 0x325   :  { %14093 = vmatmul.mubr.msk.f32.gmra.mrb[28].mxu0 %vm35_vm0, %v20163_v47  ;;  %v20171_v47 = vld [vmem:[#allocation49_spill] sm:$0xff] }
 0x326   :  { %14095 = vmatprep.mubr.msk.f32.mxu0 %vm35_vm0, %v18585_v9 }
 0x329   :  { %14096 = vmatmul.mubr.msk.f32.gmra.mrb[30].mxu0 %vm35_vm0, %v18591_v6  ;;  %v20172_v6 = vld [vmem:[#allocation50_spill] sm:$0xff] }
 0x32a   :  { %14098 = vmatprep.mubr.msk.f32.mxu0 %vm35_vm0, %v20165_v12  ;;  %v20173_v12 = vld [vmem:[#allocation51_spill] sm:$0xff] }
 0x32d   :  { %14099 = vmatmul.mubr.msk.f32.gmra.mrb[32].mxu0 %vm35_vm0, %v20166_v14  ;;  %v20174_v14 = vld [vmem:[#allocation52_spill] sm:$0xff] }
 0x32e   :  { %14101 = vmatprep.mubr.msk.f32.mxu0 %vm35_vm0, %v20167_v34  ;;  %v20175_v34 = vld [vmem:[#allocation53_spill] sm:$0xff] }
 0x331   :  { %14102 = vmatmul.mubr.msk.f32.gmra.mrb[34].mxu0 %vm35_vm0, %v20168_v46  ;;  %v20176_v46 = vld [vmem:[#allocation54_spill] sm:$0xff] }
 0x332   :  { %14104 = vmatprep.mubr.msk.f32.mxu0 %vm35_vm0, %v20169_v5  ;;  %v20177_v5 = vld [vmem:[#allocation55_spill] sm:$0xff] }
 0x335   :  { %14105 = vmatmul.mubr.msk.f32.gmra.mrb[36].mxu0 %vm35_vm0, %v20170_v7  ;;  %v20178_v7 = vld [vmem:[#allocation56_spill] sm:$0xff] }
 0x336   :  { %14107 = vmatprep.mubr.msk.f32.mxu0 %vm35_vm0, %v20171_v47  ;;  %v20179_v47 = vld [vmem:[#allocation57_spill] sm:$0xff] }
 0x339   :  { %14108 = vmatmul.mubr.msk.f32.gmra.mrb[38].mxu0 %vm35_vm0, %v20172_v6  ;;  %v20180_v6 = vld [vmem:[#allocation58_spill] sm:$0xff] }
 0x33a   :  { %14110 = vmatprep.mubr.msk.f32.mxu0 %vm35_vm0, %v20173_v12  ;;  %v20181_v12 = vld [vmem:[#allocation59_spill] sm:$0xff] }
 0x33d   :  { %14111 = vmatmul.mubr.msk.f32.gmra.mrb[40].mxu0 %vm35_vm0, %v20174_v14  ;;  %v20182_v14 = vld [vmem:[#allocation60_spill] sm:$0xff] }
 0x33e   :  { %14113 = vmatprep.mubr.msk.f32.mxu0 %vm35_vm0, %v20175_v34  ;;  %v20183_v34 = vld [vmem:[#allocation61_spill] sm:$0xff] }
 0x341   :  { %14114 = vmatmul.mubr.msk.f32.gmra.mrb[42].mxu0 %vm35_vm0, %v20176_v46  ;;  %v20184_v46 = vld [vmem:[#allocation62_spill] sm:$0xff] }
 0x342   :  { %14116 = vmatprep.mubr.msk.f32.mxu0 %vm35_vm0, %v20177_v5  ;;  %v20185_v5 = vld [vmem:[#allocation63_spill] sm:$0xff] }
 0x345   :  { %14117 = vmatmul.mubr.msk.f32.gmra.mrb[44].mxu0 %vm35_vm0, %v20178_v7  ;;  %v20186_v7 = vld [vmem:[#allocation64_spill] sm:$0xff] }
 0x346   :  { %14119 = vmatprep.mubr.msk.f32.mxu0 %vm35_vm0, %v20179_v47  ;;  %v20187_v47 = vld [vmem:[#allocation65_spill] sm:$0xff] }
 0x349   :  { %14120 = vmatmul.mubr.msk.f32.gmra.mrb[46].mxu0 %vm35_vm0, %v20180_v6  ;;  %v20188_v6 = vld [vmem:[#allocation66_spill] sm:$0xff] }
 0x34a   :  { %14122 = vmatprep.mubr.msk.f32.mxu0 %vm35_vm0, %v20181_v12  ;;  %v20189_v12 = vld [vmem:[#allocation67_spill] sm:$0xff] }
 0x34d   :  { %14123 = vmatmul.mubr.msk.f32.gmra.mrb[48].mxu0 %vm35_vm0, %v20182_v14  ;;  %v18653_v14 = vld [vmem:[#allocation2 + $0x332] sm:$0xff] }
 0x34e   :  { %14125 = vmatprep.mubr.msk.f32.mxu0 %vm35_vm0, %v20183_v34  ;;  %v18659_v34 = vld [vmem:[#allocation2 + $0x33a] sm:$0xff] }
 0x351   :  { %14126 = vmatmul.mubr.msk.f32.gmra.mrb[50].mxu0 %vm35_vm0, %v20184_v46  ;;  %v4474_v46 = vld [vmem:[#allocation2 + $0x60] sm:$0xff] }
 0x352   :  { %14128 = vmatprep.mubr.msk.f32.mxu0 %vm35_vm0, %v20185_v5  ;;  %v4475_v5 = vld [vmem:[#allocation2 + $0x68] sm:$0xff] }
 0x355   :  { %14129 = vmatmul.mubr.msk.f32.gmra.mrb[52].mxu0 %vm35_vm0, %v20186_v7  ;;  %v4476_v7 = vld [vmem:[#allocation2 + $0x78] sm:$0xff] }
 0x356   :  { %14131 = vmatprep.mubr.msk.f32.mxu0 %vm35_vm0, %v20187_v47  ;;  %v4477_v47 = vld [vmem:[#allocation2 + $0x80] sm:$0xff] }
 0x359   :  { %14132 = vmatmul.mubr.msk.f32.gmra.mrb[54].mxu0 %vm35_vm0, %v20188_v6  ;;  %v4478_v6 = vld [vmem:[#allocation2 + $0x90] sm:$0xff] }
 0x35a   :  { %14134 = vmatprep.mubr.msk.f32.mxu0 %vm35_vm0, %v20189_v12  ;;  %v4480_v12 = vld [vmem:[#allocation2 + $0xa8] sm:$0xff] }
 0x35d   :  { %14135 = vmatmul.mubr.msk.f32.gmra.mrb[56].mxu0 %vm35_vm0, %v18092_v3  ;;  %v4470_v3 = vld [vmem:[#allocation2 + $0x30] sm:$0xff] }
 0x35e   :  { %14137 = vmatprep.mubr.msk.f32.mxu0 %vm35_vm0, %v18094_v63  ;;  %v4471_v63 = vld [vmem:[#allocation2 + $0x38] sm:$0xff] }
 0x361   :  { %14138 = vmatmul.mubr.msk.f32.gmra.mrb[58].mxu0 %vm35_vm0, %v18108_v1  ;;  %v4472_v1 = vld [vmem:[#allocation2 + $0x48] sm:$0xff] }
 0x362   :  { %14140 = vmatprep.mubr.msk.f32.mxu0 %vm35_vm0, %v18110_v0  ;;  %v18667_v0 = vld [vmem:[%s19894_s1 + $0x20] sm:$0xf] }
 0x365   :  { %14141 = vmatmul.mubr.msk.f32.gmra.mrb[60].mxu0 %vm35_vm0, %v18116_v62  ;;  %v4473_v62 = vld [vmem:[#allocation2 + $0x50] sm:$0xff] }
 0x366   :  { %14143 = vmatprep.mubr.msk.f32.mxu0 %vm35_vm0, %v18653_v14 }
 0x369   :  { %14144 = vmatmul.mubr.msk.f32.gmra.mrb[62].mxu0 %vm35_vm0, %v18659_v34 }
 0x36a   :  { %14148 = vmatprep.mubr.msk.f32.mxu0 %vm35_vm0, %v4470_v3  ;;  %v4481_v3 = vld [vmem:[#allocation2 + $0xb0] sm:$0xff] }
 0x36d   :  { %14149 = vmatmul.mubr.msk.f32.vlgmr.msra.gmra.mrb[0].mxu0 %vm35_vm0, %v4471_v63  ;;  %v4482_v63 = vld [vmem:[#allocation2 + $0xc0] sm:$0xff] }
 0x36e   :  { %14245 = vmatpush3.msk.msra.mxu0 %vm660_vm3, %v18523_v11  ;;  %14151 = vmatprep.mubr.msk.f32.mxu0 %vm35_vm0, %v4472_v1  ;;  %v4479_v11 = vld [vmem:[#allocation2 + $0x98] sm:$0xff]  ;;  %v4483_v1 = vld [vmem:[#allocation2 + $0xc8] sm:$0xff] }
 0x36f   :  { %14342 = vmatprep.subr.msk.mxu0 %vm660_vm3, %v18667_v0 }
 0x371   :  { %14152 = vmatmul.mubr.msk.f32.gmra.mrb[2].mxu0 %vm35_vm0, %v4473_v62  ;;  %v4484_v62 = vld [vmem:[#allocation2 + $0xd8] sm:$0xff] }
 0x372   :  { %14154 = vmatprep.mubr.msk.f32.mxu0 %vm35_vm0, %v4474_v46  ;;  %v4485_v46 = vld [vmem:[#allocation2 + $0xe0] sm:$0xff] }
 0x375   :  { %14155 = vmatmul.mubr.msk.f32.gmra.mrb[4].mxu0 %vm35_vm0, %v4475_v5  ;;  %v4486_v5 = vld [vmem:[#allocation2 + $0xf0] sm:$0xff] }
 0x376   :  { %14157 = vmatprep.mubr.msk.f32.mxu0 %vm35_vm0, %v4476_v7  ;;  %v4487_v7 = vld [vmem:[#allocation2 + $0xf8] sm:$0xff] }
 0x379   :  { %14158 = vmatmul.mubr.msk.f32.gmra.mrb[6].mxu0 %vm35_vm0, %v4477_v47  ;;  %v4488_v47 = vld [vmem:[#allocation2 + $0x108] sm:$0xff] }
 0x37a   :  { %14160 = vmatprep.mubr.msk.f32.mxu0 %vm35_vm0, %v4478_v6  ;;  %v4489_v6 = vld [vmem:[#allocation2 + $0x110] sm:$0xff] }
 0x37d   :  { %14161 = vmatmul.mubr.msk.f32.gmra.mrb[8].mxu0 %vm35_vm0, %v4479_v11  ;;  %v4490_v11 = vld [vmem:[#allocation2 + $0x120] sm:$0xff] }
 0x37e   :  { %14163 = vmatprep.mubr.msk.f32.mxu0 %vm35_vm0, %v4480_v12  ;;  %v4491_v12 = vld [vmem:[#allocation2 + $0x128] sm:$0xff] }
 0x381   :  { %14164 = vmatmul.mubr.msk.f32.gmra.mrb[10].mxu0 %vm35_vm0, %v4481_v3  ;;  %v4492_v3 = vld [vmem:[#allocation2 + $0x138] sm:$0xff] }
 0x382   :  { %14166 = vmatprep.mubr.msk.f32.mxu0 %vm35_vm0, %v4482_v63  ;;  %v4493_v63 = vld [vmem:[#allocation2 + $0x140] sm:$0xff] }
 0x385   :  { %14167 = vmatmul.mubr.msk.f32.gmra.mrb[12].mxu0 %vm35_vm0, %v4483_v1  ;;  %v4494_v1 = vld [vmem:[#allocation2 + $0x150] sm:$0xff] }
 0x386   :  { %14169 = vmatprep.mubr.msk.f32.mxu0 %vm35_vm0, %v4484_v62  ;;  %v4495_v62 = vld [vmem:[#allocation2 + $0x158] sm:$0xff] }
 0x389   :  { %14170 = vmatmul.mubr.msk.f32.gmra.mrb[14].mxu0 %vm35_vm0, %v4485_v46  ;;  %v4496_v46 = vld [vmem:[#allocation2 + $0x168] sm:$0xff] }
 0x38a   :  { %14172 = vmatprep.mubr.msk.f32.mxu0 %vm35_vm0, %v4486_v5  ;;  %v4497_v5 = vld [vmem:[#allocation2 + $0x170] sm:$0xff] }
 0x38d   :  { %14173 = vmatmul.mubr.msk.f32.gmra.mrb[16].mxu0 %vm35_vm0, %v4487_v7  ;;  %v4500_v7 = vld [vmem:[#allocation2 + $0x198] sm:$0xff] }
 0x38e   :  { %14175 = vmatprep.mubr.msk.f32.mxu0 %vm35_vm0, %v4488_v47  ;;  %v4501_v47 = vld [vmem:[#allocation2 + $0x1a0] sm:$0xff] }
 0x391   :  { %14176 = vmatmul.mubr.msk.f32.gmra.mrb[18].mxu0 %vm35_vm0, %v4489_v6  ;;  %v4502_v6 = vld [vmem:[#allocation2 + $0x1e0] sm:$0xff] }
 0x392   :  { %14178 = vmatprep.mubr.msk.f32.mxu0 %vm35_vm0, %v4490_v11  ;;  %v4503_v11 = vld [vmem:[#allocation2 + $0x1e8] sm:$0xff] }
 0x395   :  { %14179 = vmatmul.mubr.msk.f32.gmra.mrb[20].mxu0 %vm35_vm0, %v4491_v12  ;;  %v4504_v12 = vld [vmem:[#allocation2 + $0x1f8] sm:$0xff] }
 0x396   :  { %14181 = vmatprep.mubr.msk.f32.mxu0 %vm35_vm0, %v4492_v3  ;;  %v4505_v3 = vld [vmem:[#allocation2 + $0x200] sm:$0xff] }
 0x399   :  { %14182 = vmatmul.mubr.msk.f32.gmra.mrb[22].mxu0 %vm35_vm0, %v4493_v63  ;;  %v4508_v63 = vld [vmem:[#allocation2 + $0x228] sm:$0xff] }
 0x39a   :  { %14184 = vmatprep.mubr.msk.f32.mxu0 %vm35_vm0, %v4494_v1  ;;  %v4509_v1 = vld [vmem:[#allocation2 + $0x230] sm:$0xff] }
 0x39d   :  { %14185 = vmatmul.mubr.msk.f32.gmra.mrb[24].mxu0 %vm35_vm0, %v4495_v62  ;;  %v4510_v62 = vld [vmem:[#allocation2 + $0x240] sm:$0xff] }
 0x39e   :  { %14187 = vmatprep.mubr.msk.f32.mxu0 %vm35_vm0, %v4496_v46  ;;  %v4511_v46 = vld [vmem:[#allocation2 + $0x248] sm:$0xff] }
 0x3a1   :  { %14188 = vmatmul.mubr.msk.f32.gmra.mrb[26].mxu0 %vm35_vm0, %v4497_v5  ;;  %v4512_v5 = vld [vmem:[#allocation2 + $0x258] sm:$0xff] }
 0x3a2   :  { %14190 = vmatprep.mubr.msk.f32.mxu0 %vm35_vm0, %v18187_v2  ;;  %v4506_v2 = vld [vmem:[#allocation2 + $0x210] sm:$0xff] }
 0x3a5   :  { %14191 = vmatmul.mubr.msk.f32.gmra.mrb[28].mxu0 %vm35_vm0, %v18193_v4  ;;  %v4507_v4 = vld [vmem:[#allocation2 + $0x218] sm:$0xff] }
 0x3a6   :  { %14193 = vmatprep.mubr.msk.f32.mxu0 %vm35_vm0, %v4500_v7  ;;  %v4513_v7 = vld [vmem:[#allocation2 + $0x260] sm:$0xff] }
 0x3a9   :  { %14194 = vmatmul.mubr.msk.f32.gmra.mrb[30].mxu0 %vm35_vm0, %v4501_v47  ;;  %v4514_v47 = vld [vmem:[#allocation2 + $0x270] sm:$0xff] }
 0x3aa   :  { %14196 = vmatprep.mubr.msk.f32.mxu0 %vm35_vm0, %v4502_v6  ;;  %v4515_v6 = vld [vmem:[#allocation2 + $0x278] sm:$0xff] }
 0x3ad   :  { %14197 = vmatmul.mubr.msk.f32.gmra.mrb[32].mxu0 %vm35_vm0, %v4503_v11  ;;  %v4516_v11 = vld [vmem:[#allocation2 + $0x288] sm:$0xff] }
 0x3ae   :  { %14199 = vmatprep.mubr.msk.f32.mxu0 %vm35_vm0, %v4504_v12  ;;  %v4517_v12 = vld [vmem:[#allocation2 + $0x290] sm:$0xff] }
 0x3b1   :  { %14200 = vmatmul.mubr.msk.f32.gmra.mrb[34].mxu0 %vm35_vm0, %v4505_v3  ;;  %v4518_v3 = vld [vmem:[#allocation2 + $0x2a0] sm:$0xff] }
 0x3b2   :  { %14202 = vmatprep.mubr.msk.f32.mxu0 %vm35_vm0, %v4506_v2  ;;  %v4519_v2 = vld [vmem:[#allocation2 + $0x2a8] sm:$0xff] }
 0x3b5   :  { %14203 = vmatmul.mubr.msk.f32.gmra.mrb[36].mxu0 %vm35_vm0, %v4507_v4  ;;  %v4520_v4 = vld [vmem:[#allocation2 + $0x2b8] sm:$0xff] }
 0x3b6   :  { %14205 = vmatprep.mubr.msk.f32.mxu0 %vm35_vm0, %v4508_v63  ;;  %v4521_v63 = vld [vmem:[#allocation2 + $0x2c0] sm:$0xff] }
 0x3b9   :  { %14206 = vmatmul.mubr.msk.f32.gmra.mrb[38].mxu0 %vm35_vm0, %v4509_v1  ;;  %v4522_v1 = vld [vmem:[#allocation2 + $0x2d0] sm:$0xff] }
 0x3ba   :  { %14208 = vmatprep.mubr.msk.f32.mxu0 %vm35_vm0, %v4510_v62  ;;  %v4523_v62 = vld [vmem:[#allocation2 + $0x2d8] sm:$0xff] }
 0x3bd   :  { %14209 = vmatmul.mubr.msk.f32.gmra.mrb[40].mxu0 %vm35_vm0, %v4511_v46  ;;  %v4524_v46 = vld [vmem:[#allocation2 + $0x2e8] sm:$0xff] }
 0x3be   :  { %14211 = vmatprep.mubr.msk.f32.mxu0 %vm35_vm0, %v4512_v5  ;;  %v4525_v5 = vld [vmem:[#allocation2 + $0x2f0] sm:$0xff] }
 0x3c1   :  { %14212 = vmatmul.mubr.msk.f32.gmra.mrb[42].mxu0 %vm35_vm0, %v4513_v7  ;;  %v4526_v7 = vld [vmem:[#allocation2 + $0x300] sm:$0xff] }
 0x3c2   :  { %14214 = vmatprep.mubr.msk.f32.mxu0 %vm35_vm0, %v4514_v47  ;;  %v4527_v47 = vld [vmem:[#allocation2 + $0x308] sm:$0xff] }
 0x3c5   :  { %14215 = vmatmul.mubr.msk.f32.gmra.mrb[44].mxu0 %vm35_vm0, %v4515_v6  ;;  %v4528_v6 = vld [vmem:[#allocation2 + $0x318] sm:$0xff] }
 0x3c6   :  { %14217 = vmatprep.mubr.msk.f32.mxu0 %vm35_vm0, %v4516_v11  ;;  %v4529_v11 = vld [vmem:[#allocation2 + $0x320] sm:$0xff] }
 0x3c9   :  { %14218 = vmatmul.mubr.msk.f32.gmra.mrb[46].mxu0 %vm35_vm0, %v4517_v12  ;;  %v4532_v12 = vld [vmem:[#allocation2 + $0x348] sm:$0xff] }
 0x3ca   :  { %14220 = vmatprep.mubr.msk.f32.mxu0 %vm35_vm0, %v4518_v3  ;;  %v4533_v3 = vld [vmem:[#allocation2 + $0x350] sm:$0xff] }
 0x3cd   :  { %14221 = vmatmul.mubr.msk.f32.gmra.mrb[48].mxu0 %vm35_vm0, %v4519_v2  ;;  %v5901_v2 = vld [vmem:[#allocation2 + $0xb2] sm:$0xff] }
 0x3ce   :  { %14223 = vmatprep.mubr.msk.f32.mxu0 %vm35_vm0, %v4520_v4  ;;  %v5902_v4 = vld [vmem:[#allocation2 + $0xc2] sm:$0xff] }
 0x3d1   :  { %14224 = vmatmul.mubr.msk.f32.gmra.mrb[50].mxu0 %vm35_vm0, %v4521_v63  ;;  %v5903_v63 = vld [vmem:[#allocation2 + $0xca] sm:$0xff] }
 0x3d2   :  { %14226 = vmatprep.mubr.msk.f32.mxu0 %vm35_vm0, %v4522_v1  ;;  %v5904_v1 = vld [vmem:[#allocation2 + $0xda] sm:$0xff] }
 0x3d5   :  { %14227 = vmatmul.mubr.msk.f32.gmra.mrb[52].mxu0 %vm35_vm0, %v4523_v62  ;;  %v5905_v62 = vld [vmem:[#allocation2 + $0xe2] sm:$0xff] }
 0x3d6   :  { %14229 = vmatprep.mubr.msk.f32.mxu0 %vm35_vm0, %v4524_v46  ;;  %v5906_v46 = vld [vmem:[#allocation2 + $0xf2] sm:$0xff] }
 0x3d9   :  { %14230 = vmatmul.mubr.msk.f32.gmra.mrb[54].mxu0 %vm35_vm0, %v4525_v5  ;;  %v5907_v5 = vld [vmem:[#allocation2 + $0xfa] sm:$0xff] }
 0x3da   :  { %14232 = vmatprep.mubr.msk.f32.mxu0 %vm35_vm0, %v4526_v7  ;;  %v5908_v7 = vld [vmem:[#allocation2 + $0x10a] sm:$0xff] }
 0x3dd   :  { %14233 = vmatmul.mubr.msk.f32.gmra.mrb[56].mxu0 %vm35_vm0, %v4527_v47  ;;  %v5909_v47 = vld [vmem:[#allocation2 + $0x112] sm:$0xff] }
 0x3de   :  { %14235 = vmatprep.mubr.msk.f32.mxu0 %vm35_vm0, %v4528_v6  ;;  %v5910_v6 = vld [vmem:[#allocation2 + $0x122] sm:$0xff] }
 0x3e1   :  { %14236 = vmatmul.mubr.msk.f32.gmra.mrb[58].mxu0 %vm35_vm0, %v4529_v11  ;;  %v5911_v11 = vld [vmem:[#allocation2 + $0x12a] sm:$0xff] }
 0x3e2   :  { %14238 = vmatprep.mubr.msk.f32.mxu0 %vm35_vm0, %v18255_v8  ;;  %v5210_v8 = vld [vmem:[#allocation2 + $0x199] sm:$0xff] }
 0x3e5   :  { %14239 = vmatmul.mubr.msk.f32.gmra.mrb[60].mxu0 %vm35_vm0, %v18261_v10  ;;  %v5211_v10 = vld [vmem:[#allocation2 + $0x1a1] sm:$0xff] }
 0x3e6   :  { %14241 = vmatprep.mubr.msk.f32.mxu0 %vm35_vm0, %v4532_v12  ;;  %v5912_v12 = vld [vmem:[#allocation2 + $0x13a] sm:$0xff] }
 0x3e9   :  { %14242 = vmatmul.mubr.msk.f32.gmra.mrb[62].mxu0 %vm35_vm0, %v4533_v3  ;;  %v5913_v3 = vld [vmem:[#allocation2 + $0x142] sm:$0xff] }
 0x3ea   :  { %14246 = vmatprep.mubr.msk.f32.mxu0 %vm35_vm0, %v18266_v13  ;;  %v20190_v13 = vld [vmem:[#allocation10_spill] sm:$0xff] }
 0x3ed   :  { %14247 = vmatmul.mubr.msk.f32.vlgmr.msra.gmra.mrb[0].mxu0 %vm35_vm0, %v18278_v15  ;;  %v20191_v15 = vld [vmem:[#allocation11_spill] sm:$0xff] }
 0x3ee   :  { %14343 = vmatpush3.msk.msra.mxu0 %vm660_vm3, %v18667_v0  ;;  %14249 = vmatprep.mubr.msk.f32.mxu0 %vm35_vm0, %v18280_v16  ;;  %v20192_v16 = vld [vmem:[#allocation12_spill] sm:$0xff] }
 0x3f1   :  { %14250 = vmatmul.mubr.msk.f32.gmra.mrb[2].mxu0 %vm35_vm0, %v18288_v17  ;;  %v20193_v17 = vld [vmem:[#allocation13_spill] sm:$0xff] }
 0x3f2   :  { %14252 = vmatprep.mubr.msk.f32.mxu0 %vm35_vm0, %v18290_v18  ;;  %v20194_v18 = vld [vmem:[#allocation68_spill] sm:$0xff] }
 0x3f5   :  { %14253 = vmatmul.mubr.msk.f32.gmra.mrb[4].mxu0 %vm35_vm0, %v18296_v19  ;;  %v20195_v19 = vld [vmem:[#allocation69_spill] sm:$0xff] }
 0x3f6   :  { %14255 = vmatprep.mubr.msk.f32.mxu0 %vm35_vm0, %v18298_v20  ;;  %v20196_v20 = vld [vmem:[#allocation70_spill] sm:$0xff] }
 0x3f9   :  { %14256 = vmatmul.mubr.msk.f32.gmra.mrb[6].mxu0 %vm35_vm0, %v18304_v21  ;;  %v20197_v21 = vld [vmem:[#allocation71_spill] sm:$0xff] }
 0x3fa   :  { %14258 = vmatprep.mubr.msk.f32.mxu0 %vm35_vm0, %v18306_v22  ;;  %v20198_v22 = vld [vmem:[#allocation72_spill] sm:$0xff] }
 0x3fd   :  { %14259 = vmatmul.mubr.msk.f32.gmra.mrb[8].mxu0 %vm35_vm0, %v18312_v23  ;;  %v20199_v23 = vld [vmem:[#allocation73_spill] sm:$0xff] }
 0x3fe   :  { %14261 = vmatprep.mubr.msk.f32.mxu0 %vm35_vm0, %v18314_v24  ;;  %v20200_v24 = vld [vmem:[#allocation74_spill] sm:$0xff] }
 0x401   :  { %14262 = vmatmul.mubr.msk.f32.gmra.mrb[10].mxu0 %vm35_vm0, %v18320_v25  ;;  %v20201_v25 = vld [vmem:[#allocation75_spill] sm:$0xff] }
 0x402   :  { %14264 = vmatprep.mubr.msk.f32.mxu0 %vm35_vm0, %v18322_v26  ;;  %v20202_v26 = vld [vmem:[#allocation76_spill] sm:$0xff] }
 0x405   :  { %14265 = vmatmul.mubr.msk.f32.gmra.mrb[12].mxu0 %vm35_vm0, %v18328_v27  ;;  %v20203_v27 = vld [vmem:[#allocation77_spill] sm:$0xff] }
 0x406   :  { %14267 = vmatprep.mubr.msk.f32.mxu0 %vm35_vm0, %v18330_v28  ;;  %v5242_v28 = vld [vmem:[#allocation2 + $0x349] sm:$0xff] }
 0x409   :  { %14268 = vmatmul.mubr.msk.f32.gmra.mrb[14].mxu0 %vm35_vm0, %v18336_v29  ;;  %v20204_v29 = vld [vmem:[#allocation78_spill] sm:$0xff] }
 0x40a   :  { %14270 = vmatprep.mubr.msk.f32.mxu0 %vm35_vm0, %v18338_v30  ;;  %v5243_v30 = vld [vmem:[#allocation2 + $0x351] sm:$0xff] }
 0x40d   :  { %14271 = vmatmul.mubr.msk.f32.gmra.mrb[16].mxu0 %vm35_vm0, %v18344_v31  ;;  %v5890_v31 = vld [vmem:[#allocation2 + $0x32] sm:$0xff] }
 0x40e   :  { %14273 = vmatprep.mubr.msk.f32.mxu0 %vm35_vm0, %v18346_v32  ;;  %v6945_v32 = vld [vmem:[#allocation4 + $0x80] sm:$0xff] }
 0x411   :  { %14274 = vmatmul.mubr.msk.f32.gmra.mrb[18].mxu0 %vm35_vm0, %v18352_v35  ;;  %v6946_v35 = vld [vmem:[#allocation4 + $0x88] sm:$0xff] }
 0x412   :  { %14276 = vmatprep.mubr.msk.f32.mxu0 %vm35_vm0, %v18354_v36  ;;  %v6947_v36 = vld [vmem:[#allocation4 + $0x90] sm:$0xff] }
 0x415   :  { %14277 = vmatmul.mubr.msk.f32.gmra.mrb[20].mxu0 %vm35_vm0, %v18360_v37  ;;  %v5891_v37 = vld [vmem:[#allocation2 + $0x3a] sm:$0xff] }
 0x416   :  { %14279 = vmatprep.mubr.msk.f32.mxu0 %vm35_vm0, %v18362_v38  ;;  %v15592_v38 = vpack.c.bf16 %v6946_v35, %v6945_v32  ;;  %v6959_v32 = vld [vmem:[#allocation4 + $0xf0] sm:$0xff]  ;;  %v6960_v35 = vld [vmem:[#allocation4 + $0xf8] sm:$0xff] }
 0x418   :  { %15593 = vmatprep.subr.bf16.mxu0 %v15592_v38  ;;  %15880 = vmatprep.subr.bf16.mxu1 %v15592_v38 }
 0x419   :  { %14280 = vmatmul.mubr.msk.f32.gmra.mrb[22].mxu0 %vm35_vm0, %v18368_v39  ;;  %v6948_v39 = vld [vmem:[#allocation4 + $0x98] sm:$0xff]  ;;  %15888 = vmatpush3.bf16.msra.mxu1 %v15592_v38 }
 0x41a   :  { %14282 = vmatprep.mubr.msk.f32.mxu0 %vm35_vm0, %v18370_v40  ;;  %v5892_v40 = vld [vmem:[#allocation2 + $0x4a] sm:$0xff] }
 0x41d   :  { %14283 = vmatmul.mubr.msk.f32.gmra.mrb[24].mxu0 %vm35_vm0, %v18376_v41  ;;  %v15596_v41 = vpack.c.bf16 %v6948_v39, %v6947_v36  ;;  %v15620_v36 = vpack.c.bf16 %v6960_v35, %v6959_v32  ;;  %v5935_v39 = vld [vmem:[#allocation2 + $0x27a] sm:$0xff] }
 0x41e   :  { %14285 = vmatprep.mubr.msk.f32.mxu0 %vm35_vm0, %v18378_v42  ;;  %v6949_v42 = vld [vmem:[#allocation4 + $0xa0] sm:$0xff] }
 0x41f   :  { %15881 = vmatprep.subr.bf16.mxu1 %v15596_v41 }
 0x420   :  { %15889 = vmatpush3.bf16.msra.mxu1 %v15596_v41 }
 0x421   :  { %14286 = vmatmul.mubr.msk.f32.gmra.mrb[26].mxu0 %vm35_vm0, %v18384_v43  ;;  %v6950_v43 = vld [vmem:[#allocation4 + $0xa8] sm:$0xff] }
 0x422   :  { %14288 = vmatprep.mubr.msk.f32.mxu0 %vm35_vm0, %v18386_v44  ;;  %v5893_v44 = vld [vmem:[#allocation2 + $0x52] sm:$0xff] }
 0x425   :  { %14289 = vmatmul.mubr.msk.f32.gmra.mrb[28].mxu0 %vm35_vm0, %v18392_v45  ;;  %v5894_v45 = vld [vmem:[#allocation2 + $0x62] sm:$0xff] }
 0x426   :  { %14291 = vmatprep.mubr.msk.f32.mxu0 %vm35_vm0, %v5210_v8  ;;  %v5914_v8 = vld [vmem:[#allocation2 + $0x152] sm:$0xff] }
 0x429   :  { %14292 = vmatmul.mubr.msk.f32.gmra.mrb[30].mxu0 %vm35_vm0, %v5211_v10  ;;  %v5915_v10 = vld [vmem:[#allocation2 + $0x15a] sm:$0xff] }
 0x42a   :  { %14294 = vmatprep.mubr.msk.f32.mxu0 %vm35_vm0, %v18397_v48  ;;  %v15600_v48 = vpack.c.bf16 %v6950_v43, %v6949_v42  ;;  %v5938_v42 = vld [vmem:[#allocation2 + $0x2a2] sm:$0xff]  ;;  %v5939_v43 = vld [vmem:[#allocation2 + $0x2aa] sm:$0xff] }
 0x42c   :  { %15882 = vmatprep.subr.bf16.mxu1 %v15600_v48 }
 0x42d   :  { %14295 = vmatmul.mubr.msk.f32.gmra.mrb[32].mxu0 %vm35_vm0, %v18402_v49  ;;  %v6951_v49 = vld [vmem:[#allocation4 + $0xb0] sm:$0xff]  ;;  %15890 = vmatpush3.bf16.msra.mxu1 %v15600_v48 }
 0x42e   :  { %14297 = vmatprep.mubr.msk.f32.mxu0 %vm35_vm0, %v18404_v50  ;;  %v6952_v50 = vld [vmem:[#allocation4 + $0xb8] sm:$0xff] }
 0x431   :  { %14298 = vmatmul.mubr.msk.f32.gmra.mrb[34].mxu0 %vm35_vm0, %v18410_v51  ;;  %v5895_v51 = vld [vmem:[#allocation2 + $0x6a] sm:$0xff] }
 0x432   :  { %14300 = vmatprep.mubr.msk.f32.mxu0 %vm35_vm0, %v18412_v52  ;;  %v5896_v52 = vld [vmem:[#allocation2 + $0x7a] sm:$0xff] }
 0x435   :  { %14301 = vmatmul.mubr.msk.f32.gmra.mrb[36].mxu0 %vm35_vm0, %v18418_v53  ;;  %v15604_v53 = vpack.c.bf16 %v6952_v50, %v6951_v49  ;;  %v5943_v49 = vld [vmem:[#allocation2 + $0x2da] sm:$0xff]  ;;  %v5944_v50 = vld [vmem:[#allocation2 + $0x2ea] sm:$0xff] }
 0x436   :  { %14303 = vmatprep.mubr.msk.f32.mxu0 %vm35_vm0, %v18420_v54  ;;  %v6953_v54 = vld [vmem:[#allocation4 + $0xc0] sm:$0xff] }
 0x437   :  { %15883 = vmatprep.subr.bf16.mxu1 %v15604_v53 }
 0x438   :  { %15891 = vmatpush3.bf16.msra.mxu1 %v15604_v53 }
 0x439   :  { %14304 = vmatmul.mubr.msk.f32.gmra.mrb[38].mxu0 %vm35_vm0, %v18426_v55  ;;  %v6954_v55 = vld [vmem:[#allocation4 + $0xc8] sm:$0xff] }
 0x43a   :  { %14306 = vmatprep.mubr.msk.f32.mxu0 %vm35_vm0, %v18428_v56  ;;  %v5897_v56 = vld [vmem:[#allocation2 + $0x82] sm:$0xff] }
 0x43d   :  { %14307 = vmatmul.mubr.msk.f32.gmra.mrb[40].mxu0 %vm35_vm0, %v18434_v57  ;;  %v5898_v57 = vld [vmem:[#allocation2 + $0x92] sm:$0xff] }
 0x43e   :  { %14309 = vmatprep.mubr.msk.f32.mxu0 %vm35_vm0, %v18436_v58  ;;  %v15608_v58 = vpack.c.bf16 %v6954_v55, %v6953_v54  ;;  %v6864_v54 = vld [vmem:[#allocation4] sm:$0xff]  ;;  %v6865_v55 = vld [vmem:[#allocation4 + $0x8] sm:$0xff] }
 0x440   :  { %15884 = vmatprep.subr.bf16.mxu1 %v15608_v58 }
 0x441   :  { %14310 = vmatmul.mubr.msk.f32.gmra.mrb[42].mxu0 %vm35_vm0, %v18442_v59  ;;  %v6955_v59 = vld [vmem:[#allocation4 + $0xd0] sm:$0xff]  ;;  %15892 = vmatpush3.bf16.msra.mxu1 %v15608_v58 }
 0x442   :  { %14312 = vmatprep.mubr.msk.f32.mxu0 %vm35_vm0, %v18444_v60  ;;  %v6956_v60 = vld [vmem:[#allocation4 + $0xd8] sm:$0xff] }
 0x443   :  { %v15612_v0 = vpack.c.bf16 %v6956_v60, %v6955_v59  ;;  %v5952_v59 = vld [vmem:[#allocation2 + $0x34a] sm:$0xff]  ;;  %v5953_v60 = vld [vmem:[#allocation2 + $0x352] sm:$0xff] }
 0x445   :  { %14313 = vmatmul.mubr.msk.f32.gmra.mrb[44].mxu0 %vm35_vm0, %v18450_v61  ;;  %v5899_v61 = vld [vmem:[#allocation2 + $0x9a] sm:$0xff]  ;;  %15885 = vmatprep.subr.bf16.mxu1 %v15612_v0 }
 0x446   :  { %14315 = vmatprep.mubr.msk.f32.mxu0 %vm35_vm0, %v18452_v33  ;;  %v5900_v33 = vld [vmem:[#allocation2 + $0xaa] sm:$0xff]  ;;  %15893 = vmatpush3.bf16.msra.mxu1 %v15612_v0 }
 0x449   :  { %14316 = vmatmul.mubr.msk.f32.gmra.mrb[46].mxu0 %vm35_vm0, %v20190_v13  ;;  %v5916_v13 = vld [vmem:[#allocation2 + $0x16a] sm:$0xff] }
 0x44a   :  { %14318 = vmatprep.mubr.msk.f32.mxu0 %vm35_vm0, %v20191_v15  ;;  %v5917_v15 = vld [vmem:[#allocation2 + $0x172] sm:$0xff] }
 0x44d   :  { %14319 = vmatmul.mubr.msk.f32.gmra.mrb[48].mxu0 %vm35_vm0, %v20192_v16  ;;  %v5920_v16 = vld [vmem:[#allocation2 + $0x19a] sm:$0xff] }
 0x44e   :  { %14321 = vmatprep.mubr.msk.f32.mxu0 %vm35_vm0, %v20193_v17  ;;  %v20205_v17 = vld [vmem:[#allocation14_spill] sm:$0xff] }
 0x451   :  { %14322 = vmatmul.mubr.msk.f32.gmra.mrb[50].mxu0 %vm35_vm0, %v20194_v18  ;;  %v5921_v18 = vld [vmem:[#allocation2 + $0x1a2] sm:$0xff] }
 0x452   :  { %14324 = vmatprep.mubr.msk.f32.mxu0 %vm35_vm0, %v20195_v19  ;;  %v5922_v19 = vld [vmem:[#allocation2 + $0x1e2] sm:$0xff] }
 0x455   :  { %14325 = vmatmul.mubr.msk.f32.gmra.mrb[52].mxu0 %vm35_vm0, %v20196_v20  ;;  %v5923_v20 = vld [vmem:[#allocation2 + $0x1ea] sm:$0xff] }
 0x456   :  { %14327 = vmatprep.mubr.msk.f32.mxu0 %vm35_vm0, %v20197_v21  ;;  %v5924_v21 = vld [vmem:[#allocation2 + $0x1fa] sm:$0xff] }
 0x459   :  { %14328 = vmatmul.mubr.msk.f32.gmra.mrb[54].mxu0 %vm35_vm0, %v20198_v22  ;;  %v5925_v22 = vld [vmem:[#allocation2 + $0x202] sm:$0xff] }
 0x45a   :  { %14330 = vmatprep.mubr.msk.f32.mxu0 %vm35_vm0, %v20199_v23  ;;  %v5927_v23 = vld [vmem:[#allocation2 + $0x21a] sm:$0xff] }
 0x45d   :  { %14331 = vmatmul.mubr.msk.f32.gmra.mrb[56].mxu0 %vm35_vm0, %v20200_v24  ;;  %v5928_v24 = vld [vmem:[#allocation2 + $0x22a] sm:$0xff] }
 0x45e   :  { %14333 = vmatprep.mubr.msk.f32.mxu0 %vm35_vm0, %v20201_v25  ;;  %v5929_v25 = vld [vmem:[#allocation2 + $0x232] sm:$0xff] }
 0x461   :  { %14334 = vmatmul.mubr.msk.f32.gmra.mrb[58].mxu0 %vm35_vm0, %v20202_v26  ;;  %v5930_v26 = vld [vmem:[#allocation2 + $0x242] sm:$0xff] }
 0x462   :  { %14336 = vmatprep.mubr.msk.f32.mxu0 %vm35_vm0, %v20203_v27  ;;  %v6957_v27 = vld [vmem:[#allocation4 + $0xe0] sm:$0xff] }
 0x465   :  { %14337 = vmatmul.mubr.msk.f32.gmra.mrb[60].mxu0 %vm35_vm0, %v20204_v29 }
 0x466   :  { %14339 = vmatprep.mubr.msk.f32.mxu0 %vm35_vm0, %v5242_v28  ;;  %v6958_v28 = vld [vmem:[#allocation4 + $0xe8] sm:$0xff] }
 0x467   :  { %v15616_v29 = vpack.c.bf16 %v6958_v28, %v6957_v27 }
 0x469   :  { %14340 = vmatmul.mubr.msk.f32.gmra.mrb[62].mxu0 %vm35_vm0, %v5243_v30  ;;  %v5931_v30 = vld [vmem:[#allocation2 + $0x24a] sm:$0xff]  ;;  %15886 = vmatprep.subr.bf16.mxu1 %v15616_v29 }
 0x46a   :  { %14344 = vmatprep.mubr.msk.f32.mxu0 %vm35_vm0, %v5890_v31  ;;  %v5932_v31 = vld [vmem:[#allocation2 + $0x25a] sm:$0xff]  ;;  %15894 = vmatpush3.bf16.msra.mxu1 %v15616_v29 }
 0x46b   :  { %15887 = vmatprep.subr.bf16.mxu1 %v15620_v36 }
 0x46d   :  { %14345 = vmatmul.mubr.msk.f32.vlgmr.msra.gmra.mrb[0].mxu0 %vm35_vm0, %v5891_v37  ;;  %v5933_v37 = vld [vmem:[#allocation2 + $0x262] sm:$0xff] }
 0x46e   :  { %14347 = vmatprep.mubr.msk.f32.mxu0 %vm35_vm0, %v5892_v40  ;;  %15595 = vmatpush3.bf16.msra.mxu0 %v15592_v38  ;;  %v5934_v38 = vld [vmem:[#allocation2 + $0x272] sm:$0xff]  ;;  %v5936_v40 = vld [vmem:[#allocation2 + $0x28a] sm:$0xff] }
 0x46f   :  { %15597 = vmatprep.subr.bf16.mxu0 %v15596_v41  ;;  %15895 = vmatpush3.bf16.msra.mxu1 %v15620_v36 }
 0x471   :  { %14348 = vmatmul.mubr.msk.f32.gmra.mrb[2].mxu0 %vm35_vm0, %v5893_v44  ;;  %v5940_v44 = vld [vmem:[#allocation2 + $0x2ba] sm:$0xff] }
 0x472   :  { %14350 = vmatprep.mubr.msk.f32.mxu0 %vm35_vm0, %v5894_v45  ;;  %15599 = vmatpush3.bf16.msra.mxu0 %v15596_v41  ;;  %v5937_v41 = vld [vmem:[#allocation2 + $0x292] sm:$0xff]  ;;  %v5941_v45 = vld [vmem:[#allocation2 + $0x2c2] sm:$0xff] }
 0x473   :  { %15601 = vmatprep.subr.bf16.mxu0 %v15600_v48 }
 0x475   :  { %14351 = vmatmul.mubr.msk.f32.gmra.mrb[4].mxu0 %vm35_vm0, %v5895_v51  ;;  %v5945_v51 = vld [vmem:[#allocation2 + $0x2f2] sm:$0xff] }
 0x476   :  { %14353 = vmatprep.mubr.msk.f32.mxu0 %vm35_vm0, %v5896_v52  ;;  %15603 = vmatpush3.bf16.msra.mxu0 %v15600_v48  ;;  %v5942_v48 = vld [vmem:[#allocation2 + $0x2d2] sm:$0xff]  ;;  %v5946_v52 = vld [vmem:[#allocation2 + $0x302] sm:$0xff] }
 0x477   :  { %15605 = vmatprep.subr.bf16.mxu0 %v15604_v53 }
 0x479   :  { %14354 = vmatmul.mubr.msk.f32.gmra.mrb[6].mxu0 %vm35_vm0, %v5897_v56  ;;  %v5948_v56 = vld [vmem:[#allocation2 + $0x31a] sm:$0xff] }
 0x47a   :  { %14356 = vmatprep.mubr.msk.f32.mxu0 %vm35_vm0, %v5898_v57  ;;  %15607 = vmatpush3.bf16.msra.mxu0 %v15604_v53  ;;  %v5947_v53 = vld [vmem:[#allocation2 + $0x30a] sm:$0xff]  ;;  %v15624_v57 = vpack.c.bf16 %v6865_v55, %v6864_v54 }
 0x47b   :  { %15609 = vmatprep.subr.bf16.mxu0 %v15608_v58 }
 0x47c   :  { %15625 = vmatprep.subr.bf16.mxu1 %v15624_v57 }
 0x47d   :  { %14357 = vmatmul.mubr.msk.f32.gmra.mrb[8].mxu0 %vm35_vm0, %v5899_v61  ;;  %v6880_v61 = vld [vmem:[#allocation3 + $0x1] sm:$0xff] }
 0x47e   :  { %14359 = vmatprep.mubr.msk.f32.mxu0 %vm35_vm0, %v5900_v33  ;;  %15611 = vmatpush3.bf16.msra.mxu0 %v15608_v58  ;;  %v5949_v58 = vld [vmem:[#allocation2 + $0x322] sm:$0xff] }
 0x47f   :  { %15613 = vmatprep.subr.bf16.mxu0 %v15612_v0  ;;  %v6881_v33 = vld [vmem:[#allocation3 + $0x9] sm:$0xff] }
 0x481   :  { %14360 = vmatmul.mubr.msk.f32.gmra.mrb[10].mxu0 %vm35_vm0, %v5901_v2 }
 0x482   :  { %14362 = vmatprep.mubr.msk.f32.mxu0 %vm35_vm0, %v5902_v4  ;;  %15615 = vmatpush3.bf16.msra.mxu0 %v15612_v0  ;;  %v18937_v0 = vld [vmem:[%s19895_s2] ss:$0 sm:$0xff] }
 0x483   :  { %15617 = vmatprep.subr.bf16.mxu0 %v15616_v29 }
 0x485   :  { %14363 = vmatmul.mubr.msk.f32.gmra.mrb[12].mxu0 %vm35_vm0, %v5903_v63 }
 0x486   :  { %14365 = vmatprep.mubr.msk.f32.mxu0 %vm35_vm0, %v5904_v1  ;;  %15619 = vmatpush3.bf16.msra.mxu0 %v15616_v29 }
 0x487   :  { %15621 = vmatprep.subr.bf16.mxu0 %v15620_v36 }
 0x489   :  { %14366 = vmatmul.mubr.msk.f32.gmra.mrb[14].mxu0 %vm35_vm0, %v5905_v62 }
 0x48a   :  { %14368 = vmatprep.mubr.msk.f32.mxu0 %vm35_vm0, %v5906_v46  ;;  %15623 = vmatpush3.bf16.msra.mxu0 %v15620_v36 }
 0x48d   :  { %14369 = vmatmul.mubr.msk.f32.gmra.mrb[16].mxu0 %vm35_vm0, %v5907_v5 }
 0x48e   :  { %14371 = vmatprep.mubr.msk.f32.mxu0 %vm35_vm0, %v5908_v7 }
 0x491   :  { %14372 = vmatmul.mubr.msk.f32.gmra.mrb[18].mxu0 %vm35_vm0, %v5909_v47 }
 0x492   :  { %14374 = vmatprep.mubr.msk.f32.mxu0 %vm35_vm0, %v5910_v6 }
 0x495   :  { %14375 = vmatmul.mubr.msk.f32.gmra.mrb[20].mxu0 %vm35_vm0, %v5911_v11 }
 0x496   :  { %14377 = vmatprep.mubr.msk.f32.mxu0 %vm35_vm0, %v5912_v12 }
 0x499   :  { %14378 = vmatmul.mubr.msk.f32.gmra.mrb[22].mxu0 %vm35_vm0, %v5913_v3 }
 0x49a   :  { %14380 = vmatprep.mubr.msk.f32.mxu0 %vm35_vm0, %v5914_v8 }
 0x49d   :  { %14381 = vmatmul.mubr.msk.f32.gmra.mrb[24].mxu0 %vm35_vm0, %v5915_v10  ;;  %v6866_v10 = vld [vmem:[#allocation4 + $0x10] sm:$0xff] }
 0x49e   :  { %14383 = vmatprep.mubr.msk.f32.mxu0 %vm35_vm0, %v5916_v13  ;;  %v6867_v13 = vld [vmem:[#allocation4 + $0x18] sm:$0xff] }
 0x4a1   :  { %14384 = vmatmul.mubr.msk.f32.gmra.mrb[26].mxu0 %vm35_vm0, %v5917_v15 }
 0x4a2   :  { %14386 = vmatprep.mubr.msk.f32.mxu0 %vm35_vm0, %v18585_v9  ;;  %v5926_v9 = vld [vmem:[#allocation2 + $0x212] sm:$0xff] }
 0x4a5   :  { %14387 = vmatmul.mubr.msk.f32.gmra.mrb[28].mxu0 %vm35_vm0, %v20205_v17 }
 0x4a6   :  { %14389 = vmatprep.mubr.msk.f32.mxu0 %vm35_vm0, %v5920_v16 }
 0x4a9   :  { %14390 = vmatmul.mubr.msk.f32.gmra.mrb[30].mxu0 %vm35_vm0, %v5921_v18 }
 0x4aa   :  { %14392 = vmatprep.mubr.msk.f32.mxu0 %vm35_vm0, %v5922_v19 }
 0x4ad   :  { %14393 = vmatmul.mubr.msk.f32.gmra.mrb[32].mxu0 %vm35_vm0, %v5923_v20  ;;  %v15628_v20 = vpack.c.bf16 %v6867_v13, %v6866_v10  ;;  %v7796_v10 = vld [vmem:[#allocation4 + $0x100] sm:$0xff]  ;;  %v7797_v13 = vld [vmem:[#allocation4 + $0x108] sm:$0xff] }
 0x4ae   :  { %14395 = vmatprep.mubr.msk.f32.mxu0 %vm35_vm0, %v5924_v21 }
 0x4b1   :  { %14396 = vmatmul.mubr.msk.f32.gmra.mrb[34].mxu0 %vm35_vm0, %v5925_v22  ;;  %v6868_v22 = vld [vmem:[#allocation4 + $0x20] sm:$0xff] }
 0x4b2   :  { %14398 = vmatprep.mubr.msk.f32.mxu0 %vm35_vm0, %v5926_v9  ;;  %v6869_v9 = vld [vmem:[#allocation4 + $0x28] sm:$0xff] }
 0x4b3   :  { %v15632_v28 = vpack.c.bf16 %v6869_v9, %v6868_v22 }
 0x4b5   :  { %14399 = vmatmul.mubr.msk.f32.gmra.mrb[36].mxu0 %vm35_vm0, %v5927_v23 }
 0x4b6   :  { %14401 = vmatprep.mubr.msk.f32.mxu0 %vm35_vm0, %v5928_v24 }
 0x4b9   :  { %14402 = vmatmul.mubr.msk.f32.gmra.mrb[38].mxu0 %vm35_vm0, %v5929_v25 }
 0x4ba   :  { %14404 = vmatprep.mubr.msk.f32.mxu0 %vm35_vm0, %v5930_v26 }
 0x4bd   :  { %14405 = vmatmul.mubr.msk.f32.gmra.mrb[40].mxu0 %vm35_vm0, %v5931_v30  ;;  %v6870_v30 = vld [vmem:[#allocation4 + $0x30] sm:$0xff] }
 0x4be   :  { %14407 = vmatprep.mubr.msk.f32.mxu0 %vm35_vm0, %v5932_v31  ;;  %v6871_v31 = vld [vmem:[#allocation4 + $0x38] sm:$0xff] }
 0x4c1   :  { %14408 = vmatmul.mubr.msk.f32.gmra.mrb[42].mxu0 %vm35_vm0, %v5933_v37 }
 0x4c2   :  { %14410 = vmatprep.mubr.msk.f32.mxu0 %vm35_vm0, %v5934_v38 }
 0x4c5   :  { %14411 = vmatmul.mubr.msk.f32.gmra.mrb[44].mxu0 %vm35_vm0, %v5935_v39  ;;  %v15636_v39 = vpack.c.bf16 %v6871_v31, %v6870_v30 }
 0x4c6   :  { %14413 = vmatprep.mubr.msk.f32.mxu0 %vm35_vm0, %v5936_v40 }
 0x4c9   :  { %14414 = vmatmul.mubr.msk.f32.gmra.mrb[46].mxu0 %vm35_vm0, %v5937_v41  ;;  %v6872_v41 = vld [vmem:[#allocation4 + $0x40] sm:$0xff] }
 0x4ca   :  { %14416 = vmatprep.mubr.msk.f32.mxu0 %vm35_vm0, %v5938_v42  ;;  %v6873_v42 = vld [vmem:[#allocation4 + $0x48] sm:$0xff] }
 0x4cd   :  { %14417 = vmatmul.mubr.msk.f32.gmra.mrb[48].mxu0 %vm35_vm0, %v5939_v43 }
 0x4ce   :  { %14419 = vmatprep.mubr.msk.f32.mxu0 %vm35_vm0, %v5940_v44 }
 0x4d1   :  { %14420 = vmatmul.mubr.msk.f32.gmra.mrb[50].mxu0 %vm35_vm0, %v5941_v45 }
 0x4d2   :  { %14422 = vmatprep.mubr.msk.f32.mxu0 %vm35_vm0, %v5942_v48 }
 0x4d5   :  { %14423 = vmatmul.mubr.msk.f32.gmra.mrb[52].mxu0 %vm35_vm0, %v5943_v49 }
 0x4d6   :  { %14425 = vmatprep.mubr.msk.f32.mxu0 %vm35_vm0, %v5944_v50  ;;  %v15640_v50 = vpack.c.bf16 %v6873_v42, %v6872_v41 }
 0x4d9   :  { %14426 = vmatmul.mubr.msk.f32.gmra.mrb[54].mxu0 %vm35_vm0, %v5945_v51 }
 0x4da   :  { %14428 = vmatprep.mubr.msk.f32.mxu0 %vm35_vm0, %v5946_v52  ;;  %v6874_v52 = vld [vmem:[#allocation4 + $0x50] sm:$0xff] }
 0x4dd   :  { %14429 = vmatmul.mubr.msk.f32.gmra.mrb[56].mxu0 %vm35_vm0, %v5947_v53  ;;  %v6875_v53 = vld [vmem:[#allocation4 + $0x58] sm:$0xff] }
 0x4de   :  { %14431 = vmatprep.mubr.msk.f32.mxu0 %vm35_vm0, %v5948_v56 }
 0x4e1   :  { %14432 = vmatmul.mubr.msk.f32.gmra.mrb[58].mxu0 %vm35_vm0, %v5949_v58 }
 0x4e2   :  { %14434 = vmatprep.mubr.msk.f32.mxu0 %vm35_vm0, %v18653_v14 }
 0x4e5   :  { %14435 = vmatmul.mubr.msk.f32.gmra.mrb[60].mxu0 %vm35_vm0, %v18659_v34 }
 0x4e6   :  { %14437 = vmatprep.mubr.msk.f32.mxu0 %vm35_vm0, %v5952_v59  ;;  %v15644_v59 = vpack.c.bf16 %v6875_v53, %v6874_v52 }
 0x4e9   :  { %14438 = vmatmul.mubr.msk.f32.gmra.mrb[62].mxu0 %vm35_vm0, %v5953_v60 }
 0x4ea   :  { %14472 = vmatprep.mubr.f32.mxu0 %v6880_v61  ;;  %v6876_v61 = vld [vmem:[#allocation4 + $0x60] sm:$0xff] }
 0x4ed   :  { %14473 = vmatmul.mubr.f32.vlgmr.msra.gmra.mrb[64].mxu0 %v6881_v33  ;;  %v6877_v33 = vld [vmem:[#allocation4 + $0x68] sm:$0xff] }
 0x540   :  { %v14346_v2 = vpop.f32.mrb[0].mxu0 }
 0x541   :  { %v6608_v14 = vadd.f32 %v14346_v2, %v18937_v0  ;;  %v6217_v4 = vpop.f32.mrb[1].mxu0 }
 0x542   :  { %v6607_v34 = vadd.f32 %v18937_v0, %v6217_v4 }
 0x543   :  { %v6672_v63 = vmax.f32 %v6608_v14, 0.0 }
 0x544   :  { %v6671_v1 = vmax.f32 %v6607_v34, 0.0  ;;  %v14349_v62 = vpop.f32.mrb[2].mxu0 }
 0x545   :  { %6737 = vst [vmem:[#allocation3 + $0x21] sm:$0xff] %v6672_v63  ;;  %v6610_v46 = vadd.f32 %v14349_v62, %v18937_v0  ;;  %v6227_v5 = vpop.f32.mrb[3].mxu0 }
 0x546   :  { %6736 = vst [vmem:[#allocation3 + $0x19] sm:$0xff] %v6671_v1  ;;  %v6609_v7 = vadd.f32 %v18937_v0, %v6227_v5  ;;  %14475 = vmatprep.mubr.f32.mxu0 %v6671_v1  ;;  %v15648_v1 = vpack.c.bf16 %v6877_v33, %v6876_v61  ;;  %v6879_v5 = vld [vmem:[#allocation4 + $0x78] sm:$0xff] }
 0x547   :  { %v6674_v47 = vmax.f32 %v6610_v46, 0.0  ;;  %14476 = vmatmul.mubr.f32.gmra.mrb[66].mxu0 %v6672_v63  ;;  %v6878_v46 = vld [vmem:[#allocation4 + $0x70] sm:$0xff] }
 0x548   :  { %v6673_v6 = vmax.f32 %v6609_v7, 0.0  ;;  %v14352_v11 = vpop.f32.mrb[4].mxu0 }
 0x549   :  { %6739 = vst [vmem:[#allocation3 + $0x39] sm:$0xff] %v6674_v47  ;;  %v6612_v12 = vadd.f32 %v14352_v11, %v18937_v0  ;;  %v6237_v3 = vpop.f32.mrb[5].mxu0 }
 0x54a   :  { %6738 = vst [vmem:[#allocation3 + $0x31] sm:$0xff] %v6673_v6  ;;  %v6611_v8 = vadd.f32 %v18937_v0, %v6237_v3  ;;  %14478 = vmatprep.mubr.f32.mxu0 %v6673_v6  ;;  %v15652_v3 = vpack.c.bf16 %v6879_v5, %v6878_v46 }
 0x54b   :  { %v6676_v15 = vmax.f32 %v6612_v12, 0.0  ;;  %14479 = vmatmul.mubr.f32.gmra.mrb[68].mxu0 %v6674_v47 }
 0x54c   :  { %v6675_v16 = vmax.f32 %v6611_v8, 0.0  ;;  %v14355_v17 = vpop.f32.mrb[6].mxu0 }
 0x54d   :  { %6741 = vst [vmem:[#allocation3 + $0x51] sm:$0xff] %v6676_v15  ;;  %v6614_v18 = vadd.f32 %v14355_v17, %v18937_v0  ;;  %v6247_v19 = vpop.f32.mrb[7].mxu0 }
 0x54e   :  { %6740 = vst [vmem:[#allocation3 + $0x49] sm:$0xff] %v6675_v16  ;;  %v6613_v21 = vadd.f32 %v18937_v0, %v6247_v19  ;;  %14481 = vmatprep.mubr.f32.mxu1 %v6675_v16 }
 0x54f   :  { %v6678_v23 = vmax.f32 %v6614_v18, 0.0  ;;  %14482 = vmatmul.mubr.f32.vlgmr.msra.gmra.mrb[0].mxu1 %v6676_v15 }
 0x550   :  { %v6677_v24 = vmax.f32 %v6613_v21, 0.0  ;;  %v14358_v25 = vpop.f32.mrb[8].mxu0  ;;  %15627 = vmatpush3.bf16.msra.mxu1 %v15624_v57 }
 0x551   :  { %6743 = vst [vmem:[#allocation3 + $0x69] sm:$0xff] %v6678_v23  ;;  %v6616_v26 = vadd.f32 %v14358_v25, %v18937_v0  ;;  %v6257_v27 = vpop.f32.mrb[9].mxu0  ;;  %15629 = vmatprep.subr.bf16.mxu1 %v15628_v20 }
 0x552   :  { %6742 = vst [vmem:[#allocation3 + $0x61] sm:$0xff] %v6677_v24  ;;  %v6615_v29 = vadd.f32 %v18937_v0, %v6257_v27  ;;  %14484 = vmatprep.mubr.f32.mxu1 %v6677_v24 }
 0x553   :  { %v6680_v32 = vmax.f32 %v6616_v26, 0.0  ;;  %14485 = vmatmul.mubr.f32.gmra.mrb[2].mxu1 %v6678_v23 }
 0x554   :  { %v6679_v35 = vmax.f32 %v6615_v29, 0.0  ;;  %v14361_v36 = vpop.f32.mrb[10].mxu0  ;;  %15631 = vmatpush3.bf16.msra.mxu1 %v15628_v20  ;;  %v18960_v20 = vpack.c.bf16 %v7797_v13, %v7796_v10 }
 0x555   :  { %6745 = vst [vmem:[#allocation3 + $0x81] sm:$0xff] %v6680_v32  ;;  %v6618_v37 = vadd.f32 %v14361_v36, %v18937_v0  ;;  %v6267_v38 = vpop.f32.mrb[11].mxu0  ;;  %15633 = vmatprep.subr.bf16.mxu1 %v15632_v28 }
 0x556   :  { %6744 = vst [vmem:[#allocation3 + $0x79] sm:$0xff] %v6679_v35  ;;  %v6617_v40 = vadd.f32 %v18937_v0, %v6267_v38  ;;  %14487 = vmatprep.mubr.f32.mxu1 %v6679_v35 }
 0x557   :  { %v6682_v43 = vmax.f32 %v6618_v37, 0.0  ;;  %14488 = vmatmul.mubr.f32.gmra.mrb[4].mxu1 %v6680_v32 }
 0x558   :  { %v6681_v44 = vmax.f32 %v6617_v40, 0.0  ;;  %v14364_v45 = vpop.f32.mrb[12].mxu0  ;;  %15635 = vmatpush3.bf16.msra.mxu1 %v15632_v28 }
 0x559   :  { %6747 = vst [vmem:[#allocation3 + $0x99] sm:$0xff] %v6682_v43  ;;  %v6620_v48 = vadd.f32 %v14364_v45, %v18937_v0  ;;  %v6277_v49 = vpop.f32.mrb[13].mxu0  ;;  %15637 = vmatprep.subr.bf16.mxu1 %v15636_v39 }
 0x55a   :  { %6746 = vst [vmem:[#allocation3 + $0x91] sm:$0xff] %v6681_v44  ;;  %v6619_v51 = vadd.f32 %v18937_v0, %v6277_v49  ;;  %14490 = vmatprep.mubr.f32.mxu1 %v6681_v44 }
 0x55b   :  { %v6684_v54 = vmax.f32 %v6620_v48, 0.0  ;;  %14491 = vmatmul.mubr.f32.gmra.mrb[6].mxu1 %v6682_v43 }
 0x55c   :  { %v6683_v55 = vmax.f32 %v6619_v51, 0.0  ;;  %v14367_v56 = vpop.f32.mrb[14].mxu0  ;;  %15639 = vmatpush3.bf16.msra.mxu1 %v15636_v39 }
 0x55d   :  { %6749 = vst [vmem:[#allocation3 + $0xb1] sm:$0xff] %v6684_v54  ;;  %v6622_v57 = vadd.f32 %v14367_v56, %v18937_v0  ;;  %v6287_v58 = vpop.f32.mrb[15].mxu0  ;;  %15641 = vmatprep.subr.bf16.mxu1 %v15640_v50 }
 0x55e   :  { %6748 = vst [vmem:[#allocation3 + $0xa9] sm:$0xff] %v6683_v55  ;;  %v6621_v60 = vadd.f32 %v18937_v0, %v6287_v58  ;;  %14493 = vmatprep.mubr.f32.mxu1 %v6683_v55 }
 0x55f   :  { %v6686_v2 = vmax.f32 %v6622_v57, 0.0  ;;  %14494 = vmatmul.mubr.f32.gmra.mrb[8].mxu1 %v6684_v54  ;;  %v6912_v54 = vld [vmem:[#allocation3 + $0x1b1] sm:$0xff] }
 0x560   :  { %v6685_v14 = vmax.f32 %v6621_v60, 0.0  ;;  %v14370_v4 = vpop.f32.mrb[16].mxu0  ;;  %15643 = vmatpush3.bf16.msra.mxu1 %v15640_v50 }
 0x561   :  { %6751 = vst [vmem:[#allocation3 + $0xc9] sm:$0xff] %v6686_v2  ;;  %v6624_v34 = vadd.f32 %v14370_v4, %v18937_v0  ;;  %v6297_v63 = vpop.f32.mrb[17].mxu0  ;;  %15645 = vmatprep.subr.bf16.mxu1 %v15644_v59 }
 0x562   :  { %6750 = vst [vmem:[#allocation3 + $0xc1] sm:$0xff] %v6685_v14  ;;  %v6623_v62 = vadd.f32 %v18937_v0, %v6297_v63  ;;  %14496 = vmatprep.mubr.f32.mxu1 %v6685_v14 }
 0x563   :  { %v6688_v7 = vmax.f32 %v6624_v34, 0.0  ;;  %14497 = vmatmul.mubr.f32.gmra.mrb[10].mxu1 %v6686_v2 }
 0x564   :  { %v6687_v47 = vmax.f32 %v6623_v62, 0.0  ;;  %v14373_v6 = vpop.f32.mrb[18].mxu0  ;;  %15647 = vmatpush3.bf16.msra.mxu1 %v15644_v59  ;;  %v6913_v59 = vld [vmem:[#allocation3 + $0x1b9] sm:$0xff] }
 0x565   :  { %6753 = vst [vmem:[#allocation3 + $0xe1] sm:$0xff] %v6688_v7  ;;  %v6626_v11 = vadd.f32 %v14373_v6, %v18937_v0  ;;  %v6307_v12 = vpop.f32.mrb[19].mxu0  ;;  %15649 = vmatprep.subr.bf16.mxu1 %v15648_v1 }
 0x566   :  { %6752 = vst [vmem:[#allocation3 + $0xd9] sm:$0xff] %v6687_v47  ;;  %v6625_v8 = vadd.f32 %v18937_v0, %v6307_v12  ;;  %14499 = vmatprep.mubr.f32.mxu1 %v6687_v47 }
 0x567   :  { %v6690_v15 = vmax.f32 %v6626_v11, 0.0  ;;  %14500 = vmatmul.mubr.f32.gmra.mrb[12].mxu1 %v6688_v7 }
 0x568   :  { %v6689_v16 = vmax.f32 %v6625_v8, 0.0  ;;  %v14376_v17 = vpop.f32.mrb[20].mxu0  ;;  %15651 = vmatpush3.bf16.msra.mxu1 %v15648_v1 }
 0x569   :  { %6755 = vst [vmem:[#allocation3 + $0xf9] sm:$0xff] %v6690_v15  ;;  %v6628_v18 = vadd.f32 %v14376_v17, %v18937_v0  ;;  %v6317_v19 = vpop.f32.mrb[21].mxu0  ;;  %15653 = vmatprep.subr.bf16.mxu1 %v15652_v3 }
 0x56a   :  { %6754 = vst [vmem:[#allocation3 + $0xf1] sm:$0xff] %v6689_v16  ;;  %v6627_v21 = vadd.f32 %v18937_v0, %v6317_v19  ;;  %14502 = vmatprep.mubr.f32.mxu1 %v6689_v16 }
 0x56b   :  { %v6692_v22 = vmax.f32 %v6628_v18, 0.0  ;;  %14503 = vmatmul.mubr.f32.gmra.mrb[14].mxu1 %v6690_v15 }
 0x56c   :  { %v6691_v9 = vmax.f32 %v6627_v21, 0.0  ;;  %v14379_v23 = vpop.f32.mrb[22].mxu0  ;;  %15655 = vmatpush3.bf16.msra.mxu1 %v15652_v3 }
 0x56d   :  { %6757 = vst [vmem:[#allocation3 + $0x111] sm:$0xff] %v6692_v22  ;;  %v6630_v24 = vadd.f32 %v14379_v23, %v18937_v0  ;;  %v6327_v25 = vpop.f32.mrb[23].mxu0  ;;  %15657 = vmatprep.subr.bf16.mxu1 %v18960_v20 }
 0x56e   :  { %6756 = vst [vmem:[#allocation3 + $0x109] sm:$0xff] %v6691_v9  ;;  %v6629_v26 = vadd.f32 %v18937_v0, %v6327_v25  ;;  %14505 = vmatprep.mubr.f32.mxu1 %v6691_v9 }
 0x56f   :  { %v6694_v27 = vmax.f32 %v6630_v24, 0.0  ;;  %14506 = vmatmul.mubr.f32.gmra.mrb[16].mxu1 %v6692_v22 }
 0x570   :  { %v6693_v28 = vmax.f32 %v6629_v26, 0.0  ;;  %v14382_v29 = vpop.f32.mrb[24].mxu0 }
 0x571   :  { %6759 = vst [vmem:[#allocation3 + $0x129] sm:$0xff] %v6694_v27  ;;  %v6632_v30 = vadd.f32 %v14382_v29, %v18937_v0  ;;  %v6337_v31 = vpop.f32.mrb[25].mxu0 }
 0x572   :  { %6758 = vst [vmem:[#allocation3 + $0x121] sm:$0xff] %v6693_v28  ;;  %v6631_v32 = vadd.f32 %v18937_v0, %v6337_v31  ;;  %14508 = vmatprep.mubr.f32.mxu1 %v6693_v28 }
 0x573   :  { %v6696_v35 = vmax.f32 %v6632_v30, 0.0  ;;  %14509 = vmatmul.mubr.f32.gmra.mrb[18].mxu1 %v6694_v27 }
 0x574   :  { %v6695_v36 = vmax.f32 %v6631_v32, 0.0  ;;  %v14385_v37 = vpop.f32.mrb[26].mxu0 }
 0x575   :  { %6761 = vst [vmem:[#allocation3 + $0x141] sm:$0xff] %v6696_v35  ;;  %v6634_v38 = vadd.f32 %v14385_v37, %v18937_v0  ;;  %v6347_v39 = vpop.f32.mrb[27].mxu0 }
 0x576   :  { %6760 = vst [vmem:[#allocation3 + $0x139] sm:$0xff] %v6695_v36  ;;  %v6633_v40 = vadd.f32 %v18937_v0, %v6347_v39  ;;  %14511 = vmatprep.mubr.f32.mxu1 %v6695_v36 }
 0x577   :  { %v6698_v41 = vmax.f32 %v6634_v38, 0.0  ;;  %14512 = vmatmul.mubr.f32.gmra.mrb[20].mxu1 %v6696_v35 }
 0x578   :  { %v6697_v42 = vmax.f32 %v6633_v40, 0.0  ;;  %v14388_v43 = vpop.f32.mrb[28].mxu0 }
 0x579   :  { %6763 = vst [vmem:[#allocation3 + $0x159] sm:$0xff] %v6698_v41  ;;  %v6636_v44 = vadd.f32 %v14388_v43, %v18937_v0  ;;  %v6357_v45 = vpop.f32.mrb[29].mxu0 }
 0x57a   :  { %6762 = vst [vmem:[#allocation3 + $0x151] sm:$0xff] %v6697_v42  ;;  %v6635_v48 = vadd.f32 %v18937_v0, %v6357_v45  ;;  %14514 = vmatprep.mubr.f32.mxu1 %v6697_v42 }
 0x57b   :  { %v6700_v49 = vmax.f32 %v6636_v44, 0.0  ;;  %14515 = vmatmul.mubr.f32.gmra.mrb[22].mxu1 %v6698_v41 }
 0x57c   :  { %v6699_v50 = vmax.f32 %v6635_v48, 0.0  ;;  %v14391_v51 = vpop.f32.mrb[30].mxu0 }
 0x57d   :  { %6765 = vst [vmem:[#allocation3 + $0x171] sm:$0xff] %v6700_v49  ;;  %v6638_v52 = vadd.f32 %v14391_v51, %v18937_v0  ;;  %v6367_v53 = vpop.f32.mrb[31].mxu0 }
 0x57e   :  { %6764 = vst [vmem:[#allocation3 + $0x169] sm:$0xff] %v6699_v50  ;;  %v6637_v55 = vadd.f32 %v18937_v0, %v6367_v53  ;;  %14517 = vmatprep.mubr.f32.mxu1 %v6699_v50 }
 0x57f   :  { %v6702_v56 = vmax.f32 %v6638_v52, 0.0  ;;  %14518 = vmatmul.mubr.f32.gmra.mrb[24].mxu1 %v6700_v49 }
 0x580   :  { %v6701_v57 = vmax.f32 %v6637_v55, 0.0  ;;  %v14394_v58 = vpop.f32.mrb[32].mxu0  ;;  %14520 = vmatprep.mubr.f32.mxu1 %v6912_v54 }
 0x581   :  { %6767 = vst [vmem:[#allocation3 + $0x189] sm:$0xff] %v6702_v56  ;;  %v6640_v60 = vadd.f32 %v14394_v58, %v18937_v0  ;;  %v6377_v61 = vpop.f32.mrb[33].mxu0 }
 0x582   :  { %6766 = vst [vmem:[#allocation3 + $0x181] sm:$0xff] %v6701_v57  ;;  %v6639_v33 = vadd.f32 %v18937_v0, %v6377_v61 }
 0x583   :  { %v6704_v2 = vmax.f32 %v6640_v60, 0.0  ;;  %14521 = vmatmul.mubr.f32.gmra.mrb[26].mxu1 %v6913_v59 }
 0x584   :  { %v6703_v14 = vmax.f32 %v6639_v33, 0.0  ;;  %v14397_v4 = vpop.f32.mrb[34].mxu0 }
 0x585   :  { %6769 = vst [vmem:[#allocation3 + $0x1d1] sm:$0xff] %v6704_v2  ;;  %v6642_v34 = vadd.f32 %v14397_v4, %v18937_v0  ;;  %v6387_v63 = vpop.f32.mrb[35].mxu0 }
 0x586   :  { %6768 = vst [vmem:[#allocation3 + $0x1c9] sm:$0xff] %v6703_v14  ;;  %v6641_v1 = vadd.f32 %v18937_v0, %v6387_v63  ;;  %14523 = vmatprep.mubr.f32.mxu1 %v6703_v14 }
 0x587   :  { %v6706_v62 = vmax.f32 %v6642_v34, 0.0  ;;  %14524 = vmatmul.mubr.f32.gmra.mrb[28].mxu1 %v6704_v2 }
 0x588   :  { %v6705_v46 = vmax.f32 %v6641_v1, 0.0  ;;  %v14400_v5 = vpop.f32.mrb[36].mxu0 }
 0x589   :  { %6771 = vst [vmem:[#allocation3 + $0x1e9] sm:$0xff] %v6706_v62  ;;  %v6644_v7 = vadd.f32 %v14400_v5, %v18937_v0  ;;  %v6397_v47 = vpop.f32.mrb[37].mxu0 }
 0x58a   :  { %6770 = vst [vmem:[#allocation3 + $0x1e1] sm:$0xff] %v6705_v46  ;;  %v6643_v6 = vadd.f32 %v18937_v0, %v6397_v47  ;;  %14526 = vmatprep.mubr.f32.mxu1 %v6705_v46 }
 0x58b   :  { %v6708_v11 = vmax.f32 %v6644_v7, 0.0  ;;  %14527 = vmatmul.mubr.f32.gmra.mrb[30].mxu1 %v6706_v62 }
 0x58c   :  { %v6707_v12 = vmax.f32 %v6643_v6, 0.0  ;;  %v14403_v3 = vpop.f32.mrb[38].mxu0 }
 0x58d   :  { %6773 = vst [vmem:[#allocation3 + $0x201] sm:$0xff] %v6708_v11  ;;  %v6646_v8 = vadd.f32 %v14403_v3, %v18937_v0  ;;  %v6407_v10 = vpop.f32.mrb[39].mxu0 }
 0x58e   :  { %6772 = vst [vmem:[#allocation3 + $0x1f9] sm:$0xff] %v6707_v12  ;;  %v6645_v13 = vadd.f32 %v18937_v0, %v6407_v10  ;;  %14529 = vmatprep.mubr.f32.mxu1 %v6707_v12 }
 0x58f   :  { %v6710_v15 = vmax.f32 %v6646_v8, 0.0  ;;  %14530 = vmatmul.mubr.f32.gmra.mrb[32].mxu1 %v6708_v11 }
 0x590   :  { %v6709_v16 = vmax.f32 %v6645_v13, 0.0  ;;  %v14406_v17 = vpop.f32.mrb[40].mxu0 }
 0x591   :  { %6775 = vst [vmem:[#allocation3 + $0x219] sm:$0xff] %v6710_v15  ;;  %v6648_v18 = vadd.f32 %v14406_v17, %v18937_v0  ;;  %v6417_v19 = vpop.f32.mrb[41].mxu0 }
 0x592   :  { %6774 = vst [vmem:[#allocation3 + $0x211] sm:$0xff] %v6709_v16  ;;  %v6647_v21 = vadd.f32 %v18937_v0, %v6417_v19  ;;  %14532 = vmatprep.mubr.f32.mxu1 %v6709_v16 }
 0x593   :  { %v6712_v22 = vmax.f32 %v6648_v18, 0.0  ;;  %14533 = vmatmul.mubr.f32.gmra.mrb[34].mxu1 %v6710_v15 }
 0x594   :  { %v6711_v9 = vmax.f32 %v6647_v21, 0.0  ;;  %v14409_v23 = vpop.f32.mrb[42].mxu0 }
 0x595   :  { %6777 = vst [vmem:[#allocation3 + $0x231] sm:$0xff] %v6712_v22  ;;  %v6650_v24 = vadd.f32 %v14409_v23, %v18937_v0  ;;  %v6427_v25 = vpop.f32.mrb[43].mxu0 }
 0x596   :  { %6776 = vst [vmem:[#allocation3 + $0x229] sm:$0xff] %v6711_v9  ;;  %v6649_v26 = vadd.f32 %v18937_v0, %v6427_v25  ;;  %14535 = vmatprep.mubr.f32.mxu1 %v6711_v9 }
 0x597   :  { %v6714_v27 = vmax.f32 %v6650_v24, 0.0  ;;  %14536 = vmatmul.mubr.f32.gmra.mrb[36].mxu1 %v6712_v22  ;;  %v6800_v24 = vld [vmem:[#allocation3] sm:$0xff] }
 0x598   :  { %v6713_v28 = vmax.f32 %v6649_v26, 0.0  ;;  %v14412_v29 = vpop.f32.mrb[44].mxu0  ;;  %v7798_v26 = vld [vmem:[#allocation4 + $0x110] sm:$0xff] }
 0x599   :  { %6779 = vst [vmem:[#allocation3 + $0x249] sm:$0xff] %v6714_v27  ;;  %v6652_v30 = vadd.f32 %v14412_v29, %v18937_v0  ;;  %v6437_v31 = vpop.f32.mrb[45].mxu0 }
 0x59a   :  { %6778 = vst [vmem:[#allocation3 + $0x241] sm:$0xff] %v6713_v28  ;;  %v6651_v32 = vadd.f32 %v18937_v0, %v6437_v31  ;;  %14538 = vmatprep.mubr.f32.mxu1 %v6713_v28 }
 0x59b   :  { %v6716_v35 = vmax.f32 %v6652_v30, 0.0  ;;  %14539 = vmatmul.mubr.f32.gmra.mrb[38].mxu1 %v6714_v27  ;;  %v7799_v27 = vld [vmem:[#allocation4 + $0x118] sm:$0xff] }
 0x59c   :  { %v6715_v36 = vmax.f32 %v6651_v32, 0.0  ;;  %v14415_v37 = vpop.f32.mrb[46].mxu0  ;;  %v15660_v31 = vpack.c.bf16 %v7799_v27, %v7798_v26  ;;  %v19120_v26 = vld [vmem:[#allocation3 + $0x1f8] sm:$0xff]  ;;  %v19123_v27 = vld [vmem:[#allocation3 + $0x200] sm:$0xff] }
 0x59d   :  { %6781 = vst [vmem:[#allocation3 + $0x261] sm:$0xff] %v6716_v35  ;;  %v6654_v38 = vadd.f32 %v14415_v37, %v18937_v0  ;;  %v6447_v39 = vpop.f32.mrb[47].mxu0  ;;  %v19010_v37 = vld [vmem:[#allocation3 + $0x8] sm:$0xff] }
 0x59e   :  { %6780 = vst [vmem:[#allocation3 + $0x259] sm:$0xff] %v6715_v36  ;;  %v6653_v40 = vadd.f32 %v18937_v0, %v6447_v39  ;;  %14541 = vmatprep.mubr.f32.mxu1 %v6715_v36  ;;  %v7801_v36 = vld [vmem:[#allocation4 + $0x128] sm:$0xff]  ;;  %v19017_v39 = vld [vmem:[#allocation3 + $0x20] sm:$0xff] }
 0x59f   :  { %v6718_v41 = vmax.f32 %v6654_v38, 0.0  ;;  %14542 = vmatmul.mubr.f32.gmra.mrb[40].mxu1 %v6716_v35  ;;  %v7800_v35 = vld [vmem:[#allocation4 + $0x120] sm:$0xff] }
 0x5a0   :  { %v6717_v42 = vmax.f32 %v6653_v40, 0.0  ;;  %v14418_v43 = vpop.f32.mrb[48].mxu0  ;;  %v15664_v38 = vpack.c.bf16 %v7801_v36, %v7800_v35  ;;  %v7802_v40 = vld [vmem:[#allocation4 + $0x130] sm:$0xff] }
 0x5a1   :  { %6783 = vst [vmem:[#allocation3 + $0x279] sm:$0xff] %v6718_v41  ;;  %v6656_v44 = vadd.f32 %v14418_v43, %v18937_v0  ;;  %v6457_v45 = vpop.f32.mrb[49].mxu0  ;;  %v19135_v35 = vld [vmem:[#allocation3 + $0x230] sm:$0xff]  ;;  %v19138_v36 = vld [vmem:[#allocation3 + $0x240] sm:$0xff] }
 0x5a2   :  { %6782 = vst [vmem:[#allocation3 + $0x271] sm:$0xff] %v6717_v42  ;;  %v6655_v48 = vadd.f32 %v18937_v0, %v6457_v45  ;;  %14544 = vmatprep.mubr.f32.mxu1 %v6717_v42  ;;  %v19020_v42 = vld [vmem:[#allocation3 + $0x30] sm:$0xff]  ;;  %v7805_v45 = vld [vmem:[#allocation4 + $0x148] sm:$0xff] }
 0x5a3   :  { %v6720_v49 = vmax.f32 %v6656_v44, 0.0  ;;  %14545 = vmatmul.mubr.f32.gmra.mrb[42].mxu1 %v6718_v41  ;;  %v7803_v41 = vld [vmem:[#allocation4 + $0x138] sm:$0xff] }
 0x5a4   :  { %v6719_v50 = vmax.f32 %v6655_v48, 0.0  ;;  %v14421_v51 = vpop.f32.mrb[50].mxu0  ;;  %v15668_v43 = vpack.c.bf16 %v7803_v41, %v7802_v40  ;;  %v19023_v44 = vld [vmem:[#allocation3 + $0x38] sm:$0xff]  ;;  %v19026_v48 = vld [vmem:[#allocation3 + $0x48] sm:$0xff] }
 0x5a5   :  { %6785 = vst [vmem:[#allocation3 + $0x291] sm:$0xff] %v6720_v49  ;;  %v6658_v52 = vadd.f32 %v14421_v51, %v18937_v0  ;;  %v6467_v53 = vpop.f32.mrb[51].mxu0  ;;  %v7806_v51 = vld [vmem:[#allocation4 + $0x150] sm:$0xff]  ;;  %v19148_v41 = vld [vmem:[#allocation3 + $0x258] sm:$0xff] }
 0x5a6   :  { %6784 = vst [vmem:[#allocation3 + $0x289] sm:$0xff] %v6719_v50  ;;  %v6657_v54 = vadd.f32 %v18937_v0, %v6467_v53  ;;  %14547 = vmatprep.mubr.f32.mxu1 %v6719_v50  ;;  %v19029_v50 = vld [vmem:[#allocation3 + $0x50] sm:$0xff]  ;;  %v19032_v53 = vld [vmem:[#allocation3 + $0x60] sm:$0xff] }
 0x5a7   :  { %v6722_v55 = vmax.f32 %v6658_v52, 0.0  ;;  %14548 = vmatmul.mubr.f32.gmra.mrb[44].mxu1 %v6720_v49  ;;  %v7807_v52 = vld [vmem:[#allocation4 + $0x158] sm:$0xff] }
 0x5a8   :  { %v6721_v56 = vmax.f32 %v6657_v54, 0.0  ;;  %v14424_v57 = vpop.f32.mrb[52].mxu0  ;;  %v15676_v54 = vpack.c.bf16 %v7807_v52, %v7806_v51 }
 0x5a9   :  { %6787 = vst [vmem:[#allocation3 + $0x2a9] sm:$0xff] %v6722_v55  ;;  %v6660_v58 = vadd.f32 %v14424_v57, %v18937_v0  ;;  %v6477_v59 = vpop.f32.mrb[53].mxu0  ;;  %v7809_v57 = vld [vmem:[#allocation4 + $0x168] sm:$0xff]  ;;  %v19161_v51 = vld [vmem:[#allocation3 + $0x278] sm:$0xff] }
 0x5aa   :  { %6786 = vst [vmem:[#allocation3 + $0x2a1] sm:$0xff] %v6721_v56  ;;  %v6659_v60 = vadd.f32 %v18937_v0, %v6477_v59  ;;  %14550 = vmatprep.mubr.f32.mxu1 %v6721_v56  ;;  %v7808_v56 = vld [vmem:[#allocation4 + $0x160] sm:$0xff] }
 0x5ab   :  { %v6724_v61 = vmax.f32 %v6660_v58, 0.0  ;;  %14551 = vmatmul.mubr.f32.gmra.mrb[46].mxu1 %v6722_v55  ;;  %v19035_v55 = vld [vmem:[#allocation3 + $0x68] sm:$0xff]  ;;  %v19038_v58 = vld [vmem:[#allocation3 + $0x78] sm:$0xff]  ;;  %v15680_v59 = vpack.c.bf16 %v7809_v57, %v7808_v56 }
 0x5ac   :  { %v6723_v33 = vmax.f32 %v6659_v60, 0.0  ;;  %v14427_v2 = vpop.f32.mrb[54].mxu0  ;;  %v19041_v60 = vld [vmem:[#allocation3 + $0x80] sm:$0xff] }
 0x5ad   :  { %6789 = vst [vmem:[#allocation3 + $0x2c1] sm:$0xff] %v6724_v61  ;;  %v6662_v14 = vadd.f32 %v14427_v2, %v18937_v0  ;;  %v6487_v4 = vpop.f32.mrb[55].mxu0  ;;  %v19044_v2 = vld [vmem:[#allocation3 + $0x90] sm:$0xff]  ;;  %v19164_v52 = vld [vmem:[#allocation3 + $0x288] sm:$0xff] }
 0x5ae   :  { %6788 = vst [vmem:[#allocation3 + $0x2b9] sm:$0xff] %v6723_v33  ;;  %v6661_v34 = vadd.f32 %v18937_v0, %v6487_v4  ;;  %14553 = vmatprep.mubr.f32.mxu1 %v6723_v33  ;;  %v7811_v33 = vld [vmem:[#allocation4 + $0x178] sm:$0xff] }
 0x5af   :  { %v6726_v63 = vmax.f32 %v6662_v14, 0.0  ;;  %14554 = vmatmul.mubr.f32.gmra.mrb[48].mxu1 %v6724_v61  ;;  %v7810_v61 = vld [vmem:[#allocation4 + $0x170] sm:$0xff]  ;;  %v19047_v4 = vld [vmem:[#allocation3 + $0x98] sm:$0xff] }
 0x5b0   :  { %v6725_v1 = vmax.f32 %v6661_v34, 0.0  ;;  %v14430_v62 = vpop.f32.mrb[56].mxu0  ;;  %v15684_v14 = vpack.c.bf16 %v7811_v33, %v7810_v61  ;;  %v8326_v34 = vld [vmem:[#allocation4 + $0x180] sm:$0xff] }
 0x5b1   :  { %6791 = vst [vmem:[#allocation3 + $0x2d9] sm:$0xff] %v6726_v63  ;;  %v6664_v46 = vadd.f32 %v14430_v62, %v18937_v0  ;;  %v6497_v5 = vpop.f32.mrb[57].mxu0  ;;  %v19170_v56 = vld [vmem:[#allocation3 + $0x2a0] sm:$0xff]  ;;  %v19173_v57 = vld [vmem:[#allocation3 + $0x2a8] sm:$0xff] }
 0x5b2   :  { %6790 = vst [vmem:[#allocation3 + $0x2d1] sm:$0xff] %v6725_v1  ;;  %v6663_v7 = vadd.f32 %v18937_v0, %v6497_v5  ;;  %14556 = vmatprep.mubr.f32.mxu1 %v6725_v1  ;;  %v19050_v1 = vld [vmem:[#allocation3 + $0xa8] sm:$0xff]  ;;  %v19058_v5 = vld [vmem:[#allocation3 + $0xc0] sm:$0xff] }
 0x5b3   :  { %v6728_v47 = vmax.f32 %v6664_v46, 0.0  ;;  %14557 = vmatmul.mubr.f32.gmra.mrb[50].mxu1 %v6726_v63  ;;  %v8327_v63 = vld [vmem:[#allocation4 + $0x188] sm:$0xff]  ;;  %v19055_v46 = vld [vmem:[#allocation3 + $0xb0] sm:$0xff] }
 0x5b4   :  { %v6727_v6 = vmax.f32 %v6663_v7, 0.0  ;;  %v14433_v11 = vpop.f32.mrb[58].mxu0  ;;  %v19053_v62 = vpack.c.bf16 %v8327_v63, %v8326_v34  ;;  %v19062_v7 = vld [vmem:[#allocation3 + $0xc8] sm:$0xff] }
 0x5b5   :  { %6793 = vst [vmem:[#allocation3 + $0x2f1] sm:$0xff] %v6728_v47  ;;  %v6666_v12 = vadd.f32 %v14433_v11, %v18937_v0  ;;  %v6507_v3 = vpop.f32.mrb[59].mxu0  ;;  %v19071_v11 = vld [vmem:[#allocation3 + $0xf0] sm:$0xff]  ;;  %v19179_v61 = vld [vmem:[#allocation3 + $0x2c0] sm:$0xff] }
 0x5b6   :  { %6792 = vst [vmem:[#allocation3 + $0x2e9] sm:$0xff] %v6727_v6  ;;  %v6665_v8 = vadd.f32 %v18937_v0, %v6507_v3  ;;  %14559 = vmatprep.mubr.f32.mxu1 %v6727_v6  ;;  %v19068_v6 = vld [vmem:[#allocation3 + $0xe0] sm:$0xff]  ;;  %v19077_v3 = vld [vmem:[#allocation3 + $0x108] sm:$0xff]  ;;  %20213 = vst [vmem:[#allocation22_spill] sm:$0xff] %v19179_v61 }
 0x5b7   :  { %v6730_v10 = vmax.f32 %v6666_v12, 0.0  ;;  %14560 = vmatmul.mubr.f32.gmra.mrb[52].mxu1 %v6728_v47  ;;  %v19065_v47 = vld [vmem:[#allocation3 + $0xd8] sm:$0xff] }
 0x5b8   :  { %v6729_v13 = vmax.f32 %v6665_v8, 0.0  ;;  %v14436_v15 = vpop.f32.mrb[60].mxu0  ;;  %v19074_v12 = vld [vmem:[#allocation3 + $0xf8] sm:$0xff]  ;;  %v19080_v8 = vld [vmem:[#allocation3 + $0x110] sm:$0xff] }
 0x5b9   :  { %6795 = vst [vmem:[#allocation3 + $0x309] sm:$0xff] %v6730_v10  ;;  %v6668_v16 = vadd.f32 %v14436_v15, %v18937_v0  ;;  %v6517_v17 = vpop.f32.mrb[61].mxu0  ;;  %v19089_v15 = vld [vmem:[#allocation3 + $0x138] sm:$0xff]  ;;  %v19182_v33 = vld [vmem:[#allocation3 + $0x2d0] sm:$0xff] }
 0x5ba   :  { %6794 = vst [vmem:[#allocation3 + $0x301] sm:$0xff] %v6729_v13  ;;  %v6667_v18 = vadd.f32 %v18937_v0, %v6517_v17  ;;  %14562 = vmatprep.mubr.f32.mxu1 %v6729_v13  ;;  %v19086_v13 = vld [vmem:[#allocation3 + $0x128] sm:$0xff]  ;;  %v19095_v17 = vld [vmem:[#allocation3 + $0x150] sm:$0xff]  ;;  %20214 = vst [vmem:[#allocation23_spill] sm:$0xff] %v19182_v33 }
 0x5bb   :  { %v6732_v19 = vmax.f32 %v6668_v16, 0.0  ;;  %14563 = vmatmul.mubr.f32.gmra.mrb[54].mxu1 %v6730_v10  ;;  %v19083_v10 = vld [vmem:[#allocation3 + $0x120] sm:$0xff] }
 0x5bc   :  { %v6731_v21 = vmax.f32 %v6667_v18, 0.0  ;;  %v14439_v22 = vpop.f32.mrb[62].mxu0  ;;  %v19092_v16 = vld [vmem:[#allocation3 + $0x140] sm:$0xff]  ;;  %v19098_v18 = vld [vmem:[#allocation3 + $0x158] sm:$0xff] }
 0x5bd   :  { %6797 = vst [vmem:[#allocation3 + $0x321] sm:$0xff] %v6732_v19  ;;  %v6670_v9 = vadd.f32 %v14439_v22, %v18937_v0  ;;  %v6527_v23 = vpop.f32.mrb[63].mxu0  ;;  %v19104_v22 = vld [vmem:[#allocation3 + $0x170] sm:$0xff]  ;;  %v19188_v34 = vld [vmem:[#allocation3 + $0x2e8] sm:$0xff] }
 0x5be   :  { %6796 = vst [vmem:[#allocation3 + $0x319] sm:$0xff] %v6731_v21  ;;  %v6669_v25 = vadd.f32 %v18937_v0, %v6527_v23  ;;  %14565 = vmatprep.mubr.f32.mxu1 %v6731_v21  ;;  %v19013_v0 = vld [vmem:[#allocation3 + $0x18] sm:$0xff]  ;;  %v6832_v21 = vld [vmem:[#allocation3 + $0x1b0] sm:$0xff]  ;;  %20216 = vst [vmem:[#allocation25_spill] sm:$0xff] %v19188_v34 }
 0x5bf   :  { %v6734_v28 = vmax.f32 %v6670_v9, 0.0  ;;  %14566 = vmatmul.mubr.f32.gmra.mrb[56].mxu1 %v6732_v19  ;;  %v19101_v19 = vld [vmem:[#allocation3 + $0x168] sm:$0xff]  ;;  %v19111_v23 = vld [vmem:[#allocation3 + $0x1d0] sm:$0xff] }
 0x5c0   :  { %v6733_v29 = vmax.f32 %v6669_v25, 0.0  ;;  %14600 = vmatprep.mubr.f32.mxu1 %v6800_v24  ;;  %v19006_v30 = vpop.f32.mrb[64].mxu0  ;;  %v19108_v9 = vld [vmem:[#allocation3 + $0x1c8] sm:$0xff]  ;;  %v19114_v24 = vld [vmem:[#allocation3 + $0x1e0] sm:$0xff]  ;;  %v19191_v63 = vld [vmem:[#allocation3 + $0x2f0] sm:$0xff] }
 0x5c1   :  { %20206 = vst [vmem:[#allocation15_spill] sm:$0xff] %v19006_v30  ;;  %6799 = vst [vmem:[#allocation3 + $0x339] sm:$0xff] %v6734_v28  ;;  %v19008_v32 = vpop.f32.mrb[65].mxu0  ;;  %v19117_v25 = vld [vmem:[#allocation3 + $0x1e8] sm:$0xff]  ;;  %v19126_v28 = vld [vmem:[#allocation3 + $0x210] sm:$0xff] }
 0x5c2   :  { %20207 = vst [vmem:[#allocation16_spill] sm:$0xff] %v19008_v32  ;;  %6798 = vst [vmem:[#allocation3 + $0x331] sm:$0xff] %v6733_v29  ;;  %v19129_v29 = vld [vmem:[#allocation3 + $0x218] sm:$0xff]  ;;  %v8328_v32 = vld [vmem:[#allocation4 + $0x190] sm:$0xff] }
 0x5c3   :  { %14601 = vmatmul.mubr.f32.vlgmr.msra.gmra.mrb[58].mxu1 %v19010_v37  ;;  %20217 = vst [vmem:[#allocation26_spill] sm:$0xff] %v19191_v63  ;;  %v8329_v30 = vld [vmem:[#allocation4 + $0x198] sm:$0xff] }
 0x5c4   :  { %15659 = vmatpush3.bf16.msra.mxu1 %v18960_v20  ;;  %14603 = vmatprep.mubr.f32.mxu1 %v19013_v0  ;;  %v7804_v20 = vld [vmem:[#allocation4 + $0x140] sm:$0xff] }
 0x5c5   :  { %15661 = vmatprep.subr.bf16.mxu1 %v15660_v31  ;;  %v15672_v49 = vpack.c.bf16 %v7805_v45, %v7804_v20  ;;  %v19153_v20 = vld [vmem:[#allocation3 + $0x260] sm:$0xff] }
 0x5c7   :  { %14604 = vmatmul.mubr.f32.gmra.mrb[60].mxu1 %v19017_v39 }
 0x5c8   :  { %14606 = vmatprep.mubr.f32.mxu1 %v19020_v42  ;;  %15663 = vmatpush3.bf16.msra.mxu1 %v15660_v31  ;;  %v19132_v31 = vld [vmem:[#allocation3 + $0x228] sm:$0xff] }
 0x5c9   :  { %15665 = vmatprep.subr.bf16.mxu1 %v15664_v38 }
 0x5cb   :  { %14607 = vmatmul.mubr.f32.gmra.mrb[62].mxu1 %v19023_v44 }
 0x5cc   :  { %14609 = vmatprep.mubr.f32.mxu1 %v19026_v48  ;;  %15667 = vmatpush3.bf16.msra.mxu1 %v15664_v38  ;;  %v19143_v38 = vld [vmem:[#allocation3 + $0x248] sm:$0xff] }
 0x5cd   :  { %15669 = vmatprep.subr.bf16.mxu1 %v15668_v43 }
 0x5cf   :  { %14610 = vmatmul.mubr.f32.gmra.mrb[0].mxu1 %v19029_v50 }
 0x5d0   :  { %14612 = vmatprep.mubr.f32.mxu1 %v19032_v53  ;;  %15671 = vmatpush3.bf16.msra.mxu1 %v15668_v43 }
 0x5d1   :  { %15673 = vmatprep.subr.bf16.mxu1 %v15672_v49 }
 0x5d3   :  { %14613 = vmatmul.mubr.f32.gmra.mrb[2].mxu1 %v19035_v55 }
 0x5d4   :  { %14615 = vmatprep.mubr.f32.mxu1 %v19038_v58  ;;  %15675 = vmatpush3.bf16.msra.mxu1 %v15672_v49  ;;  %v19158_v49 = vld [vmem:[#allocation3 + $0x270] sm:$0xff] }
 0x5d5   :  { %15677 = vmatprep.subr.bf16.mxu1 %v15676_v54 }
 0x5d7   :  { %14616 = vmatmul.mubr.f32.gmra.mrb[4].mxu1 %v19041_v60 }
 0x5d8   :  { %14618 = vmatprep.mubr.f32.mxu1 %v19044_v2  ;;  %15679 = vmatpush3.bf16.msra.mxu1 %v15676_v54  ;;  %v19167_v54 = vld [vmem:[#allocation3 + $0x290] sm:$0xff] }
 0x5d9   :  { %15681 = vmatprep.subr.bf16.mxu1 %v15680_v59 }
 0x5db   :  { %14619 = vmatmul.mubr.f32.gmra.mrb[6].mxu1 %v19047_v4 }
 0x5dc   :  { %14621 = vmatprep.mubr.f32.mxu1 %v19050_v1  ;;  %15683 = vmatpush3.bf16.msra.mxu1 %v15680_v59  ;;  %v19176_v59 = vld [vmem:[#allocation3 + $0x2b8] sm:$0xff] }
 0x5dd   :  { %15685 = vmatprep.subr.bf16.mxu1 %v15684_v14  ;;  %20212 = vst [vmem:[#allocation21_spill] sm:$0xff] %v19176_v59 }
 0x5df   :  { %14622 = vmatmul.mubr.f32.gmra.mrb[8].mxu1 %v19055_v46 }
 0x5e0   :  { %14624 = vmatprep.mubr.f32.mxu1 %v19058_v5  ;;  %15687 = vmatpush3.bf16.msra.mxu1 %v15684_v14  ;;  %v19185_v14 = vld [vmem:[#allocation3 + $0x2d8] sm:$0xff] }
 0x5e1   :  { %15689 = vmatprep.subr.bf16.mxu1 %v19053_v62  ;;  %20215 = vst [vmem:[#allocation24_spill] sm:$0xff] %v19185_v14 }
 0x5e3   :  { %14625 = vmatmul.mubr.f32.gmra.mrb[10].mxu1 %v19062_v7 }
 0x5e4   :  { %14627 = vmatprep.mubr.f32.mxu1 %v19065_v47 }
 0x5e7   :  { %14628 = vmatmul.mubr.f32.gmra.mrb[12].mxu1 %v19068_v6 }
 0x5e8   :  { %14630 = vmatprep.mubr.f32.mxu1 %v19071_v11 }
 0x5eb   :  { %14631 = vmatmul.mubr.f32.gmra.mrb[14].mxu1 %v19074_v12 }
 0x5ec   :  { %14633 = vmatprep.mubr.f32.mxu1 %v19077_v3 }
 0x5ef   :  { %14634 = vmatmul.mubr.f32.gmra.mrb[16].mxu1 %v19080_v8 }
 0x5f0   :  { %14636 = vmatprep.mubr.f32.mxu1 %v19083_v10 }
 0x5f3   :  { %14637 = vmatmul.mubr.f32.gmra.mrb[18].mxu1 %v19086_v13 }
 0x5f4   :  { %14639 = vmatprep.mubr.f32.mxu1 %v19089_v15 }
 0x5f7   :  { %14640 = vmatmul.mubr.f32.gmra.mrb[20].mxu1 %v19092_v16 }
 0x5f8   :  { %14642 = vmatprep.mubr.f32.mxu1 %v19095_v17 }
 0x5fb   :  { %14643 = vmatmul.mubr.f32.gmra.mrb[22].mxu1 %v19098_v18 }
 0x5fc   :  { %14645 = vmatprep.mubr.f32.mxu1 %v19101_v19 }
 0x5ff   :  { %14646 = vmatmul.mubr.f32.gmra.mrb[24].mxu1 %v19104_v22 }
 0x600   :  { %14648 = vmatprep.mubr.f32.mxu1 %v6832_v21  ;;  %v19194_v21 = vld [vmem:[#allocation3 + $0x300] sm:$0xff] }
 0x601   :  { %20218 = vst [vmem:[#allocation27_spill] sm:$0xff] %v19194_v21 }
 0x603   :  { %14649 = vmatmul.mubr.f32.gmra.mrb[26].mxu1 %v19010_v37 }
 0x604   :  { %14651 = vmatprep.mubr.f32.mxu1 %v19108_v9 }
 0x607   :  { %14652 = vmatmul.mubr.f32.gmra.mrb[28].mxu1 %v19111_v23 }
 0x608   :  { %14654 = vmatprep.mubr.f32.mxu1 %v19114_v24 }
 0x60b   :  { %14655 = vmatmul.mubr.f32.gmra.mrb[30].mxu1 %v19117_v25 }
 0x60c   :  { %14657 = vmatprep.mubr.f32.mxu1 %v19120_v26 }
 0x60f   :  { %14658 = vmatmul.mubr.f32.gmra.mrb[32].mxu1 %v19123_v27 }
 0x610   :  { %14660 = vmatprep.mubr.f32.mxu1 %v19126_v28 }
 0x613   :  { %14661 = vmatmul.mubr.f32.gmra.mrb[34].mxu1 %v19129_v29 }
 0x614   :  { %14663 = vmatprep.mubr.f32.mxu1 %v19132_v31 }
 0x617   :  { %14664 = vmatmul.mubr.f32.gmra.mrb[36].mxu1 %v19135_v35 }
 0x618   :  { %14666 = vmatprep.mubr.f32.mxu1 %v19138_v36 }
 0x61a   :  { %v19141_v37 = vpop.f32.mrb[66].mxu0 }
 0x61b   :  { %20208 = vst [vmem:[#allocation17_spill] sm:$0xff] %v19141_v37  ;;  %v19145_v40 = vpop.f32.mrb[67].mxu0  ;;  %14667 = vmatmul.mubr.f32.gmra.mrb[38].mxu1 %v19143_v38  ;;  %v19203_v37 = vld [vmem:[#allocation3 + $0x320] sm:$0xff] }
 0x61c   :  { %20209 = vst [vmem:[#allocation18_spill] sm:$0xff] %v19145_v40  ;;  %14669 = vmatprep.mubr.f32.mxu1 %v19148_v41  ;;  %v7731_v40 = vld [vmem:[#allocation3 + $0x2] sm:$0xff] }
 0x61e   :  { %v19151_v43 = vpop.f32.mrb[68].mxu0 }
 0x61f   :  { %20210 = vst [vmem:[#allocation19_spill] sm:$0xff] %v19151_v43  ;;  %v19155_v45 = vpop.f32.mrb[69].mxu0  ;;  %14670 = vmatmul.mubr.f32.gmra.mrb[40].mxu1 %v19153_v20  ;;  %v19200_v43 = vld [vmem:[#allocation3 + $0x318] sm:$0xff] }
 0x620   :  { %20211 = vst [vmem:[#allocation20_spill] sm:$0xff] %v19155_v45  ;;  %14672 = vmatprep.mubr.f32.mxu1 %v19158_v49  ;;  %v19197_v45 = vld [vmem:[#allocation3 + $0x308] sm:$0xff]  ;;  %20220 = vst [vmem:[#allocation29_spill] sm:$0xff] %v19200_v43 }
 0x621   :  { %20219 = vst [vmem:[#allocation28_spill] sm:$0xff] %v19197_v45 }
 0x623   :  { %14673 = vmatmul.mubr.f32.gmra.mrb[42].mxu1 %v19161_v51 }
 0x624   :  { %14675 = vmatprep.mubr.f32.mxu1 %v19164_v52 }
 0x627   :  { %14676 = vmatmul.mubr.f32.gmra.mrb[44].mxu1 %v19167_v54 }
 0x628   :  { %14678 = vmatprep.mubr.f32.mxu1 %v19170_v56 }
 0x62b   :  { %14679 = vmatmul.mubr.f32.gmra.mrb[46].mxu1 %v19173_v57 }
 0x62c   :  { %14681 = vmatprep.mubr.f32.mxu1 %v19176_v59  ;;  %v8333_v59 = vld [vmem:[#allocation4 + $0x1b8] sm:$0xff] }
 0x62f   :  { %14682 = vmatmul.mubr.f32.gmra.mrb[48].mxu1 %v19179_v61  ;;  %v8332_v61 = vld [vmem:[#allocation4 + $0x1b0] sm:$0xff] }
 0x630   :  { %14684 = vmatprep.mubr.f32.mxu1 %v19182_v33  ;;  %v19206_v33 = vld [vmem:[#allocation3 + $0x1a] sm:$0xff] }
 0x631   :  { %20221 = vst [vmem:[#allocation30_spill] sm:$0xff] %v19206_v33 }
 0x633   :  { %14685 = vmatmul.mubr.f32.gmra.mrb[50].mxu1 %v19185_v14  ;;  %v8330_v14 = vld [vmem:[#allocation4 + $0x1a0] sm:$0xff] }
 0x634   :  { %14687 = vmatprep.mubr.f32.mxu1 %v19188_v34  ;;  %v15692_v34 = vpack.c.bf16 %v8329_v30, %v8328_v32  ;;  %v15700_v30 = vpack.c.bf16 %v8333_v59, %v8332_v61  ;;  %v19216_v32 = vld [vmem:[#allocation3 + $0x3a] sm:$0xff]  ;;  %v19225_v59 = vld [vmem:[#allocation3 + $0x62] sm:$0xff] }
 0x635   :  { %20224 = vst [vmem:[#allocation33_spill] sm:$0xff] %v19216_v32  ;;  %20227 = vst [vmem:[#allocation36_spill] sm:$0xff] %v19225_v59 }
 0x637   :  { %14688 = vmatmul.mubr.f32.gmra.mrb[52].mxu1 %v19191_v63  ;;  %v7732_v63 = vld [vmem:[#allocation3 + $0xa] sm:$0xff] }
 0x638   :  { %14690 = vmatprep.mubr.f32.mxu1 %v19194_v21  ;;  %v8331_v21 = vld [vmem:[#allocation4 + $0x1a8] sm:$0xff] }
 0x63b   :  { %14691 = vmatmul.mubr.f32.gmra.mrb[54].mxu1 %v19197_v45  ;;  %v19210_v45 = vld [vmem:[#allocation3 + $0x22] sm:$0xff] }
 0x63c   :  { %14693 = vmatprep.mubr.f32.mxu1 %v19200_v43  ;;  %v15696_v43 = vpack.c.bf16 %v8331_v21, %v8330_v14  ;;  %20222 = vst [vmem:[#allocation31_spill] sm:$0xff] %v19210_v45  ;;  %v19219_v14 = vld [vmem:[#allocation3 + $0x4a] sm:$0xff] }
 0x63d   :  { %20225 = vst [vmem:[#allocation34_spill] sm:$0xff] %v19219_v14 }
 0x63f   :  { %14694 = vmatmul.mubr.f32.gmra.mrb[56].mxu1 %v19203_v37 }
 0x640   :  { %14728 = vmatprep.mubr.f32.mxu1 %v7731_v40  ;;  %v19213_v40 = vld [vmem:[#allocation3 + $0x32] sm:$0xff] }
 0x641   :  { %20223 = vst [vmem:[#allocation32_spill] sm:$0xff] %v19213_v40 }
 0x643   :  { %14729 = vmatmul.mubr.f32.vlgmr.msra.gmra.mrb[58].mxu1 %v7732_v63  ;;  %v8335_v63 = vld [vmem:[#allocation4 + $0x1c8] sm:$0xff] }
 0x644   :  { %15691 = vmatpush3.bf16.msra.mxu1 %v19053_v62  ;;  %14731 = vmatprep.mubr.f32.mxu1 %v19206_v33  ;;  %v8334_v62 = vld [vmem:[#allocation4 + $0x1c0] sm:$0xff]  ;;  %v8336_v33 = vld [vmem:[#allocation4 + $0x1d0] sm:$0xff] }
 0x645   :  { %15693 = vmatprep.subr.bf16.mxu1 %v15692_v34  ;;  %v15704_v21 = vpack.c.bf16 %v8335_v63, %v8334_v62  ;;  %v19234_v63 = vld [vmem:[#allocation3 + $0x82] sm:$0xff] }
 0x647   :  { %14732 = vmatmul.mubr.f32.gmra.mrb[60].mxu1 %v19210_v45  ;;  %v19222_v45 = vld [vmem:[#allocation3 + $0x52] sm:$0xff] }
 0x648   :  { %14734 = vmatprep.mubr.f32.mxu1 %v19213_v40  ;;  %15695 = vmatpush3.bf16.msra.mxu1 %v15692_v34  ;;  %20226 = vst [vmem:[#allocation35_spill] sm:$0xff] %v19222_v45  ;;  %v8337_v40 = vld [vmem:[#allocation4 + $0x1d8] sm:$0xff]  ;;  %v19228_v34 = vld [vmem:[#allocation3 + $0x6a] sm:$0xff] }
 0x649   :  { %15697 = vmatprep.subr.bf16.mxu1 %v15696_v43  ;;  %v15708_v61 = vpack.c.bf16 %v8337_v40, %v8336_v33  ;;  %20228 = vst [vmem:[#allocation37_spill] sm:$0xff] %v19228_v34  ;;  %v19237_v33 = vld [vmem:[#allocation3 + $0x92] sm:$0xff] }
 0x64b   :  { %14735 = vmatmul.mubr.f32.gmra.mrb[62].mxu1 %v19216_v32  ;;  %v8338_v32 = vld [vmem:[#allocation4 + $0x1e0] sm:$0xff] }
 0x64c   :  { %14737 = vmatprep.mubr.f32.mxu1 %v19219_v14  ;;  %15699 = vmatpush3.bf16.msra.mxu1 %v15696_v43  ;;  %v8339_v14 = vld [vmem:[#allocation4 + $0x1e8] sm:$0xff]  ;;  %v19231_v43 = vld [vmem:[#allocation3 + $0x7a] sm:$0xff] }
 0x64d   :  { %15701 = vmatprep.subr.bf16.mxu1 %v15700_v30  ;;  %20229 = vst [vmem:[#allocation38_spill] sm:$0xff] %v19231_v43  ;;  %v15712_v62 = vpack.c.bf16 %v8339_v14, %v8338_v32  ;;  %v19243_v32 = vld [vmem:[#allocation3 + $0xaa] sm:$0xff] }
 0x64e   :  { %20230 = vst [vmem:[#allocation39_spill] sm:$0xff] %v19243_v32 }
 0x64f   :  { %14738 = vmatmul.mubr.f32.gmra.mrb[0].mxu1 %v19222_v45  ;;  %v8340_v45 = vld [vmem:[#allocation4 + $0x1f0] sm:$0xff] }
 0x650   :  { %14740 = vmatprep.mubr.f32.mxu1 %v19225_v59  ;;  %15703 = vmatpush3.bf16.msra.mxu1 %v15700_v30  ;;  %v8341_v59 = vld [vmem:[#allocation4 + $0x1f8] sm:$0xff] }
 0x651   :  { %15705 = vmatprep.subr.bf16.mxu1 %v15704_v21  ;;  %v15716_v40 = vpack.c.bf16 %v8341_v59, %v8340_v45  ;;  %v19240_v30 = vld [vmem:[#allocation3 + $0x9a] sm:$0xff]  ;;  %v19255_v45 = vld [vmem:[#allocation3 + $0xca] sm:$0xff] }
 0x652   :  { %20233 = vst [vmem:[#allocation42_spill] sm:$0xff] %v19255_v45  ;;  %v19258_v59 = vld [vmem:[#allocation3 + $0xda] sm:$0xff] }
 0x653   :  { %14741 = vmatmul.mubr.f32.gmra.mrb[2].mxu1 %v19228_v34  ;;  %v8856_v34 = vld [vmem:[#allocation4 + $0x200] sm:$0xff]  ;;  %20234 = vst [vmem:[#allocation43_spill] sm:$0xff] %v19258_v59 }
 0x654   :  { %14743 = vmatprep.mubr.f32.mxu1 %v19231_v43  ;;  %15707 = vmatpush3.bf16.msra.mxu1 %v15704_v21  ;;  %v8857_v43 = vld [vmem:[#allocation4 + $0x208] sm:$0xff]  ;;  %v19248_v21 = vld [vmem:[#allocation3 + $0xb2] sm:$0xff] }
 0x655   :  { %15709 = vmatprep.subr.bf16.mxu1 %v15708_v61  ;;  %v19246_v14 = vpack.c.bf16 %v8857_v43, %v8856_v34  ;;  %20231 = vst [vmem:[#allocation40_spill] sm:$0xff] %v19248_v21  ;;  %v19261_v34 = vld [vmem:[#allocation3 + $0xe2] sm:$0xff]  ;;  %v19264_v43 = vld [vmem:[#allocation3 + $0xf2] sm:$0xff] }
 0x656   :  { %20235 = vst [vmem:[#allocation44_spill] sm:$0xff] %v19261_v34  ;;  %20236 = vst [vmem:[#allocation45_spill] sm:$0xff] %v19264_v43 }
 0x657   :  { %14744 = vmatmul.mubr.f32.gmra.mrb[4].mxu1 %v19234_v63 }
 0x658   :  { %14746 = vmatprep.mubr.f32.mxu1 %v19237_v33  ;;  %15711 = vmatpush3.bf16.msra.mxu1 %v15708_v61  ;;  %v19251_v61 = vld [vmem:[#allocation3 + $0xc2] sm:$0xff] }
 0x659   :  { %15713 = vmatprep.subr.bf16.mxu1 %v15712_v62  ;;  %20232 = vst [vmem:[#allocation41_spill] sm:$0xff] %v19251_v61 }
 0x65b   :  { %14747 = vmatmul.mubr.f32.gmra.mrb[6].mxu1 %v19240_v30 }
 0x65c   :  { %14749 = vmatprep.mubr.f32.mxu1 %v19243_v32  ;;  %15715 = vmatpush3.bf16.msra.mxu1 %v15712_v62  ;;  %v19267_v62 = vld [vmem:[#allocation3 + $0xfa] sm:$0xff]  ;;  %v8861_v32 = vld [vmem:[#allocation4 + $0x228] sm:$0xff] }
 0x65d   :  { %15717 = vmatprep.subr.bf16.mxu1 %v15716_v40  ;;  %20237 = vst [vmem:[#allocation46_spill] sm:$0xff] %v19267_v62 }
 0x65f   :  { %14750 = vmatmul.mubr.f32.gmra.mrb[8].mxu1 %v19248_v21  ;;  %v8860_v21 = vld [vmem:[#allocation4 + $0x220] sm:$0xff] }
 0x660   :  { %14752 = vmatprep.mubr.f32.mxu1 %v19251_v61  ;;  %15719 = vmatpush3.bf16.msra.mxu1 %v15716_v40  ;;  %v19270_v40 = vld [vmem:[#allocation3 + $0x10a] sm:$0xff]  ;;  %v19297_v61 = vld [vmem:[#allocation3 + $0x172] sm:$0xff] }
 0x661   :  { %15721 = vmatprep.subr.bf16.mxu1 %v19246_v14  ;;  %20238 = vst [vmem:[#allocation47_spill] sm:$0xff] %v19270_v40  ;;  %20247 = vst [vmem:[#allocation56_spill] sm:$0xff] %v19297_v61 }
 0x663   :  { %14753 = vmatmul.mubr.f32.gmra.mrb[10].mxu1 %v19255_v45  ;;  %v19273_v45 = vld [vmem:[#allocation3 + $0x112] sm:$0xff] }
 0x664   :  { %14755 = vmatprep.mubr.f32.mxu1 %v19258_v59  ;;  %20239 = vst [vmem:[#allocation48_spill] sm:$0xff] %v19273_v45  ;;  %v19276_v59 = vld [vmem:[#allocation3 + $0x122] sm:$0xff] }
 0x665   :  { %20240 = vst [vmem:[#allocation49_spill] sm:$0xff] %v19276_v59 }
 0x667   :  { %14756 = vmatmul.mubr.f32.gmra.mrb[12].mxu1 %v19261_v34  ;;  %v19279_v34 = vld [vmem:[#allocation3 + $0x12a] sm:$0xff] }
 0x668   :  { %14758 = vmatprep.mubr.f32.mxu1 %v19264_v43  ;;  %20241 = vst [vmem:[#allocation50_spill] sm:$0xff] %v19279_v34  ;;  %v19282_v43 = vld [vmem:[#allocation3 + $0x13a] sm:$0xff] }
 0x669   :  { %20242 = vst [vmem:[#allocation51_spill] sm:$0xff] %v19282_v43 }
 0x66b   :  { %14759 = vmatmul.mubr.f32.gmra.mrb[14].mxu1 %v19267_v62  ;;  %v19285_v62 = vld [vmem:[#allocation3 + $0x142] sm:$0xff] }
 0x66c   :  { %14761 = vmatprep.mubr.f32.mxu1 %v19270_v40  ;;  %20243 = vst [vmem:[#allocation52_spill] sm:$0xff] %v19285_v62  ;;  %v19288_v40 = vld [vmem:[#allocation3 + $0x152] sm:$0xff] }
 0x66d   :  { %20244 = vst [vmem:[#allocation53_spill] sm:$0xff] %v19288_v40 }
 0x66f   :  { %14762 = vmatmul.mubr.f32.gmra.mrb[16].mxu1 %v19273_v45  ;;  %v19291_v45 = vld [vmem:[#allocation3 + $0x15a] sm:$0xff] }
 0x670   :  { %14764 = vmatprep.mubr.f32.mxu1 %v19276_v59  ;;  %20245 = vst [vmem:[#allocation54_spill] sm:$0xff] %v19291_v45  ;;  %v19294_v59 = vld [vmem:[#allocation3 + $0x16a] sm:$0xff] }
 0x671   :  { %20246 = vst [vmem:[#allocation55_spill] sm:$0xff] %v19294_v59 }
 0x673   :  { %14765 = vmatmul.mubr.f32.gmra.mrb[18].mxu1 %v19279_v34  ;;  %v7763_v34 = vld [vmem:[#allocation3 + $0x1b2] sm:$0xff] }
 0x674   :  { %14767 = vmatprep.mubr.f32.mxu1 %v19282_v43  ;;  %v7764_v43 = vld [vmem:[#allocation3 + $0x1ba] sm:$0xff] }
 0x677   :  { %14768 = vmatmul.mubr.f32.gmra.mrb[20].mxu1 %v19285_v62  ;;  %v19300_v62 = vld [vmem:[#allocation3 + $0x1ca] sm:$0xff] }
 0x678   :  { %14770 = vmatprep.mubr.f32.mxu1 %v19288_v40  ;;  %20248 = vst [vmem:[#allocation57_spill] sm:$0xff] %v19300_v62  ;;  %v19303_v40 = vld [vmem:[#allocation3 + $0x1d2] sm:$0xff] }
 0x679   :  { %20249 = vst [vmem:[#allocation58_spill] sm:$0xff] %v19303_v40 }
 0x67b   :  { %14771 = vmatmul.mubr.f32.gmra.mrb[22].mxu1 %v19291_v45  ;;  %v19306_v45 = vld [vmem:[#allocation3 + $0x1e2] sm:$0xff] }
 0x67c   :  { %14773 = vmatprep.mubr.f32.mxu1 %v19294_v59  ;;  %20250 = vst [vmem:[#allocation59_spill] sm:$0xff] %v19306_v45  ;;  %v19309_v59 = vld [vmem:[#allocation3 + $0x1ea] sm:$0xff] }
 0x67d   :  { %20251 = vst [vmem:[#allocation60_spill] sm:$0xff] %v19309_v59 }
 0x67f   :  { %14774 = vmatmul.mubr.f32.gmra.mrb[24].mxu1 %v19297_v61  ;;  %v19312_v61 = vld [vmem:[#allocation3 + $0x1fa] sm:$0xff] }
 0x680   :  { %14776 = vmatprep.mubr.f32.mxu1 %v7763_v34  ;;  %20252 = vst [vmem:[#allocation61_spill] sm:$0xff] %v19312_v61  ;;  %v19315_v34 = vld [vmem:[#allocation3 + $0x202] sm:$0xff] }
 0x681   :  { %20253 = vst [vmem:[#allocation62_spill] sm:$0xff] %v19315_v34 }
 0x683   :  { %14777 = vmatmul.mubr.f32.gmra.mrb[26].mxu1 %v7764_v43  ;;  %v19318_v43 = vld [vmem:[#allocation3 + $0x212] sm:$0xff] }
 0x684   :  { %14779 = vmatprep.mubr.f32.mxu1 %v19300_v62  ;;  %20254 = vst [vmem:[#allocation63_spill] sm:$0xff] %v19318_v43  ;;  %v8858_v62 = vld [vmem:[#allocation4 + $0x210] sm:$0xff] }
 0x687   :  { %14780 = vmatmul.mubr.f32.gmra.mrb[28].mxu1 %v19303_v40  ;;  %v19321_v40 = vld [vmem:[#allocation3 + $0x21a] sm:$0xff] }
 0x688   :  { %14782 = vmatprep.mubr.f32.mxu1 %v19306_v45  ;;  %20255 = vst [vmem:[#allocation64_spill] sm:$0xff] %v19321_v40  ;;  %v19324_v45 = vld [vmem:[#allocation3 + $0x22a] sm:$0xff] }
 0x689   :  { %20256 = vst [vmem:[#allocation65_spill] sm:$0xff] %v19324_v45 }
 0x68b   :  { %14783 = vmatmul.mubr.f32.gmra.mrb[30].mxu1 %v19309_v59  ;;  %v19327_v59 = vld [vmem:[#allocation3 + $0x232] sm:$0xff] }
 0x68c   :  { %14785 = vmatprep.mubr.f32.mxu1 %v19312_v61  ;;  %20257 = vst [vmem:[#allocation66_spill] sm:$0xff] %v19327_v59  ;;  %v19330_v61 = vld [vmem:[#allocation3 + $0x242] sm:$0xff] }
 0x68d   :  { %20258 = vst [vmem:[#allocation67_spill] sm:$0xff] %v19330_v61 }
 0x68f   :  { %14786 = vmatmul.mubr.f32.gmra.mrb[32].mxu1 %v19315_v34  ;;  %v19333_v34 = vld [vmem:[#allocation3 + $0x24a] sm:$0xff] }
 0x690   :  { %14788 = vmatprep.mubr.f32.mxu1 %v19318_v43  ;;  %20259 = vst [vmem:[#allocation10_spill] sm:$0xff] %v19333_v34  ;;  %v19336_v43 = vld [vmem:[#allocation3 + $0x25a] sm:$0xff] }
 0x691   :  { %20260 = vst [vmem:[#allocation11_spill] sm:$0xff] %v19336_v43 }
 0x693   :  { %14789 = vmatmul.mubr.f32.gmra.mrb[34].mxu1 %v19321_v40  ;;  %v19339_v40 = vld [vmem:[#allocation3 + $0x262] sm:$0xff] }
 0x694   :  { %14791 = vmatprep.mubr.f32.mxu1 %v19324_v45  ;;  %20261 = vst [vmem:[#allocation12_spill] sm:$0xff] %v19339_v40  ;;  %v19342_v45 = vld [vmem:[#allocation3 + $0x272] sm:$0xff] }
 0x695   :  { %20262 = vst [vmem:[#allocation13_spill] sm:$0xff] %v19342_v45 }
 0x697   :  { %14792 = vmatmul.mubr.f32.gmra.mrb[36].mxu1 %v19327_v59  ;;  %v19345_v59 = vld [vmem:[#allocation3 + $0x27a] sm:$0xff] }
 0x698   :  { %14794 = vmatprep.mubr.f32.mxu1 %v19330_v61  ;;  %20263 = vst [vmem:[#allocation68_spill] sm:$0xff] %v19345_v59  ;;  %v19348_v61 = vld [vmem:[#allocation3 + $0x28a] sm:$0xff] }
 0x699   :  { %20264 = vst [vmem:[#allocation69_spill] sm:$0xff] %v19348_v61 }
 0x69b   :  { %14795 = vmatmul.mubr.f32.gmra.mrb[38].mxu1 %v19333_v34  ;;  %v19351_v34 = vld [vmem:[#allocation3 + $0x292] sm:$0xff] }
 0x69c   :  { %14797 = vmatprep.mubr.f32.mxu1 %v19336_v43  ;;  %20265 = vst [vmem:[#allocation70_spill] sm:$0xff] %v19351_v34  ;;  %v19354_v43 = vld [vmem:[#allocation3 + $0x2a2] sm:$0xff] }
 0x69d   :  { %20266 = vst [vmem:[#allocation71_spill] sm:$0xff] %v19354_v43 }
 0x69f   :  { %14798 = vmatmul.mubr.f32.gmra.mrb[40].mxu1 %v19339_v40  ;;  %v19357_v40 = vld [vmem:[#allocation3 + $0x2aa] sm:$0xff] }
 0x6a0   :  { %14800 = vmatprep.mubr.f32.mxu1 %v19342_v45  ;;  %20267 = vst [vmem:[#allocation72_spill] sm:$0xff] %v19357_v40  ;;  %v19360_v45 = vld [vmem:[#allocation3 + $0x2ba] sm:$0xff] }
 0x6a1   :  { %20268 = vst [vmem:[#allocation73_spill] sm:$0xff] %v19360_v45 }
 0x6a3   :  { %14801 = vmatmul.mubr.f32.gmra.mrb[42].mxu1 %v19345_v59  ;;  %v19363_v59 = vld [vmem:[#allocation3 + $0x2c2] sm:$0xff] }
 0x6a4   :  { %14803 = vmatprep.mubr.f32.mxu1 %v19348_v61  ;;  %20269 = vst [vmem:[#allocation74_spill] sm:$0xff] %v19363_v59  ;;  %v19366_v61 = vld [vmem:[#allocation3 + $0x2d2] sm:$0xff] }
 0x6a5   :  { %20270 = vst [vmem:[#allocation75_spill] sm:$0xff] %v19366_v61 }
 0x6a7   :  { %14804 = vmatmul.mubr.f32.gmra.mrb[44].mxu1 %v19351_v34  ;;  %v19369_v34 = vld [vmem:[#allocation3 + $0x2da] sm:$0xff] }
 0x6a8   :  { %14806 = vmatprep.mubr.f32.mxu1 %v19354_v43  ;;  %20271 = vst [vmem:[#allocation76_spill] sm:$0xff] %v19369_v34  ;;  %v19372_v43 = vld [vmem:[#allocation3 + $0x2ea] sm:$0xff] }
 0x6a9   :  { %20272 = vst [vmem:[#allocation77_spill] sm:$0xff] %v19372_v43 }
 0x6ab   :  { %14807 = vmatmul.mubr.f32.gmra.mrb[46].mxu1 %v19357_v40  ;;  %v19375_v40 = vld [vmem:[#allocation3 + $0x2f2] sm:$0xff] }
 0x6ac   :  { %14809 = vmatprep.mubr.f32.mxu1 %v19360_v45  ;;  %20273 = vst [vmem:[#allocation78_spill] sm:$0xff] %v19375_v40  ;;  %v19378_v45 = vld [vmem:[#allocation3 + $0x302] sm:$0xff] }
 0x6ad   :  { %20274 = vst [vmem:[#allocation14_spill] sm:$0xff] %v19378_v45 }
 0x6af   :  { %14810 = vmatmul.mubr.f32.gmra.mrb[48].mxu1 %v19363_v59  ;;  %v19381_v59 = vld [vmem:[#allocation3 + $0x30a] sm:$0xff] }
 0x6b0   :  { %14812 = vmatprep.mubr.f32.mxu1 %v19366_v61  ;;  %20275 = vst [vmem:[#allocation79_spill] sm:$0xff] %v19381_v59  ;;  %v19384_v61 = vld [vmem:[#allocation3 + $0x31a] sm:$0xff] }
 0x6b1   :  { %20276 = vst [vmem:[#allocation80_spill] sm:$0xff] %v19384_v61 }
 0x6b3   :  { %14813 = vmatmul.mubr.f32.gmra.mrb[50].mxu1 %v19369_v34  ;;  %v19387_v34 = vld [vmem:[#allocation3 + $0x322] sm:$0xff] }
 0x6b4   :  { %14815 = vmatprep.mubr.f32.mxu1 %v19372_v43  ;;  %v8859_v43 = vld [vmem:[#allocation4 + $0x218] sm:$0xff] }
 0x6b7   :  { %14816 = vmatmul.mubr.f32.gmra.mrb[52].mxu1 %v19375_v40  ;;  %v15724_v40 = vpack.c.bf16 %v8859_v43, %v8858_v62  ;;  %v8864_v62 = vld [vmem:[#allocation4 + $0x240] sm:$0xff]  ;;  %v8865_v43 = vld [vmem:[#allocation4 + $0x248] sm:$0xff] }
 0x6b8   :  { %14818 = vmatprep.mubr.f32.mxu1 %v19378_v45  ;;  %v8863_v45 = vld [vmem:[#allocation4 + $0x238] sm:$0xff] }
 0x6bb   :  { %14819 = vmatmul.mubr.f32.gmra.mrb[54].mxu1 %v19381_v59  ;;  %v15728_v59 = vpack.c.bf16 %v8861_v32, %v8860_v21  ;;  %v8867_v32 = vld [vmem:[#allocation4 + $0x258] sm:$0xff] }
 0x6bc   :  { %14821 = vmatprep.mubr.f32.mxu1 %v19384_v61  ;;  %v8862_v61 = vld [vmem:[#allocation4 + $0x230] sm:$0xff]  ;;  %v8871_v21 = vld [vmem:[#allocation4 + $0x278] sm:$0xff] }
 0x6bf   :  { %14822 = vmatmul.mubr.f32.gmra.mrb[56].mxu1 %v19387_v34 }
 0x6c0   :  { %14856 = vmatprep.mubr.f32.mxu1 %v19013_v0  ;;  %v15732_v0 = vpack.c.bf16 %v8863_v45, %v8862_v61  ;;  %v9387_v61 = vld [vmem:[#allocation4 + $0x288] sm:$0xff] }
 0x6c3   :  { %14857 = vmatmul.mubr.f32.vlgmr.msra.gmra.mrb[58].mxu1 %v19017_v39  ;;  %v15736_v39 = vpack.c.bf16 %v8865_v43, %v8864_v62  ;;  %v19497_v62 = vld [vmem:[#allocation3 + $0xa9] sm:$0xff] }
 0x6c4   :  { %15723 = vmatpush3.bf16.msra.mxu1 %v19246_v14  ;;  %14859 = vmatprep.mubr.f32.mxu1 %v19020_v42  ;;  %v8866_v42 = vld [vmem:[#allocation4 + $0x250] sm:$0xff]  ;;  %v8869_v14 = vld [vmem:[#allocation4 + $0x268] sm:$0xff] }
 0x6c5   :  { %15725 = vmatprep.subr.bf16.mxu1 %v15724_v40 }
 0x6c7   :  { %14860 = vmatmul.mubr.f32.gmra.mrb[60].mxu1 %v19023_v44  ;;  %v15740_v44 = vpack.c.bf16 %v8867_v32, %v8866_v42  ;;  %v9917_v42 = vld [vmem:[#allocation4 + $0x300] sm:$0xff]  ;;  %v9918_v32 = vld [vmem:[#allocation4 + $0x308] sm:$0xff] }
 0x6c8   :  { %14862 = vmatprep.mubr.f32.mxu1 %v19026_v48  ;;  %15727 = vmatpush3.bf16.msra.mxu1 %v15724_v40  ;;  %v8868_v48 = vld [vmem:[#allocation4 + $0x260] sm:$0xff]  ;;  %v9400_v40 = vld [vmem:[#allocation4 + $0x2f0] sm:$0xff] }
 0x6c9   :  { %15729 = vmatprep.subr.bf16.mxu1 %v15728_v59 }
 0x6cb   :  { %14863 = vmatmul.mubr.f32.gmra.mrb[62].mxu1 %v19029_v50  ;;  %v15744_v50 = vpack.c.bf16 %v8869_v14, %v8868_v48  ;;  %v19506_v48 = vpack.c.bf16 %v9918_v32, %v9917_v42  ;;  %v19508_v14 = vld [vmem:[#allocation3 + $0xc9] sm:$0xff]  ;;  %v19623_v42 = vld [vmem:[#allocation3 + $0x2d9] sm:$0xff] }
 0x6cc   :  { %14865 = vmatprep.mubr.f32.mxu1 %v19032_v53  ;;  %15731 = vmatpush3.bf16.msra.mxu1 %v15728_v59  ;;  %v8870_v53 = vld [vmem:[#allocation4 + $0x270] sm:$0xff]  ;;  %v19494_v59 = vld [vmem:[#allocation3 + $0x99] sm:$0xff]  ;;  %20297 = vst [vmem:[#allocation83_spill] sm:$0xff] %v19623_v42 }
 0x6cd   :  { %15733 = vmatprep.subr.bf16.mxu1 %v15732_v0  ;;  %v19626_v32 = vld [vmem:[#allocation3 + $0x2e9] sm:$0xff] }
 0x6ce   :  { %20298 = vst [vmem:[#allocation84_spill] sm:$0xff] %v19626_v32 }
 0x6cf   :  { %14866 = vmatmul.mubr.f32.gmra.mrb[0].mxu1 %v19035_v55  ;;  %v15748_v55 = vpack.c.bf16 %v8871_v21, %v8870_v53  ;;  %v19515_v53 = vld [vmem:[#allocation3 + $0xe1] sm:$0xff]  ;;  %v19518_v21 = vld [vmem:[#allocation3 + $0xf1] sm:$0xff] }
 0x6d0   :  { %14868 = vmatprep.mubr.f32.mxu1 %v19038_v58  ;;  %15735 = vmatpush3.bf16.msra.mxu1 %v15732_v0  ;;  %v9386_v58 = vld [vmem:[#allocation4 + $0x280] sm:$0xff]  ;;  %v9401_v0 = vld [vmem:[#allocation4 + $0x2f8] sm:$0xff] }
 0x6d1   :  { %15737 = vmatprep.subr.bf16.mxu1 %v15736_v39  ;;  %v15780_v43 = vpack.c.bf16 %v9401_v0, %v9400_v40  ;;  %v19614_v40 = vld [vmem:[#allocation3 + $0x2b9] sm:$0xff]  ;;  %v19617_v0 = vld [vmem:[#allocation3 + $0x2c1] sm:$0xff] }
 0x6d2   :  { %20295 = vst [vmem:[#allocation81_spill] sm:$0xff] %v19617_v0 }
 0x6d3   :  { %14869 = vmatmul.mubr.f32.gmra.mrb[2].mxu1 %v19041_v60  ;;  %v19406_v60 = vpack.c.bf16 %v9387_v61, %v9386_v58  ;;  %v19524_v58 = vld [vmem:[#allocation3 + $0x109] sm:$0xff]  ;;  %v19527_v61 = vld [vmem:[#allocation3 + $0x111] sm:$0xff] }
 0x6d4   :  { %14871 = vmatprep.mubr.f32.mxu1 %v19044_v2  ;;  %15739 = vmatpush3.bf16.msra.mxu1 %v15736_v39  ;;  %v19424_v2 = vld [vmem:[#allocation3 + $0x180] sm:$0xff]  ;;  %v19500_v39 = vld [vmem:[#allocation3 + $0xb1] sm:$0xff] }
 0x6d5   :  { %15741 = vmatprep.subr.bf16.mxu1 %v15740_v44 }
 0x6d7   :  { %14872 = vmatmul.mubr.f32.gmra.mrb[4].mxu1 %v19047_v4  ;;  %v19427_v4 = vld [vmem:[#allocation3 + $0x188] sm:$0xff] }
 0x6d8   :  { %14874 = vmatprep.mubr.f32.mxu1 %v19050_v1  ;;  %15743 = vmatpush3.bf16.msra.mxu1 %v15740_v44  ;;  %v20277_v1 = vld [vmem:[#allocation21_spill] sm:$0xff]  ;;  %v19503_v44 = vld [vmem:[#allocation3 + $0xc1] sm:$0xff] }
 0x6d9   :  { %15745 = vmatprep.subr.bf16.mxu1 %v15744_v50 }
 0x6db   :  { %14875 = vmatmul.mubr.f32.gmra.mrb[6].mxu1 %v19055_v46  ;;  %v20278_v46 = vld [vmem:[#allocation22_spill] sm:$0xff] }
 0x6dc   :  { %14877 = vmatprep.mubr.f32.mxu1 %v19058_v5  ;;  %15747 = vmatpush3.bf16.msra.mxu1 %v15744_v50  ;;  %v20279_v5 = vld [vmem:[#allocation23_spill] sm:$0xff]  ;;  %v19511_v50 = vld [vmem:[#allocation3 + $0xd9] sm:$0xff] }
 0x6dd   :  { %15749 = vmatprep.subr.bf16.mxu1 %v15748_v55 }
 0x6df   :  { %14878 = vmatmul.mubr.f32.gmra.mrb[8].mxu1 %v19062_v7  ;;  %v20280_v7 = vld [vmem:[#allocation24_spill] sm:$0xff] }
 0x6e0   :  { %14880 = vmatprep.mubr.f32.mxu1 %v19065_v47  ;;  %15751 = vmatpush3.bf16.msra.mxu1 %v15748_v55  ;;  %v20281_v47 = vld [vmem:[#allocation25_spill] sm:$0xff] }
 0x6e1   :  { %15753 = vmatprep.subr.bf16.mxu1 %v19406_v60  ;;  %v19521_v55 = vld [vmem:[#allocation3 + $0xf9] sm:$0xff] }
 0x6e3   :  { %14881 = vmatmul.mubr.f32.gmra.mrb[10].mxu1 %v19068_v6  ;;  %v20282_v6 = vld [vmem:[#allocation26_spill] sm:$0xff] }
 0x6e4   :  { %14883 = vmatprep.mubr.f32.mxu1 %v19071_v11  ;;  %v20283_v11 = vld [vmem:[#allocation27_spill] sm:$0xff] }
 0x6e7   :  { %14884 = vmatmul.mubr.f32.gmra.mrb[12].mxu1 %v19074_v12  ;;  %v20284_v12 = vld [vmem:[#allocation28_spill] sm:$0xff] }
 0x6e8   :  { %14886 = vmatprep.mubr.f32.mxu1 %v19077_v3  ;;  %v20285_v3 = vld [vmem:[#allocation29_spill] sm:$0xff] }
 0x6e9   :  { %20294 = vst [vmem:[#allocation29_spill] sm:$0xff] %v19614_v40 }
 0x6eb   :  { %14887 = vmatmul.mubr.f32.gmra.mrb[14].mxu1 %v19080_v8  ;;  %v19460_v8 = vld [vmem:[#allocation3 + $0x330] sm:$0xff] }
 0x6ec   :  { %14889 = vmatprep.mubr.f32.mxu1 %v19083_v10  ;;  %v19463_v10 = vld [vmem:[#allocation3 + $0x338] sm:$0xff] }
 0x6ef   :  { %14890 = vmatmul.mubr.f32.gmra.mrb[16].mxu1 %v19086_v13  ;;  %v9388_v13 = vld [vmem:[#allocation4 + $0x290] sm:$0xff] }
 0x6f0   :  { %14892 = vmatprep.mubr.f32.mxu1 %v19089_v15  ;;  %v9389_v15 = vld [vmem:[#allocation4 + $0x298] sm:$0xff] }
 0x6f3   :  { %14893 = vmatmul.mubr.f32.gmra.mrb[18].mxu1 %v19092_v16  ;;  %v8791_v16 = vld [vmem:[#allocation3 + $0x19] sm:$0xff] }
 0x6f4   :  { %14895 = vmatprep.mubr.f32.mxu1 %v19095_v17  ;;  %v15756_v17 = vpack.c.bf16 %v9389_v15, %v9388_v13  ;;  %v8823_v13 = vld [vmem:[#allocation3 + $0x1c9] sm:$0xff]  ;;  %v8824_v15 = vld [vmem:[#allocation3 + $0x1d1] sm:$0xff] }
 0x6f7   :  { %14896 = vmatmul.mubr.f32.gmra.mrb[20].mxu1 %v19098_v18  ;;  %v8792_v18 = vld [vmem:[#allocation3 + $0x21] sm:$0xff] }
 0x6f8   :  { %14898 = vmatprep.mubr.f32.mxu1 %v19101_v19  ;;  %v9390_v19 = vld [vmem:[#allocation4 + $0x2a0] sm:$0xff] }
 0x6fb   :  { %14899 = vmatmul.mubr.f32.gmra.mrb[22].mxu1 %v19104_v22  ;;  %v9391_v22 = vld [vmem:[#allocation4 + $0x2a8] sm:$0xff] }
 0x6fc   :  { %14901 = vmatprep.mubr.f32.mxu1 %v19424_v2 }
 0x6ff   :  { %14902 = vmatmul.mubr.f32.gmra.mrb[24].mxu1 %v19427_v4 }
 0x700   :  { %14904 = vmatprep.mubr.f32.mxu1 %v19108_v9  ;;  %v19466_v9 = vld [vmem:[#allocation3 + $0x31] sm:$0xff] }
 0x703   :  { %14905 = vmatmul.mubr.f32.gmra.mrb[26].mxu1 %v19111_v23  ;;  %v15760_v23 = vpack.c.bf16 %v9391_v22, %v9390_v19  ;;  %v19569_v19 = vld [vmem:[#allocation3 + $0x201] sm:$0xff]  ;;  %v19572_v22 = vld [vmem:[#allocation3 + $0x211] sm:$0xff] }
 0x704   :  { %14907 = vmatprep.mubr.f32.mxu1 %v19114_v24  ;;  %v19470_v24 = vld [vmem:[#allocation3 + $0x39] sm:$0xff] }
 0x707   :  { %14908 = vmatmul.mubr.f32.gmra.mrb[28].mxu1 %v19117_v25  ;;  %v9392_v25 = vld [vmem:[#allocation4 + $0x2b0] sm:$0xff] }
 0x708   :  { %14910 = vmatprep.mubr.f32.mxu1 %v19120_v26  ;;  %v9393_v26 = vld [vmem:[#allocation4 + $0x2b8] sm:$0xff] }
 0x70b   :  { %14911 = vmatmul.mubr.f32.gmra.mrb[30].mxu1 %v19123_v27  ;;  %v19473_v27 = vld [vmem:[#allocation3 + $0x49] sm:$0xff] }
 0x70c   :  { %14913 = vmatprep.mubr.f32.mxu1 %v19126_v28  ;;  %v15764_v28 = vpack.c.bf16 %v9393_v26, %v9392_v25  ;;  %v19578_v25 = vld [vmem:[#allocation3 + $0x229] sm:$0xff]  ;;  %v19581_v26 = vld [vmem:[#allocation3 + $0x231] sm:$0xff] }
 0x70f   :  { %14914 = vmatmul.mubr.f32.gmra.mrb[32].mxu1 %v19129_v29  ;;  %v19476_v29 = vld [vmem:[#allocation3 + $0x51] sm:$0xff] }
 0x710   :  { %14916 = vmatprep.mubr.f32.mxu1 %v19132_v31  ;;  %v9394_v31 = vld [vmem:[#allocation4 + $0x2c0] sm:$0xff] }
 0x713   :  { %14917 = vmatmul.mubr.f32.gmra.mrb[34].mxu1 %v19135_v35  ;;  %v9395_v35 = vld [vmem:[#allocation4 + $0x2c8] sm:$0xff] }
 0x714   :  { %14919 = vmatprep.mubr.f32.mxu1 %v19138_v36  ;;  %v19479_v36 = vld [vmem:[#allocation3 + $0x61] sm:$0xff] }
 0x717   :  { %14920 = vmatmul.mubr.f32.gmra.mrb[36].mxu1 %v19143_v38  ;;  %v19482_v38 = vld [vmem:[#allocation3 + $0x69] sm:$0xff] }
 0x718   :  { %14922 = vmatprep.mubr.f32.mxu1 %v19148_v41  ;;  %v9396_v41 = vld [vmem:[#allocation4 + $0x2d0] sm:$0xff] }
 0x71b   :  { %14923 = vmatmul.mubr.f32.gmra.mrb[38].mxu1 %v19153_v20  ;;  %v9397_v20 = vld [vmem:[#allocation4 + $0x2d8] sm:$0xff] }
 0x71c   :  { %14925 = vmatprep.mubr.f32.mxu1 %v19158_v49  ;;  %v19485_v49 = vld [vmem:[#allocation3 + $0x79] sm:$0xff] }
 0x71f   :  { %14926 = vmatmul.mubr.f32.gmra.mrb[40].mxu1 %v19161_v51  ;;  %v15772_v51 = vpack.c.bf16 %v9397_v20, %v9396_v41  ;;  %v19596_v41 = vld [vmem:[#allocation3 + $0x271] sm:$0xff]  ;;  %v19599_v20 = vld [vmem:[#allocation3 + $0x279] sm:$0xff] }
 0x720   :  { %14928 = vmatprep.mubr.f32.mxu1 %v19164_v52  ;;  %v19488_v52 = vld [vmem:[#allocation3 + $0x81] sm:$0xff]  ;;  %20288 = vst [vmem:[#allocation23_spill] sm:$0xff] %v19596_v41  ;;  %20289 = vst [vmem:[#allocation24_spill] sm:$0xff] %v19599_v20 }
 0x723   :  { %14929 = vmatmul.mubr.f32.gmra.mrb[42].mxu1 %v19167_v54  ;;  %v9398_v54 = vld [vmem:[#allocation4 + $0x2e0] sm:$0xff] }
 0x724   :  { %14931 = vmatprep.mubr.f32.mxu1 %v19170_v56  ;;  %v9399_v56 = vld [vmem:[#allocation4 + $0x2e8] sm:$0xff] }
 0x725   :  { %v15776_v45 = vpack.c.bf16 %v9399_v56, %v9398_v54  ;;  %v19605_v54 = vld [vmem:[#allocation3 + $0x291] sm:$0xff]  ;;  %v19608_v56 = vld [vmem:[#allocation3 + $0x2a1] sm:$0xff] }
 0x726   :  { %20291 = vst [vmem:[#allocation26_spill] sm:$0xff] %v19605_v54  ;;  %20292 = vst [vmem:[#allocation27_spill] sm:$0xff] %v19608_v56 }
 0x727   :  { %14932 = vmatmul.mubr.f32.gmra.mrb[44].mxu1 %v19173_v57  ;;  %v19491_v57 = vld [vmem:[#allocation3 + $0x91] sm:$0xff] }
 0x728   :  { %14934 = vmatprep.mubr.f32.mxu1 %v20277_v1  ;;  %v19533_v1 = vld [vmem:[#allocation3 + $0x129] sm:$0xff] }
 0x72b   :  { %14935 = vmatmul.mubr.f32.gmra.mrb[46].mxu1 %v20278_v46  ;;  %v19536_v46 = vld [vmem:[#allocation3 + $0x139] sm:$0xff] }
 0x72c   :  { %14937 = vmatprep.mubr.f32.mxu1 %v20279_v5  ;;  %v19539_v5 = vld [vmem:[#allocation3 + $0x141] sm:$0xff] }
 0x72f   :  { %14938 = vmatmul.mubr.f32.gmra.mrb[48].mxu1 %v20280_v7  ;;  %v19542_v7 = vld [vmem:[#allocation3 + $0x151] sm:$0xff] }
 0x730   :  { %14940 = vmatprep.mubr.f32.mxu1 %v20281_v47  ;;  %v19545_v47 = vld [vmem:[#allocation3 + $0x159] sm:$0xff] }
 0x733   :  { %14941 = vmatmul.mubr.f32.gmra.mrb[50].mxu1 %v20282_v6  ;;  %v19548_v6 = vld [vmem:[#allocation3 + $0x169] sm:$0xff] }
 0x734   :  { %14943 = vmatprep.mubr.f32.mxu1 %v20283_v11  ;;  %v19551_v11 = vld [vmem:[#allocation3 + $0x171] sm:$0xff] }
 0x737   :  { %14944 = vmatmul.mubr.f32.gmra.mrb[52].mxu1 %v20284_v12  ;;  %v19554_v12 = vld [vmem:[#allocation3 + $0x181] sm:$0xff] }
 0x738   :  { %14946 = vmatprep.mubr.f32.mxu1 %v20285_v3  ;;  %v19557_v3 = vld [vmem:[#allocation3 + $0x189] sm:$0xff] }
 0x73b   :  { %14947 = vmatmul.mubr.f32.gmra.mrb[54].mxu1 %v19203_v37  ;;  %v15768_v37 = vpack.c.bf16 %v9395_v35, %v9394_v31  ;;  %v19587_v31 = vld [vmem:[#allocation3 + $0x249] sm:$0xff]  ;;  %v19590_v35 = vld [vmem:[#allocation3 + $0x259] sm:$0xff] }
 0x73c   :  { %14949 = vmatprep.mubr.f32.mxu1 %v19460_v8  ;;  %20286 = vst [vmem:[#allocation21_spill] sm:$0xff] %v19590_v35 }
 0x73f   :  { %14950 = vmatmul.mubr.f32.gmra.mrb[56].mxu1 %v19463_v10 }
 0x740   :  { %14984 = vmatprep.mubr.f32.mxu1 %v8791_v16  ;;  %v19560_v16 = vld [vmem:[#allocation3 + $0x1e1] sm:$0xff] }
 0x743   :  { %14985 = vmatmul.mubr.f32.vlgmr.msra.gmra.mrb[58].mxu1 %v8792_v18  ;;  %v19566_v18 = vld [vmem:[#allocation3 + $0x1f9] sm:$0xff] }
 0x744   :  { %15755 = vmatpush3.bf16.msra.mxu1 %v19406_v60  ;;  %14987 = vmatprep.mubr.f32.mxu1 %v19466_v9  ;;  %v19530_v60 = vld [vmem:[#allocation3 + $0x121] sm:$0xff] }
 0x745   :  { %15757 = vmatprep.subr.bf16.mxu1 %v15756_v17 }
 0x747   :  { %14988 = vmatmul.mubr.f32.gmra.mrb[60].mxu1 %v19470_v24 }
 0x748   :  { %14990 = vmatprep.mubr.f32.mxu1 %v19473_v27  ;;  %15759 = vmatpush3.bf16.msra.mxu1 %v15756_v17  ;;  %v19563_v17 = vld [vmem:[#allocation3 + $0x1e9] sm:$0xff] }
 0x749   :  { %15761 = vmatprep.subr.bf16.mxu1 %v15760_v23 }
 0x74b   :  { %14991 = vmatmul.mubr.f32.gmra.mrb[62].mxu1 %v19476_v29 }
 0x74c   :  { %14993 = vmatprep.mubr.f32.mxu1 %v19479_v36  ;;  %15763 = vmatpush3.bf16.msra.mxu1 %v15760_v23  ;;  %v19575_v23 = vld [vmem:[#allocation3 + $0x219] sm:$0xff] }
 0x74d   :  { %15765 = vmatprep.subr.bf16.mxu1 %v15764_v28 }
 0x74f   :  { %14994 = vmatmul.mubr.f32.gmra.mrb[0].mxu1 %v19482_v38 }
 0x750   :  { %14996 = vmatprep.mubr.f32.mxu1 %v19485_v49  ;;  %15767 = vmatpush3.bf16.msra.mxu1 %v15764_v28  ;;  %v19584_v28 = vld [vmem:[#allocation3 + $0x241] sm:$0xff] }
 0x751   :  { %15769 = vmatprep.subr.bf16.mxu1 %v15768_v37 }
 0x753   :  { %14997 = vmatmul.mubr.f32.gmra.mrb[2].mxu1 %v19488_v52 }
 0x754   :  { %14999 = vmatprep.mubr.f32.mxu1 %v19491_v57  ;;  %15771 = vmatpush3.bf16.msra.mxu1 %v15768_v37  ;;  %v19593_v37 = vld [vmem:[#allocation3 + $0x261] sm:$0xff] }
 0x755   :  { %15773 = vmatprep.subr.bf16.mxu1 %v15772_v51  ;;  %20287 = vst [vmem:[#allocation22_spill] sm:$0xff] %v19593_v37 }
 0x757   :  { %15000 = vmatmul.mubr.f32.gmra.mrb[4].mxu1 %v19494_v59 }
 0x758   :  { %15002 = vmatprep.mubr.f32.mxu1 %v19497_v62  ;;  %15775 = vmatpush3.bf16.msra.mxu1 %v15772_v51  ;;  %v19602_v51 = vld [vmem:[#allocation3 + $0x289] sm:$0xff] }
 0x759   :  { %15777 = vmatprep.subr.bf16.mxu1 %v15776_v45  ;;  %20290 = vst [vmem:[#allocation25_spill] sm:$0xff] %v19602_v51 }
 0x75b   :  { %15003 = vmatmul.mubr.f32.gmra.mrb[6].mxu1 %v19500_v39 }
 0x75c   :  { %15005 = vmatprep.mubr.f32.mxu1 %v19503_v44  ;;  %15779 = vmatpush3.bf16.msra.mxu1 %v15776_v45  ;;  %v19611_v45 = vld [vmem:[#allocation3 + $0x2a9] sm:$0xff] }
 0x75d   :  { %15781 = vmatprep.subr.bf16.mxu1 %v15780_v43  ;;  %20293 = vst [vmem:[#allocation28_spill] sm:$0xff] %v19611_v45 }
 0x75f   :  { %15006 = vmatmul.mubr.f32.gmra.mrb[8].mxu1 %v19508_v14 }
 0x760   :  { %15008 = vmatprep.mubr.f32.mxu1 %v19511_v50  ;;  %15783 = vmatpush3.bf16.msra.mxu1 %v15780_v43  ;;  %v19620_v43 = vld [vmem:[#allocation3 + $0x2d1] sm:$0xff] }
 0x761   :  { %15785 = vmatprep.subr.bf16.mxu1 %v19506_v48  ;;  %20296 = vst [vmem:[#allocation82_spill] sm:$0xff] %v19620_v43 }
 0x763   :  { %15009 = vmatmul.mubr.f32.gmra.mrb[10].mxu1 %v19515_v53 }
 0x764   :  { %15011 = vmatprep.mubr.f32.mxu1 %v19518_v21 }
 0x767   :  { %15012 = vmatmul.mubr.f32.gmra.mrb[12].mxu1 %v19521_v55 }
 0x768   :  { %15014 = vmatprep.mubr.f32.mxu1 %v19524_v58 }
 0x76b   :  { %15015 = vmatmul.mubr.f32.gmra.mrb[14].mxu1 %v19527_v61 }
 0x76c   :  { %15017 = vmatprep.mubr.f32.mxu1 %v19530_v60 }
 0x76f   :  { %15018 = vmatmul.mubr.f32.gmra.mrb[16].mxu1 %v19533_v1 }
 0x770   :  { %15020 = vmatprep.mubr.f32.mxu1 %v19536_v46 }
 0x773   :  { %15021 = vmatmul.mubr.f32.gmra.mrb[18].mxu1 %v19539_v5 }
 0x774   :  { %15023 = vmatprep.mubr.f32.mxu1 %v19542_v7 }
 0x777   :  { %15024 = vmatmul.mubr.f32.gmra.mrb[20].mxu1 %v19545_v47 }
 0x778   :  { %15026 = vmatprep.mubr.f32.mxu1 %v19548_v6 }
 0x77b   :  { %15027 = vmatmul.mubr.f32.gmra.mrb[22].mxu1 %v19551_v11 }
 0x77c   :  { %15029 = vmatprep.mubr.f32.mxu1 %v19554_v12 }
 0x77f   :  { %15030 = vmatmul.mubr.f32.gmra.mrb[24].mxu1 %v19557_v3 }
 0x780   :  { %15032 = vmatprep.mubr.f32.mxu1 %v8823_v13  ;;  %v19629_v13 = vld [vmem:[#allocation3 + $0x2f1] sm:$0xff] }
 0x781   :  { %20299 = vst [vmem:[#allocation85_spill] sm:$0xff] %v19629_v13 }
 0x783   :  { %15033 = vmatmul.mubr.f32.gmra.mrb[26].mxu1 %v8824_v15  ;;  %v19632_v15 = vld [vmem:[#allocation3 + $0x301] sm:$0xff] }
 0x784   :  { %15035 = vmatprep.mubr.f32.mxu1 %v19560_v16  ;;  %20300 = vst [vmem:[#allocation86_spill] sm:$0xff] %v19632_v15 }
 0x787   :  { %15036 = vmatmul.mubr.f32.gmra.mrb[28].mxu1 %v19563_v17 }
 0x788   :  { %15038 = vmatprep.mubr.f32.mxu1 %v19566_v18 }
 0x78b   :  { %15039 = vmatmul.mubr.f32.gmra.mrb[30].mxu1 %v19569_v19 }
 0x78c   :  { %15041 = vmatprep.mubr.f32.mxu1 %v19572_v22 }
 0x78f   :  { %15042 = vmatmul.mubr.f32.gmra.mrb[32].mxu1 %v19575_v23 }
 0x790   :  { %15044 = vmatprep.mubr.f32.mxu1 %v19578_v25 }
 0x793   :  { %15045 = vmatmul.mubr.f32.gmra.mrb[34].mxu1 %v19581_v26 }
 0x794   :  { %15047 = vmatprep.mubr.f32.mxu1 %v19584_v28 }
 0x797   :  { %15048 = vmatmul.mubr.f32.gmra.mrb[36].mxu1 %v19587_v31 }
 0x798   :  { %15050 = vmatprep.mubr.f32.mxu1 %v19590_v35  ;;  %v20314_v35 = vld [vmem:[#allocation38_spill] sm:$0xff] }
 0x79b   :  { %15051 = vmatmul.mubr.f32.gmra.mrb[38].mxu1 %v19593_v37  ;;  %v20310_v37 = vld [vmem:[#allocation34_spill] sm:$0xff] }
 0x79c   :  { %15053 = vmatprep.mubr.f32.mxu1 %v19596_v41  ;;  %v20309_v41 = vld [vmem:[#allocation33_spill] sm:$0xff] }
 0x79f   :  { %15054 = vmatmul.mubr.f32.gmra.mrb[40].mxu1 %v19599_v20  ;;  %v9924_v20 = vld [vmem:[#allocation4 + $0x338] sm:$0xff] }
 0x7a0   :  { %15056 = vmatprep.mubr.f32.mxu1 %v19602_v51 }
 0x7a3   :  { %15057 = vmatmul.mubr.f32.gmra.mrb[42].mxu1 %v19605_v54  ;;  %v9922_v54 = vld [vmem:[#allocation4 + $0x328] sm:$0xff] }
 0x7a4   :  { %15059 = vmatprep.mubr.f32.mxu1 %v19608_v56  ;;  %v9921_v56 = vld [vmem:[#allocation4 + $0x320] sm:$0xff] }
 0x7a5   :  { %v15792_v51 = vpack.c.bf16 %v9922_v54, %v9921_v56  ;;  %v9928_v54 = vld [vmem:[#allocation4 + $0x358] sm:$0xff] }
 0x7a6   :  { %v20313_v56 = vld [vmem:[#allocation37_spill] sm:$0xff] }
 0x7a7   :  { %15060 = vmatmul.mubr.f32.gmra.mrb[44].mxu1 %v19611_v45  ;;  %v20306_v45 = vld [vmem:[#allocation30_spill] sm:$0xff] }
 0x7a8   :  { %15062 = vmatprep.mubr.f32.mxu1 %v19614_v40  ;;  %v9919_v40 = vld [vmem:[#allocation4 + $0x310] sm:$0xff] }
 0x7ab   :  { %15063 = vmatmul.mubr.f32.gmra.mrb[46].mxu1 %v19617_v0  ;;  %v19635_v0 = vld [vmem:[#allocation3 + $0x309] sm:$0xff] }
 0x7ac   :  { %15065 = vmatprep.mubr.f32.mxu1 %v19620_v43  ;;  %20301 = vst [vmem:[#allocation87_spill] sm:$0xff] %v19635_v0  ;;  %v19638_v43 = vld [vmem:[#allocation3 + $0x319] sm:$0xff] }
 0x7ad   :  { %20302 = vst [vmem:[#allocation88_spill] sm:$0xff] %v19638_v43 }
 0x7af   :  { %15066 = vmatmul.mubr.f32.gmra.mrb[48].mxu1 %v19623_v42  ;;  %v19641_v42 = vld [vmem:[#allocation3 + $0x321] sm:$0xff] }
 0x7b0   :  { %15068 = vmatprep.mubr.f32.mxu1 %v19626_v32  ;;  %20303 = vst [vmem:[#allocation89_spill] sm:$0xff] %v19641_v42  ;;  %v19644_v32 = vld [vmem:[#allocation3 + $0x331] sm:$0xff] }
 0x7b1   :  { %20304 = vst [vmem:[#allocation90_spill] sm:$0xff] %v19644_v32 }
 0x7b3   :  { %15069 = vmatmul.mubr.f32.gmra.mrb[50].mxu1 %v19629_v13  ;;  %v19647_v13 = vld [vmem:[#allocation3 + $0x339] sm:$0xff] }
 0x7b4   :  { %15071 = vmatprep.mubr.f32.mxu1 %v19632_v15  ;;  %20305 = vst [vmem:[#allocation91_spill] sm:$0xff] %v19647_v13  ;;  %v9920_v15 = vld [vmem:[#allocation4 + $0x318] sm:$0xff] }
 0x7b7   :  { %15072 = vmatmul.mubr.f32.gmra.mrb[52].mxu1 %v19635_v0  ;;  %v15788_v0 = vpack.c.bf16 %v9920_v15, %v9919_v40  ;;  %v9925_v40 = vld [vmem:[#allocation4 + $0x340] sm:$0xff]  ;;  %v9926_v15 = vld [vmem:[#allocation4 + $0x348] sm:$0xff] }
 0x7b8   :  { %15074 = vmatprep.mubr.f32.mxu1 %v19638_v43  ;;  %v20307_v43 = vld [vmem:[#allocation31_spill] sm:$0xff] }
 0x7bb   :  { %15075 = vmatmul.mubr.f32.gmra.mrb[54].mxu1 %v19641_v42  ;;  %v20308_v42 = vld [vmem:[#allocation32_spill] sm:$0xff] }
 0x7bc   :  { %15077 = vmatprep.mubr.f32.mxu1 %v19644_v32  ;;  %v9923_v32 = vld [vmem:[#allocation4 + $0x330] sm:$0xff] }
 0x7bf   :  { %15078 = vmatmul.mubr.f32.gmra.mrb[56].mxu1 %v19647_v13  ;;  %v20311_v13 = vld [vmem:[#allocation35_spill] sm:$0xff] }
 0x7c0   :  { %15112 = vmatprep.mubr.f32.mxu1 %v20306_v45  ;;  %v15796_v45 = vpack.c.bf16 %v9924_v20, %v9923_v32  ;;  %v9930_v20 = vld [vmem:[#allocation4 + $0x368] sm:$0xff]  ;;  %v9932_v32 = vld [vmem:[#allocation4 + $0x378] sm:$0xff] }
 0x7c3   :  { %15113 = vmatmul.mubr.f32.vlgmr.msra.gmra.mrb[58].mxu1 %v20307_v43  ;;  %v20312_v43 = vld [vmem:[#allocation36_spill] sm:$0xff] }
 0x7c4   :  { %15787 = vmatpush3.bf16.msra.mxu1 %v19506_v48  ;;  %15115 = vmatprep.mubr.f32.mxu1 %v20308_v42  ;;  %v15800_v48 = vpack.c.bf16 %v9926_v15, %v9925_v40  ;;  %v9927_v42 = vld [vmem:[#allocation4 + $0x350] sm:$0xff]  ;;  %v10448_v40 = vld [vmem:[#allocation4 + $0x388] sm:$0xff] }
 0x7c5   :  { %15789 = vmatprep.subr.bf16.mxu1 %v15788_v0  ;;  %v20316_v15 = vld [vmem:[#allocation40_spill] sm:$0xff] }
 0x7c7   :  { %15116 = vmatmul.mubr.f32.gmra.mrb[60].mxu1 %v20309_v41  ;;  %v9929_v41 = vld [vmem:[#allocation4 + $0x360] sm:$0xff] }
 0x7c8   :  { %15118 = vmatprep.mubr.f32.mxu1 %v20310_v37  ;;  %15791 = vmatpush3.bf16.msra.mxu1 %v15788_v0  ;;  %v15804_v37 = vpack.c.bf16 %v9928_v54, %v9927_v42  ;;  %v9931_v0 = vld [vmem:[#allocation4 + $0x370] sm:$0xff]  ;;  %v20321_v42 = vld [vmem:[#allocation45_spill] sm:$0xff]  ;;  %v20322_v54 = vld [vmem:[#allocation46_spill] sm:$0xff] }
 0x7c9   :  { %15793 = vmatprep.subr.bf16.mxu1 %v15792_v51 }
 0x7cb   :  { %15119 = vmatmul.mubr.f32.gmra.mrb[62].mxu1 %v20311_v13  ;;  %v20315_v13 = vld [vmem:[#allocation39_spill] sm:$0xff] }
 0x7cc   :  { %15121 = vmatprep.mubr.f32.mxu1 %v20312_v43  ;;  %15795 = vmatpush3.bf16.msra.mxu1 %v15792_v51  ;;  %v15808_v51 = vpack.c.bf16 %v9930_v20, %v9929_v41  ;;  %v20317_v43 = vld [vmem:[#allocation41_spill] sm:$0xff]  ;;  %v20326_v20 = vld [vmem:[#allocation50_spill] sm:$0xff] }
 0x7cd   :  { %15797 = vmatprep.subr.bf16.mxu1 %v15796_v45  ;;  %v20325_v41 = vld [vmem:[#allocation49_spill] sm:$0xff] }
 0x7cf   :  { %15122 = vmatmul.mubr.f32.gmra.mrb[0].mxu1 %v20313_v56  ;;  %v20323_v56 = vld [vmem:[#allocation47_spill] sm:$0xff] }
 0x7d0   :  { %15124 = vmatprep.mubr.f32.mxu1 %v20314_v35  ;;  %15799 = vmatpush3.bf16.msra.mxu1 %v15796_v45  ;;  %v15812_v35 = vpack.c.bf16 %v9932_v32, %v9931_v0  ;;  %v10447_v45 = vld [vmem:[#allocation4 + $0x380] sm:$0xff]  ;;  %v20328_v0 = vld [vmem:[#allocation52_spill] sm:$0xff]  ;;  %v20329_v32 = vld [vmem:[#allocation53_spill] sm:$0xff] }
 0x7d1   :  { %15801 = vmatprep.subr.bf16.mxu1 %v15800_v48 }
 0x7d3   :  { %15125 = vmatmul.mubr.f32.gmra.mrb[2].mxu1 %v19234_v63  ;;  %v19666_v63 = vpack.c.bf16 %v10448_v40, %v10447_v45  ;;  %v20332_v45 = vld [vmem:[#allocation56_spill] sm:$0xff]  ;;  %v19684_v40 = vld [vmem:[#allocation3 + $0x182] sm:$0xff] }
 0x7d4   :  { %15127 = vmatprep.mubr.f32.mxu1 %v19237_v33  ;;  %15803 = vmatpush3.bf16.msra.mxu1 %v15800_v48  ;;  %v20318_v33 = vld [vmem:[#allocation42_spill] sm:$0xff]  ;;  %v20319_v48 = vld [vmem:[#allocation43_spill] sm:$0xff] }
 0x7d5   :  { %15805 = vmatprep.subr.bf16.mxu1 %v15804_v37 }
 0x7d7   :  { %15128 = vmatmul.mubr.f32.gmra.mrb[4].mxu1 %v19240_v30  ;;  %v20320_v30 = vld [vmem:[#allocation44_spill] sm:$0xff] }
 0x7d8   :  { %15130 = vmatprep.mubr.f32.mxu1 %v20315_v13  ;;  %15807 = vmatpush3.bf16.msra.mxu1 %v15804_v37  ;;  %v20324_v37 = vld [vmem:[#allocation48_spill] sm:$0xff]  ;;  %v20330_v13 = vld [vmem:[#allocation54_spill] sm:$0xff] }
 0x7d9   :  { %15809 = vmatprep.subr.bf16.mxu1 %v15808_v51 }
 0x7db   :  { %15131 = vmatmul.mubr.f32.gmra.mrb[6].mxu1 %v20316_v15  ;;  %v19687_v15 = vld [vmem:[#allocation3 + $0x18a] sm:$0xff] }
 0x7dc   :  { %15133 = vmatprep.mubr.f32.mxu1 %v20317_v43  ;;  %15811 = vmatpush3.bf16.msra.mxu1 %v15808_v51  ;;  %v20327_v51 = vld [vmem:[#allocation51_spill] sm:$0xff]  ;;  %v20333_v43 = vld [vmem:[#allocation57_spill] sm:$0xff] }
 0x7dd   :  { %15813 = vmatprep.subr.bf16.mxu1 %v15812_v35 }
 0x7df   :  { %15134 = vmatmul.mubr.f32.gmra.mrb[8].mxu1 %v20318_v33  ;;  %v20334_v33 = vld [vmem:[#allocation58_spill] sm:$0xff] }
 0x7e0   :  { %15136 = vmatprep.mubr.f32.mxu1 %v20319_v48  ;;  %15815 = vmatpush3.bf16.msra.mxu1 %v15812_v35  ;;  %v20331_v35 = vld [vmem:[#allocation55_spill] sm:$0xff] }
 0x7e1   :  { %15817 = vmatprep.subr.bf16.mxu1 %v19666_v63  ;;  %v20335_v48 = vld [vmem:[#allocation59_spill] sm:$0xff] }
 0x7e3   :  { %15137 = vmatmul.mubr.f32.gmra.mrb[10].mxu1 %v20320_v30  ;;  %v20336_v30 = vld [vmem:[#allocation60_spill] sm:$0xff] }
 0x7e4   :  { %15139 = vmatprep.mubr.f32.mxu1 %v20321_v42  ;;  %v20337_v42 = vld [vmem:[#allocation61_spill] sm:$0xff] }
 0x7e7   :  { %15140 = vmatmul.mubr.f32.gmra.mrb[12].mxu1 %v20322_v54  ;;  %v20338_v54 = vld [vmem:[#allocation62_spill] sm:$0xff] }
 0x7e8   :  { %15142 = vmatprep.mubr.f32.mxu1 %v20323_v56  ;;  %v20339_v56 = vld [vmem:[#allocation63_spill] sm:$0xff] }
 0x7eb   :  { %15143 = vmatmul.mubr.f32.gmra.mrb[14].mxu1 %v20324_v37  ;;  %v20340_v37 = vld [vmem:[#allocation64_spill] sm:$0xff] }
 0x7ec   :  { %15145 = vmatprep.mubr.f32.mxu1 %v20325_v41  ;;  %v20341_v41 = vld [vmem:[#allocation65_spill] sm:$0xff] }
 0x7ef   :  { %15146 = vmatmul.mubr.f32.gmra.mrb[16].mxu1 %v20326_v20  ;;  %v20342_v20 = vld [vmem:[#allocation66_spill] sm:$0xff] }
 0x7f0   :  { %15148 = vmatprep.mubr.f32.mxu1 %v20327_v51  ;;  %v20343_v51 = vld [vmem:[#allocation67_spill] sm:$0xff] }
 0x7f3   :  { %15149 = vmatmul.mubr.f32.gmra.mrb[18].mxu1 %v20328_v0  ;;  %v20344_v0 = vld [vmem:[#allocation10_spill] sm:$0xff] }
 0x7f4   :  { %15151 = vmatprep.mubr.f32.mxu1 %v20329_v32  ;;  %v20345_v32 = vld [vmem:[#allocation11_spill] sm:$0xff] }
 0x7f7   :  { %15152 = vmatmul.mubr.f32.gmra.mrb[20].mxu1 %v20330_v13  ;;  %v20346_v13 = vld [vmem:[#allocation12_spill] sm:$0xff] }
 0x7f8   :  { %15154 = vmatprep.mubr.f32.mxu1 %v20331_v35  ;;  %v20347_v35 = vld [vmem:[#allocation13_spill] sm:$0xff] }
 0x7fb   :  { %15155 = vmatmul.mubr.f32.gmra.mrb[22].mxu1 %v20332_v45  ;;  %v20348_v45 = vld [vmem:[#allocation68_spill] sm:$0xff] }
 0x7fc   :  { %15157 = vmatprep.mubr.f32.mxu1 %v19684_v40 }
 0x7ff   :  { %15158 = vmatmul.mubr.f32.gmra.mrb[24].mxu1 %v19687_v15 }
 0x800   :  { %15160 = vmatprep.mubr.f32.mxu1 %v20333_v43  ;;  %v20349_v43 = vld [vmem:[#allocation69_spill] sm:$0xff] }
 0x803   :  { %15161 = vmatmul.mubr.f32.gmra.mrb[26].mxu1 %v20334_v33  ;;  %v20350_v33 = vld [vmem:[#allocation70_spill] sm:$0xff] }
 0x804   :  { %15163 = vmatprep.mubr.f32.mxu1 %v20335_v48  ;;  %v20351_v48 = vld [vmem:[#allocation71_spill] sm:$0xff] }
 0x807   :  { %15164 = vmatmul.mubr.f32.gmra.mrb[28].mxu1 %v20336_v30  ;;  %v20352_v30 = vld [vmem:[#allocation72_spill] sm:$0xff] }
 0x808   :  { %15166 = vmatprep.mubr.f32.mxu1 %v20337_v42  ;;  %v20353_v42 = vld [vmem:[#allocation73_spill] sm:$0xff] }
 0x80b   :  { %15167 = vmatmul.mubr.f32.gmra.mrb[30].mxu1 %v20338_v54  ;;  %v20354_v54 = vld [vmem:[#allocation74_spill] sm:$0xff] }
 0x80c   :  { %15169 = vmatprep.mubr.f32.mxu1 %v20339_v56  ;;  %v20355_v56 = vld [vmem:[#allocation75_spill] sm:$0xff] }
 0x80f   :  { %15170 = vmatmul.mubr.f32.gmra.mrb[32].mxu1 %v20340_v37  ;;  %v20356_v37 = vld [vmem:[#allocation76_spill] sm:$0xff] }
 0x810   :  { %15172 = vmatprep.mubr.f32.mxu1 %v20341_v41  ;;  %v20357_v41 = vld [vmem:[#allocation77_spill] sm:$0xff] }
 0x813   :  { %15173 = vmatmul.mubr.f32.gmra.mrb[34].mxu1 %v20342_v20  ;;  %v20358_v20 = vld [vmem:[#allocation78_spill] sm:$0xff] }
 0x814   :  { %15175 = vmatprep.mubr.f32.mxu1 %v20343_v51  ;;  %v20359_v51 = vld [vmem:[#allocation14_spill] sm:$0xff] }
 0x817   :  { %15176 = vmatmul.mubr.f32.gmra.mrb[36].mxu1 %v20344_v0  ;;  %v20360_v0 = vld [vmem:[#allocation79_spill] sm:$0xff] }
 0x818   :  { %15178 = vmatprep.mubr.f32.mxu1 %v20345_v32  ;;  %v20361_v32 = vld [vmem:[#allocation80_spill] sm:$0xff] }
 0x81b   :  { %15179 = vmatmul.mubr.f32.gmra.mrb[38].mxu1 %v20346_v13  ;;  %v19720_v13 = vld [vmem:[#allocation3 + $0x332] sm:$0xff] }
 0x81c   :  { %15181 = vmatprep.mubr.f32.mxu1 %v20347_v35  ;;  %v19723_v35 = vld [vmem:[#allocation3 + $0x33a] sm:$0xff] }
 0x81f   :  { %15182 = vmatmul.mubr.f32.gmra.mrb[40].mxu1 %v20348_v45  ;;  %v10449_v45 = vld [vmem:[#allocation4 + $0x390] sm:$0xff] }
 0x820   :  { %15184 = vmatprep.mubr.f32.mxu1 %v20349_v43  ;;  %v10450_v43 = vld [vmem:[#allocation4 + $0x398] sm:$0xff] }
 0x823   :  { %15185 = vmatmul.mubr.f32.gmra.mrb[42].mxu1 %v20350_v33  ;;  %v9852_v33 = vld [vmem:[#allocation3 + $0x30] sm:$0xff] }
 0x824   :  { %15187 = vmatprep.mubr.f32.mxu1 %v20351_v48  ;;  %v15820_v48 = vpack.c.bf16 %v10450_v43, %v10449_v45  ;;  %v10455_v45 = vld [vmem:[#allocation4 + $0x3c0] sm:$0xff]  ;;  %v10456_v43 = vld [vmem:[#allocation4 + $0x3c8] sm:$0xff] }
 0x827   :  { %15188 = vmatmul.mubr.f32.gmra.mrb[44].mxu1 %v20352_v30  ;;  %v9853_v30 = vld [vmem:[#allocation3 + $0x38] sm:$0xff] }
 0x828   :  { %15190 = vmatprep.mubr.f32.mxu1 %v20353_v42  ;;  %v10451_v42 = vld [vmem:[#allocation4 + $0x3a0] sm:$0xff] }
 0x82b   :  { %15191 = vmatmul.mubr.f32.gmra.mrb[46].mxu1 %v20354_v54  ;;  %v10452_v54 = vld [vmem:[#allocation4 + $0x3a8] sm:$0xff] }
 0x82c   :  { %15193 = vmatprep.mubr.f32.mxu1 %v20355_v56  ;;  %v9854_v56 = vld [vmem:[#allocation3 + $0x48] sm:$0xff] }
 0x82f   :  { %15194 = vmatmul.mubr.f32.gmra.mrb[48].mxu1 %v20356_v37  ;;  %v9855_v37 = vld [vmem:[#allocation3 + $0x50] sm:$0xff] }
 0x830   :  { %15196 = vmatprep.mubr.f32.mxu1 %v20357_v41  ;;  %v10453_v41 = vld [vmem:[#allocation4 + $0x3b0] sm:$0xff] }
 0x833   :  { %15197 = vmatmul.mubr.f32.gmra.mrb[50].mxu1 %v20358_v20  ;;  %v10454_v20 = vld [vmem:[#allocation4 + $0x3b8] sm:$0xff] }
 0x834   :  { %15199 = vmatprep.mubr.f32.mxu1 %v20359_v51  ;;  %v9856_v51 = vld [vmem:[#allocation3 + $0x60] sm:$0xff] }
 0x837   :  { %15200 = vmatmul.mubr.f32.gmra.mrb[52].mxu1 %v20360_v0  ;;  %v15828_v0 = vpack.c.bf16 %v10454_v20, %v10453_v41  ;;  %v10459_v41 = vld [vmem:[#allocation4 + $0x3e0] sm:$0xff]  ;;  %v10460_v20 = vld [vmem:[#allocation4 + $0x3e8] sm:$0xff] }
 0x838   :  { %15202 = vmatprep.mubr.f32.mxu1 %v20361_v32  ;;  %v9857_v32 = vld [vmem:[#allocation3 + $0x68] sm:$0xff] }
 0x83b   :  { %15203 = vmatmul.mubr.f32.gmra.mrb[54].mxu1 %v19387_v34  ;;  %v15824_v34 = vpack.c.bf16 %v10452_v54, %v10451_v42  ;;  %v10457_v42 = vld [vmem:[#allocation4 + $0x3d0] sm:$0xff]  ;;  %v10458_v54 = vld [vmem:[#allocation4 + $0x3d8] sm:$0xff] }
 0x83c   :  { %15205 = vmatprep.mubr.f32.mxu1 %v19720_v13 }
 0x83f   :  { %15206 = vmatmul.mubr.f32.gmra.mrb[56].mxu1 %v19723_v35 }
 0x840   :  { %15240 = vmatprep.mubr.f32.mxu1 %v9852_v33  ;;  %v9858_v33 = vld [vmem:[#allocation3 + $0x78] sm:$0xff] }
 0x843   :  { %15241 = vmatmul.mubr.f32.vlgmr.msra.gmra.mrb[58].mxu1 %v9853_v30  ;;  %v9859_v30 = vld [vmem:[#allocation3 + $0x80] sm:$0xff] }
 0x844   :  { %15819 = vmatpush3.bf16.msra.mxu1 %v19666_v63  ;;  %15243 = vmatprep.mubr.f32.mxu1 %v9854_v56  ;;  %v15832_v63 = vpack.c.bf16 %v10456_v43, %v10455_v45  ;;  %v9860_v56 = vld [vmem:[#allocation3 + $0x90] sm:$0xff]  ;;  %v10462_v43 = vld [vmem:[#allocation4 + $0x3f8] sm:$0xff] }
 0x845   :  { %15821 = vmatprep.subr.bf16.mxu1 %v15820_v48  ;;  %v10461_v45 = vld [vmem:[#allocation4 + $0x3f0] sm:$0xff] }
 0x847   :  { %15244 = vmatmul.mubr.f32.gmra.mrb[60].mxu1 %v9855_v37  ;;  %v9861_v37 = vld [vmem:[#allocation3 + $0x98] sm:$0xff] }
 0x848   :  { %15246 = vmatprep.mubr.f32.mxu1 %v9856_v51  ;;  %15823 = vmatpush3.bf16.msra.mxu1 %v15820_v48  ;;  %v15836_v48 = vpack.c.bf16 %v10458_v54, %v10457_v42  ;;  %v9862_v51 = vld [vmem:[#allocation3 + $0xa8] sm:$0xff]  ;;  %v10977_v42 = vld [vmem:[#allocation4 + $0x400] sm:$0xff] }
 0x849   :  { %15825 = vmatprep.subr.bf16.mxu1 %v15824_v34  ;;  %v10978_v54 = vld [vmem:[#allocation4 + $0x408] sm:$0xff] }
 0x84b   :  { %15247 = vmatmul.mubr.f32.gmra.mrb[62].mxu1 %v9857_v32  ;;  %v9863_v32 = vld [vmem:[#allocation3 + $0xb0] sm:$0xff] }
 0x84c   :  { %15249 = vmatprep.mubr.f32.mxu1 %v9858_v33  ;;  %15827 = vmatpush3.bf16.msra.mxu1 %v15824_v34  ;;  %v15840_v34 = vpack.c.bf16 %v10460_v20, %v10459_v41  ;;  %v9864_v33 = vld [vmem:[#allocation3 + $0xc0] sm:$0xff]  ;;  %v9868_v41 = vld [vmem:[#allocation3 + $0xf0] sm:$0xff]  ;;  %v9870_v20 = vld [vmem:[#allocation3 + $0x108] sm:$0xff] }
 0x84d   :  { %15829 = vmatprep.subr.bf16.mxu1 %v15828_v0 }
 0x84f   :  { %15250 = vmatmul.mubr.f32.gmra.mrb[0].mxu1 %v9859_v30  ;;  %v9865_v30 = vld [vmem:[#allocation3 + $0xc8] sm:$0xff] }
 0x850   :  { %15252 = vmatprep.mubr.f32.mxu1 %v9860_v56  ;;  %15831 = vmatpush3.bf16.msra.mxu1 %v15828_v0  ;;  %v15844_v0 = vpack.c.bf16 %v10462_v43, %v10461_v45  ;;  %v9866_v56 = vld [vmem:[#allocation3 + $0xd8] sm:$0xff]  ;;  %v9873_v45 = vld [vmem:[#allocation3 + $0x128] sm:$0xff]  ;;  %v9875_v43 = vld [vmem:[#allocation3 + $0x140] sm:$0xff] }
 0x851   :  { %15833 = vmatprep.subr.bf16.mxu1 %v15832_v63 }
 0x853   :  { %15253 = vmatmul.mubr.f32.gmra.mrb[2].mxu1 %v9861_v37  ;;  %v9867_v37 = vld [vmem:[#allocation3 + $0xe0] sm:$0xff] }
 0x854   :  { %15255 = vmatprep.mubr.f32.mxu1 %v9862_v51  ;;  %15835 = vmatpush3.bf16.msra.mxu1 %v15832_v63  ;;  %v19727_v63 = vpack.c.bf16 %v10978_v54, %v10977_v42  ;;  %v9871_v51 = vld [vmem:[#allocation3 + $0x110] sm:$0xff]  ;;  %v9882_v54 = vld [vmem:[#allocation3 + $0x198] sm:$0xff] }
 0x855   :  { %15837 = vmatprep.subr.bf16.mxu1 %v15836_v48  ;;  %v9879_v42 = vld [vmem:[#allocation3 + $0x170] sm:$0xff] }
 0x857   :  { %15256 = vmatmul.mubr.f32.gmra.mrb[4].mxu1 %v9863_v32  ;;  %v9872_v32 = vld [vmem:[#allocation3 + $0x120] sm:$0xff] }
 0x858   :  { %15258 = vmatprep.mubr.f32.mxu1 %v9864_v33  ;;  %15839 = vmatpush3.bf16.msra.mxu1 %v15836_v48  ;;  %v9869_v48 = vld [vmem:[#allocation3 + $0xf8] sm:$0xff]  ;;  %v9876_v33 = vld [vmem:[#allocation3 + $0x150] sm:$0xff] }
 0x859   :  { %15841 = vmatprep.subr.bf16.mxu1 %v15840_v34 }
 0x85b   :  { %15259 = vmatmul.mubr.f32.gmra.mrb[6].mxu1 %v9865_v30  ;;  %v9877_v30 = vld [vmem:[#allocation3 + $0x158] sm:$0xff] }
 0x85c   :  { %15261 = vmatprep.mubr.f32.mxu1 %v9866_v56  ;;  %15843 = vmatpush3.bf16.msra.mxu1 %v15840_v34  ;;  %v9874_v34 = vld [vmem:[#allocation3 + $0x138] sm:$0xff]  ;;  %v19732_v56 = vld [vmem:[#allocation3 + $0x8] sm:$0xff] }
 0x85d   :  { %15845 = vmatprep.subr.bf16.mxu1 %v15844_v0 }
 0x85f   :  { %15262 = vmatmul.mubr.f32.gmra.mrb[8].mxu1 %v9867_v37  ;;  %v9884_v37 = vld [vmem:[#allocation3 + $0x1e0] sm:$0xff] }
 0x860   :  { %15264 = vmatprep.mubr.f32.mxu1 %v9868_v41  ;;  %15847 = vmatpush3.bf16.msra.mxu1 %v15844_v0  ;;  %v9878_v0 = vld [vmem:[#allocation3 + $0x168] sm:$0xff] }
 0x861   :  { %15849 = vmatprep.subr.bf16.mxu1 %v19727_v63  ;;  %v9885_v41 = vld [vmem:[#allocation3 + $0x1e8] sm:$0xff] }
 0x863   :  { %15265 = vmatmul.mubr.f32.gmra.mrb[10].mxu1 %v9869_v48  ;;  %v9886_v48 = vld [vmem:[#allocation3 + $0x1f8] sm:$0xff] }
 0x864   :  { %15267 = vmatprep.mubr.f32.mxu1 %v9870_v20  ;;  %v9887_v20 = vld [vmem:[#allocation3 + $0x200] sm:$0xff] }
 0x867   :  { %15268 = vmatmul.mubr.f32.gmra.mrb[12].mxu1 %v9871_v51  ;;  %v9888_v51 = vld [vmem:[#allocation3 + $0x210] sm:$0xff] }
 0x868   :  { %15270 = vmatprep.mubr.f32.mxu1 %v9872_v32  ;;  %v9889_v32 = vld [vmem:[#allocation3 + $0x218] sm:$0xff] }
 0x86b   :  { %15271 = vmatmul.mubr.f32.gmra.mrb[14].mxu1 %v9873_v45  ;;  %v9892_v45 = vld [vmem:[#allocation3 + $0x240] sm:$0xff] }
 0x86c   :  { %15273 = vmatprep.mubr.f32.mxu1 %v9874_v34  ;;  %v9893_v34 = vld [vmem:[#allocation3 + $0x248] sm:$0xff] }
 0x86f   :  { %15274 = vmatmul.mubr.f32.gmra.mrb[16].mxu1 %v9875_v43  ;;  %v9894_v43 = vld [vmem:[#allocation3 + $0x258] sm:$0xff] }
 0x870   :  { %15276 = vmatprep.mubr.f32.mxu1 %v9876_v33  ;;  %v9895_v33 = vld [vmem:[#allocation3 + $0x260] sm:$0xff] }
 0x873   :  { %15277 = vmatmul.mubr.f32.gmra.mrb[18].mxu1 %v9877_v30  ;;  %v9896_v30 = vld [vmem:[#allocation3 + $0x270] sm:$0xff] }
 0x874   :  { %15279 = vmatprep.mubr.f32.mxu1 %v9878_v0  ;;  %v9897_v0 = vld [vmem:[#allocation3 + $0x278] sm:$0xff] }
 0x877   :  { %15280 = vmatmul.mubr.f32.gmra.mrb[20].mxu1 %v9879_v42  ;;  %v9898_v42 = vld [vmem:[#allocation3 + $0x288] sm:$0xff] }
 0x878   :  { %15282 = vmatprep.mubr.f32.mxu1 %v19424_v2  ;;  %v9890_v2 = vld [vmem:[#allocation3 + $0x228] sm:$0xff] }
 0x87b   :  { %15283 = vmatmul.mubr.f32.gmra.mrb[22].mxu1 %v19427_v4  ;;  %v9891_v4 = vld [vmem:[#allocation3 + $0x230] sm:$0xff] }
 0x87c   :  { %15285 = vmatprep.mubr.f32.mxu1 %v9882_v54  ;;  %v9899_v54 = vld [vmem:[#allocation3 + $0x290] sm:$0xff] }
 0x87f   :  { %15286 = vmatmul.mubr.f32.gmra.mrb[24].mxu1 %v19732_v56 }
 0x880   :  { %15288 = vmatprep.mubr.f32.mxu1 %v9884_v37  ;;  %v9900_v37 = vld [vmem:[#allocation3 + $0x2a0] sm:$0xff] }
 0x883   :  { %15289 = vmatmul.mubr.f32.gmra.mrb[26].mxu1 %v9885_v41  ;;  %v9901_v41 = vld [vmem:[#allocation3 + $0x2a8] sm:$0xff] }
 0x884   :  { %15291 = vmatprep.mubr.f32.mxu1 %v9886_v48  ;;  %v9902_v48 = vld [vmem:[#allocation3 + $0x2b8] sm:$0xff] }
 0x887   :  { %15292 = vmatmul.mubr.f32.gmra.mrb[28].mxu1 %v9887_v20  ;;  %v9903_v20 = vld [vmem:[#allocation3 + $0x2c0] sm:$0xff] }
 0x888   :  { %15294 = vmatprep.mubr.f32.mxu1 %v9888_v51  ;;  %v9904_v51 = vld [vmem:[#allocation3 + $0x2d0] sm:$0xff] }
 0x88b   :  { %15295 = vmatmul.mubr.f32.gmra.mrb[30].mxu1 %v9889_v32  ;;  %v9905_v32 = vld [vmem:[#allocation3 + $0x2d8] sm:$0xff] }
 0x88c   :  { %15297 = vmatprep.mubr.f32.mxu1 %v9890_v2  ;;  %v9906_v2 = vld [vmem:[#allocation3 + $0x2e8] sm:$0xff] }
 0x88f   :  { %15298 = vmatmul.mubr.f32.gmra.mrb[32].mxu1 %v9891_v4  ;;  %v9907_v4 = vld [vmem:[#allocation3 + $0x2f0] sm:$0xff] }
 0x890   :  { %15300 = vmatprep.mubr.f32.mxu1 %v9892_v45  ;;  %v9908_v45 = vld [vmem:[#allocation3 + $0x300] sm:$0xff] }
 0x893   :  { %15301 = vmatmul.mubr.f32.gmra.mrb[34].mxu1 %v9893_v34  ;;  %v9909_v34 = vld [vmem:[#allocation3 + $0x308] sm:$0xff] }
 0x894   :  { %15303 = vmatprep.mubr.f32.mxu1 %v9894_v43  ;;  %v9910_v43 = vld [vmem:[#allocation3 + $0x318] sm:$0xff] }
 0x897   :  { %15304 = vmatmul.mubr.f32.gmra.mrb[36].mxu1 %v9895_v33  ;;  %v9911_v33 = vld [vmem:[#allocation3 + $0x320] sm:$0xff] }
 0x898   :  { %15306 = vmatprep.mubr.f32.mxu1 %v9896_v30  ;;  %v9914_v30 = vld [vmem:[#allocation3 + $0x348] sm:$0xff] }
 0x89b   :  { %15307 = vmatmul.mubr.f32.gmra.mrb[38].mxu1 %v9897_v0  ;;  %v10979_v0 = vld [vmem:[#allocation4 + $0x410] sm:$0xff] }
 0x89c   :  { %15309 = vmatprep.mubr.f32.mxu1 %v9898_v42  ;;  %v10980_v42 = vld [vmem:[#allocation4 + $0x418] sm:$0xff] }
 0x89f   :  { %15310 = vmatmul.mubr.f32.gmra.mrb[40].mxu1 %v9899_v54  ;;  %v15852_v54 = vpack.c.bf16 %v10980_v42, %v10979_v0  ;;  %v10927_v0 = vld [vmem:[#allocation3 + $0xe2] sm:$0xff]  ;;  %v10928_v42 = vld [vmem:[#allocation3 + $0xf2] sm:$0xff] }
 0x8a0   :  { %15312 = vmatprep.mubr.f32.mxu1 %v9900_v37  ;;  %v10981_v37 = vld [vmem:[#allocation4 + $0x420] sm:$0xff] }
 0x8a3   :  { %15313 = vmatmul.mubr.f32.gmra.mrb[42].mxu1 %v9901_v41  ;;  %v10982_v41 = vld [vmem:[#allocation4 + $0x428] sm:$0xff] }
 0x8a4   :  { %15315 = vmatprep.mubr.f32.mxu1 %v9902_v48  ;;  %v10983_v48 = vld [vmem:[#allocation4 + $0x430] sm:$0xff] }
 0x8a7   :  { %15316 = vmatmul.mubr.f32.gmra.mrb[44].mxu1 %v9903_v20  ;;  %v10986_v20 = vld [vmem:[#allocation4 + $0x448] sm:$0xff] }
 0x8a8   :  { %15318 = vmatprep.mubr.f32.mxu1 %v9904_v51  ;;  %v10990_v51 = vld [vmem:[#allocation4 + $0x468] sm:$0xff] }
 0x8ab   :  { %15319 = vmatmul.mubr.f32.gmra.mrb[46].mxu1 %v9905_v32  ;;  %v10992_v32 = vld [vmem:[#allocation4 + $0x478] sm:$0xff] }
 0x8ac   :  { %15321 = vmatprep.mubr.f32.mxu1 %v9906_v2  ;;  %v10920_v2 = vld [vmem:[#allocation3 + $0x92] sm:$0xff] }
 0x8af   :  { %15322 = vmatmul.mubr.f32.gmra.mrb[48].mxu1 %v9907_v4  ;;  %v10921_v4 = vld [vmem:[#allocation3 + $0x9a] sm:$0xff] }
 0x8b0   :  { %15324 = vmatprep.mubr.f32.mxu1 %v9908_v45  ;;  %v10922_v45 = vld [vmem:[#allocation3 + $0xaa] sm:$0xff] }
 0x8b3   :  { %15325 = vmatmul.mubr.f32.gmra.mrb[50].mxu1 %v9909_v34  ;;  %v10923_v34 = vld [vmem:[#allocation3 + $0xb2] sm:$0xff] }
 0x8b4   :  { %15327 = vmatprep.mubr.f32.mxu1 %v9910_v43  ;;  %v10924_v43 = vld [vmem:[#allocation3 + $0xc2] sm:$0xff] }
 0x8b7   :  { %15328 = vmatmul.mubr.f32.gmra.mrb[52].mxu1 %v9911_v33  ;;  %v10925_v33 = vld [vmem:[#allocation3 + $0xca] sm:$0xff] }
 0x8b8   :  { %15330 = vmatprep.mubr.f32.mxu1 %v19460_v8  ;;  %v15856_v8 = vpack.c.bf16 %v10982_v41, %v10981_v37  ;;  %v10930_v37 = vld [vmem:[#allocation3 + $0x10a] sm:$0xff]  ;;  %v10931_v41 = vld [vmem:[#allocation3 + $0x112] sm:$0xff] }
 0x8bb   :  { %15331 = vmatmul.mubr.f32.gmra.mrb[54].mxu1 %v19463_v10  ;;  %v10984_v10 = vld [vmem:[#allocation4 + $0x438] sm:$0xff] }
 0x8bc   :  { %15333 = vmatprep.mubr.f32.mxu1 %v9914_v30  ;;  %v10926_v30 = vld [vmem:[#allocation3 + $0xda] sm:$0xff] }
 0x8bf   :  { %15334 = vmatmul.mubr.f32.gmra.mrb[56].mxu1 %v19732_v56  ;;  %v10985_v56 = vld [vmem:[#allocation4 + $0x440] sm:$0xff] }
 0x8c0   :  { %15368 = vmatprep.mubr.f32.mxu1 %v19466_v9  ;;  %v15860_v9 = vpack.c.bf16 %v10984_v10, %v10983_v48  ;;  %v10933_v48 = vld [vmem:[#allocation3 + $0x12a] sm:$0xff]  ;;  %v10934_v10 = vld [vmem:[#allocation3 + $0x13a] sm:$0xff] }
 0x8c3   :  { %15369 = vmatmul.mubr.f32.vlgmr.msra.gmra.mrb[58].mxu1 %v19470_v24  ;;  %v15864_v24 = vpack.c.bf16 %v10986_v20, %v10985_v56  ;;  %v10936_v56 = vld [vmem:[#allocation3 + $0x152] sm:$0xff]  ;;  %v10937_v20 = vld [vmem:[#allocation3 + $0x15a] sm:$0xff] }
 0x8c4   :  { %15851 = vmatpush3.bf16.msra.mxu1 %v19727_v63  ;;  %15371 = vmatprep.mubr.f32.mxu1 %v19473_v27  ;;  %v10987_v27 = vld [vmem:[#allocation4 + $0x450] sm:$0xff]  ;;  %v10988_v63 = vld [vmem:[#allocation4 + $0x458] sm:$0xff] }
 0x8c5   :  { %15853 = vmatprep.subr.bf16.mxu1 %v15852_v54 }
 0x8c7   :  { %15372 = vmatmul.mubr.f32.gmra.mrb[60].mxu1 %v19476_v29  ;;  %v15868_v29 = vpack.c.bf16 %v10988_v63, %v10987_v27  ;;  %v10939_v27 = vld [vmem:[#allocation3 + $0x172] sm:$0xff]  ;;  %v10942_v63 = vld [vmem:[#allocation3 + $0x19a] sm:$0xff] }
 0x8c8   :  { %15374 = vmatprep.mubr.f32.mxu1 %v19479_v36  ;;  %15855 = vmatpush3.bf16.msra.mxu1 %v15852_v54  ;;  %v10989_v36 = vld [vmem:[#allocation4 + $0x460] sm:$0xff] }
 0x8c9   :  { %15857 = vmatprep.subr.bf16.mxu1 %v15856_v8  ;;  %v10929_v54 = vld [vmem:[#allocation3 + $0xfa] sm:$0xff] }
 0x8cb   :  { %15375 = vmatmul.mubr.f32.gmra.mrb[62].mxu1 %v19482_v38  ;;  %v15872_v38 = vpack.c.bf16 %v10990_v51, %v10989_v36  ;;  %v10944_v36 = vld [vmem:[#allocation3 + $0x1e2] sm:$0xff]  ;;  %v10945_v51 = vld [vmem:[#allocation3 + $0x1ea] sm:$0xff] }
 0x8cc   :  { %15377 = vmatprep.mubr.f32.mxu1 %v19485_v49  ;;  %15859 = vmatpush3.bf16.msra.mxu1 %v15856_v8  ;;  %v10991_v49 = vld [vmem:[#allocation4 + $0x470] sm:$0xff]  ;;  %v10932_v8 = vld [vmem:[#allocation3 + $0x122] sm:$0xff] }
 0x8cd   :  { %15861 = vmatprep.subr.bf16.mxu1 %v15860_v9 }
 0x8cf   :  { %15378 = vmatmul.mubr.f32.gmra.mrb[0].mxu1 %v19488_v52  ;;  %v15876_v52 = vpack.c.bf16 %v10992_v32, %v10991_v49  ;;  %v10947_v49 = vld [vmem:[#allocation3 + $0x202] sm:$0xff]  ;;  %v10948_v32 = vld [vmem:[#allocation3 + $0x212] sm:$0xff] }
 0x8d0   :  { %15380 = vmatprep.mubr.f32.mxu1 %v19491_v57  ;;  %15863 = vmatpush3.bf16.msra.mxu1 %v15860_v9  ;;  %v10412_v57 = vld [vmem:[#allocation3 + $0x199] sm:$0xff]  ;;  %v10935_v9 = vld [vmem:[#allocation3 + $0x142] sm:$0xff] }
 0x8d1   :  { %15865 = vmatprep.subr.bf16.mxu1 %v15864_v24 }
 0x8d3   :  { %15381 = vmatmul.mubr.f32.gmra.mrb[2].mxu1 %v19494_v59  ;;  %v10413_v59 = vld [vmem:[#allocation3 + $0x1a1] sm:$0xff] }
 0x8d4   :  { %15383 = vmatprep.mubr.f32.mxu1 %v19497_v62  ;;  %15867 = vmatpush3.bf16.msra.mxu1 %v15864_v24  ;;  %v20362_v62 = vld [vmem:[#allocation21_spill] sm:$0xff]  ;;  %v10938_v24 = vld [vmem:[#allocation3 + $0x16a] sm:$0xff] }
 0x8d5   :  { %15869 = vmatprep.subr.bf16.mxu1 %v15868_v29 }
 0x8d7   :  { %15384 = vmatmul.mubr.f32.gmra.mrb[4].mxu1 %v19500_v39  ;;  %v20363_v39 = vld [vmem:[#allocation22_spill] sm:$0xff] }
 0x8d8   :  { %15386 = vmatprep.mubr.f32.mxu1 %v19503_v44  ;;  %15871 = vmatpush3.bf16.msra.mxu1 %v15868_v29  ;;  %v20364_v44 = vld [vmem:[#allocation23_spill] sm:$0xff] }
 0x8d9   :  { %15873 = vmatprep.subr.bf16.mxu1 %v15872_v38  ;;  %v10943_v29 = vld [vmem:[#allocation3 + $0x1a2] sm:$0xff] }
 0x8db   :  { %15387 = vmatmul.mubr.f32.gmra.mrb[6].mxu1 %v19508_v14  ;;  %v20365_v14 = vld [vmem:[#allocation24_spill] sm:$0xff] }
 0x8dc   :  { %15389 = vmatprep.mubr.f32.mxu1 %v19511_v50  ;;  %15875 = vmatpush3.bf16.msra.mxu1 %v15872_v38  ;;  %v20366_v50 = vld [vmem:[#allocation25_spill] sm:$0xff] }
 0x8dd   :  { %15877 = vmatprep.subr.bf16.mxu1 %v15876_v52  ;;  %v10946_v38 = vld [vmem:[#allocation3 + $0x1fa] sm:$0xff] }
 0x8df   :  { %15390 = vmatmul.mubr.f32.gmra.mrb[8].mxu1 %v19515_v53  ;;  %v20367_v53 = vld [vmem:[#allocation26_spill] sm:$0xff] }
 0x8e0   :  { %15392 = vmatprep.mubr.f32.mxu1 %v19518_v21  ;;  %15879 = vmatpush3.bf16.msra.mxu1 %v15876_v52  ;;  %v20368_v21 = vld [vmem:[#allocation27_spill] sm:$0xff]  ;;  %v10949_v52 = vld [vmem:[#allocation3 + $0x21a] sm:$0xff] }
 0x8e3   :  { %15393 = vmatmul.mubr.f32.gmra.mrb[10].mxu1 %v19521_v55  ;;  %v20369_v55 = vld [vmem:[#allocation28_spill] sm:$0xff] }
 0x8e4   :  { %15395 = vmatprep.mubr.f32.mxu1 %v19524_v58  ;;  %v20370_v58 = vld [vmem:[#allocation29_spill] sm:$0xff] }
 0x8e7   :  { %15396 = vmatmul.mubr.f32.gmra.mrb[12].mxu1 %v19527_v61  ;;  %v20371_v61 = vld [vmem:[#allocation81_spill] sm:$0xff] }
 0x8e8   :  { %15398 = vmatprep.mubr.f32.mxu1 %v19530_v60  ;;  %v20372_v60 = vld [vmem:[#allocation82_spill] sm:$0xff] }
 0x8eb   :  { %15399 = vmatmul.mubr.f32.gmra.mrb[14].mxu1 %v19533_v1  ;;  %v20373_v1 = vld [vmem:[#allocation83_spill] sm:$0xff] }
 0x8ec   :  { %15401 = vmatprep.mubr.f32.mxu1 %v19536_v46  ;;  %v20374_v46 = vld [vmem:[#allocation84_spill] sm:$0xff] }
 0x8ef   :  { %15402 = vmatmul.mubr.f32.gmra.mrb[16].mxu1 %v19539_v5  ;;  %v20375_v5 = vld [vmem:[#allocation85_spill] sm:$0xff] }
 0x8f0   :  { %15404 = vmatprep.mubr.f32.mxu1 %v19542_v7  ;;  %v20376_v7 = vld [vmem:[#allocation86_spill] sm:$0xff] }
 0x8f3   :  { %15405 = vmatmul.mubr.f32.gmra.mrb[18].mxu1 %v19545_v47  ;;  %v20377_v47 = vld [vmem:[#allocation87_spill] sm:$0xff] }
 0x8f4   :  { %15407 = vmatprep.mubr.f32.mxu1 %v19548_v6  ;;  %v20378_v6 = vld [vmem:[#allocation88_spill] sm:$0xff] }
 0x8f7   :  { %15408 = vmatmul.mubr.f32.gmra.mrb[20].mxu1 %v19551_v11  ;;  %v20379_v11 = vld [vmem:[#allocation89_spill] sm:$0xff] }
 0x8f8   :  { %15410 = vmatprep.mubr.f32.mxu1 %v19554_v12  ;;  %v20380_v12 = vld [vmem:[#allocation90_spill] sm:$0xff] }
 0x8fb   :  { %15411 = vmatmul.mubr.f32.gmra.mrb[22].mxu1 %v19557_v3  ;;  %v10444_v3 = vld [vmem:[#allocation3 + $0x349] sm:$0xff] }
 0x8fc   :  { %15413 = vmatprep.mubr.f32.mxu1 %v10412_v57  ;;  %v10950_v57 = vld [vmem:[#allocation3 + $0x22a] sm:$0xff] }
 0x8ff   :  { %15414 = vmatmul.mubr.f32.gmra.mrb[24].mxu1 %v10413_v59  ;;  %v10953_v59 = vld [vmem:[#allocation3 + $0x24a] sm:$0xff] }
 0x900   :  { %15416 = vmatprep.mubr.f32.mxu1 %v19560_v16  ;;  %v20381_v16 = vld [vmem:[#allocation91_spill] sm:$0xff] }
 0x903   :  { %15417 = vmatmul.mubr.f32.gmra.mrb[26].mxu1 %v19563_v17  ;;  %v10445_v17 = vld [vmem:[#allocation3 + $0x351] sm:$0xff] }
 0x904   :  { %15419 = vmatprep.mubr.f32.mxu1 %v19566_v18  ;;  %v10912_v18 = vld [vmem:[#allocation3 + $0x32] sm:$0xff] }
 0x907   :  { %15420 = vmatmul.mubr.f32.gmra.mrb[28].mxu1 %v19569_v19  ;;  %v10913_v19 = vld [vmem:[#allocation3 + $0x3a] sm:$0xff] }
 0x908   :  { %15422 = vmatprep.mubr.f32.mxu1 %v19572_v22  ;;  %v10914_v22 = vld [vmem:[#allocation3 + $0x4a] sm:$0xff] }
 0x90b   :  { %15423 = vmatmul.mubr.f32.gmra.mrb[30].mxu1 %v19575_v23  ;;  %v10915_v23 = vld [vmem:[#allocation3 + $0x52] sm:$0xff] }
 0x90c   :  { %15425 = vmatprep.mubr.f32.mxu1 %v19578_v25  ;;  %v10916_v25 = vld [vmem:[#allocation3 + $0x62] sm:$0xff] }
 0x90f   :  { %15426 = vmatmul.mubr.f32.gmra.mrb[32].mxu1 %v19581_v26  ;;  %v10917_v26 = vld [vmem:[#allocation3 + $0x6a] sm:$0xff] }
 0x910   :  { %15428 = vmatprep.mubr.f32.mxu1 %v19584_v28  ;;  %v10918_v28 = vld [vmem:[#allocation3 + $0x7a] sm:$0xff] }
 0x913   :  { %15429 = vmatmul.mubr.f32.gmra.mrb[34].mxu1 %v19587_v31  ;;  %v10919_v31 = vld [vmem:[#allocation3 + $0x82] sm:$0xff] }
 0x914   :  { %15431 = vmatprep.mubr.f32.mxu1 %v20362_v62  ;;  %v10954_v62 = vld [vmem:[#allocation3 + $0x25a] sm:$0xff] }
 0x917   :  { %15432 = vmatmul.mubr.f32.gmra.mrb[36].mxu1 %v20363_v39  ;;  %v10955_v39 = vld [vmem:[#allocation3 + $0x262] sm:$0xff] }
 0x918   :  { %15434 = vmatprep.mubr.f32.mxu1 %v20364_v44  ;;  %v10956_v44 = vld [vmem:[#allocation3 + $0x272] sm:$0xff] }
 0x91b   :  { %15435 = vmatmul.mubr.f32.gmra.mrb[38].mxu1 %v20365_v14  ;;  %v10957_v14 = vld [vmem:[#allocation3 + $0x27a] sm:$0xff] }
 0x91c   :  { %15437 = vmatprep.mubr.f32.mxu1 %v20366_v50  ;;  %v10958_v50 = vld [vmem:[#allocation3 + $0x28a] sm:$0xff] }
 0x91f   :  { %15438 = vmatmul.mubr.f32.gmra.mrb[40].mxu1 %v20367_v53  ;;  %v10959_v53 = vld [vmem:[#allocation3 + $0x292] sm:$0xff] }
 0x920   :  { %15440 = vmatprep.mubr.f32.mxu1 %v20368_v21  ;;  %v10960_v21 = vld [vmem:[#allocation3 + $0x2a2] sm:$0xff] }
 0x923   :  { %15441 = vmatmul.mubr.f32.gmra.mrb[42].mxu1 %v20369_v55  ;;  %v10961_v55 = vld [vmem:[#allocation3 + $0x2aa] sm:$0xff] }
 0x924   :  { %15443 = vmatprep.mubr.f32.mxu1 %v20370_v58  ;;  %v10962_v58 = vld [vmem:[#allocation3 + $0x2ba] sm:$0xff] }
 0x927   :  { %15444 = vmatmul.mubr.f32.gmra.mrb[44].mxu1 %v20371_v61  ;;  %v10963_v61 = vld [vmem:[#allocation3 + $0x2c2] sm:$0xff] }
 0x928   :  { %15446 = vmatprep.mubr.f32.mxu1 %v20372_v60  ;;  %v10964_v60 = vld [vmem:[#allocation3 + $0x2d2] sm:$0xff] }
 0x92b   :  { %15447 = vmatmul.mubr.f32.gmra.mrb[46].mxu1 %v20373_v1  ;;  %v10965_v1 = vld [vmem:[#allocation3 + $0x2da] sm:$0xff] }
 0x92c   :  { %15449 = vmatprep.mubr.f32.mxu1 %v20374_v46  ;;  %v10966_v46 = vld [vmem:[#allocation3 + $0x2ea] sm:$0xff] }
 0x92f   :  { %15450 = vmatmul.mubr.f32.gmra.mrb[48].mxu1 %v20375_v5  ;;  %v10967_v5 = vld [vmem:[#allocation3 + $0x2f2] sm:$0xff] }
 0x930   :  { %15452 = vmatprep.mubr.f32.mxu1 %v20376_v7  ;;  %v10968_v7 = vld [vmem:[#allocation3 + $0x302] sm:$0xff] }
 0x933   :  { %15453 = vmatmul.mubr.f32.gmra.mrb[50].mxu1 %v20377_v47  ;;  %v10969_v47 = vld [vmem:[#allocation3 + $0x30a] sm:$0xff] }
 0x934   :  { %15455 = vmatprep.mubr.f32.mxu1 %v20378_v6  ;;  %v10970_v6 = vld [vmem:[#allocation3 + $0x31a] sm:$0xff] }
 0x937   :  { %15456 = vmatmul.mubr.f32.gmra.mrb[52].mxu1 %v20379_v11  ;;  %v10971_v11 = vld [vmem:[#allocation3 + $0x322] sm:$0xff] }
 0x938   :  { %15458 = vmatprep.mubr.f32.mxu1 %v20380_v12  ;;  %v10974_v12 = vld [vmem:[#allocation3 + $0x34a] sm:$0xff] }
 0x93b   :  { %15459 = vmatmul.mubr.f32.gmra.mrb[54].mxu1 %v20381_v16 }
 0x93c   :  { %15461 = vmatprep.mubr.f32.mxu1 %v10444_v3  ;;  %v10975_v3 = vld [vmem:[#allocation3 + $0x352] sm:$0xff] }
 0x93f   :  { %15462 = vmatmul.mubr.f32.gmra.mrb[56].mxu1 %v10445_v17  ;;  %v19806_v17 = vld [vmem:[%s19897_s4] ss:$0 sm:$0xff]  ;;  %s16979_s4 = smov [#allocation7]  }
 0x940   :  { %15496 = vmatprep.mubr.f32.mxu1 %v10912_v18  ;;  %v20382_v18 = vld [vmem:[#allocation15_spill] sm:$0xff]  ;;  %s11646_s9 = sshll.u32 %s16979_s4, 4  ;;  %s11647_s9 = int_to_ptr.vmem [resolvable:$true] %s11646_s9 }
 0x941   :  { %s16949_s10 = scalar_lea.vmem %s11647_s9, 8192  ;;  %p16954_p9 = scmp.lt.s32.totalorder %s11647_s9, %s11647_s9 }
 0x942   :  { %p16950_p8 = scmp.ne.s32.totalorder %s11647_s9, %s16949_s10  ;;  %p16955_p10 = scmp.lt.s32.totalorder %s16949_s10, %s16949_s10 }
 0x943   :  { %15497 = vmatmul.mubr.f32.vlgmr.msra.gmra.mrb[58].mxu1 %v10913_v19 }
 0x944   :  { %15499 = vmatprep.mubr.f32.mxu1 %v10914_v22  ;;  %p16956_p11 = por %p16955_p10, %p16954_p9 }
 0x946   :  { %p16957_p12 = pnand %p16956_p11, %p16950_p8 }
 0x947   :  { %15500 = vmatmul.mubr.f32.gmra.mrb[60].mxu1 %v10915_v23  ;;  %v20383_v23 = vld [vmem:[#allocation16_spill] sm:$0xff] }
 0x948   :  { %15502 = vmatprep.mubr.f32.mxu1 %v10916_v25 }
 0x94b   :  { %15503 = vmatmul.mubr.f32.gmra.mrb[62].mxu1 %v10917_v26 }
 0x94c   :  { %15505 = vmatprep.mubr.f32.mxu1 %v10918_v28 }
 0x94f   :  { %15506 = vmatmul.mubr.f32.gmra.mrb[0].mxu1 %v10919_v31  ;;  %v20384_v31 = vld [vmem:[#allocation17_spill] sm:$0xff] }
 0x950   :  { %15508 = vmatprep.mubr.f32.mxu1 %v10920_v2 }
 0x953   :  { %15509 = vmatmul.mubr.f32.gmra.mrb[2].mxu1 %v10921_v4 }
 0x954   :  { %15511 = vmatprep.mubr.f32.mxu1 %v10922_v45 }
 0x957   :  { %15512 = vmatmul.mubr.f32.gmra.mrb[4].mxu1 %v10923_v34  ;;  %v20385_v34 = vld [vmem:[#allocation18_spill] sm:$0xff] }
 0x958   :  { %15514 = vmatprep.mubr.f32.mxu1 %v10924_v43 }
 0x95b   :  { %15515 = vmatmul.mubr.f32.gmra.mrb[6].mxu1 %v10925_v33 }
 0x95c   :  { %15517 = vmatprep.mubr.f32.mxu1 %v10926_v30 }
 0x95f   :  { %15518 = vmatmul.mubr.f32.gmra.mrb[8].mxu1 %v10927_v0 }
 0x960   :  { %15520 = vmatprep.mubr.f32.mxu1 %v10928_v42 }
 0x963   :  { %15521 = vmatmul.mubr.f32.gmra.mrb[10].mxu1 %v10929_v54  ;;  %v20386_v54 = vld [vmem:[#allocation19_spill] sm:$0xff] }
 0x964   :  { %15523 = vmatprep.mubr.f32.mxu1 %v10930_v37 }
 0x967   :  { %15524 = vmatmul.mubr.f32.gmra.mrb[12].mxu1 %v10931_v41 }
 0x968   :  { %15526 = vmatprep.mubr.f32.mxu1 %v10932_v8 }
 0x96b   :  { %15527 = vmatmul.mubr.f32.gmra.mrb[14].mxu1 %v10933_v48  ;;  %v20387_v48 = vld [vmem:[#allocation20_spill] sm:$0xff] }
 0x96c   :  { %15529 = vmatprep.mubr.f32.mxu1 %v10934_v10 }
 0x96f   :  { %15530 = vmatmul.mubr.f32.gmra.mrb[16].mxu1 %v10935_v9 }
 0x970   :  { %15532 = vmatprep.mubr.f32.mxu1 %v10936_v56 }
 0x973   :  { %15533 = vmatmul.mubr.f32.gmra.mrb[18].mxu1 %v10937_v20 }
 0x974   :  { %15535 = vmatprep.mubr.f32.mxu1 %v10938_v24 }
 0x977   :  { %15536 = vmatmul.mubr.f32.gmra.mrb[20].mxu1 %v10939_v27 }
 0x978   :  { %15538 = vmatprep.mubr.f32.mxu1 %v19684_v40  ;;  %v10951_v40 = vld [vmem:[#allocation3 + $0x232] sm:$0xff] }
 0x97b   :  { %15539 = vmatmul.mubr.f32.gmra.mrb[22].mxu1 %v19687_v15  ;;  %v10952_v15 = vld [vmem:[#allocation3 + $0x242] sm:$0xff] }
 0x97c   :  { %15541 = vmatprep.mubr.f32.mxu1 %v10942_v63 }
 0x97f   :  { %15542 = vmatmul.mubr.f32.gmra.mrb[24].mxu1 %v10943_v29 }
 0x980   :  { %15544 = vmatprep.mubr.f32.mxu1 %v10944_v36 }
 0x983   :  { %15545 = vmatmul.mubr.f32.gmra.mrb[26].mxu1 %v10945_v51 }
 0x984   :  { %15547 = vmatprep.mubr.f32.mxu1 %v10946_v38 }
 0x987   :  { %15548 = vmatmul.mubr.f32.gmra.mrb[28].mxu1 %v10947_v49 }
 0x988   :  { %15550 = vmatprep.mubr.f32.mxu1 %v10948_v32 }
 0x98b   :  { %15551 = vmatmul.mubr.f32.gmra.mrb[30].mxu1 %v10949_v52 }
 0x98c   :  { %15553 = vmatprep.mubr.f32.mxu1 %v10950_v57 }
 0x98f   :  { %15554 = vmatmul.mubr.f32.gmra.mrb[32].mxu1 %v10951_v40 }
 0x990   :  { %15556 = vmatprep.mubr.f32.mxu1 %v10952_v15 }
 0x993   :  { %15557 = vmatmul.mubr.f32.gmra.mrb[34].mxu1 %v10953_v59 }
 0x994   :  { %15559 = vmatprep.mubr.f32.mxu1 %v10954_v62 }
 0x997   :  { %15560 = vmatmul.mubr.f32.gmra.mrb[36].mxu1 %v10955_v39 }
 0x998   :  { %15562 = vmatprep.mubr.f32.mxu1 %v10956_v44 }
 0x99b   :  { %15563 = vmatmul.mubr.f32.gmra.mrb[38].mxu1 %v10957_v14 }
 0x99c   :  { %15565 = vmatprep.mubr.f32.mxu1 %v10958_v50 }
 0x99f   :  { %15566 = vmatmul.mubr.f32.gmra.mrb[40].mxu1 %v10959_v53 }
 0x9a0   :  { %15568 = vmatprep.mubr.f32.mxu1 %v10960_v21 }
 0x9a3   :  { %15569 = vmatmul.mubr.f32.gmra.mrb[42].mxu1 %v10961_v55 }
 0x9a4   :  { %15571 = vmatprep.mubr.f32.mxu1 %v10962_v58 }
 0x9a7   :  { %15572 = vmatmul.mubr.f32.gmra.mrb[44].mxu1 %v10963_v61 }
 0x9a8   :  { %15574 = vmatprep.mubr.f32.mxu1 %v10964_v60 }
 0x9ab   :  { %15575 = vmatmul.mubr.f32.gmra.mrb[46].mxu1 %v10965_v1 }
 0x9ac   :  { %15577 = vmatprep.mubr.f32.mxu1 %v10966_v46 }
 0x9af   :  { %15578 = vmatmul.mubr.f32.gmra.mrb[48].mxu1 %v10967_v5 }
 0x9b0   :  { %15580 = vmatprep.mubr.f32.mxu1 %v10968_v7 }
 0x9b3   :  { %15581 = vmatmul.mubr.f32.gmra.mrb[50].mxu1 %v10969_v47 }
 0x9b4   :  { %15583 = vmatprep.mubr.f32.mxu1 %v10970_v6 }
 0x9b7   :  { %15584 = vmatmul.mubr.f32.gmra.mrb[52].mxu1 %v10971_v11 }
 0x9b8   :  { %15586 = vmatprep.mubr.f32.mxu1 %v19720_v13 }
 0x9bb   :  { %15587 = vmatmul.mubr.f32.gmra.mrb[54].mxu1 %v19723_v35 }
 0x9bc   :  { %15589 = vmatprep.mubr.f32.mxu1 %v10974_v12 }
 0x9bf   :  { %15590 = vmatmul.mubr.f32.gmra.mrb[56].mxu1 %v10975_v3 }
 0xa16   :  { %v15498_v16 = vpop.f32.mrb[58].mxu1 }
 0xa17   :  { %v15896_v19 = vadd.f32 %v15498_v16, %v20382_v18  ;;  %v11059_v22 = vpop.f32.mrb[59].mxu1 }
 0xa18   :  { %v15897_v25 = vadd.f32 %v11059_v22, %v20383_v23 }
 0xa19   :  { %v11450_v26 = vadd.f32 %v15896_v19, %v19806_v17 }
 0xa1a   :  { %v11449_v13 = vadd.f32 %v15897_v25, %v19806_v17  ;;  %v15501_v28 = vpop.f32.mrb[60].mxu1 }
 0xa1b   :  { %v11514_v35 = vmax.f32 %v11450_v26, 0.0  ;;  %v15898_v2 = vadd.f32 %v15501_v28, %v20384_v31  ;;  %v11069_v4 = vpop.f32.mrb[61].mxu1 }
 0xa1c   :  { %v11513_v45 = vmax.f32 %v11449_v13, 0.0  ;;  %v15899_v43 = vadd.f32 %v11069_v4, %v20385_v34 }
 0xa1d   :  { %11578 = vst [vmem:[#allocation7 + $0x8] sm:$0xff] %v11514_v35  ;;  %v11452_v33 = vadd.f32 %v15898_v2, %v19806_v17 }
 0xa1e   :  { %11577 = vst [vmem:[#allocation7] sm:$0xff] %v11513_v45  ;;  %v11451_v30 = vadd.f32 %v15899_v43, %v19806_v17  ;;  %v15504_v0 = vpop.f32.mrb[62].mxu1 }
 0xa1f   :  { %v11516_v42 = vmax.f32 %v11452_v33, 0.0  ;;  %v15900_v37 = vadd.f32 %v15504_v0, %v20386_v54  ;;  %v11079_v41 = vpop.f32.mrb[63].mxu1 }
 0xa20   :  { %v11515_v8 = vmax.f32 %v11451_v30, 0.0  ;;  %v15901_v10 = vadd.f32 %v11079_v41, %v20387_v48 }
 0xa21   :  { %11580 = vst [vmem:[#allocation7 + $0x18] sm:$0xff] %v11516_v42  ;;  %v11454_v9 = vadd.f32 %v15900_v37, %v19806_v17 }
 0xa22   :  { %11579 = vst [vmem:[#allocation7 + $0x10] sm:$0xff] %v11515_v8  ;;  %v11453_v56 = vadd.f32 %v15901_v10, %v19806_v17  ;;  %v15507_v20 = vpop.f32.mrb[0].mxu1 }
 0xa23   :  { %v11518_v24 = vmax.f32 %v11454_v9, 0.0  ;;  %v11456_v27 = vadd.f32 %v15507_v20, %v19806_v17  ;;  %v11089_v63 = vpop.f32.mrb[1].mxu1 }
 0xa24   :  { %v11517_v29 = vmax.f32 %v11453_v56, 0.0  ;;  %v11455_v36 = vadd.f32 %v19806_v17, %v11089_v63 }
 0xa25   :  { %11582 = vst [vmem:[#allocation7 + $0x28] sm:$0xff] %v11518_v24  ;;  %v11520_v51 = vmax.f32 %v11456_v27, 0.0 }
 0xa26   :  { %11581 = vst [vmem:[#allocation7 + $0x20] sm:$0xff] %v11517_v29  ;;  %v11519_v38 = vmax.f32 %v11455_v36, 0.0  ;;  %v15510_v49 = vpop.f32.mrb[2].mxu1 }
 0xa27   :  { %11584 = vst [vmem:[#allocation7 + $0x38] sm:$0xff] %v11520_v51  ;;  %v11458_v32 = vadd.f32 %v15510_v49, %v19806_v17  ;;  %v11099_v52 = vpop.f32.mrb[3].mxu1 }
 0xa28   :  { %11583 = vst [vmem:[#allocation7 + $0x30] sm:$0xff] %v11519_v38  ;;  %v11457_v57 = vadd.f32 %v19806_v17, %v11099_v52 }
 0xa29   :  { %v11522_v40 = vmax.f32 %v11458_v32, 0.0 }
 0xa2a   :  { %v11521_v15 = vmax.f32 %v11457_v57, 0.0  ;;  %v15513_v59 = vpop.f32.mrb[4].mxu1 }
 0xa2b   :  { %11586 = vst [vmem:[#allocation7 + $0x48] sm:$0xff] %v11522_v40  ;;  %v11460_v62 = vadd.f32 %v15513_v59, %v19806_v17  ;;  %v11109_v39 = vpop.f32.mrb[5].mxu1 }
 0xa2c   :  { %11585 = vst [vmem:[#allocation7 + $0x40] sm:$0xff] %v11521_v15  ;;  %v11459_v44 = vadd.f32 %v19806_v17, %v11109_v39 }
 0xa2d   :  { %v11524_v14 = vmax.f32 %v11460_v62, 0.0 }
 0xa2e   :  { %v11523_v50 = vmax.f32 %v11459_v44, 0.0  ;;  %v15516_v53 = vpop.f32.mrb[6].mxu1 }
 0xa2f   :  { %11588 = vst [vmem:[#allocation7 + $0x58] sm:$0xff] %v11524_v14  ;;  %v11462_v21 = vadd.f32 %v15516_v53, %v19806_v17  ;;  %v11119_v55 = vpop.f32.mrb[7].mxu1 }
 0xa30   :  { %11587 = vst [vmem:[#allocation7 + $0x50] sm:$0xff] %v11523_v50  ;;  %v11461_v58 = vadd.f32 %v19806_v17, %v11119_v55 }
 0xa31   :  { %v11526_v61 = vmax.f32 %v11462_v21, 0.0 }
 0xa32   :  { %v11525_v60 = vmax.f32 %v11461_v58, 0.0  ;;  %v15519_v1 = vpop.f32.mrb[8].mxu1 }
 0xa33   :  { %11590 = vst [vmem:[#allocation7 + $0x68] sm:$0xff] %v11526_v61  ;;  %v11464_v46 = vadd.f32 %v15519_v1, %v19806_v17  ;;  %v11129_v5 = vpop.f32.mrb[9].mxu1 }
 0xa34   :  { %11589 = vst [vmem:[#allocation7 + $0x60] sm:$0xff] %v11525_v60  ;;  %v11463_v7 = vadd.f32 %v19806_v17, %v11129_v5 }
 0xa35   :  { %v11528_v47 = vmax.f32 %v11464_v46, 0.0 }
 0xa36   :  { %v11527_v6 = vmax.f32 %v11463_v7, 0.0  ;;  %v15522_v11 = vpop.f32.mrb[10].mxu1 }
 0xa37   :  { %11592 = vst [vmem:[#allocation7 + $0x78] sm:$0xff] %v11528_v47  ;;  %v11466_v12 = vadd.f32 %v15522_v11, %v19806_v17  ;;  %v11139_v3 = vpop.f32.mrb[11].mxu1 }
 0xa38   :  { %11591 = vst [vmem:[#allocation7 + $0x70] sm:$0xff] %v11527_v6  ;;  %v11465_v16 = vadd.f32 %v19806_v17, %v11139_v3 }
 0xa39   :  { %v11530_v18 = vmax.f32 %v11466_v12, 0.0 }
 0xa3a   :  { %v11529_v19 = vmax.f32 %v11465_v16, 0.0  ;;  %v15525_v22 = vpop.f32.mrb[12].mxu1 }
 0xa3b   :  { %11594 = vst [vmem:[#allocation7 + $0x88] sm:$0xff] %v11530_v18  ;;  %v11468_v23 = vadd.f32 %v15525_v22, %v19806_v17  ;;  %v11149_v25 = vpop.f32.mrb[13].mxu1 }
 0xa3c   :  { %11593 = vst [vmem:[#allocation7 + $0x80] sm:$0xff] %v11529_v19  ;;  %v11467_v26 = vadd.f32 %v19806_v17, %v11149_v25 }
 0xa3d   :  { %v11532_v13 = vmax.f32 %v11468_v23, 0.0 }
 0xa3e   :  { %v11531_v28 = vmax.f32 %v11467_v26, 0.0  ;;  %v15528_v35 = vpop.f32.mrb[14].mxu1 }
 0xa3f   :  { %11596 = vst [vmem:[#allocation7 + $0x98] sm:$0xff] %v11532_v13  ;;  %v11470_v31 = vadd.f32 %v15528_v35, %v19806_v17  ;;  %v11159_v2 = vpop.f32.mrb[15].mxu1 }
 0xa40   :  { %11595 = vst [vmem:[#allocation7 + $0x90] sm:$0xff] %v11531_v28  ;;  %v11469_v4 = vadd.f32 %v19806_v17, %v11159_v2 }
 0xa41   :  { %v11534_v45 = vmax.f32 %v11470_v31, 0.0 }
 0xa42   :  { %v11533_v34 = vmax.f32 %v11469_v4, 0.0  ;;  %v15531_v43 = vpop.f32.mrb[16].mxu1 }
 0xa43   :  { %11598 = vst [vmem:[#allocation7 + $0xa8] sm:$0xff] %v11534_v45  ;;  %v11472_v33 = vadd.f32 %v15531_v43, %v19806_v17  ;;  %v11169_v30 = vpop.f32.mrb[17].mxu1 }
 0xa44   :  { %11597 = vst [vmem:[#allocation7 + $0xa0] sm:$0xff] %v11533_v34  ;;  %v11471_v0 = vadd.f32 %v19806_v17, %v11169_v30 }
 0xa45   :  { %v11536_v42 = vmax.f32 %v11472_v33, 0.0 }
 0xa46   :  { %v11535_v54 = vmax.f32 %v11471_v0, 0.0  ;;  %v15534_v37 = vpop.f32.mrb[18].mxu1 }
 0xa47   :  { %11600 = vst [vmem:[#allocation7 + $0xb8] sm:$0xff] %v11536_v42  ;;  %v11474_v41 = vadd.f32 %v15534_v37, %v19806_v17  ;;  %v11179_v8 = vpop.f32.mrb[19].mxu1 }
 0xa48   :  { %11599 = vst [vmem:[#allocation7 + $0xb0] sm:$0xff] %v11535_v54  ;;  %v11473_v48 = vadd.f32 %v19806_v17, %v11179_v8 }
 0xa49   :  { %v11538_v10 = vmax.f32 %v11474_v41, 0.0 }
 0xa4a   :  { %v11537_v9 = vmax.f32 %v11473_v48, 0.0  ;;  %v15537_v56 = vpop.f32.mrb[20].mxu1 }
 0xa4b   :  { %11602 = vst [vmem:[#allocation7 + $0xc8] sm:$0xff] %v11538_v10  ;;  %v11476_v20 = vadd.f32 %v15537_v56, %v19806_v17  ;;  %v11189_v24 = vpop.f32.mrb[21].mxu1 }
 0xa4c   :  { %11601 = vst [vmem:[#allocation7 + $0xc0] sm:$0xff] %v11537_v9  ;;  %v11475_v27 = vadd.f32 %v19806_v17, %v11189_v24 }
 0xa4d   :  { %v11540_v63 = vmax.f32 %v11476_v20, 0.0 }
 0xa4e   :  { %v11539_v29 = vmax.f32 %v11475_v27, 0.0  ;;  %v15540_v36 = vpop.f32.mrb[22].mxu1 }
 0xa4f   :  { %11604 = vst [vmem:[#allocation7 + $0xd8] sm:$0xff] %v11540_v63  ;;  %v11478_v51 = vadd.f32 %v15540_v36, %v19806_v17  ;;  %v11199_v38 = vpop.f32.mrb[23].mxu1 }
 0xa50   :  { %11603 = vst [vmem:[#allocation7 + $0xd0] sm:$0xff] %v11539_v29  ;;  %v11477_v49 = vadd.f32 %v19806_v17, %v11199_v38 }
 0xa51   :  { %v11542_v32 = vmax.f32 %v11478_v51, 0.0 }
 0xa52   :  { %v11541_v52 = vmax.f32 %v11477_v49, 0.0  ;;  %v15543_v57 = vpop.f32.mrb[24].mxu1 }
 0xa53   :  { %11606 = vst [vmem:[#allocation7 + $0xe8] sm:$0xff] %v11542_v32  ;;  %v11480_v40 = vadd.f32 %v15543_v57, %v19806_v17  ;;  %v11209_v15 = vpop.f32.mrb[25].mxu1 }
 0xa54   :  { %11605 = vst [vmem:[#allocation7 + $0xe0] sm:$0xff] %v11541_v52  ;;  %v11479_v59 = vadd.f32 %v19806_v17, %v11209_v15 }
 0xa55   :  { %v11544_v62 = vmax.f32 %v11480_v40, 0.0 }
 0xa56   :  { %v11543_v39 = vmax.f32 %v11479_v59, 0.0  ;;  %v15546_v44 = vpop.f32.mrb[26].mxu1 }
 0xa57   :  { %11608 = vst [vmem:[#allocation7 + $0xf8] sm:$0xff] %v11544_v62  ;;  %v11482_v14 = vadd.f32 %v15546_v44, %v19806_v17  ;;  %v11219_v50 = vpop.f32.mrb[27].mxu1 }
 0xa58   :  { %11607 = vst [vmem:[#allocation7 + $0xf0] sm:$0xff] %v11543_v39  ;;  %v11481_v53 = vadd.f32 %v19806_v17, %v11219_v50 }
 0xa59   :  { %v11546_v21 = vmax.f32 %v11482_v14, 0.0 }
 0xa5a   :  { %v11545_v55 = vmax.f32 %v11481_v53, 0.0  ;;  %v15549_v58 = vpop.f32.mrb[28].mxu1 }
 0xa5b   :  { %11610 = vst [vmem:[#allocation7 + $0x108] sm:$0xff] %v11546_v21  ;;  %v11484_v61 = vadd.f32 %v15549_v58, %v19806_v17  ;;  %v11229_v60 = vpop.f32.mrb[29].mxu1 }
 0xa5c   :  { %11609 = vst [vmem:[#allocation7 + $0x100] sm:$0xff] %v11545_v55  ;;  %v11483_v1 = vadd.f32 %v19806_v17, %v11229_v60 }
 0xa5d   :  { %v11548_v46 = vmax.f32 %v11484_v61, 0.0 }
 0xa5e   :  { %v11547_v5 = vmax.f32 %v11483_v1, 0.0  ;;  %v15552_v7 = vpop.f32.mrb[30].mxu1 }
 0xa5f   :  { %11612 = vst [vmem:[#allocation7 + $0x118] sm:$0xff] %v11548_v46  ;;  %v11486_v47 = vadd.f32 %v15552_v7, %v19806_v17  ;;  %v11239_v6 = vpop.f32.mrb[31].mxu1 }
 0xa60   :  { %11611 = vst [vmem:[#allocation7 + $0x110] sm:$0xff] %v11547_v5  ;;  %v11485_v11 = vadd.f32 %v19806_v17, %v11239_v6 }
 0xa61   :  { %v11550_v12 = vmax.f32 %v11486_v47, 0.0 }
 0xa62   :  { %v11549_v3 = vmax.f32 %v11485_v11, 0.0  ;;  %v15555_v16 = vpop.f32.mrb[32].mxu1 }
 0xa63   :  { %11614 = vst [vmem:[#allocation7 + $0x128] sm:$0xff] %v11550_v12  ;;  %v11488_v18 = vadd.f32 %v15555_v16, %v19806_v17  ;;  %v11249_v19 = vpop.f32.mrb[33].mxu1 }
 0xa64   :  { %11613 = vst [vmem:[#allocation7 + $0x120] sm:$0xff] %v11549_v3  ;;  %v11487_v22 = vadd.f32 %v19806_v17, %v11249_v19 }
 0xa65   :  { %v11552_v23 = vmax.f32 %v11488_v18, 0.0 }
 0xa66   :  { %v11551_v25 = vmax.f32 %v11487_v22, 0.0  ;;  %v15558_v26 = vpop.f32.mrb[34].mxu1 }
 0xa67   :  { %11616 = vst [vmem:[#allocation7 + $0x138] sm:$0xff] %v11552_v23  ;;  %v11490_v13 = vadd.f32 %v15558_v26, %v19806_v17  ;;  %v11259_v28 = vpop.f32.mrb[35].mxu1 }
 0xa68   :  { %11615 = vst [vmem:[#allocation7 + $0x130] sm:$0xff] %v11551_v25  ;;  %v11489_v35 = vadd.f32 %v19806_v17, %v11259_v28 }
 0xa69   :  { %v11554_v31 = vmax.f32 %v11490_v13, 0.0 }
 0xa6a   :  { %v11553_v2 = vmax.f32 %v11489_v35, 0.0  ;;  %v15561_v4 = vpop.f32.mrb[36].mxu1 }
 0xa6b   :  { %11618 = vst [vmem:[#allocation7 + $0x148] sm:$0xff] %v11554_v31  ;;  %v11492_v45 = vadd.f32 %v15561_v4, %v19806_v17  ;;  %v11269_v34 = vpop.f32.mrb[37].mxu1 }
 0xa6c   :  { %11617 = vst [vmem:[#allocation7 + $0x140] sm:$0xff] %v11553_v2  ;;  %v11491_v43 = vadd.f32 %v19806_v17, %v11269_v34 }
 0xa6d   :  { %v11556_v33 = vmax.f32 %v11492_v45, 0.0 }
 0xa6e   :  { %v11555_v30 = vmax.f32 %v11491_v43, 0.0  ;;  %v15564_v0 = vpop.f32.mrb[38].mxu1 }
 0xa6f   :  { %11620 = vst [vmem:[#allocation7 + $0x158] sm:$0xff] %v11556_v33  ;;  %v11494_v42 = vadd.f32 %v15564_v0, %v19806_v17  ;;  %v11279_v54 = vpop.f32.mrb[39].mxu1 }
 0xa70   :  { %11619 = vst [vmem:[#allocation7 + $0x150] sm:$0xff] %v11555_v30  ;;  %v11493_v37 = vadd.f32 %v19806_v17, %v11279_v54 }
 0xa71   :  { %v11558_v41 = vmax.f32 %v11494_v42, 0.0 }
 0xa72   :  { %v11557_v8 = vmax.f32 %v11493_v37, 0.0  ;;  %v15567_v48 = vpop.f32.mrb[40].mxu1 }
 0xa73   :  { %11622 = vst [vmem:[#allocation7 + $0x168] sm:$0xff] %v11558_v41  ;;  %v11496_v10 = vadd.f32 %v15567_v48, %v19806_v17  ;;  %v11289_v9 = vpop.f32.mrb[41].mxu1 }
 0xa74   :  { %11621 = vst [vmem:[#allocation7 + $0x160] sm:$0xff] %v11557_v8  ;;  %v11495_v56 = vadd.f32 %v19806_v17, %v11289_v9 }
 0xa75   :  { %v11560_v20 = vmax.f32 %v11496_v10, 0.0 }
 0xa76   :  { %v11559_v24 = vmax.f32 %v11495_v56, 0.0  ;;  %v15570_v27 = vpop.f32.mrb[42].mxu1 }
 0xa77   :  { %11624 = vst [vmem:[#allocation7 + $0x178] sm:$0xff] %v11560_v20  ;;  %v11498_v63 = vadd.f32 %v15570_v27, %v19806_v17  ;;  %v11299_v29 = vpop.f32.mrb[43].mxu1 }
 0xa78   :  { %11623 = vst [vmem:[#allocation7 + $0x170] sm:$0xff] %v11559_v24  ;;  %v11497_v36 = vadd.f32 %v19806_v17, %v11299_v29 }
 0xa79   :  { %v11562_v51 = vmax.f32 %v11498_v63, 0.0 }
 0xa7a   :  { %v11561_v38 = vmax.f32 %v11497_v36, 0.0  ;;  %v15573_v49 = vpop.f32.mrb[44].mxu1 }
 0xa7b   :  { %11626 = vst [vmem:[#allocation7 + $0x188] sm:$0xff] %v11562_v51  ;;  %v11500_v32 = vadd.f32 %v15573_v49, %v19806_v17  ;;  %v11309_v52 = vpop.f32.mrb[45].mxu1 }
 0xa7c   :  { %11625 = vst [vmem:[#allocation7 + $0x180] sm:$0xff] %v11561_v38  ;;  %v11499_v57 = vadd.f32 %v19806_v17, %v11309_v52 }
 0xa7d   :  { %v11564_v40 = vmax.f32 %v11500_v32, 0.0 }
 0xa7e   :  { %v11563_v15 = vmax.f32 %v11499_v57, 0.0  ;;  %v15576_v59 = vpop.f32.mrb[46].mxu1 }
 0xa7f   :  { %11628 = vst [vmem:[#allocation7 + $0x198] sm:$0xff] %v11564_v40  ;;  %v11502_v62 = vadd.f32 %v15576_v59, %v19806_v17  ;;  %v11319_v39 = vpop.f32.mrb[47].mxu1 }
 0xa80   :  { %11627 = vst [vmem:[#allocation7 + $0x190] sm:$0xff] %v11563_v15  ;;  %v11501_v44 = vadd.f32 %v19806_v17, %v11319_v39 }
 0xa81   :  { %v11566_v14 = vmax.f32 %v11502_v62, 0.0 }
 0xa82   :  { %v11565_v50 = vmax.f32 %v11501_v44, 0.0  ;;  %v15579_v53 = vpop.f32.mrb[48].mxu1 }
 0xa83   :  { %11630 = vst [vmem:[#allocation7 + $0x1a8] sm:$0xff] %v11566_v14  ;;  %v11504_v21 = vadd.f32 %v15579_v53, %v19806_v17  ;;  %v11329_v55 = vpop.f32.mrb[49].mxu1 }
 0xa84   :  { %11629 = vst [vmem:[#allocation7 + $0x1a0] sm:$0xff] %v11565_v50  ;;  %v11503_v58 = vadd.f32 %v19806_v17, %v11329_v55 }
 0xa85   :  { %v11568_v61 = vmax.f32 %v11504_v21, 0.0 }
 0xa86   :  { %v11567_v60 = vmax.f32 %v11503_v58, 0.0  ;;  %v15582_v1 = vpop.f32.mrb[50].mxu1 }
 0xa87   :  { %11632 = vst [vmem:[#allocation7 + $0x1b8] sm:$0xff] %v11568_v61  ;;  %v11506_v46 = vadd.f32 %v15582_v1, %v19806_v17  ;;  %v11339_v5 = vpop.f32.mrb[51].mxu1 }
 0xa88   :  { %11631 = vst [vmem:[#allocation7 + $0x1b0] sm:$0xff] %v11567_v60  ;;  %v11505_v7 = vadd.f32 %v19806_v17, %v11339_v5 }
 0xa89   :  { %v11570_v47 = vmax.f32 %v11506_v46, 0.0 }
 0xa8a   :  { %v11569_v6 = vmax.f32 %v11505_v7, 0.0  ;;  %v15585_v11 = vpop.f32.mrb[52].mxu1 }
 0xa8b   :  { %11634 = vst [vmem:[#allocation7 + $0x1c8] sm:$0xff] %v11570_v47  ;;  %v11508_v12 = vadd.f32 %v15585_v11, %v19806_v17  ;;  %v11349_v3 = vpop.f32.mrb[53].mxu1 }
 0xa8c   :  { %11633 = vst [vmem:[#allocation7 + $0x1c0] sm:$0xff] %v11569_v6  ;;  %v11507_v16 = vadd.f32 %v19806_v17, %v11349_v3 }
 0xa8d   :  { %v11572_v18 = vmax.f32 %v11508_v12, 0.0 }
 0xa8e   :  { %v11571_v19 = vmax.f32 %v11507_v16, 0.0  ;;  %v15588_v22 = vpop.f32.mrb[54].mxu1 }
 0xa8f   :  { %11636 = vst [vmem:[#allocation7 + $0x1d8] sm:$0xff] %v11572_v18  ;;  %v11510_v23 = vadd.f32 %v15588_v22, %v19806_v17  ;;  %v11359_v25 = vpop.f32.mrb[55].mxu1 }
 0xa90   :  { %11635 = vst [vmem:[#allocation7 + $0x1d0] sm:$0xff] %v11571_v19  ;;  %v11509_v26 = vadd.f32 %v19806_v17, %v11359_v25 }
 0xa91   :  { %v11574_v13 = vmax.f32 %v11510_v23, 0.0 }
 0xa92   :  { %v11573_v28 = vmax.f32 %v11509_v26, 0.0  ;;  %v15591_v35 = vpop.f32.mrb[56].mxu1 }
 0xa93   :  { %11638 = vst [vmem:[#allocation7 + $0x1e8] sm:$0xff] %v11574_v13  ;;  %v11512_v31 = vadd.f32 %v15591_v35, %v19806_v17  ;;  %v11369_v2 = vpop.f32.mrb[57].mxu1 }
 0xa94   :  { %11637 = vst [vmem:[#allocation7 + $0x1e0] sm:$0xff] %v11573_v28  ;;  %v11511_v4 = vadd.f32 %v19806_v17, %v11369_v2 }
 0xa95   :  { %v11576_v45 = vmax.f32 %v11512_v31, 0.0 }
 0xa96   :  { %v11575_v34 = vmax.f32 %v11511_v4, 0.0 }
 0xa97   :  { %11640 = vst [vmem:[#allocation7 + $0x1f8] sm:$0xff] %v11576_v45 }
 0xa98   :  { %11639 = vst [vmem:[#allocation7 + $0x1f0] sm:$0xff] %v11575_v34 }
 0xa99   :  { %16960 = shalt.err (!%p16957_p12)
}
 0xa9a   :  { %s16961_s13 = scalar_lea.hbm %s19898_s5, 8192 }
 0xa9b   :  { %p16962_p13 = scmp.ne.s32.totalorder %s19898_s5, %s16961_s13  ;;  %p16965_p0 = scmp.lt.u32.totalorder %s16961_s13, %s19898_s5 }
 0xa9d   :  { %p16967_p1 = pnand %p16965_p0, %p16962_p13 }
 0xa9f   :  { %16970 = shalt.err (!%p16967_p1)
}
 0xaa0   :  { %11652 = dma.vmem_to_hbm [thread:$0]  %s11647_s9, 8192, %s19898_s5, [#allocation6], %s16976_s28, %s16976_s28, %s16977_s29  }
 0xaa1   :  { %16973 = dma.done.wait [#allocation6], 8192  }
 0xaa2   :  { %16974 = vsyncadd [#allocation6], 4294959104 }
 0xaa3   :  { %11656 = vsyncpa [#allocation5], 1 }
 0xaa4   :  { %11657 = vsyncpa [#allocation6], 1 }

</bundles_post_ra>
